<compile_context>
chip_gen: v7x
topology: tpu7x:2x2x1
jax: 0.10.0
libtpu: 0.0.40
codegen_flags: <defaults>
</compile_context>

<pallas_src>
import functools

import jax
import jax.numpy as jnp
from jax import lax
from jax.experimental import pallas as pl
from jax.experimental.pallas import tpu as pltpu


# ----------------------------------------------------------------------------
# Helpers
# ----------------------------------------------------------------------------
def _pick_tile(T, cap=512):
    """Largest time tile <= cap that evenly divides T (multiple of 8 if tiled)."""
    if T <= cap:
        return T
    t = cap - (cap % 8)
    while t >= 8:
        if T % t == 0:
            return t
        t -= 8
    return T


def _lrelu(x):
    # HiFiGAN-style slope 0.1 (kept identical to the reference implementation).
    return jnp.where(x >= 0.0, x, 0.1 * x)


# ----------------------------------------------------------------------------
# Generic fused conv / linear kernel
#   y = act( sum_k lrelu?(x[t + k*dil]) @ W[k] + b ) [+ residual]
#   optional: z = mu + exp(0.5*logvar)*eps  (stats split inside the kernel)
# ----------------------------------------------------------------------------
def _conv_kernel(x_ref, w_ref, b_ref, *rest, K, dilation, tile_T,
                 activation, pre_act, has_res, zdim):
    rest = list(rest)
    res_ref = rest.pop(0) if has_res else None
    eps_ref = rest.pop(0) if zdim else None
    o_ref = rest.pop(0)
    z_ref = rest.pop(0) if zdim else None

    t0 = pl.program_id(1) * tile_T
    if tile_T % 8 == 0:
        t0 = pl.multiple_of(t0, 8)

    cout = w_ref.shape[-1]
    acc = jnp.zeros((tile_T, cout), jnp.float32)
    for k in range(K):                              # in-kernel im2col
        xk = x_ref[0, pl.ds(t0 + k * dilation, tile_T), :]
        if pre_act == "lrelu":
            xk = _lrelu(xk)
        acc = acc + jnp.dot(xk.astype(jnp.bfloat16), w_ref[k],
                            preferred_element_type=jnp.float32)
    y = acc + b_ref[...]
    if activation == "relu":
        y = jnp.maximum(y, 0.0)
    elif activation == "lrelu":
        y = _lrelu(y)
    elif activation == "tanh":
        y = jnp.tanh(y)
    if has_res:
        y = y + res_ref[0]
    o_ref[0] = y
    if zdim:
        mu = y[:, :zdim]
        lv = y[:, zdim:]
        z_ref[0] = mu + jnp.exp(0.5 * lv) * eps_ref[0]


def conv1d(x, p, kernel_size, dilation=1, activation=None, pre_act=None,
           residual=None, eps=None, zdim=0):
    """x: (B, T, Cin) -> (B, T, Cout)  [and z: (B, T, zdim) if zdim>0]."""
    B, T, Cin = x.shape
    K = kernel_size
    w = p["w"].astype(jnp.bfloat16)                 # (K, Cin, Cout)
    b = p["b"].reshape(1, -1)
    Cout = w.shape[-1]

    pad_total = dilation * (K - 1)
    pad_l = pad_total // 2
    pad_r = pad_total - pad_l
    xp = jnp.pad(x, ((0, 0), (pad_l, pad_r), (0, 0))) if pad_total else x
    Tp = T + pad_total

    tile_T = _pick_tile(T)
    nT = T // tile_T
    has_res = residual is not None

    in_specs = [
        pl.BlockSpec((1, Tp, Cin), lambda b_, t_: (b_, 0, 0)),   # resident per batch
        pl.BlockSpec((K, Cin, Cout), lambda b_, t_: (0, 0, 0)),  # pinned weights
        pl.BlockSpec((1, Cout), lambda b_, t_: (0, 0)),
    ]
    args = [xp, w, b]
    if has_res:
        in_specs.append(pl.BlockSpec((1, tile_T, Cout), lambda b_, t_: (b_, t_, 0)))
        args.append(residual)
    if zdim:
        in_specs.append(pl.BlockSpec((1, tile_T, zdim), lambda b_, t_: (b_, t_, 0)))
        args.append(eps)

    out_shapes = [jax.ShapeDtypeStruct((B, T, Cout), jnp.float32)]
    out_specs = [pl.BlockSpec((1, tile_T, Cout), lambda b_, t_: (b_, t_, 0))]
    if zdim:
        out_shapes.append(jax.ShapeDtypeStruct((B, T, zdim), jnp.float32))
        out_specs.append(pl.BlockSpec((1, tile_T, zdim), lambda b_, t_: (b_, t_, 0)))

    kernel = functools.partial(_conv_kernel, K=K, dilation=dilation,
                               tile_T=tile_T, activation=activation,
                               pre_act=pre_act, has_res=has_res, zdim=zdim)
    out = pl.pallas_call(
        kernel,
        out_shape=tuple(out_shapes) if zdim else out_shapes[0],
        grid=(B, nT),
        in_specs=in_specs,
        out_specs=tuple(out_specs) if zdim else out_specs[0],
        compiler_params=pltpu.CompilerParams(
            dimension_semantics=("parallel", "arbitrary")),
    )(*args)
    return out


# ----------------------------------------------------------------------------
# Fused multi-head self-attention (QKV packed, softmax, out-proj, residual)
# ----------------------------------------------------------------------------
def _mha_kernel(x_ref, wqkv_ref, bqkv_ref, wo_ref, bo_ref, o_ref, *,
                num_heads, scale):
    x = x_ref[0]                                      # (L, H) f32
    L, H = x.shape
    Dh = H // num_heads
    qkv = jnp.dot(x.astype(jnp.bfloat16), wqkv_ref[...],
                  preferred_element_type=jnp.float32) + bqkv_ref[...]
    acc = jnp.zeros((L, H), jnp.float32)
    for h in range(num_heads):
        q = qkv[:, h * Dh:(h + 1) * Dh]
        k = qkv[:, H + h * Dh:H + (h + 1) * Dh]
        v = qkv[:, 2 * H + h * Dh:2 * H + (h + 1) * Dh]
        s = lax.dot_general(q.astype(jnp.bfloat16), k.astype(jnp.bfloat16),
                            (((1,), (1,)), ((), ())),
                            preferred_element_type=jnp.float32) * scale
        s = s - jnp.max(s, axis=-1, keepdims=True)
        pexp = jnp.exp(s)
        pexp = pexp * pl.reciprocal(jnp.sum(pexp, axis=-1, keepdims=True),
                                    approx=True)
        o_h = jnp.dot(pexp.astype(jnp.bfloat16), v.astype(jnp.bfloat16),
                      preferred_element_type=jnp.float32)
        # concat(o_h) @ Wo  ==  sum_h o_h @ Wo[h*Dh:(h+1)*Dh]  (avoids concat)
        acc = acc + jnp.dot(o_h.astype(jnp.bfloat16),
                            wo_ref[h * Dh:(h + 1) * Dh, :],
                            preferred_element_type=jnp.float32)
    o_ref[0] = x + acc + bo_ref[...]                  # residual fused


def mha(x, p, num_heads):
    B, L, H = x.shape
    Dh = H // num_heads
    return pl.pallas_call(
        functools.partial(_mha_kernel, num_heads=num_heads,
                          scale=1.0 / (Dh ** 0.5)),
        out_shape=jax.ShapeDtypeStruct((B, L, H), jnp.float32),
        grid=(B,),
        in_specs=[pl.BlockSpec((1, L, H), lambda b: (b, 0, 0)),
                  pl.BlockSpec((H, 3 * H), lambda b: (0, 0)),
                  pl.BlockSpec((1, 3 * H), lambda b: (0, 0)),
                  pl.BlockSpec((H, H), lambda b: (0, 0)),
                  pl.BlockSpec((1, H), lambda b: (0, 0))],
        out_specs=pl.BlockSpec((1, L, H), lambda b: (b, 0, 0)),
        compiler_params=pltpu.CompilerParams(dimension_semantics=("parallel",)),
    )(x, p["wqkv"].astype(jnp.bfloat16), p["bqkv"].reshape(1, -1),
      p["wo"].astype(jnp.bfloat16), p["bo"].reshape(1, -1))


# ----------------------------------------------------------------------------
# Fused HiFiGAN upsample stage: leaky-relu + nearest-neighbour repeat + conv,
# computed as a phase-decomposed conv on the *pre-repeat* signal.
# ----------------------------------------------------------------------------
def _upsample_conv_kernel(x_ref, w_ref, b_ref, o_ref, *, K, r, pad_l,
                          pad_pre_l, tile_T):
    t0 = pl.program_id(1) * tile_T
    if tile_T % 8 == 0:
        t0 = pl.multiple_of(t0, 8)
    cout = w_ref.shape[-1]
    for p in range(r):
        acc = jnp.zeros((tile_T, cout), jnp.float32)
        for k in range(K):
            q = (p + k - pad_l) // r                  # python floor division
            xk = x_ref[0, pl.ds(t0 + q + pad_pre_l, tile_T), :]
            xk = _lrelu(xk)                           # fused pre-activation
            acc = acc + jnp.dot(xk.astype(jnp.bfloat16), w_ref[k],
                                preferred_element_type=jnp.float32)
        o_ref[0, :, p * cout:(p + 1) * cout] = acc + b_ref[...]


def upsample_conv(x, p, kernel_size, r):
    """(B, T, Cin) -> (B, T*r, Cout); equals conv1d(repeat(lrelu(x), r))."""
    B, T, Cin = x.shape
    K = kernel_size
    pad_l = (K - 1) // 2
    q_min = (0 - pad_l) // r
    q_max = (r - 1 + K - 1 - pad_l) // r
    pad_pre_l = max(0, -q_min)
    pad_pre_r = max(0, q_max)
    xp = jnp.pad(x, ((0, 0), (pad_pre_l, pad_pre_r), (0, 0)))
    Tp = T + pad_pre_l + pad_pre_r

    w = p["w"].astype(jnp.bfloat16)                   # (K, Cin, Cout)
    b = p["b"].reshape(1, -1)
    Cout = w.shape[-1]
    tile_T = _pick_tile(T)
    nT = T // tile_T

    y = pl.pallas_call(
        functools.partial(_upsample_conv_kernel, K=K, r=r, pad_l=pad_l,
                          pad_pre_l=pad_pre_l, tile_T=tile_T),
        out_shape=jax.ShapeDtypeStruct((B, T, r * Cout), jnp.float32),
        grid=(B, nT),
        in_specs=[pl.BlockSpec((1, Tp, Cin), lambda b_, t_: (b_, 0, 0)),
                  pl.BlockSpec((K, Cin, Cout), lambda b_, t_: (0, 0, 0)),
                  pl.BlockSpec((1, Cout), lambda b_, t_: (0, 0))],
        out_specs=pl.BlockSpec((1, tile_T, r * Cout), lambda b_, t_: (b_, t_, 0)),
        compiler_params=pltpu.CompilerParams(
            dimension_semantics=("parallel", "arbitrary")),
    )(xp, w, b)
    # (B, T, r*Cout) -> (B, T*r, Cout) is a layout-compatible (free) reshape.
    return y.reshape(B, T * r, Cout)


# ----------------------------------------------------------------------------
# Fused normalizing-flow step: conv(hh) -> (s, t); zb' = zb*exp(s)+t; logdet
# ----------------------------------------------------------------------------
def _flow_kernel(hh_ref, w_ref, b_ref, zb_ref, o_ref, ld_ref, *, K, tile_T,
                 half):
    t = pl.program_id(1)
    t0 = t * tile_T
    if tile_T % 8 == 0:
        t0 = pl.multiple_of(t0, 8)
    acc = jnp.zeros((tile_T, 2 * half), jnp.float32)
    for k in range(K):
        xk = hh_ref[0, pl.ds(t0 + k, tile_T), :]
        acc = acc + jnp.dot(xk.astype(jnp.bfloat16), w_ref[k],
                            preferred_element_type=jnp.float32)
    st = acc + b_ref[...]
    s = st[:, :half]
    tt = st[:, half:]
    o_ref[0] = zb_ref[0] * jnp.exp(s) + tt
    part = jnp.sum(jnp.sum(s, axis=1, keepdims=True), axis=0, keepdims=True)

    @pl.when(t == 0)
    def _():
        ld_ref[0] = part

    @pl.when(t > 0)
    def _():
        ld_ref[0] = ld_ref[0] + part


def flow_step(za, zb, fp, kernel_size):
    hh = conv1d(za, fp["h"], kernel_size, activation="relu")
    B, T, half = zb.shape
    K = kernel_size
    pad_total = K - 1
    pad_l = pad_total // 2
    hhp = jnp.pad(hh, ((0, 0), (pad_l, pad_total - pad_l), (0, 0)))
    Tp = T + pad_total
    Hh = hh.shape[-1]
    w = fp["st"]["w"].astype(jnp.bfloat16)
    b = fp["st"]["b"].reshape(1, -1)
    tile_T = _pick_tile(T)
    nT = T // tile_T

    zb_new, ld = pl.pallas_call(
        functools.partial(_flow_kernel, K=K, tile_T=tile_T, half=half),
        out_shape=(jax.ShapeDtypeStruct((B, T, half), jnp.float32),
                   jax.ShapeDtypeStruct((B, 1, 1), jnp.float32)),
        grid=(B, nT),
        in_specs=[pl.BlockSpec((1, Tp, Hh), lambda b_, t_: (b_, 0, 0)),
                  pl.BlockSpec((K, Hh, 2 * half), lambda b_, t_: (0, 0, 0)),
                  pl.BlockSpec((1, 2 * half), lambda b_, t_: (0, 0)),
                  pl.BlockSpec((1, tile_T, half), lambda b_, t_: (b_, t_, 0))],
        out_specs=(pl.BlockSpec((1, tile_T, half), lambda b_, t_: (b_, t_, 0)),
                   pl.BlockSpec((1, 1, 1), lambda b_, t_: (b_, 0, 0))),
        compiler_params=pltpu.CompilerParams(
            dimension_semantics=("parallel", "arbitrary")),
    )(hhp, w, b, zb)
    return zb_new, ld[:, 0, 0]


# ----------------------------------------------------------------------------
# Parameters (deterministic synthetic init)
# ----------------------------------------------------------------------------
class KeyGen:
    def __init__(self, seed):
        self._key = jax.random.PRNGKey(seed)

    def __call__(self):
        self._key, k = jax.random.split(self._key)
        return k


def conv_param(kg, cin, cout, k):
    w = jax.random.normal(kg(), (k, cin, cout), jnp.float32) * ((cin * k) ** -0.5)
    return {"w": w, "b": jnp.zeros((cout,), jnp.float32)}


def mha_param(kg, H):
    return {"wqkv": jax.random.normal(kg(), (H, 3 * H), jnp.float32) * (H ** -0.5),
            "bqkv": jnp.zeros((3 * H,), jnp.float32),
            "wo": jax.random.normal(kg(), (H, H), jnp.float32) * (H ** -0.5),
            "bo": jnp.zeros((H,), jnp.float32)}


CFG = dict(
    n_symbols=16, embed_dim=32, hidden_dim=32, z_pr_dim=8,
    pre_fft_blocks=1, post_fft_blocks=1, fft_heads=2, fft_kernel=3,
    bn_feature_dim=16, bn_hidden_dim=32, bn_kernel=3, bn_layers=2,
    z_ac_dim=8, num_speakers=4, spk_emb_dim=8,
    prior_hidden_dim=32, prior_kernel=3, prior_layers=2, num_flows=2,
    n_mels=16, post_hidden_dim=32, post_layers=2, post_kernel=3,
    upsample_rates=(2, 2), upsample_kernel_sizes=(4, 4),
    resblock_kernel_sizes=(3,), resblock_dilation_sizes=((1, 2),),
    hifigan_channels=32, flow_hidden=16,
)


def init_params(cfg, seed=1):
    kg = KeyGen(seed)
    H, Kf = cfg["hidden_dim"], cfg["fft_kernel"]

    def fftb():
        return {"attn": mha_param(kg, H),
                "ffn1": conv_param(kg, H, H, Kf),
                "ffn2": conv_param(kg, H, H, Kf)}

    pron = {
        "embed": jax.random.normal(kg(), (cfg["n_symbols"], cfg["embed_dim"]),
                                   jnp.float32) * 0.1,
        "in": conv_param(kg, cfg["embed_dim"], H, 1),
        "pre_blocks": [fftb() for _ in range(cfg["pre_fft_blocks"])],
        "dur": conv_param(kg, H, 1, 1),
        "post_blocks": [fftb() for _ in range(cfg["post_fft_blocks"])],
        "out": conv_param(kg, H, 2 * cfg["z_pr_dim"], 1),
    }

    def conv_stack(cin, hid, k, nlayers):
        convs, c = [], cin
        for _ in range(nlayers):
            convs.append(conv_param(kg, c, hid, k))
            c = hid
        return convs

    bn = {"convs": conv_stack(cfg["bn_feature_dim"], cfg["bn_hidden_dim"],
                              cfg["bn_kernel"], cfg["bn_layers"]),
          "out": conv_param(kg, cfg["bn_hidden_dim"], 2 * cfg["z_pr_dim"], 1)}

    post = {"convs": conv_stack(cfg["n_mels"], cfg["post_hidden_dim"],
                                cfg["post_kernel"], cfg["post_layers"]),
            "out": conv_param(kg, cfg["post_hidden_dim"], 2 * cfg["z_ac_dim"], 1)}

    half = cfg["z_ac_dim"] // 2
    prior = {
        "spk_embed": jax.random.normal(kg(), (cfg["num_speakers"],
                                              cfg["spk_emb_dim"]),
                                       jnp.float32) * 0.1,
        "convs": conv_stack(cfg["z_pr_dim"] + cfg["spk_emb_dim"],
                            cfg["prior_hidden_dim"], cfg["prior_kernel"],
                            cfg["prior_layers"]),
        "out": conv_param(kg, cfg["prior_hidden_dim"], 2 * cfg["z_ac_dim"], 1),
        "flows": [{"h": conv_param(kg, half, cfg["flow_hidden"], cfg["prior_kernel"]),
                   "st": conv_param(kg, cfg["flow_hidden"], 2 * half, cfg["prior_kernel"])}
                  for _ in range(cfg["num_flows"])],
    }

    ch = cfg["hifigan_channels"]
    ups, res, c = [], [], ch
    for i, ku in enumerate(cfg["upsample_kernel_sizes"]):
        c_out = ch // (2 ** (i + 1))
        ups.append(conv_param(kg, c, c_out, ku))
        stage = []
        for j, k_rb in enumerate(cfg["resblock_kernel_sizes"]):
            stage.append([conv_param(kg, c_out, c_out, k_rb)
                          for _ in cfg["resblock_dilation_sizes"][j]])
        res.append(stage)
        c = c_out
    dec = {"pre": conv_param(kg, cfg["z_ac_dim"], ch, 7),
           "ups": ups, "res": res,
           "post": conv_param(kg, c, 1, 7)}

    # TODO(synk): HiFiGANDiscriminator is constructed in __init__ but never
    # called in forward(); it is intentionally not instantiated here.
    return {"pron": pron, "bn": bn, "post": post, "prior": prior, "dec": dec}


# ----------------------------------------------------------------------------
# Sub-encoders
# ----------------------------------------------------------------------------
def fft_block(h, p, num_heads, kernel_size):
    # TODO(synk): LayerNorm / dropout inside the FFT blocks omitted (submodule
    # definitions are not part of the reference).
    h = mha(h, p["attn"], num_heads)                           # residual fused
    f = conv1d(h, p["ffn1"], kernel_size, activation="relu")
    h = conv1d(f, p["ffn2"], kernel_size, residual=h)          # residual fused
    return h


def length_regulate(h, durations, total_len):
    """Expand phoneme reps by integer durations to frame level (gather glue)."""
    B, L, H = h.shape
    cum = jnp.cumsum(durations, axis=1)
    frame = jnp.arange(total_len)
    idx = jnp.sum(frame[None, :, None] >= cum[:, None, :], axis=-1)
    idx = jnp.clip(idx, 0, L - 1)
    return jnp.take_along_axis(h, idx[..., None], axis=1)


def pron_encoder(p, cfg, phonemes, durations, total_frames):
    L = durations.shape[1]
    emb = p["embed"][phonemes]                                 # (B, L_eos, E)
    h = conv1d(emb, p["in"], 1, activation="relu")
    for blk in p["pre_blocks"]:
        h = fft_block(h, blk, cfg["fft_heads"], cfg["fft_kernel"])
    log_dur_pred = conv1d(h[:, :L], p["dur"], 1)[..., 0]       # (B, L)
    e = length_regulate(h[:, :L], durations, total_frames)
    for blk in p["post_blocks"]:
        e = fft_block(e, blk, cfg["fft_heads"], cfg["fft_kernel"])
    stats = conv1d(e, p["out"], 1)
    mu, logvar = jnp.split(stats, 2, axis=-1)
    return mu, logvar, log_dur_pred


def bn_encoder(p, cfg, bn, eps):
    h = bn
    for c in p["convs"]:
        h = conv1d(h, c, cfg["bn_kernel"], activation="relu")
    stats, z = conv1d(h, p["out"], 1, eps=eps, zdim=cfg["z_pr_dim"])
    mu, logvar = jnp.split(stats, 2, axis=-1)
    return mu, logvar, z


def post_encoder(p, cfg, mel, eps):
    h = jnp.transpose(mel, (0, 2, 1))                          # NCT -> NTC
    for c in p["convs"]:
        h = conv1d(h, c, cfg["post_kernel"], activation="relu")
    stats, z = conv1d(h, p["out"], 1, eps=eps, zdim=cfg["z_ac_dim"])
    mu, logvar = jnp.split(stats, 2, axis=-1)
    return mu, logvar, z


def prior_encoder(p, cfg, z_pr, speaker_ids, eps):
    B, T, _ = z_pr.shape
    spk = p["spk_embed"][speaker_ids]
    h = jnp.concatenate(
        [z_pr, jnp.broadcast_to(spk[:, None, :], (B, T, spk.shape[-1]))], axis=-1)
    for c in p["convs"]:
        h = conv1d(h, c, cfg["prior_kernel"], activation="relu")
    stats, z = conv1d(h, p["out"], 1, eps=eps, zdim=cfg["z_ac_dim"])
    mu, logvar = jnp.split(stats, 2, axis=-1)

    logdet = jnp.zeros((B,), jnp.float32)
    half = cfg["z_ac_dim"] // 2
    for fp in p["flows"]:
        za, zb = z[..., :half], z[..., half:]
        zb_new, ld = flow_step(za, zb, fp, cfg["prior_kernel"])
        logdet = logdet + ld
        z = jnp.concatenate([zb_new, za], axis=-1)             # flip halves
    return mu, logvar, z, logdet


def hifigan_generator(p, cfg, x_nct):
    # TODO(synk): torch HiFiGAN uses ConvTranspose1d; approximated by fused
    # leaky-relu + nearest-neighbour repeat + Conv1d (single Pallas kernel).
    h = jnp.transpose(x_nct, (0, 2, 1))                        # (B, T, C)
    h = conv1d(h, p["pre"], 7)
    for i, r in enumerate(cfg["upsample_rates"]):
        h = upsample_conv(h, p["ups"][i], cfg["upsample_kernel_sizes"][i], r)
        for j, k_rb in enumerate(cfg["resblock_kernel_sizes"]):
            for d_idx, d in enumerate(cfg["resblock_dilation_sizes"][j]):
                h = conv1d(h, p["res"][i][j][d_idx], k_rb, dilation=d,
                           pre_act="lrelu", residual=h)
    y = conv1d(h, p["post"], 7, pre_act="lrelu", activation="tanh")
    return jnp.transpose(y, (0, 2, 1))                         # (B, 1, T_wav)


# ----------------------------------------------------------------------------
# Full AccentVITS forward
# ----------------------------------------------------------------------------
def accent_vits_forward(params, cfg, phonemes, durations, bn_features, mel,
                        speaker_ids, rng):
    B = phonemes.shape[0]
    T_bn = bn_features.shape[1]
    T_mel = mel.shape[2]

    mu_pr, logvar_pr, log_dur_pred = pron_encoder(
        params["pron"], cfg, phonemes, durations, T_bn)

    k1, k2, k3 = jax.random.split(rng, 3)
    eps_pr = jax.random.normal(k1, (B, T_bn, cfg["z_pr_dim"]), jnp.float32)
    mu_bn, logvar_bn, z_pr = bn_encoder(params["bn"], cfg, bn_features, eps_pr)

    eps_post = jax.random.normal(k2, (B, T_mel, cfg["z_ac_dim"]), jnp.float32)
    mu_ac_post, logvar_ac_post, z_ac = post_encoder(
        params["post"], cfg, mel, eps_post)

    eps_prior = jax.random.normal(k3, (B, T_bn, cfg["z_ac_dim"]), jnp.float32)
    mu_ac_pr, logvar_ac_pr, z_ac_flow, logdet = prior_encoder(
        params["prior"], cfg, z_pr, speaker_ids, eps_prior)

    x = jnp.transpose(z_ac_flow, (0, 2, 1))                    # .transpose(1, 2)
    y_hat = hifigan_generator(params["dec"], cfg, x)

    return {
        "mu_pr": mu_pr, "logvar_pr": logvar_pr,
        "mu_bn": mu_bn, "logvar_bn": logvar_bn, "z_pr": z_pr,
        "mu_ac_post": mu_ac_post, "logvar_ac_post": logvar_ac_post, "z_ac": z_ac,
        "mu_ac_pr": mu_ac_pr, "logvar_ac_pr": logvar_ac_pr,
        "z_ac_flow": z_ac_flow, "flow_logdet": logdet,
        "y_hat": y_hat, "log_dur_pred": log_dur_pred,
    }


# ----------------------------------------------------------------------------
if __name__ == "__main__":
    cfg = CFG
    B, L, T_bn, T_mel = 2, 8, 16, 16
    L_eos = L + 1

    params = init_params(cfg, seed=1)

    key = jax.random.PRNGKey(0)
    k_ph, k_bn, k_mel, k_spk, k_noise = jax.random.split(key, 5)
    phonemes = jax.random.randint(k_ph, (B, L_eos), 0, cfg["n_symbols"], jnp.int32)
    durations = jnp.full((B, L), T_bn // L, jnp.int32)          # sums to T_bn
    bn_features = jax.random.normal(k_bn, (B, T_bn, cfg["bn_feature_dim"]), jnp.float32)
    mel = jax.random.normal(k_mel, (B, cfg["n_mels"], T_mel), jnp.float32)
    speaker_ids = jax.random.randint(k_spk, (B,), 0, cfg["num_speakers"], jnp.int32)

    forward_jit = jax.jit(
        lambda prm, ph, du, bnf, me, spk, rng:
            accent_vits_forward(prm, CFG, ph, du, bnf, me, spk, rng))

    out = forward_jit(params, phonemes, durations, bn_features, mel,
                      speaker_ids, k_noise)
    out = jax.tree_util.tree_map(jax.block_until_ready, out)

    T_wav = T_bn
    for r in cfg["upsample_rates"]:
        T_wav *= r
    assert out["mu_pr"].shape == (B, T_bn, cfg["z_pr_dim"])
    assert out["z_pr"].shape == (B, T_bn, cfg["z_pr_dim"])
    assert out["z_ac"].shape == (B, T_mel, cfg["z_ac_dim"])
    assert out["z_ac_flow"].shape == (B, T_bn, cfg["z_ac_dim"])
    assert out["flow_logdet"].shape == (B,)
    assert out["log_dur_pred"].shape == (B, L)
    assert out["y_hat"].shape == (B, 1, T_wav)
    assert all(bool(jnp.all(jnp.isfinite(v))) for v in jax.tree_util.tree_leaves(out))

    print("KERNEL_OK")
</pallas_src>

<mosaic_0001>
module attributes {stable_mosaic.version = 11 : i64} {
  func.func @_conv_kernel(%arg0: i32, %arg1: i32, %arg2: memref<1x18x16xf32, #tpu.memory_space<vmem>>, %arg3: memref<3x16x32xbf16, #tpu.memory_space<vmem>>, %arg4: memref<1x32xf32, #tpu.memory_space<vmem>>, %arg5: memref<1x16x32xf32, #tpu.memory_space<vmem>>) attributes {dimension_semantics = [#tpu.dimension_semantics<parallel>, #tpu.dimension_semantics<arbitrary>], iteration_bounds = array<i64: 2, 1>, scalar_prefetch = 0 : i64, scratch_operands = 0 : i64, tpu.core_type = #tpu.core_type<tc>, window_params = [{transform_indices = @transform_0, window_bounds = array<i64: 1, 18, 16>}, {pipeline_mode = #tpu.pipeline_mode<synchronous>, transform_indices = @transform_1, window_bounds = array<i64: 3, 16, 32>}, {pipeline_mode = #tpu.pipeline_mode<synchronous>, transform_indices = @transform_2, window_bounds = array<i64: 1, 32>}, {transform_indices = @transform_3, window_bounds = array<i64: 1, 16, 32>}]} {
    %c16_i32 = arith.constant 16 : i32
    %0 = arith.muli %arg1, %c16_i32 : i32
    %1 = tpu.assume_multiple %0, 8 : i32
    %cst = arith.constant 0.000000e+00 : f32
    %2 = vector.broadcast %cst : f32 to vector<16x32xf32>
    %c0_i32 = arith.constant 0 : i32
    %3 = arith.addi %1, %c0_i32 : i32
    %c0 = arith.constant 0 : index
    %4 = arith.index_cast %3 : i32 to index
    %c0_0 = arith.constant 0 : index
    %5 = vector.load %arg2[%c0, %4, %c0_0] : memref<1x18x16xf32, #tpu.memory_space<vmem>>, vector<1x16x16xf32>
    %6 = vector.shape_cast %5 : vector<1x16x16xf32> to vector<16x16xf32>
    %7 = arith.truncf %6 : vector<16x16xf32> to vector<16x16xbf16>
    %c0_1 = arith.constant 0 : index
    %c0_2 = arith.constant 0 : index
    %c0_3 = arith.constant 0 : index
    %8 = vector.load %arg3[%c0_1, %c0_2, %c0_3] : memref<3x16x32xbf16, #tpu.memory_space<vmem>>, vector<1x16x32xbf16>
    %9 = vector.shape_cast %8 : vector<1x16x32xbf16> to vector<16x32xbf16>
    %cst_4 = arith.constant dense<0.000000e+00> : vector<16x32xf32>
    %10 = tpu.matmul %7, %9, %cst_4 {dimension_numbers = #tpu.dot_dimension_numbers<[1], [0], [0], [1], [0, 0, 1, 1], [], []>} : vector<16x16xbf16>, vector<16x32xbf16>, vector<16x32xf32> -> vector<16x32xf32>
    %11 = arith.addf %2, %10 : vector<16x32xf32>
    %c1_i32 = arith.constant 1 : i32
    %12 = arith.addi %1, %c1_i32 : i32
    %c0_5 = arith.constant 0 : index
    %13 = arith.index_cast %12 : i32 to index
    %c0_6 = arith.constant 0 : index
    %14 = vector.load %arg2[%c0_5, %13, %c0_6] : memref<1x18x16xf32, #tpu.memory_space<vmem>>, vector<1x16x16xf32>
    %15 = vector.shape_cast %14 : vector<1x16x16xf32> to vector<16x16xf32>
    %16 = arith.truncf %15 : vector<16x16xf32> to vector<16x16xbf16>
    %c1 = arith.constant 1 : index
    %c0_7 = arith.constant 0 : index
    %c0_8 = arith.constant 0 : index
    %17 = vector.load %arg3[%c1, %c0_7, %c0_8] : memref<3x16x32xbf16, #tpu.memory_space<vmem>>, vector<1x16x32xbf16>
    %18 = vector.shape_cast %17 : vector<1x16x32xbf16> to vector<16x32xbf16>
    %cst_9 = arith.constant dense<0.000000e+00> : vector<16x32xf32>
    %19 = tpu.matmul %16, %18, %cst_9 {dimension_numbers = #tpu.dot_dimension_numbers<[1], [0], [0], [1], [0, 0, 1, 1], [], []>} : vector<16x16xbf16>, vector<16x32xbf16>, vector<16x32xf32> -> vector<16x32xf32>
    %20 = arith.addf %11, %19 : vector<16x32xf32>
    %c2_i32 = arith.constant 2 : i32
    %21 = arith.addi %1, %c2_i32 : i32
    %c0_10 = arith.constant 0 : index
    %22 = arith.index_cast %21 : i32 to index
    %c0_11 = arith.constant 0 : index
    %23 = vector.load %arg2[%c0_10, %22, %c0_11] : memref<1x18x16xf32, #tpu.memory_space<vmem>>, vector<1x16x16xf32>
    %24 = vector.shape_cast %23 : vector<1x16x16xf32> to vector<16x16xf32>
    %25 = arith.truncf %24 : vector<16x16xf32> to vector<16x16xbf16>
    %c2 = arith.constant 2 : index
    %c0_12 = arith.constant 0 : index
    %c0_13 = arith.constant 0 : index
    %26 = vector.load %arg3[%c2, %c0_12, %c0_13] : memref<3x16x32xbf16, #tpu.memory_space<vmem>>, vector<1x16x32xbf16>
    %27 = vector.shape_cast %26 : vector<1x16x32xbf16> to vector<16x32xbf16>
    %cst_14 = arith.constant dense<0.000000e+00> : vector<16x32xf32>
    %28 = tpu.matmul %25, %27, %cst_14 {dimension_numbers = #tpu.dot_dimension_numbers<[1], [0], [0], [1], [0, 0, 1, 1], [], []>} : vector<16x16xbf16>, vector<16x32xbf16>, vector<16x32xf32> -> vector<16x32xf32>
    %29 = arith.addf %20, %28 : vector<16x32xf32>
    %c0_15 = arith.constant 0 : index
    %c0_16 = arith.constant 0 : index
    %30 = vector.load %arg4[%c0_15, %c0_16] : memref<1x32xf32, #tpu.memory_space<vmem>>, vector<1x32xf32>
    %31 = vector.broadcast %30 : vector<1x32xf32> to vector<16x32xf32>
    %32 = arith.addf %29, %31 : vector<16x32xf32>
    %cst_17 = arith.constant 0.000000e+00 : f32
    %33 = vector.broadcast %cst_17 : f32 to vector<16x32xf32>
    %34 = arith.maximumf %32, %33 : vector<16x32xf32>
    %c0_18 = arith.constant 0 : index
    %c0_19 = arith.constant 0 : index
    %c0_20 = arith.constant 0 : index
    %35 = vector.load %arg5[%c0_18, %c0_19, %c0_20] : memref<1x16x32xf32, #tpu.memory_space<vmem>>, vector<1x16x32xf32>
    %36 = vector.shape_cast %35 : vector<1x16x32xf32> to vector<16x32xf32>
    %37 = vector.shape_cast %34 : vector<16x32xf32> to vector<1x16x32xf32>
    tpu.vector_store %arg5[%c0_18, %c0_19, %c0_20], %37 {strides = array<i32>} : memref<1x16x32xf32, #tpu.memory_space<vmem>>, vector<1x16x32xf32>,
    return
  }
  func.func @transform_0(%arg0: i32, %arg1: i32) -> (i32, i32, i32) {
    %c0_i32 = arith.constant 0 : i32
    %c0_i32_0 = arith.constant 0 : i32
    %c0_i32_1 = arith.constant 0 : i32
    return %arg0, %c0_i32, %c0_i32_0 : i32, i32, i32
  }
  func.func @transform_1(%arg0: i32, %arg1: i32) -> (i32, i32, i32) {
    %c0_i32 = arith.constant 0 : i32
    %c0_i32_0 = arith.constant 0 : i32
    %c0_i32_1 = arith.constant 0 : i32
    %c0_i32_2 = arith.constant 0 : i32
    return %c0_i32, %c0_i32_0, %c0_i32_1 : i32, i32, i32
  }
  func.func @transform_2(%arg0: i32, %arg1: i32) -> (i32, i32) {
    %c0_i32 = arith.constant 0 : i32
    %c0_i32_0 = arith.constant 0 : i32
    %c0_i32_1 = arith.constant 0 : i32
    return %c0_i32, %c0_i32_0 : i32, i32
  }
  func.func @transform_3(%arg0: i32, %arg1: i32) -> (i32, i32, i32) {
    %c0_i32 = arith.constant 0 : i32
    %c0_i32_0 = arith.constant 0 : i32
    return %arg0, %arg1, %c0_i32 : i32, i32, i32
  }
}

module attributes {stable_mosaic.version = 11 : i64} {
  func.func @_conv_kernel(%arg0: i32, %arg1: i32, %arg2: memref<1x16x32xf32, #tpu.memory_space<vmem>>, %arg3: memref<1x32x16xbf16, #tpu.memory_space<vmem>>, %arg4: memref<1x16xf32, #tpu.memory_space<vmem>>, %arg5: memref<1x16x8xf32, #tpu.memory_space<vmem>>, %arg6: memref<1x16x16xf32, #tpu.memory_space<vmem>>, %arg7: memref<1x16x8xf32, #tpu.memory_space<vmem>>) attributes {dimension_semantics = [#tpu.dimension_semantics<parallel>, #tpu.dimension_semantics<arbitrary>], iteration_bounds = array<i64: 2, 1>, scalar_prefetch = 0 : i64, scratch_operands = 0 : i64, tpu.core_type = #tpu.core_type<tc>, window_params = [{transform_indices = @transform_0, window_bounds = array<i64: 1, 16, 32>}, {pipeline_mode = #tpu.pipeline_mode<synchronous>, transform_indices = @transform_1, window_bounds = array<i64: 1, 32, 16>}, {pipeline_mode = #tpu.pipeline_mode<synchronous>, transform_indices = @transform_2, window_bounds = array<i64: 1, 16>}, {transform_indices = @transform_3, window_bounds = array<i64: 1, 16, 8>}, {transform_indices = @transform_4, window_bounds = array<i64: 1, 16, 16>}, {transform_indices = @transform_5, window_bounds = array<i64: 1, 16, 8>}]} {
    %c16_i32 = arith.constant 16 : i32
    %0 = arith.muli %arg1, %c16_i32 : i32
    %1 = tpu.assume_multiple %0, 8 : i32
    %cst = arith.constant 0.000000e+00 : f32
    %2 = vector.broadcast %cst : f32 to vector<16x16xf32>
    %c0_i32 = arith.constant 0 : i32
    %3 = arith.addi %1, %c0_i32 : i32
    %c0 = arith.constant 0 : index
    %4 = arith.index_cast %3 : i32 to index
    %c0_0 = arith.constant 0 : index
    %5 = vector.load %arg2[%c0, %4, %c0_0] : memref<1x16x32xf32, #tpu.memory_space<vmem>>, vector<1x16x32xf32>
    %6 = vector.shape_cast %5 : vector<1x16x32xf32> to vector<16x32xf32>
    %7 = arith.truncf %6 : vector<16x32xf32> to vector<16x32xbf16>
    %c0_1 = arith.constant 0 : index
    %c0_2 = arith.constant 0 : index
    %c0_3 = arith.constant 0 : index
    %8 = vector.load %arg3[%c0_1, %c0_2, %c0_3] : memref<1x32x16xbf16, #tpu.memory_space<vmem>>, vector<1x32x16xbf16>
    %9 = vector.shape_cast %8 : vector<1x32x16xbf16> to vector<32x16xbf16>
    %cst_4 = arith.constant dense<0.000000e+00> : vector<16x16xf32>
    %10 = tpu.matmul %7, %9, %cst_4 {dimension_numbers = #tpu.dot_dimension_numbers<[1], [0], [0], [1], [0, 0, 1, 1], [], []>} : vector<16x32xbf16>, vector<32x16xbf16>, vector<16x16xf32> -> vector<16x16xf32>
    %11 = arith.addf %2, %10 : vector<16x16xf32>
    %c0_5 = arith.constant 0 : index
    %c0_6 = arith.constant 0 : index
    %12 = vector.load %arg4[%c0_5, %c0_6] : memref<1x16xf32, #tpu.memory_space<vmem>>, vector<1x16xf32>
    %13 = vector.broadcast %12 : vector<1x16xf32> to vector<16x16xf32>
    %14 = arith.addf %11, %13 : vector<16x16xf32>
    %c0_7 = arith.constant 0 : index
    %c0_8 = arith.constant 0 : index
    %c0_9 = arith.constant 0 : index
    %15 = vector.load %arg6[%c0_7, %c0_8, %c0_9] : memref<1x16x16xf32, #tpu.memory_space<vmem>>, vector<1x16x16xf32>
    %16 = vector.shape_cast %15 : vector<1x16x16xf32> to vector<16x16xf32>
    %17 = vector.shape_cast %14 : vector<16x16xf32> to vector<1x16x16xf32>
    tpu.vector_store %arg6[%c0_7, %c0_8, %c0_9], %17 {strides = array<i32>} : memref<1x16x16xf32, #tpu.memory_space<vmem>>, vector<1x16x16xf32>,
    %18 = vector.extract_strided_slice %14 {offsets = [0, 0], sizes = [16, 8], strides = [1, 1]} : vector<16x16xf32> to vector<16x8xf32>
    %19 = vector.extract_strided_slice %14 {offsets = [0, 8], sizes = [16, 8], strides = [1, 1]} : vector<16x16xf32> to vector<16x8xf32>
    %cst_10 = arith.constant 5.000000e-01 : f32
    %20 = vector.broadcast %cst_10 : f32 to vector<16x8xf32>
    %21 = arith.mulf %20, %19 : vector<16x8xf32>
    %22 = math.exp %21 : vector<16x8xf32>
    %c0_11 = arith.constant 0 : index
    %c0_12 = arith.constant 0 : index
    %c0_13 = arith.constant 0 : index
    %23 = vector.load %arg5[%c0_11, %c0_12, %c0_13] : memref<1x16x8xf32, #tpu.memory_space<vmem>>, vector<1x16x8xf32>
    %24 = vector.shape_cast %23 : vector<1x16x8xf32> to vector<16x8xf32>
    %25 = arith.mulf %22, %24 : vector<16x8xf32>
    %26 = arith.addf %18, %25 : vector<16x8xf32>
    %c0_14 = arith.constant 0 : index
    %c0_15 = arith.constant 0 : index
    %c0_16 = arith.constant 0 : index
    %27 = vector.load %arg7[%c0_14, %c0_15, %c0_16] : memref<1x16x8xf32, #tpu.memory_space<vmem>>, vector<1x16x8xf32>
    %28 = vector.shape_cast %27 : vector<1x16x8xf32> to vector<16x8xf32>
    %29 = vector.shape_cast %26 : vector<16x8xf32> to vector<1x16x8xf32>
    tpu.vector_store %arg7[%c0_14, %c0_15, %c0_16], %29 {strides = array<i32>} : memref<1x16x8xf32, #tpu.memory_space<vmem>>, vector<1x16x8xf32>,
    return
  }
  func.func @transform_0(%arg0: i32, %arg1: i32) -> (i32, i32, i32) {
    %c0_i32 = arith.constant 0 : i32
    %c0_i32_0 = arith.constant 0 : i32
    %c0_i32_1 = arith.constant 0 : i32
    return %arg0, %c0_i32, %c0_i32_0 : i32, i32, i32
  }
  func.func @transform_1(%arg0: i32, %arg1: i32) -> (i32, i32, i32) {
    %c0_i32 = arith.constant 0 : i32
    %c0_i32_0 = arith.constant 0 : i32
    %c0_i32_1 = arith.constant 0 : i32
    %c0_i32_2 = arith.constant 0 : i32
    return %c0_i32, %c0_i32_0, %c0_i32_1 : i32, i32, i32
  }
  func.func @transform_2(%arg0: i32, %arg1: i32) -> (i32, i32) {
    %c0_i32 = arith.constant 0 : i32
    %c0_i32_0 = arith.constant 0 : i32
    %c0_i32_1 = arith.constant 0 : i32
    return %c0_i32, %c0_i32_0 : i32, i32
  }
  func.func @transform_3(%arg0: i32, %arg1: i32) -> (i32, i32, i32) {
    %c0_i32 = arith.constant 0 : i32
    %c0_i32_0 = arith.constant 0 : i32
    return %arg0, %arg1, %c0_i32 : i32, i32, i32
  }
  func.func @transform_4(%arg0: i32, %arg1: i32) -> (i32, i32, i32) {
    %c0_i32 = arith.constant 0 : i32
    %c0_i32_0 = arith.constant 0 : i32
    return %arg0, %arg1, %c0_i32 : i32, i32, i32
  }
  func.func @transform_5(%arg0: i32, %arg1: i32) -> (i32, i32, i32) {
    %c0_i32 = arith.constant 0 : i32
    %c0_i32_0 = arith.constant 0 : i32
    return %arg0, %arg1, %c0_i32 : i32, i32, i32
  }
}

module attributes {stable_mosaic.version = 11 : i64} {
  func.func @_conv_kernel(%arg0: i32, %arg1: i32, %arg2: memref<1x18x32xf32, #tpu.memory_space<vmem>>, %arg3: memref<3x32x32xbf16, #tpu.memory_space<vmem>>, %arg4: memref<1x32xf32, #tpu.memory_space<vmem>>, %arg5: memref<1x16x32xf32, #tpu.memory_space<vmem>>) attributes {dimension_semantics = [#tpu.dimension_semantics<parallel>, #tpu.dimension_semantics<arbitrary>], iteration_bounds = array<i64: 2, 1>, scalar_prefetch = 0 : i64, scratch_operands = 0 : i64, tpu.core_type = #tpu.core_type<tc>, window_params = [{transform_indices = @transform_0, window_bounds = array<i64: 1, 18, 32>}, {pipeline_mode = #tpu.pipeline_mode<synchronous>, transform_indices = @transform_1, window_bounds = array<i64: 3, 32, 32>}, {pipeline_mode = #tpu.pipeline_mode<synchronous>, transform_indices = @transform_2, window_bounds = array<i64: 1, 32>}, {transform_indices = @transform_3, window_bounds = array<i64: 1, 16, 32>}]} {
    %c16_i32 = arith.constant 16 : i32
    %0 = arith.muli %arg1, %c16_i32 : i32
    %1 = tpu.assume_multiple %0, 8 : i32
    %cst = arith.constant 0.000000e+00 : f32
    %2 = vector.broadcast %cst : f32 to vector<16x32xf32>
    %c0_i32 = arith.constant 0 : i32
    %3 = arith.addi %1, %c0_i32 : i32
    %c0 = arith.constant 0 : index
    %4 = arith.index_cast %3 : i32 to index
    %c0_0 = arith.constant 0 : index
    %5 = vector.load %arg2[%c0, %4, %c0_0] : memref<1x18x32xf32, #tpu.memory_space<vmem>>, vector<1x16x32xf32>
    %6 = vector.shape_cast %5 : vector<1x16x32xf32> to vector<16x32xf32>
    %7 = arith.truncf %6 : vector<16x32xf32> to vector<16x32xbf16>
    %c0_1 = arith.constant 0 : index
    %c0_2 = arith.constant 0 : index
    %c0_3 = arith.constant 0 : index
    %8 = vector.load %arg3[%c0_1, %c0_2, %c0_3] : memref<3x32x32xbf16, #tpu.memory_space<vmem>>, vector<1x32x32xbf16>
    %9 = vector.shape_cast %8 : vector<1x32x32xbf16> to vector<32x32xbf16>
    %cst_4 = arith.constant dense<0.000000e+00> : vector<16x32xf32>
    %10 = tpu.matmul %7, %9, %cst_4 {dimension_numbers = #tpu.dot_dimension_numbers<[1], [0], [0], [1], [0, 0, 1, 1], [], []>} : vector<16x32xbf16>, vector<32x32xbf16>, vector<16x32xf32> -> vector<16x32xf32>
    %11 = arith.addf %2, %10 : vector<16x32xf32>
    %c1_i32 = arith.constant 1 : i32
    %12 = arith.addi %1, %c1_i32 : i32
    %c0_5 = arith.constant 0 : index
    %13 = arith.index_cast %12 : i32 to index
    %c0_6 = arith.constant 0 : index
    %14 = vector.load %arg2[%c0_5, %13, %c0_6] : memref<1x18x32xf32, #tpu.memory_space<vmem>>, vector<1x16x32xf32>
    %15 = vector.shape_cast %14 : vector<1x16x32xf32> to vector<16x32xf32>
    %16 = arith.truncf %15 : vector<16x32xf32> to vector<16x32xbf16>
    %c1 = arith.constant 1 : index
    %c0_7 = arith.constant 0 : index
    %c0_8 = arith.constant 0 : index
    %17 = vector.load %arg3[%c1, %c0_7, %c0_8] : memref<3x32x32xbf16, #tpu.memory_space<vmem>>, vector<1x32x32xbf16>
    %18 = vector.shape_cast %17 : vector<1x32x32xbf16> to vector<32x32xbf16>
    %cst_9 = arith.constant dense<0.000000e+00> : vector<16x32xf32>
    %19 = tpu.matmul %16, %18, %cst_9 {dimension_numbers = #tpu.dot_dimension_numbers<[1], [0], [0], [1], [0, 0, 1, 1], [], []>} : vector<16x32xbf16>, vector<32x32xbf16>, vector<16x32xf32> -> vector<16x32xf32>
    %20 = arith.addf %11, %19 : vector<16x32xf32>
    %c2_i32 = arith.constant 2 : i32
    %21 = arith.addi %1, %c2_i32 : i32
    %c0_10 = arith.constant 0 : index
    %22 = arith.index_cast %21 : i32 to index
    %c0_11 = arith.constant 0 : index
    %23 = vector.load %arg2[%c0_10, %22, %c0_11] : memref<1x18x32xf32, #tpu.memory_space<vmem>>, vector<1x16x32xf32>
    %24 = vector.shape_cast %23 : vector<1x16x32xf32> to vector<16x32xf32>
    %25 = arith.truncf %24 : vector<16x32xf32> to vector<16x32xbf16>
    %c2 = arith.constant 2 : index
    %c0_12 = arith.constant 0 : index
    %c0_13 = arith.constant 0 : index
    %26 = vector.load %arg3[%c2, %c0_12, %c0_13] : memref<3x32x32xbf16, #tpu.memory_space<vmem>>, vector<1x32x32xbf16>
    %27 = vector.shape_cast %26 : vector<1x32x32xbf16> to vector<32x32xbf16>
    %cst_14 = arith.constant dense<0.000000e+00> : vector<16x32xf32>
    %28 = tpu.matmul %25, %27, %cst_14 {dimension_numbers = #tpu.dot_dimension_numbers<[1], [0], [0], [1], [0, 0, 1, 1], [], []>} : vector<16x32xbf16>, vector<32x32xbf16>, vector<16x32xf32> -> vector<16x32xf32>
    %29 = arith.addf %20, %28 : vector<16x32xf32>
    %c0_15 = arith.constant 0 : index
    %c0_16 = arith.constant 0 : index
    %30 = vector.load %arg4[%c0_15, %c0_16] : memref<1x32xf32, #tpu.memory_space<vmem>>, vector<1x32xf32>
    %31 = vector.broadcast %30 : vector<1x32xf32> to vector<16x32xf32>
    %32 = arith.addf %29, %31 : vector<16x32xf32>
    %cst_17 = arith.constant 0.000000e+00 : f32
    %33 = vector.broadcast %cst_17 : f32 to vector<16x32xf32>
    %34 = arith.maximumf %32, %33 : vector<16x32xf32>
    %c0_18 = arith.constant 0 : index
    %c0_19 = arith.constant 0 : index
    %c0_20 = arith.constant 0 : index
    %35 = vector.load %arg5[%c0_18, %c0_19, %c0_20] : memref<1x16x32xf32, #tpu.memory_space<vmem>>, vector<1x16x32xf32>
    %36 = vector.shape_cast %35 : vector<1x16x32xf32> to vector<16x32xf32>
    %37 = vector.shape_cast %34 : vector<16x32xf32> to vector<1x16x32xf32>
    tpu.vector_store %arg5[%c0_18, %c0_19, %c0_20], %37 {strides = array<i32>} : memref<1x16x32xf32, #tpu.memory_space<vmem>>, vector<1x16x32xf32>,
    return
  }
  func.func @transform_0(%arg0: i32, %arg1: i32) -> (i32, i32, i32) {
    %c0_i32 = arith.constant 0 : i32
    %c0_i32_0 = arith.constant 0 : i32
    %c0_i32_1 = arith.constant 0 : i32
    return %arg0, %c0_i32, %c0_i32_0 : i32, i32, i32
  }
  func.func @transform_1(%arg0: i32, %arg1: i32) -> (i32, i32, i32) {
    %c0_i32 = arith.constant 0 : i32
    %c0_i32_0 = arith.constant 0 : i32
    %c0_i32_1 = arith.constant 0 : i32
    %c0_i32_2 = arith.constant 0 : i32
    return %c0_i32, %c0_i32_0, %c0_i32_1 : i32, i32, i32
  }
  func.func @transform_2(%arg0: i32, %arg1: i32) -> (i32, i32) {
    %c0_i32 = arith.constant 0 : i32
    %c0_i32_0 = arith.constant 0 : i32
    %c0_i32_1 = arith.constant 0 : i32
    return %c0_i32, %c0_i32_0 : i32, i32
  }
  func.func @transform_3(%arg0: i32, %arg1: i32) -> (i32, i32, i32) {
    %c0_i32 = arith.constant 0 : i32
    %c0_i32_0 = arith.constant 0 : i32
    return %arg0, %arg1, %c0_i32 : i32, i32, i32
  }
}

module attributes {stable_mosaic.version = 11 : i64} {
  func.func @_conv_kernel(%arg0: i32, %arg1: i32, %arg2: memref<1x18x4xf32, #tpu.memory_space<vmem>>, %arg3: memref<3x4x16xbf16, #tpu.memory_space<vmem>>, %arg4: memref<1x16xf32, #tpu.memory_space<vmem>>, %arg5: memref<1x16x16xf32, #tpu.memory_space<vmem>>) attributes {dimension_semantics = [#tpu.dimension_semantics<parallel>, #tpu.dimension_semantics<arbitrary>], iteration_bounds = array<i64: 2, 1>, scalar_prefetch = 0 : i64, scratch_operands = 0 : i64, tpu.core_type = #tpu.core_type<tc>, window_params = [{transform_indices = @transform_0, window_bounds = array<i64: 1, 18, 4>}, {pipeline_mode = #tpu.pipeline_mode<synchronous>, transform_indices = @transform_1, window_bounds = array<i64: 3, 4, 16>}, {pipeline_mode = #tpu.pipeline_mode<synchronous>, transform_indices = @transform_2, window_bounds = array<i64: 1, 16>}, {transform_indices = @transform_3, window_bounds = array<i64: 1, 16, 16>}]} {
    %c16_i32 = arith.constant 16 : i32
    %0 = arith.muli %arg1, %c16_i32 : i32
    %1 = tpu.assume_multiple %0, 8 : i32
    %cst = arith.constant 0.000000e+00 : f32
    %2 = vector.broadcast %cst : f32 to vector<16x16xf32>
    %c0_i32 = arith.constant 0 : i32
    %3 = arith.addi %1, %c0_i32 : i32
    %c0 = arith.constant 0 : index
    %4 = arith.index_cast %3 : i32 to index
    %c0_0 = arith.constant 0 : index
    %5 = vector.load %arg2[%c0, %4, %c0_0] : memref<1x18x4xf32, #tpu.memory_space<vmem>>, vector<1x16x4xf32>
    %6 = vector.shape_cast %5 : vector<1x16x4xf32> to vector<16x4xf32>
    %7 = arith.truncf %6 : vector<16x4xf32> to vector<16x4xbf16>
    %c0_1 = arith.constant 0 : index
    %c0_2 = arith.constant 0 : index
    %c0_3 = arith.constant 0 : index
    %8 = vector.load %arg3[%c0_1, %c0_2, %c0_3] : memref<3x4x16xbf16, #tpu.memory_space<vmem>>, vector<1x4x16xbf16>
    %9 = vector.shape_cast %8 : vector<1x4x16xbf16> to vector<4x16xbf16>
    %cst_4 = arith.constant dense<0.000000e+00> : vector<16x16xf32>
    %10 = tpu.matmul %7, %9, %cst_4 {dimension_numbers = #tpu.dot_dimension_numbers<[1], [0], [0], [1], [0, 0, 1, 1], [], []>} : vector<16x4xbf16>, vector<4x16xbf16>, vector<16x16xf32> -> vector<16x16xf32>
    %11 = arith.addf %2, %10 : vector<16x16xf32>
    %c1_i32 = arith.constant 1 : i32
    %12 = arith.addi %1, %c1_i32 : i32
    %c0_5 = arith.constant 0 : index
    %13 = arith.index_cast %12 : i32 to index
    %c0_6 = arith.constant 0 : index
    %14 = vector.load %arg2[%c0_5, %13, %c0_6] : memref<1x18x4xf32, #tpu.memory_space<vmem>>, vector<1x16x4xf32>
    %15 = vector.shape_cast %14 : vector<1x16x4xf32> to vector<16x4xf32>
    %16 = arith.truncf %15 : vector<16x4xf32> to vector<16x4xbf16>
    %c1 = arith.constant 1 : index
    %c0_7 = arith.constant 0 : index
    %c0_8 = arith.constant 0 : index
    %17 = vector.load %arg3[%c1, %c0_7, %c0_8] : memref<3x4x16xbf16, #tpu.memory_space<vmem>>, vector<1x4x16xbf16>
    %18 = vector.shape_cast %17 : vector<1x4x16xbf16> to vector<4x16xbf16>
    %cst_9 = arith.constant dense<0.000000e+00> : vector<16x16xf32>
    %19 = tpu.matmul %16, %18, %cst_9 {dimension_numbers = #tpu.dot_dimension_numbers<[1], [0], [0], [1], [0, 0, 1, 1], [], []>} : vector<16x4xbf16>, vector<4x16xbf16>, vector<16x16xf32> -> vector<16x16xf32>
    %20 = arith.addf %11, %19 : vector<16x16xf32>
    %c2_i32 = arith.constant 2 : i32
    %21 = arith.addi %1, %c2_i32 : i32
    %c0_10 = arith.constant 0 : index
    %22 = arith.index_cast %21 : i32 to index
    %c0_11 = arith.constant 0 : index
    %23 = vector.load %arg2[%c0_10, %22, %c0_11] : memref<1x18x4xf32, #tpu.memory_space<vmem>>, vector<1x16x4xf32>
    %24 = vector.shape_cast %23 : vector<1x16x4xf32> to vector<16x4xf32>
    %25 = arith.truncf %24 : vector<16x4xf32> to vector<16x4xbf16>
    %c2 = arith.constant 2 : index
    %c0_12 = arith.constant 0 : index
    %c0_13 = arith.constant 0 : index
    %26 = vector.load %arg3[%c2, %c0_12, %c0_13] : memref<3x4x16xbf16, #tpu.memory_space<vmem>>, vector<1x4x16xbf16>
    %27 = vector.shape_cast %26 : vector<1x4x16xbf16> to vector<4x16xbf16>
    %cst_14 = arith.constant dense<0.000000e+00> : vector<16x16xf32>
    %28 = tpu.matmul %25, %27, %cst_14 {dimension_numbers = #tpu.dot_dimension_numbers<[1], [0], [0], [1], [0, 0, 1, 1], [], []>} : vector<16x4xbf16>, vector<4x16xbf16>, vector<16x16xf32> -> vector<16x16xf32>
    %29 = arith.addf %20, %28 : vector<16x16xf32>
    %c0_15 = arith.constant 0 : index
    %c0_16 = arith.constant 0 : index
    %30 = vector.load %arg4[%c0_15, %c0_16] : memref<1x16xf32, #tpu.memory_space<vmem>>, vector<1x16xf32>
    %31 = vector.broadcast %30 : vector<1x16xf32> to vector<16x16xf32>
    %32 = arith.addf %29, %31 : vector<16x16xf32>
    %cst_17 = arith.constant 0.000000e+00 : f32
    %33 = vector.broadcast %cst_17 : f32 to vector<16x16xf32>
    %34 = arith.maximumf %32, %33 : vector<16x16xf32>
    %c0_18 = arith.constant 0 : index
    %c0_19 = arith.constant 0 : index
    %c0_20 = arith.constant 0 : index
    %35 = vector.load %arg5[%c0_18, %c0_19, %c0_20] : memref<1x16x16xf32, #tpu.memory_space<vmem>>, vector<1x16x16xf32>
    %36 = vector.shape_cast %35 : vector<1x16x16xf32> to vector<16x16xf32>
    %37 = vector.shape_cast %34 : vector<16x16xf32> to vector<1x16x16xf32>
    tpu.vector_store %arg5[%c0_18, %c0_19, %c0_20], %37 {strides = array<i32>} : memref<1x16x16xf32, #tpu.memory_space<vmem>>, vector<1x16x16xf32>,
    return
  }
  func.func @transform_0(%arg0: i32, %arg1: i32) -> (i32, i32, i32) {
    %c0_i32 = arith.constant 0 : i32
    %c0_i32_0 = arith.constant 0 : i32
    %c0_i32_1 = arith.constant 0 : i32
    return %arg0, %c0_i32, %c0_i32_0 : i32, i32, i32
  }
  func.func @transform_1(%arg0: i32, %arg1: i32) -> (i32, i32, i32) {
    %c0_i32 = arith.constant 0 : i32
    %c0_i32_0 = arith.constant 0 : i32
    %c0_i32_1 = arith.constant 0 : i32
    %c0_i32_2 = arith.constant 0 : i32
    return %c0_i32, %c0_i32_0, %c0_i32_1 : i32, i32, i32
  }
  func.func @transform_2(%arg0: i32, %arg1: i32) -> (i32, i32) {
    %c0_i32 = arith.constant 0 : i32
    %c0_i32_0 = arith.constant 0 : i32
    %c0_i32_1 = arith.constant 0 : i32
    return %c0_i32, %c0_i32_0 : i32, i32
  }
  func.func @transform_3(%arg0: i32, %arg1: i32) -> (i32, i32, i32) {
    %c0_i32 = arith.constant 0 : i32
    %c0_i32_0 = arith.constant 0 : i32
    return %arg0, %arg1, %c0_i32 : i32, i32, i32
  }
}

module attributes {stable_mosaic.version = 11 : i64} {
  func.func @_conv_kernel(%arg0: i32, %arg1: i32, %arg2: memref<1x22x8xf32, #tpu.memory_space<vmem>>, %arg3: memref<7x8x32xbf16, #tpu.memory_space<vmem>>, %arg4: memref<1x32xf32, #tpu.memory_space<vmem>>, %arg5: memref<1x16x32xf32, #tpu.memory_space<vmem>>) attributes {dimension_semantics = [#tpu.dimension_semantics<parallel>, #tpu.dimension_semantics<arbitrary>], iteration_bounds = array<i64: 2, 1>, scalar_prefetch = 0 : i64, scratch_operands = 0 : i64, tpu.core_type = #tpu.core_type<tc>, window_params = [{transform_indices = @transform_0, window_bounds = array<i64: 1, 22, 8>}, {pipeline_mode = #tpu.pipeline_mode<synchronous>, transform_indices = @transform_1, window_bounds = array<i64: 7, 8, 32>}, {pipeline_mode = #tpu.pipeline_mode<synchronous>, transform_indices = @transform_2, window_bounds = array<i64: 1, 32>}, {transform_indices = @transform_3, window_bounds = array<i64: 1, 16, 32>}]} {
    %c16_i32 = arith.constant 16 : i32
    %0 = arith.muli %arg1, %c16_i32 : i32
    %1 = tpu.assume_multiple %0, 8 : i32
    %cst = arith.constant 0.000000e+00 : f32
    %2 = vector.broadcast %cst : f32 to vector<16x32xf32>
    %c0_i32 = arith.constant 0 : i32
    %3 = arith.addi %1, %c0_i32 : i32
    %c0 = arith.constant 0 : index
    %4 = arith.index_cast %3 : i32 to index
    %c0_0 = arith.constant 0 : index
    %5 = vector.load %arg2[%c0, %4, %c0_0] : memref<1x22x8xf32, #tpu.memory_space<vmem>>, vector<1x16x8xf32>
    %6 = vector.shape_cast %5 : vector<1x16x8xf32> to vector<16x8xf32>
    %7 = arith.truncf %6 : vector<16x8xf32> to vector<16x8xbf16>
    %c0_1 = arith.constant 0 : index
    %c0_2 = arith.constant 0 : index
    %c0_3 = arith.constant 0 : index
    %8 = vector.load %arg3[%c0_1, %c0_2, %c0_3] : memref<7x8x32xbf16, #tpu.memory_space<vmem>>, vector<1x8x32xbf16>
    %9 = vector.shape_cast %8 : vector<1x8x32xbf16> to vector<8x32xbf16>
    %cst_4 = arith.constant dense<0.000000e+00> : vector<16x32xf32>
    %10 = tpu.matmul %7, %9, %cst_4 {dimension_numbers = #tpu.dot_dimension_numbers<[1], [0], [0], [1], [0, 0, 1, 1], [], []>} : vector<16x8xbf16>, vector<8x32xbf16>, vector<16x32xf32> -> vector<16x32xf32>
    %11 = arith.addf %2, %10 : vector<16x32xf32>
    %c1_i32 = arith.constant 1 : i32
    %12 = arith.addi %1, %c1_i32 : i32
    %c0_5 = arith.constant 0 : index
    %13 = arith.index_cast %12 : i32 to index
    %c0_6 = arith.constant 0 : index
    %14 = vector.load %arg2[%c0_5, %13, %c0_6] : memref<1x22x8xf32, #tpu.memory_space<vmem>>, vector<1x16x8xf32>
    %15 = vector.shape_cast %14 : vector<1x16x8xf32> to vector<16x8xf32>
    %16 = arith.truncf %15 : vector<16x8xf32> to vector<16x8xbf16>
    %c1 = arith.constant 1 : index
    %c0_7 = arith.constant 0 : index
    %c0_8 = arith.constant 0 : index
    %17 = vector.load %arg3[%c1, %c0_7, %c0_8] : memref<7x8x32xbf16, #tpu.memory_space<vmem>>, vector<1x8x32xbf16>
    %18 = vector.shape_cast %17 : vector<1x8x32xbf16> to vector<8x32xbf16>
    %cst_9 = arith.constant dense<0.000000e+00> : vector<16x32xf32>
    %19 = tpu.matmul %16, %18, %cst_9 {dimension_numbers = #tpu.dot_dimension_numbers<[1], [0], [0], [1], [0, 0, 1, 1], [], []>} : vector<16x8xbf16>, vector<8x32xbf16>, vector<16x32xf32> -> vector<16x32xf32>
    %20 = arith.addf %11, %19 : vector<16x32xf32>
    %c2_i32 = arith.constant 2 : i32
    %21 = arith.addi %1, %c2_i32 : i32
    %c0_10 = arith.constant 0 : index
    %22 = arith.index_cast %21 : i32 to index
    %c0_11 = arith.constant 0 : index
    %23 = vector.load %arg2[%c0_10, %22, %c0_11] : memref<1x22x8xf32, #tpu.memory_space<vmem>>, vector<1x16x8xf32>
    %24 = vector.shape_cast %23 : vector<1x16x8xf32> to vector<16x8xf32>
    %25 = arith.truncf %24 : vector<16x8xf32> to vector<16x8xbf16>
    %c2 = arith.constant 2 : index
    %c0_12 = arith.constant 0 : index
    %c0_13 = arith.constant 0 : index
    %26 = vector.load %arg3[%c2, %c0_12, %c0_13] : memref<7x8x32xbf16, #tpu.memory_space<vmem>>, vector<1x8x32xbf16>
    %27 = vector.shape_cast %26 : vector<1x8x32xbf16> to vector<8x32xbf16>
    %cst_14 = arith.constant dense<0.000000e+00> : vector<16x32xf32>
    %28 = tpu.matmul %25, %27, %cst_14 {dimension_numbers = #tpu.dot_dimension_numbers<[1], [0], [0], [1], [0, 0, 1, 1], [], []>} : vector<16x8xbf16>, vector<8x32xbf16>, vector<16x32xf32> -> vector<16x32xf32>
    %29 = arith.addf %20, %28 : vector<16x32xf32>
    %c3_i32 = arith.constant 3 : i32
    %30 = arith.addi %1, %c3_i32 : i32
    %c0_15 = arith.constant 0 : index
    %31 = arith.index_cast %30 : i32 to index
    %c0_16 = arith.constant 0 : index
    %32 = vector.load %arg2[%c0_15, %31, %c0_16] : memref<1x22x8xf32, #tpu.memory_space<vmem>>, vector<1x16x8xf32>
    %33 = vector.shape_cast %32 : vector<1x16x8xf32> to vector<16x8xf32>
    %34 = arith.truncf %33 : vector<16x8xf32> to vector<16x8xbf16>
    %c3 = arith.constant 3 : index
    %c0_17 = arith.constant 0 : index
    %c0_18 = arith.constant 0 : index
    %35 = vector.load %arg3[%c3, %c0_17, %c0_18] : memref<7x8x32xbf16, #tpu.memory_space<vmem>>, vector<1x8x32xbf16>
    %36 = vector.shape_cast %35 : vector<1x8x32xbf16> to vector<8x32xbf16>
    %cst_19 = arith.constant dense<0.000000e+00> : vector<16x32xf32>
    %37 = tpu.matmul %34, %36, %cst_19 {dimension_numbers = #tpu.dot_dimension_numbers<[1], [0], [0], [1], [0, 0, 1, 1], [], []>} : vector<16x8xbf16>, vector<8x32xbf16>, vector<16x32xf32> -> vector<16x32xf32>
    %38 = arith.addf %29, %37 : vector<16x32xf32>
    %c4_i32 = arith.constant 4 : i32
    %39 = arith.addi %1, %c4_i32 : i32
    %c0_20 = arith.constant 0 : index
    %40 = arith.index_cast %39 : i32 to index
    %c0_21 = arith.constant 0 : index
    %41 = vector.load %arg2[%c0_20, %40, %c0_21] : memref<1x22x8xf32, #tpu.memory_space<vmem>>, vector<1x16x8xf32>
    %42 = vector.shape_cast %41 : vector<1x16x8xf32> to vector<16x8xf32>
    %43 = arith.truncf %42 : vector<16x8xf32> to vector<16x8xbf16>
    %c4 = arith.constant 4 : index
    %c0_22 = arith.constant 0 : index
    %c0_23 = arith.constant 0 : index
    %44 = vector.load %arg3[%c4, %c0_22, %c0_23] : memref<7x8x32xbf16, #tpu.memory_space<vmem>>, vector<1x8x32xbf16>
    %45 = vector.shape_cast %44 : vector<1x8x32xbf16> to vector<8x32xbf16>
    %cst_24 = arith.constant dense<0.000000e+00> : vector<16x32xf32>
    %46 = tpu.matmul %43, %45, %cst_24 {dimension_numbers = #tpu.dot_dimension_numbers<[1], [0], [0], [1], [0, 0, 1, 1], [], []>} : vector<16x8xbf16>, vector<8x32xbf16>, vector<16x32xf32> -> vector<16x32xf32>
    %47 = arith.addf %38, %46 : vector<16x32xf32>
    %c5_i32 = arith.constant 5 : i32
    %48 = arith.addi %1, %c5_i32 : i32
    %c0_25 = arith.constant 0 : index
    %49 = arith.index_cast %48 : i32 to index
    %c0_26 = arith.constant 0 : index
    %50 = vector.load %arg2[%c0_25, %49, %c0_26] : memref<1x22x8xf32, #tpu.memory_space<vmem>>, vector<1x16x8xf32>
    %51 = vector.shape_cast %50 : vector<1x16x8xf32> to vector<16x8xf32>
    %52 = arith.truncf %51 : vector<16x8xf32> to vector<16x8xbf16>
    %c5 = arith.constant 5 : index
    %c0_27 = arith.constant 0 : index
    %c0_28 = arith.constant 0 : index
    %53 = vector.load %arg3[%c5, %c0_27, %c0_28] : memref<7x8x32xbf16, #tpu.memory_space<vmem>>, vector<1x8x32xbf16>
    %54 = vector.shape_cast %53 : vector<1x8x32xbf16> to vector<8x32xbf16>
    %cst_29 = arith.constant dense<0.000000e+00> : vector<16x32xf32>
    %55 = tpu.matmul %52, %54, %cst_29 {dimension_numbers = #tpu.dot_dimension_numbers<[1], [0], [0], [1], [0, 0, 1, 1], [], []>} : vector<16x8xbf16>, vector<8x32xbf16>, vector<16x32xf32> -> vector<16x32xf32>
    %56 = arith.addf %47, %55 : vector<16x32xf32>
    %c6_i32 = arith.constant 6 : i32
    %57 = arith.addi %1, %c6_i32 : i32
    %c0_30 = arith.constant 0 : index
    %58 = arith.index_cast %57 : i32 to index
    %c0_31 = arith.constant 0 : index
    %59 = vector.load %arg2[%c0_30, %58, %c0_31] : memref<1x22x8xf32, #tpu.memory_space<vmem>>, vector<1x16x8xf32>
    %60 = vector.shape_cast %59 : vector<1x16x8xf32> to vector<16x8xf32>
    %61 = arith.truncf %60 : vector<16x8xf32> to vector<16x8xbf16>
    %c6 = arith.constant 6 : index
    %c0_32 = arith.constant 0 : index
    %c0_33 = arith.constant 0 : index
    %62 = vector.load %arg3[%c6, %c0_32, %c0_33] : memref<7x8x32xbf16, #tpu.memory_space<vmem>>, vector<1x8x32xbf16>
    %63 = vector.shape_cast %62 : vector<1x8x32xbf16> to vector<8x32xbf16>
    %cst_34 = arith.constant dense<0.000000e+00> : vector<16x32xf32>
    %64 = tpu.matmul %61, %63, %cst_34 {dimension_numbers = #tpu.dot_dimension_numbers<[1], [0], [0], [1], [0, 0, 1, 1], [], []>} : vector<16x8xbf16>, vector<8x32xbf16>, vector<16x32xf32> -> vector<16x32xf32>
    %65 = arith.addf %56, %64 : vector<16x32xf32>
    %c0_35 = arith.constant 0 : index
    %c0_36 = arith.constant 0 : index
    %66 = vector.load %arg4[%c0_35, %c0_36] : memref<1x32xf32, #tpu.memory_space<vmem>>, vector<1x32xf32>
    %67 = vector.broadcast %66 : vector<1x32xf32> to vector<16x32xf32>
    %68 = arith.addf %65, %67 : vector<16x32xf32>
    %c0_37 = arith.constant 0 : index
    %c0_38 = arith.constant 0 : index
    %c0_39 = arith.constant 0 : index
    %69 = vector.load %arg5[%c0_37, %c0_38, %c0_39] : memref<1x16x32xf32, #tpu.memory_space<vmem>>, vector<1x16x32xf32>
    %70 = vector.shape_cast %69 : vector<1x16x32xf32> to vector<16x32xf32>
    %71 = vector.shape_cast %68 : vector<16x32xf32> to vector<1x16x32xf32>
    tpu.vector_store %arg5[%c0_37, %c0_38, %c0_39], %71 {strides = array<i32>} : memref<1x16x32xf32, #tpu.memory_space<vmem>>, vector<1x16x32xf32>,
    return
  }
  func.func @transform_0(%arg0: i32, %arg1: i32) -> (i32, i32, i32) {
    %c0_i32 = arith.constant 0 : i32
    %c0_i32_0 = arith.constant 0 : i32
    %c0_i32_1 = arith.constant 0 : i32
    return %arg0, %c0_i32, %c0_i32_0 : i32, i32, i32
  }
  func.func @transform_1(%arg0: i32, %arg1: i32) -> (i32, i32, i32) {
    %c0_i32 = arith.constant 0 : i32
    %c0_i32_0 = arith.constant 0 : i32
    %c0_i32_1 = arith.constant 0 : i32
    %c0_i32_2 = arith.constant 0 : i32
    return %c0_i32, %c0_i32_0, %c0_i32_1 : i32, i32, i32
  }
  func.func @transform_2(%arg0: i32, %arg1: i32) -> (i32, i32) {
    %c0_i32 = arith.constant 0 : i32
    %c0_i32_0 = arith.constant 0 : i32
    %c0_i32_1 = arith.constant 0 : i32
    return %c0_i32, %c0_i32_0 : i32, i32
  }
  func.func @transform_3(%arg0: i32, %arg1: i32) -> (i32, i32, i32) {
    %c0_i32 = arith.constant 0 : i32
    %c0_i32_0 = arith.constant 0 : i32
    return %arg0, %arg1, %c0_i32 : i32, i32, i32
  }
}

module attributes {stable_mosaic.version = 11 : i64} {
  func.func @_flow_kernel(%arg0: i32, %arg1: i32, %arg2: memref<1x18x16xf32, #tpu.memory_space<vmem>>, %arg3: memref<3x16x8xbf16, #tpu.memory_space<vmem>>, %arg4: memref<1x8xf32, #tpu.memory_space<vmem>>, %arg5: memref<1x16x4xf32, #tpu.memory_space<vmem>>, %arg6: memref<1x16x4xf32, #tpu.memory_space<vmem>>, %arg7: memref<1x1x1xf32, #tpu.memory_space<vmem>>) attributes {dimension_semantics = [#tpu.dimension_semantics<parallel>, #tpu.dimension_semantics<arbitrary>], iteration_bounds = array<i64: 2, 1>, scalar_prefetch = 0 : i64, scratch_operands = 0 : i64, tpu.core_type = #tpu.core_type<tc>, window_params = [{transform_indices = @transform_0, window_bounds = array<i64: 1, 18, 16>}, {pipeline_mode = #tpu.pipeline_mode<synchronous>, transform_indices = @transform_1, window_bounds = array<i64: 3, 16, 8>}, {pipeline_mode = #tpu.pipeline_mode<synchronous>, transform_indices = @transform_2, window_bounds = array<i64: 1, 8>}, {transform_indices = @transform_3, window_bounds = array<i64: 1, 16, 4>}, {transform_indices = @transform_4, window_bounds = array<i64: 1, 16, 4>}, {transform_indices = @transform_5, window_bounds = array<i64: 1, 1, 1>}]} {
    %c16_i32 = arith.constant 16 : i32
    %0 = arith.muli %arg1, %c16_i32 : i32
    %1 = tpu.assume_multiple %0, 8 : i32
    %cst = arith.constant 0.000000e+00 : f32
    %2 = vector.broadcast %cst : f32 to vector<16x8xf32>
    %c0_i32 = arith.constant 0 : i32
    %3 = arith.addi %1, %c0_i32 : i32
    %c0 = arith.constant 0 : index
    %4 = arith.index_cast %3 : i32 to index
    %c0_0 = arith.constant 0 : index
    %5 = vector.load %arg2[%c0, %4, %c0_0] : memref<1x18x16xf32, #tpu.memory_space<vmem>>, vector<1x16x16xf32>
    %6 = vector.shape_cast %5 : vector<1x16x16xf32> to vector<16x16xf32>
    %7 = arith.truncf %6 : vector<16x16xf32> to vector<16x16xbf16>
    %c0_1 = arith.constant 0 : index
    %c0_2 = arith.constant 0 : index
    %c0_3 = arith.constant 0 : index
    %8 = vector.load %arg3[%c0_1, %c0_2, %c0_3] : memref<3x16x8xbf16, #tpu.memory_space<vmem>>, vector<1x16x8xbf16>
    %9 = vector.shape_cast %8 : vector<1x16x8xbf16> to vector<16x8xbf16>
    %cst_4 = arith.constant dense<0.000000e+00> : vector<16x8xf32>
    %10 = tpu.matmul %7, %9, %cst_4 {dimension_numbers = #tpu.dot_dimension_numbers<[1], [0], [0], [1], [0, 0, 1, 1], [], []>} : vector<16x16xbf16>, vector<16x8xbf16>, vector<16x8xf32> -> vector<16x8xf32>
    %11 = arith.addf %2, %10 : vector<16x8xf32>
    %c1_i32 = arith.constant 1 : i32
    %12 = arith.addi %1, %c1_i32 : i32
    %c0_5 = arith.constant 0 : index
    %13 = arith.index_cast %12 : i32 to index
    %c0_6 = arith.constant 0 : index
    %14 = vector.load %arg2[%c0_5, %13, %c0_6] : memref<1x18x16xf32, #tpu.memory_space<vmem>>, vector<1x16x16xf32>
    %15 = vector.shape_cast %14 : vector<1x16x16xf32> to vector<16x16xf32>
    %16 = arith.truncf %15 : vector<16x16xf32> to vector<16x16xbf16>
    %c1 = arith.constant 1 : index
    %c0_7 = arith.constant 0 : index
    %c0_8 = arith.constant 0 : index
    %17 = vector.load %arg3[%c1, %c0_7, %c0_8] : memref<3x16x8xbf16, #tpu.memory_space<vmem>>, vector<1x16x8xbf16>
    %18 = vector.shape_cast %17 : vector<1x16x8xbf16> to vector<16x8xbf16>
    %cst_9 = arith.constant dense<0.000000e+00> : vector<16x8xf32>
    %19 = tpu.matmul %16, %18, %cst_9 {dimension_numbers = #tpu.dot_dimension_numbers<[1], [0], [0], [1], [0, 0, 1, 1], [], []>} : vector<16x16xbf16>, vector<16x8xbf16>, vector<16x8xf32> -> vector<16x8xf32>
    %20 = arith.addf %11, %19 : vector<16x8xf32>
    %c2_i32 = arith.constant 2 : i32
    %21 = arith.addi %1, %c2_i32 : i32
    %c0_10 = arith.constant 0 : index
    %22 = arith.index_cast %21 : i32 to index
    %c0_11 = arith.constant 0 : index
    %23 = vector.load %arg2[%c0_10, %22, %c0_11] : memref<1x18x16xf32, #tpu.memory_space<vmem>>, vector<1x16x16xf32>
    %24 = vector.shape_cast %23 : vector<1x16x16xf32> to vector<16x16xf32>
    %25 = arith.truncf %24 : vector<16x16xf32> to vector<16x16xbf16>
    %c2 = arith.constant 2 : index
    %c0_12 = arith.constant 0 : index
    %c0_13 = arith.constant 0 : index
    %26 = vector.load %arg3[%c2, %c0_12, %c0_13] : memref<3x16x8xbf16, #tpu.memory_space<vmem>>, vector<1x16x8xbf16>
    %27 = vector.shape_cast %26 : vector<1x16x8xbf16> to vector<16x8xbf16>
    %cst_14 = arith.constant dense<0.000000e+00> : vector<16x8xf32>
    %28 = tpu.matmul %25, %27, %cst_14 {dimension_numbers = #tpu.dot_dimension_numbers<[1], [0], [0], [1], [0, 0, 1, 1], [], []>} : vector<16x16xbf16>, vector<16x8xbf16>, vector<16x8xf32> -> vector<16x8xf32>
    %29 = arith.addf %20, %28 : vector<16x8xf32>
    %c0_15 = arith.constant 0 : index
    %c0_16 = arith.constant 0 : index
    %30 = vector.load %arg4[%c0_15, %c0_16] : memref<1x8xf32, #tpu.memory_space<vmem>>, vector<1x8xf32>
    %31 = vector.broadcast %30 : vector<1x8xf32> to vector<16x8xf32>
    %32 = arith.addf %29, %31 : vector<16x8xf32>
    %33 = vector.extract_strided_slice %32 {offsets = [0, 0], sizes = [16, 4], strides = [1, 1]} : vector<16x8xf32> to vector<16x4xf32>
    %34 = vector.extract_strided_slice %32 {offsets = [0, 4], sizes = [16, 4], strides = [1, 1]} : vector<16x8xf32> to vector<16x4xf32>
    %c0_17 = arith.constant 0 : index
    %c0_18 = arith.constant 0 : index
    %c0_19 = arith.constant 0 : index
    %35 = vector.load %arg5[%c0_17, %c0_18, %c0_19] : memref<1x16x4xf32, #tpu.memory_space<vmem>>, vector<1x16x4xf32>
    %36 = vector.shape_cast %35 : vector<1x16x4xf32> to vector<16x4xf32>
    %37 = math.exp %33 : vector<16x4xf32>
    %38 = arith.mulf %36, %37 : vector<16x4xf32>
    %39 = arith.addf %38, %34 : vector<16x4xf32>
    %c0_20 = arith.constant 0 : index
    %c0_21 = arith.constant 0 : index
    %c0_22 = arith.constant 0 : index
    %40 = vector.load %arg6[%c0_20, %c0_21, %c0_22] : memref<1x16x4xf32, #tpu.memory_space<vmem>>, vector<1x16x4xf32>
    %41 = vector.shape_cast %40 : vector<1x16x4xf32> to vector<16x4xf32>
    %42 = vector.shape_cast %39 : vector<16x4xf32> to vector<1x16x4xf32>
    tpu.vector_store %arg6[%c0_20, %c0_21, %c0_22], %42 {strides = array<i32>} : memref<1x16x4xf32, #tpu.memory_space<vmem>>, vector<1x16x4xf32>,
    %cst_23 = arith.constant dense<0.000000e+00> : vector<16xf32>
    %43 = vector.multi_reduction <add>, %33, %cst_23 [1] : vector<16x4xf32> to vector<16xf32>
    %44 = vector.shape_cast %43 : vector<16xf32> to vector<16x1xf32>
    %cst_24 = arith.constant dense<0.000000e+00> : vector<1xf32>
    %45 = vector.multi_reduction <add>, %44, %cst_24 [0] : vector<16x1xf32> to vector<1xf32>
    %46 = vector.shape_cast %45 : vector<1xf32> to vector<1x1xf32>
    %c0_i32_25 = arith.constant 0 : i32
    %47 = arith.cmpi eq, %arg1, %c0_i32_25 : i32
    %48 = arith.extui %47 : i1 to i32
    %c0_i32_26 = arith.constant 0 : i32
    %49 = arith.cmpi ne, %48, %c0_i32_26 : i32
    scf.if %49 {
      %c0_29 = arith.constant 0 : index
      %c0_30 = arith.constant 0 : index
      %c0_31 = arith.constant 0 : index
      %53 = vector.load %arg7[%c0_29, %c0_30, %c0_31] : memref<1x1x1xf32, #tpu.memory_space<vmem>>, vector<1x1x1xf32>
      %54 = vector.shape_cast %53 : vector<1x1x1xf32> to vector<1x1xf32>
      %55 = vector.shape_cast %46 : vector<1x1xf32> to vector<1x1x1xf32>
      tpu.vector_store %arg7[%c0_29, %c0_30, %c0_31], %55 {strides = array<i32>} : memref<1x1x1xf32, #tpu.memory_space<vmem>>, vector<1x1x1xf32>,
    } else {
    }
    %c0_i32_27 = arith.constant 0 : i32
    %50 = arith.cmpi sgt, %arg1, %c0_i32_27 : i32
    %51 = arith.extui %50 : i1 to i32
    %c0_i32_28 = arith.constant 0 : i32
    %52 = arith.cmpi ne, %51, %c0_i32_28 : i32
    scf.if %52 {
      %c0_29 = arith.constant 0 : index
      %c0_30 = arith.constant 0 : index
      %c0_31 = arith.constant 0 : index
      %53 = vector.load %arg7[%c0_29, %c0_30, %c0_31] : memref<1x1x1xf32, #tpu.memory_space<vmem>>, vector<1x1x1xf32>
      %54 = vector.shape_cast %53 : vector<1x1x1xf32> to vector<1x1xf32>
      %55 = arith.addf %54, %46 : vector<1x1xf32>
      %c0_32 = arith.constant 0 : index
      %c0_33 = arith.constant 0 : index
      %c0_34 = arith.constant 0 : index
      %56 = vector.load %arg7[%c0_32, %c0_33, %c0_34] : memref<1x1x1xf32, #tpu.memory_space<vmem>>, vector<1x1x1xf32>
      %57 = vector.shape_cast %56 : vector<1x1x1xf32> to vector<1x1xf32>
      %58 = vector.shape_cast %55 : vector<1x1xf32> to vector<1x1x1xf32>
      tpu.vector_store %arg7[%c0_32, %c0_33, %c0_34], %58 {strides = array<i32>} : memref<1x1x1xf32, #tpu.memory_space<vmem>>, vector<1x1x1xf32>,
    } else {
    }
    return
  }
  func.func @transform_0(%arg0: i32, %arg1: i32) -> (i32, i32, i32) {
    %c0_i32 = arith.constant 0 : i32
    %c0_i32_0 = arith.constant 0 : i32
    %c0_i32_1 = arith.constant 0 : i32
    return %arg0, %c0_i32, %c0_i32_0 : i32, i32, i32
  }
  func.func @transform_1(%arg0: i32, %arg1: i32) -> (i32, i32, i32) {
    %c0_i32 = arith.constant 0 : i32
    %c0_i32_0 = arith.constant 0 : i32
    %c0_i32_1 = arith.constant 0 : i32
    %c0_i32_2 = arith.constant 0 : i32
    return %c0_i32, %c0_i32_0, %c0_i32_1 : i32, i32, i32
  }
  func.func @transform_2(%arg0: i32, %arg1: i32) -> (i32, i32) {
    %c0_i32 = arith.constant 0 : i32
    %c0_i32_0 = arith.constant 0 : i32
    %c0_i32_1 = arith.constant 0 : i32
    return %c0_i32, %c0_i32_0 : i32, i32
  }
  func.func @transform_3(%arg0: i32, %arg1: i32) -> (i32, i32, i32) {
    %c0_i32 = arith.constant 0 : i32
    %c0_i32_0 = arith.constant 0 : i32
    return %arg0, %arg1, %c0_i32 : i32, i32, i32
  }
  func.func @transform_4(%arg0: i32, %arg1: i32) -> (i32, i32, i32) {
    %c0_i32 = arith.constant 0 : i32
    %c0_i32_0 = arith.constant 0 : i32
    return %arg0, %arg1, %c0_i32 : i32, i32, i32
  }
  func.func @transform_5(%arg0: i32, %arg1: i32) -> (i32, i32, i32) {
    %c0_i32 = arith.constant 0 : i32
    %c0_i32_0 = arith.constant 0 : i32
    %c0_i32_1 = arith.constant 0 : i32
    return %arg0, %c0_i32, %c0_i32_0 : i32, i32, i32
  }
}

module attributes {stable_mosaic.version = 11 : i64} {
  func.func @_upsample_conv_kernel(%arg0: i32, %arg1: i32, %arg2: memref<1x18x32xf32, #tpu.memory_space<vmem>>, %arg3: memref<4x32x16xbf16, #tpu.memory_space<vmem>>, %arg4: memref<1x16xf32, #tpu.memory_space<vmem>>, %arg5: memref<1x16x32xf32, #tpu.memory_space<vmem>>) attributes {dimension_semantics = [#tpu.dimension_semantics<parallel>, #tpu.dimension_semantics<arbitrary>], iteration_bounds = array<i64: 2, 1>, scalar_prefetch = 0 : i64, scratch_operands = 0 : i64, tpu.core_type = #tpu.core_type<tc>, window_params = [{transform_indices = @transform_0, window_bounds = array<i64: 1, 18, 32>}, {pipeline_mode = #tpu.pipeline_mode<synchronous>, transform_indices = @transform_1, window_bounds = array<i64: 4, 32, 16>}, {pipeline_mode = #tpu.pipeline_mode<synchronous>, transform_indices = @transform_2, window_bounds = array<i64: 1, 16>}, {transform_indices = @transform_3, window_bounds = array<i64: 1, 16, 32>}]} {
    %c16_i32 = arith.constant 16 : i32
    %0 = arith.muli %arg1, %c16_i32 : i32
    %1 = tpu.assume_multiple %0, 8 : i32
    %cst = arith.constant 0.000000e+00 : f32
    %2 = vector.broadcast %cst : f32 to vector<16x16xf32>
    %c-1_i32 = arith.constant -1 : i32
    %3 = arith.addi %1, %c-1_i32 : i32
    %c1_i32 = arith.constant 1 : i32
    %4 = arith.addi %3, %c1_i32 : i32
    %c0 = arith.constant 0 : index
    %5 = arith.index_cast %4 : i32 to index
    %c0_0 = arith.constant 0 : index
    %6 = vector.load %arg2[%c0, %5, %c0_0] : memref<1x18x32xf32, #tpu.memory_space<vmem>>, vector<1x16x32xf32>
    %7 = vector.shape_cast %6 : vector<1x16x32xf32> to vector<16x32xf32>
    %cst_1 = arith.constant 0.000000e+00 : f32
    %8 = vector.broadcast %cst_1 : f32 to vector<16x32xf32>
    %9 = arith.cmpf oge, %7, %8 : vector<16x32xf32>
    %cst_2 = arith.constant 1.000000e-01 : f32
    %10 = vector.broadcast %cst_2 : f32 to vector<16x32xf32>
    %11 = arith.mulf %10, %7 : vector<16x32xf32>
    %12 = arith.select %9, %7, %11 : vector<16x32xi1>, vector<16x32xf32>
    %13 = arith.truncf %12 : vector<16x32xf32> to vector<16x32xbf16>
    %c0_3 = arith.constant 0 : index
    %c0_4 = arith.constant 0 : index
    %c0_5 = arith.constant 0 : index
    %14 = vector.load %arg3[%c0_3, %c0_4, %c0_5] : memref<4x32x16xbf16, #tpu.memory_space<vmem>>, vector<1x32x16xbf16>
    %15 = vector.shape_cast %14 : vector<1x32x16xbf16> to vector<32x16xbf16>
    %cst_6 = arith.constant dense<0.000000e+00> : vector<16x16xf32>
    %16 = tpu.matmul %13, %15, %cst_6 {dimension_numbers = #tpu.dot_dimension_numbers<[1], [0], [0], [1], [0, 0, 1, 1], [], []>} : vector<16x32xbf16>, vector<32x16xbf16>, vector<16x16xf32> -> vector<16x16xf32>
    %17 = arith.addf %2, %16 : vector<16x16xf32>
    %c0_i32 = arith.constant 0 : i32
    %18 = arith.addi %1, %c0_i32 : i32
    %c1_i32_7 = arith.constant 1 : i32
    %19 = arith.addi %18, %c1_i32_7 : i32
    %c0_8 = arith.constant 0 : index
    %20 = arith.index_cast %19 : i32 to index
    %c0_9 = arith.constant 0 : index
    %21 = vector.load %arg2[%c0_8, %20, %c0_9] : memref<1x18x32xf32, #tpu.memory_space<vmem>>, vector<1x16x32xf32>
    %22 = vector.shape_cast %21 : vector<1x16x32xf32> to vector<16x32xf32>
    %cst_10 = arith.constant 0.000000e+00 : f32
    %23 = vector.broadcast %cst_10 : f32 to vector<16x32xf32>
    %24 = arith.cmpf oge, %22, %23 : vector<16x32xf32>
    %cst_11 = arith.constant 1.000000e-01 : f32
    %25 = vector.broadcast %cst_11 : f32 to vector<16x32xf32>
    %26 = arith.mulf %25, %22 : vector<16x32xf32>
    %27 = arith.select %24, %22, %26 : vector<16x32xi1>, vector<16x32xf32>
    %28 = arith.truncf %27 : vector<16x32xf32> to vector<16x32xbf16>
    %c1 = arith.constant 1 : index
    %c0_12 = arith.constant 0 : index
    %c0_13 = arith.constant 0 : index
    %29 = vector.load %arg3[%c1, %c0_12, %c0_13] : memref<4x32x16xbf16, #tpu.memory_space<vmem>>, vector<1x32x16xbf16>
    %30 = vector.shape_cast %29 : vector<1x32x16xbf16> to vector<32x16xbf16>
    %cst_14 = arith.constant dense<0.000000e+00> : vector<16x16xf32>
    %31 = tpu.matmul %28, %30, %cst_14 {dimension_numbers = #tpu.dot_dimension_numbers<[1], [0], [0], [1], [0, 0, 1, 1], [], []>} : vector<16x32xbf16>, vector<32x16xbf16>, vector<16x16xf32> -> vector<16x16xf32>
    %32 = arith.addf %17, %31 : vector<16x16xf32>
    %c0_i32_15 = arith.constant 0 : i32
    %33 = arith.addi %1, %c0_i32_15 : i32
    %c1_i32_16 = arith.constant 1 : i32
    %34 = arith.addi %33, %c1_i32_16 : i32
    %c0_17 = arith.constant 0 : index
    %35 = arith.index_cast %34 : i32 to index
    %c0_18 = arith.constant 0 : index
    %36 = vector.load %arg2[%c0_17, %35, %c0_18] : memref<1x18x32xf32, #tpu.memory_space<vmem>>, vector<1x16x32xf32>
    %37 = vector.shape_cast %36 : vector<1x16x32xf32> to vector<16x32xf32>
    %cst_19 = arith.constant 0.000000e+00 : f32
    %38 = vector.broadcast %cst_19 : f32 to vector<16x32xf32>
    %39 = arith.cmpf oge, %37, %38 : vector<16x32xf32>
    %cst_20 = arith.constant 1.000000e-01 : f32
    %40 = vector.broadcast %cst_20 : f32 to vector<16x32xf32>
    %41 = arith.mulf %40, %37 : vector<16x32xf32>
    %42 = arith.select %39, %37, %41 : vector<16x32xi1>, vector<16x32xf32>
    %43 = arith.truncf %42 : vector<16x32xf32> to vector<16x32xbf16>
    %c2 = arith.constant 2 : index
    %c0_21 = arith.constant 0 : index
    %c0_22 = arith.constant 0 : index
    %44 = vector.load %arg3[%c2, %c0_21, %c0_22] : memref<4x32x16xbf16, #tpu.memory_space<vmem>>, vector<1x32x16xbf16>
    %45 = vector.shape_cast %44 : vector<1x32x16xbf16> to vector<32x16xbf16>
    %cst_23 = arith.constant dense<0.000000e+00> : vector<16x16xf32>
    %46 = tpu.matmul %43, %45, %cst_23 {dimension_numbers = #tpu.dot_dimension_numbers<[1], [0], [0], [1], [0, 0, 1, 1], [], []>} : vector<16x32xbf16>, vector<32x16xbf16>, vector<16x16xf32> -> vector<16x16xf32>
    %47 = arith.addf %32, %46 : vector<16x16xf32>
    %c1_i32_24 = arith.constant 1 : i32
    %48 = arith.addi %1, %c1_i32_24 : i32
    %c1_i32_25 = arith.constant 1 : i32
    %49 = arith.addi %48, %c1_i32_25 : i32
    %c0_26 = arith.constant 0 : index
    %50 = arith.index_cast %49 : i32 to index
    %c0_27 = arith.constant 0 : index
    %51 = vector.load %arg2[%c0_26, %50, %c0_27] : memref<1x18x32xf32, #tpu.memory_space<vmem>>, vector<1x16x32xf32>
    %52 = vector.shape_cast %51 : vector<1x16x32xf32> to vector<16x32xf32>
    %cst_28 = arith.constant 0.000000e+00 : f32
    %53 = vector.broadcast %cst_28 : f32 to vector<16x32xf32>
    %54 = arith.cmpf oge, %52, %53 : vector<16x32xf32>
    %cst_29 = arith.constant 1.000000e-01 : f32
    %55 = vector.broadcast %cst_29 : f32 to vector<16x32xf32>
    %56 = arith.mulf %55, %52 : vector<16x32xf32>
    %57 = arith.select %54, %52, %56 : vector<16x32xi1>, vector<16x32xf32>
    %58 = arith.truncf %57 : vector<16x32xf32> to vector<16x32xbf16>
    %c3 = arith.constant 3 : index
    %c0_30 = arith.constant 0 : index
    %c0_31 = arith.constant 0 : index
    %59 = vector.load %arg3[%c3, %c0_30, %c0_31] : memref<4x32x16xbf16, #tpu.memory_space<vmem>>, vector<1x32x16xbf16>
    %60 = vector.shape_cast %59 : vector<1x32x16xbf16> to vector<32x16xbf16>
    %cst_32 = arith.constant dense<0.000000e+00> : vector<16x16xf32>
    %61 = tpu.matmul %58, %60, %cst_32 {dimension_numbers = #tpu.dot_dimension_numbers<[1], [0], [0], [1], [0, 0, 1, 1], [], []>} : vector<16x32xbf16>, vector<32x16xbf16>, vector<16x16xf32> -> vector<16x16xf32>
    %62 = arith.addf %47, %61 : vector<16x16xf32>
    %c0_33 = arith.constant 0 : index
    %c0_34 = arith.constant 0 : index
    %63 = vector.load %arg4[%c0_33, %c0_34] : memref<1x16xf32, #tpu.memory_space<vmem>>, vector<1x16xf32>
    %64 = vector.broadcast %63 : vector<1x16xf32> to vector<16x16xf32>
    %65 = arith.addf %62, %64 : vector<16x16xf32>
    %c0_35 = arith.constant 0 : index
    %c0_36 = arith.constant 0 : index
    %c0_37 = arith.constant 0 : index
    %66 = vector.load %arg5[%c0_35, %c0_36, %c0_37] : memref<1x16x32xf32, #tpu.memory_space<vmem>>, vector<1x16x16xf32>
    %67 = vector.shape_cast %66 : vector<1x16x16xf32> to vector<16x16xf32>
    %68 = vector.shape_cast %65 : vector<16x16xf32> to vector<1x16x16xf32>
    tpu.vector_store %arg5[%c0_35, %c0_36, %c0_37], %68 {strides = array<i32>} : memref<1x16x32xf32, #tpu.memory_space<vmem>>, vector<1x16x16xf32>,
    %cst_38 = arith.constant 0.000000e+00 : f32
    %69 = vector.broadcast %cst_38 : f32 to vector<16x16xf32>
    %c0_i32_39 = arith.constant 0 : i32
    %70 = arith.addi %1, %c0_i32_39 : i32
    %c1_i32_40 = arith.constant 1 : i32
    %71 = arith.addi %70, %c1_i32_40 : i32
    %c0_41 = arith.constant 0 : index
    %72 = arith.index_cast %71 : i32 to index
    %c0_42 = arith.constant 0 : index
    %73 = vector.load %arg2[%c0_41, %72, %c0_42] : memref<1x18x32xf32, #tpu.memory_space<vmem>>, vector<1x16x32xf32>
    %74 = vector.shape_cast %73 : vector<1x16x32xf32> to vector<16x32xf32>
    %cst_43 = arith.constant 0.000000e+00 : f32
    %75 = vector.broadcast %cst_43 : f32 to vector<16x32xf32>
    %76 = arith.cmpf oge, %74, %75 : vector<16x32xf32>
    %cst_44 = arith.constant 1.000000e-01 : f32
    %77 = vector.broadcast %cst_44 : f32 to vector<16x32xf32>
    %78 = arith.mulf %77, %74 : vector<16x32xf32>
    %79 = arith.select %76, %74, %78 : vector<16x32xi1>, vector<16x32xf32>
    %80 = arith.truncf %79 : vector<16x32xf32> to vector<16x32xbf16>
    %c0_45 = arith.constant 0 : index
    %c0_46 = arith.constant 0 : index
    %c0_47 = arith.constant 0 : index
    %81 = vector.load %arg3[%c0_45, %c0_46, %c0_47] : memref<4x32x16xbf16, #tpu.memory_space<vmem>>, vector<1x32x16xbf16>
    %82 = vector.shape_cast %81 : vector<1x32x16xbf16> to vector<32x16xbf16>
    %cst_48 = arith.constant dense<0.000000e+00> : vector<16x16xf32>
    %83 = tpu.matmul %80, %82, %cst_48 {dimension_numbers = #tpu.dot_dimension_numbers<[1], [0], [0], [1], [0, 0, 1, 1], [], []>} : vector<16x32xbf16>, vector<32x16xbf16>, vector<16x16xf32> -> vector<16x16xf32>
    %84 = arith.addf %69, %83 : vector<16x16xf32>
    %c0_i32_49 = arith.constant 0 : i32
    %85 = arith.addi %1, %c0_i32_49 : i32
    %c1_i32_50 = arith.constant 1 : i32
    %86 = arith.addi %85, %c1_i32_50 : i32
    %c0_51 = arith.constant 0 : index
    %87 = arith.index_cast %86 : i32 to index
    %c0_52 = arith.constant 0 : index
    %88 = vector.load %arg2[%c0_51, %87, %c0_52] : memref<1x18x32xf32, #tpu.memory_space<vmem>>, vector<1x16x32xf32>
    %89 = vector.shape_cast %88 : vector<1x16x32xf32> to vector<16x32xf32>
    %cst_53 = arith.constant 0.000000e+00 : f32
    %90 = vector.broadcast %cst_53 : f32 to vector<16x32xf32>
    %91 = arith.cmpf oge, %89, %90 : vector<16x32xf32>
    %cst_54 = arith.constant 1.000000e-01 : f32
    %92 = vector.broadcast %cst_54 : f32 to vector<16x32xf32>
    %93 = arith.mulf %92, %89 : vector<16x32xf32>
    %94 = arith.select %91, %89, %93 : vector<16x32xi1>, vector<16x32xf32>
    %95 = arith.truncf %94 : vector<16x32xf32> to vector<16x32xbf16>
    %c1_55 = arith.constant 1 : index
    %c0_56 = arith.constant 0 : index
    %c0_57 = arith.constant 0 : index
    %96 = vector.load %arg3[%c1_55, %c0_56, %c0_57] : memref<4x32x16xbf16, #tpu.memory_space<vmem>>, vector<1x32x16xbf16>
    %97 = vector.shape_cast %96 : vector<1x32x16xbf16> to vector<32x16xbf16>
    %cst_58 = arith.constant dense<0.000000e+00> : vector<16x16xf32>
    %98 = tpu.matmul %95, %97, %cst_58 {dimension_numbers = #tpu.dot_dimension_numbers<[1], [0], [0], [1], [0, 0, 1, 1], [], []>} : vector<16x32xbf16>, vector<32x16xbf16>, vector<16x16xf32> -> vector<16x16xf32>
    %99 = arith.addf %84, %98 : vector<16x16xf32>
    %c1_i32_59 = arith.constant 1 : i32
    %100 = arith.addi %1, %c1_i32_59 : i32
    %c1_i32_60 = arith.constant 1 : i32
    %101 = arith.addi %100, %c1_i32_60 : i32
    %c0_61 = arith.constant 0 : index
    %102 = arith.index_cast %101 : i32 to index
    %c0_62 = arith.constant 0 : index
    %103 = vector.load %arg2[%c0_61, %102, %c0_62] : memref<1x18x32xf32, #tpu.memory_space<vmem>>, vector<1x16x32xf32>
    %104 = vector.shape_cast %103 : vector<1x16x32xf32> to vector<16x32xf32>
    %cst_63 = arith.constant 0.000000e+00 : f32
    %105 = vector.broadcast %cst_63 : f32 to vector<16x32xf32>
    %106 = arith.cmpf oge, %104, %105 : vector<16x32xf32>
    %cst_64 = arith.constant 1.000000e-01 : f32
    %107 = vector.broadcast %cst_64 : f32 to vector<16x32xf32>
    %108 = arith.mulf %107, %104 : vector<16x32xf32>
    %109 = arith.select %106, %104, %108 : vector<16x32xi1>, vector<16x32xf32>
    %110 = arith.truncf %109 : vector<16x32xf32> to vector<16x32xbf16>
    %c2_65 = arith.constant 2 : index
    %c0_66 = arith.constant 0 : index
    %c0_67 = arith.constant 0 : index
    %111 = vector.load %arg3[%c2_65, %c0_66, %c0_67] : memref<4x32x16xbf16, #tpu.memory_space<vmem>>, vector<1x32x16xbf16>
    %112 = vector.shape_cast %111 : vector<1x32x16xbf16> to vector<32x16xbf16>
    %cst_68 = arith.constant dense<0.000000e+00> : vector<16x16xf32>
    %113 = tpu.matmul %110, %112, %cst_68 {dimension_numbers = #tpu.dot_dimension_numbers<[1], [0], [0], [1], [0, 0, 1, 1], [], []>} : vector<16x32xbf16>, vector<32x16xbf16>, vector<16x16xf32> -> vector<16x16xf32>
    %114 = arith.addf %99, %113 : vector<16x16xf32>
    %c1_i32_69 = arith.constant 1 : i32
    %115 = arith.addi %1, %c1_i32_69 : i32
    %c1_i32_70 = arith.constant 1 : i32
    %116 = arith.addi %115, %c1_i32_70 : i32
    %c0_71 = arith.constant 0 : index
    %117 = arith.index_cast %116 : i32 to index
    %c0_72 = arith.constant 0 : index
    %118 = vector.load %arg2[%c0_71, %117, %c0_72] : memref<1x18x32xf32, #tpu.memory_space<vmem>>, vector<1x16x32xf32>
    %119 = vector.shape_cast %118 : vector<1x16x32xf32> to vector<16x32xf32>
    %cst_73 = arith.constant 0.000000e+00 : f32
    %120 = vector.broadcast %cst_73 : f32 to vector<16x32xf32>
    %121 = arith.cmpf oge, %119, %120 : vector<16x32xf32>
    %cst_74 = arith.constant 1.000000e-01 : f32
    %122 = vector.broadcast %cst_74 : f32 to vector<16x32xf32>
    %123 = arith.mulf %122, %119 : vector<16x32xf32>
    %124 = arith.select %121, %119, %123 : vector<16x32xi1>, vector<16x32xf32>
    %125 = arith.truncf %124 : vector<16x32xf32> to vector<16x32xbf16>
    %c3_75 = arith.constant 3 : index
    %c0_76 = arith.constant 0 : index
    %c0_77 = arith.constant 0 : index
    %126 = vector.load %arg3[%c3_75, %c0_76, %c0_77] : memref<4x32x16xbf16, #tpu.memory_space<vmem>>, vector<1x32x16xbf16>
    %127 = vector.shape_cast %126 : vector<1x32x16xbf16> to vector<32x16xbf16>
    %cst_78 = arith.constant dense<0.000000e+00> : vector<16x16xf32>
    %128 = tpu.matmul %125, %127, %cst_78 {dimension_numbers = #tpu.dot_dimension_numbers<[1], [0], [0], [1], [0, 0, 1, 1], [], []>} : vector<16x32xbf16>, vector<32x16xbf16>, vector<16x16xf32> -> vector<16x16xf32>
    %129 = arith.addf %114, %128 : vector<16x16xf32>
    %c0_79 = arith.constant 0 : index
    %c0_80 = arith.constant 0 : index
    %130 = vector.load %arg4[%c0_79, %c0_80] : memref<1x16xf32, #tpu.memory_space<vmem>>, vector<1x16xf32>
    %131 = vector.broadcast %130 : vector<1x16xf32> to vector<16x16xf32>
    %132 = arith.addf %129, %131 : vector<16x16xf32>
    %c0_81 = arith.constant 0 : index
    %c0_82 = arith.constant 0 : index
    %c16 = arith.constant 16 : index
    %133 = vector.load %arg5[%c0_81, %c0_82, %c16] : memref<1x16x32xf32, #tpu.memory_space<vmem>>, vector<1x16x16xf32>
    %134 = vector.shape_cast %133 : vector<1x16x16xf32> to vector<16x16xf32>
    %135 = vector.shape_cast %132 : vector<16x16xf32> to vector<1x16x16xf32>
    tpu.vector_store %arg5[%c0_81, %c0_82, %c16], %135 {strides = array<i32>} : memref<1x16x32xf32, #tpu.memory_space<vmem>>, vector<1x16x16xf32>,
    return
  }
  func.func @transform_0(%arg0: i32, %arg1: i32) -> (i32, i32, i32) {
    %c0_i32 = arith.constant 0 : i32
    %c0_i32_0 = arith.constant 0 : i32
    %c0_i32_1 = arith.constant 0 : i32
    return %arg0, %c0_i32, %c0_i32_0 : i32, i32, i32
  }
  func.func @transform_1(%arg0: i32, %arg1: i32) -> (i32, i32, i32) {
    %c0_i32 = arith.constant 0 : i32
    %c0_i32_0 = arith.constant 0 : i32
    %c0_i32_1 = arith.constant 0 : i32
    %c0_i32_2 = arith.constant 0 : i32
    return %c0_i32, %c0_i32_0, %c0_i32_1 : i32, i32, i32
  }
  func.func @transform_2(%arg0: i32, %arg1: i32) -> (i32, i32) {
    %c0_i32 = arith.constant 0 : i32
    %c0_i32_0 = arith.constant 0 : i32
    %c0_i32_1 = arith.constant 0 : i32
    return %c0_i32, %c0_i32_0 : i32, i32
  }
  func.func @transform_3(%arg0: i32, %arg1: i32) -> (i32, i32, i32) {
    %c0_i32 = arith.constant 0 : i32
    %c0_i32_0 = arith.constant 0 : i32
    return %arg0, %arg1, %c0_i32 : i32, i32, i32
  }
}

module attributes {stable_mosaic.version = 11 : i64} {
  func.func @_conv_kernel(%arg0: i32, %arg1: i32, %arg2: memref<1x34x16xf32, #tpu.memory_space<vmem>>, %arg3: memref<3x16x16xbf16, #tpu.memory_space<vmem>>, %arg4: memref<1x16xf32, #tpu.memory_space<vmem>>, %arg5: memref<1x32x16xf32, #tpu.memory_space<vmem>>, %arg6: memref<1x32x16xf32, #tpu.memory_space<vmem>>) attributes {dimension_semantics = [#tpu.dimension_semantics<parallel>, #tpu.dimension_semantics<arbitrary>], iteration_bounds = array<i64: 2, 1>, scalar_prefetch = 0 : i64, scratch_operands = 0 : i64, tpu.core_type = #tpu.core_type<tc>, window_params = [{transform_indices = @transform_0, window_bounds = array<i64: 1, 34, 16>}, {pipeline_mode = #tpu.pipeline_mode<synchronous>, transform_indices = @transform_1, window_bounds = array<i64: 3, 16, 16>}, {pipeline_mode = #tpu.pipeline_mode<synchronous>, transform_indices = @transform_2, window_bounds = array<i64: 1, 16>}, {transform_indices = @transform_3, window_bounds = array<i64: 1, 32, 16>}, {transform_indices = @transform_4, window_bounds = array<i64: 1, 32, 16>}]} {
    %c32_i32 = arith.constant 32 : i32
    %0 = arith.muli %arg1, %c32_i32 : i32
    %1 = tpu.assume_multiple %0, 8 : i32
    %cst = arith.constant 0.000000e+00 : f32
    %2 = vector.broadcast %cst : f32 to vector<32x16xf32>
    %c0_i32 = arith.constant 0 : i32
    %3 = arith.addi %1, %c0_i32 : i32
    %c0 = arith.constant 0 : index
    %4 = arith.index_cast %3 : i32 to index
    %c0_0 = arith.constant 0 : index
    %5 = vector.load %arg2[%c0, %4, %c0_0] : memref<1x34x16xf32, #tpu.memory_space<vmem>>, vector<1x32x16xf32>
    %6 = vector.shape_cast %5 : vector<1x32x16xf32> to vector<32x16xf32>
    %cst_1 = arith.constant 0.000000e+00 : f32
    %7 = vector.broadcast %cst_1 : f32 to vector<32x16xf32>
    %8 = arith.cmpf oge, %6, %7 : vector<32x16xf32>
    %cst_2 = arith.constant 1.000000e-01 : f32
    %9 = vector.broadcast %cst_2 : f32 to vector<32x16xf32>
    %10 = arith.mulf %9, %6 : vector<32x16xf32>
    %11 = arith.select %8, %6, %10 : vector<32x16xi1>, vector<32x16xf32>
    %12 = arith.truncf %11 : vector<32x16xf32> to vector<32x16xbf16>
    %c0_3 = arith.constant 0 : index
    %c0_4 = arith.constant 0 : index
    %c0_5 = arith.constant 0 : index
    %13 = vector.load %arg3[%c0_3, %c0_4, %c0_5] : memref<3x16x16xbf16, #tpu.memory_space<vmem>>, vector<1x16x16xbf16>
    %14 = vector.shape_cast %13 : vector<1x16x16xbf16> to vector<16x16xbf16>
    %cst_6 = arith.constant dense<0.000000e+00> : vector<32x16xf32>
    %15 = tpu.matmul %12, %14, %cst_6 {dimension_numbers = #tpu.dot_dimension_numbers<[1], [0], [0], [1], [0, 0, 1, 1], [], []>} : vector<32x16xbf16>, vector<16x16xbf16>, vector<32x16xf32> -> vector<32x16xf32>
    %16 = arith.addf %2, %15 : vector<32x16xf32>
    %c1_i32 = arith.constant 1 : i32
    %17 = arith.addi %1, %c1_i32 : i32
    %c0_7 = arith.constant 0 : index
    %18 = arith.index_cast %17 : i32 to index
    %c0_8 = arith.constant 0 : index
    %19 = vector.load %arg2[%c0_7, %18, %c0_8] : memref<1x34x16xf32, #tpu.memory_space<vmem>>, vector<1x32x16xf32>
    %20 = vector.shape_cast %19 : vector<1x32x16xf32> to vector<32x16xf32>
    %cst_9 = arith.constant 0.000000e+00 : f32
    %21 = vector.broadcast %cst_9 : f32 to vector<32x16xf32>
    %22 = arith.cmpf oge, %20, %21 : vector<32x16xf32>
    %cst_10 = arith.constant 1.000000e-01 : f32
    %23 = vector.broadcast %cst_10 : f32 to vector<32x16xf32>
    %24 = arith.mulf %23, %20 : vector<32x16xf32>
    %25 = arith.select %22, %20, %24 : vector<32x16xi1>, vector<32x16xf32>
    %26 = arith.truncf %25 : vector<32x16xf32> to vector<32x16xbf16>
    %c1 = arith.constant 1 : index
    %c0_11 = arith.constant 0 : index
    %c0_12 = arith.constant 0 : index
    %27 = vector.load %arg3[%c1, %c0_11, %c0_12] : memref<3x16x16xbf16, #tpu.memory_space<vmem>>, vector<1x16x16xbf16>
    %28 = vector.shape_cast %27 : vector<1x16x16xbf16> to vector<16x16xbf16>
    %cst_13 = arith.constant dense<0.000000e+00> : vector<32x16xf32>
    %29 = tpu.matmul %26, %28, %cst_13 {dimension_numbers = #tpu.dot_dimension_numbers<[1], [0], [0], [1], [0, 0, 1, 1], [], []>} : vector<32x16xbf16>, vector<16x16xbf16>, vector<32x16xf32> -> vector<32x16xf32>
    %30 = arith.addf %16, %29 : vector<32x16xf32>
    %c2_i32 = arith.constant 2 : i32
    %31 = arith.addi %1, %c2_i32 : i32
    %c0_14 = arith.constant 0 : index
    %32 = arith.index_cast %31 : i32 to index
    %c0_15 = arith.constant 0 : index
    %33 = vector.load %arg2[%c0_14, %32, %c0_15] : memref<1x34x16xf32, #tpu.memory_space<vmem>>, vector<1x32x16xf32>
    %34 = vector.shape_cast %33 : vector<1x32x16xf32> to vector<32x16xf32>
    %cst_16 = arith.constant 0.000000e+00 : f32
    %35 = vector.broadcast %cst_16 : f32 to vector<32x16xf32>
    %36 = arith.cmpf oge, %34, %35 : vector<32x16xf32>
    %cst_17 = arith.constant 1.000000e-01 : f32
    %37 = vector.broadcast %cst_17 : f32 to vector<32x16xf32>
    %38 = arith.mulf %37, %34 : vector<32x16xf32>
    %39 = arith.select %36, %34, %38 : vector<32x16xi1>, vector<32x16xf32>
    %40 = arith.truncf %39 : vector<32x16xf32> to vector<32x16xbf16>
    %c2 = arith.constant 2 : index
    %c0_18 = arith.constant 0 : index
    %c0_19 = arith.constant 0 : index
    %41 = vector.load %arg3[%c2, %c0_18, %c0_19] : memref<3x16x16xbf16, #tpu.memory_space<vmem>>, vector<1x16x16xbf16>
    %42 = vector.shape_cast %41 : vector<1x16x16xbf16> to vector<16x16xbf16>
    %cst_20 = arith.constant dense<0.000000e+00> : vector<32x16xf32>
    %43 = tpu.matmul %40, %42, %cst_20 {dimension_numbers = #tpu.dot_dimension_numbers<[1], [0], [0], [1], [0, 0, 1, 1], [], []>} : vector<32x16xbf16>, vector<16x16xbf16>, vector<32x16xf32> -> vector<32x16xf32>
    %44 = arith.addf %30, %43 : vector<32x16xf32>
    %c0_21 = arith.constant 0 : index
    %c0_22 = arith.constant 0 : index
    %45 = vector.load %arg4[%c0_21, %c0_22] : memref<1x16xf32, #tpu.memory_space<vmem>>, vector<1x16xf32>
    %46 = vector.broadcast %45 : vector<1x16xf32> to vector<32x16xf32>
    %47 = arith.addf %44, %46 : vector<32x16xf32>
    %c0_23 = arith.constant 0 : index
    %c0_24 = arith.constant 0 : index
    %c0_25 = arith.constant 0 : index
    %48 = vector.load %arg5[%c0_23, %c0_24, %c0_25] : memref<1x32x16xf32, #tpu.memory_space<vmem>>, vector<1x32x16xf32>
    %49 = vector.shape_cast %48 : vector<1x32x16xf32> to vector<32x16xf32>
    %50 = arith.addf %47, %49 : vector<32x16xf32>
    %c0_26 = arith.constant 0 : index
    %c0_27 = arith.constant 0 : index
    %c0_28 = arith.constant 0 : index
    %51 = vector.load %arg6[%c0_26, %c0_27, %c0_28] : memref<1x32x16xf32, #tpu.memory_space<vmem>>, vector<1x32x16xf32>
    %52 = vector.shape_cast %51 : vector<1x32x16xf32> to vector<32x16xf32>
    %53 = vector.shape_cast %50 : vector<32x16xf32> to vector<1x32x16xf32>
    tpu.vector_store %arg6[%c0_26, %c0_27, %c0_28], %53 {strides = array<i32>} : memref<1x32x16xf32, #tpu.memory_space<vmem>>, vector<1x32x16xf32>,
    return
  }
  func.func @transform_0(%arg0: i32, %arg1: i32) -> (i32, i32, i32) {
    %c0_i32 = arith.constant 0 : i32
    %c0_i32_0 = arith.constant 0 : i32
    %c0_i32_1 = arith.constant 0 : i32
    return %arg0, %c0_i32, %c0_i32_0 : i32, i32, i32
  }
  func.func @transform_1(%arg0: i32, %arg1: i32) -> (i32, i32, i32) {
    %c0_i32 = arith.constant 0 : i32
    %c0_i32_0 = arith.constant 0 : i32
    %c0_i32_1 = arith.constant 0 : i32
    %c0_i32_2 = arith.constant 0 : i32
    return %c0_i32, %c0_i32_0, %c0_i32_1 : i32, i32, i32
  }
  func.func @transform_2(%arg0: i32, %arg1: i32) -> (i32, i32) {
    %c0_i32 = arith.constant 0 : i32
    %c0_i32_0 = arith.constant 0 : i32
    %c0_i32_1 = arith.constant 0 : i32
    return %c0_i32, %c0_i32_0 : i32, i32
  }
  func.func @transform_3(%arg0: i32, %arg1: i32) -> (i32, i32, i32) {
    %c0_i32 = arith.constant 0 : i32
    %c0_i32_0 = arith.constant 0 : i32
    return %arg0, %arg1, %c0_i32 : i32, i32, i32
  }
  func.func @transform_4(%arg0: i32, %arg1: i32) -> (i32, i32, i32) {
    %c0_i32 = arith.constant 0 : i32
    %c0_i32_0 = arith.constant 0 : i32
    return %arg0, %arg1, %c0_i32 : i32, i32, i32
  }
}

module attributes {stable_mosaic.version = 11 : i64} {
  func.func @_conv_kernel(%arg0: i32, %arg1: i32, %arg2: memref<1x36x16xf32, #tpu.memory_space<vmem>>, %arg3: memref<3x16x16xbf16, #tpu.memory_space<vmem>>, %arg4: memref<1x16xf32, #tpu.memory_space<vmem>>, %arg5: memref<1x32x16xf32, #tpu.memory_space<vmem>>, %arg6: memref<1x32x16xf32, #tpu.memory_space<vmem>>) attributes {dimension_semantics = [#tpu.dimension_semantics<parallel>, #tpu.dimension_semantics<arbitrary>], iteration_bounds = array<i64: 2, 1>, scalar_prefetch = 0 : i64, scratch_operands = 0 : i64, tpu.core_type = #tpu.core_type<tc>, window_params = [{transform_indices = @transform_0, window_bounds = array<i64: 1, 36, 16>}, {pipeline_mode = #tpu.pipeline_mode<synchronous>, transform_indices = @transform_1, window_bounds = array<i64: 3, 16, 16>}, {pipeline_mode = #tpu.pipeline_mode<synchronous>, transform_indices = @transform_2, window_bounds = array<i64: 1, 16>}, {transform_indices = @transform_3, window_bounds = array<i64: 1, 32, 16>}, {transform_indices = @transform_4, window_bounds = array<i64: 1, 32, 16>}]} {
    %c32_i32 = arith.constant 32 : i32
    %0 = arith.muli %arg1, %c32_i32 : i32
    %1 = tpu.assume_multiple %0, 8 : i32
    %cst = arith.constant 0.000000e+00 : f32
    %2 = vector.broadcast %cst : f32 to vector<32x16xf32>
    %c0_i32 = arith.constant 0 : i32
    %3 = arith.addi %1, %c0_i32 : i32
    %c0 = arith.constant 0 : index
    %4 = arith.index_cast %3 : i32 to index
    %c0_0 = arith.constant 0 : index
    %5 = vector.load %arg2[%c0, %4, %c0_0] : memref<1x36x16xf32, #tpu.memory_space<vmem>>, vector<1x32x16xf32>
    %6 = vector.shape_cast %5 : vector<1x32x16xf32> to vector<32x16xf32>
    %cst_1 = arith.constant 0.000000e+00 : f32
    %7 = vector.broadcast %cst_1 : f32 to vector<32x16xf32>
    %8 = arith.cmpf oge, %6, %7 : vector<32x16xf32>
    %cst_2 = arith.constant 1.000000e-01 : f32
    %9 = vector.broadcast %cst_2 : f32 to vector<32x16xf32>
    %10 = arith.mulf %9, %6 : vector<32x16xf32>
    %11 = arith.select %8, %6, %10 : vector<32x16xi1>, vector<32x16xf32>
    %12 = arith.truncf %11 : vector<32x16xf32> to vector<32x16xbf16>
    %c0_3 = arith.constant 0 : index
    %c0_4 = arith.constant 0 : index
    %c0_5 = arith.constant 0 : index
    %13 = vector.load %arg3[%c0_3, %c0_4, %c0_5] : memref<3x16x16xbf16, #tpu.memory_space<vmem>>, vector<1x16x16xbf16>
    %14 = vector.shape_cast %13 : vector<1x16x16xbf16> to vector<16x16xbf16>
    %cst_6 = arith.constant dense<0.000000e+00> : vector<32x16xf32>
    %15 = tpu.matmul %12, %14, %cst_6 {dimension_numbers = #tpu.dot_dimension_numbers<[1], [0], [0], [1], [0, 0, 1, 1], [], []>} : vector<32x16xbf16>, vector<16x16xbf16>, vector<32x16xf32> -> vector<32x16xf32>
    %16 = arith.addf %2, %15 : vector<32x16xf32>
    %c2_i32 = arith.constant 2 : i32
    %17 = arith.addi %1, %c2_i32 : i32
    %c0_7 = arith.constant 0 : index
    %18 = arith.index_cast %17 : i32 to index
    %c0_8 = arith.constant 0 : index
    %19 = vector.load %arg2[%c0_7, %18, %c0_8] : memref<1x36x16xf32, #tpu.memory_space<vmem>>, vector<1x32x16xf32>
    %20 = vector.shape_cast %19 : vector<1x32x16xf32> to vector<32x16xf32>
    %cst_9 = arith.constant 0.000000e+00 : f32
    %21 = vector.broadcast %cst_9 : f32 to vector<32x16xf32>
    %22 = arith.cmpf oge, %20, %21 : vector<32x16xf32>
    %cst_10 = arith.constant 1.000000e-01 : f32
    %23 = vector.broadcast %cst_10 : f32 to vector<32x16xf32>
    %24 = arith.mulf %23, %20 : vector<32x16xf32>
    %25 = arith.select %22, %20, %24 : vector<32x16xi1>, vector<32x16xf32>
    %26 = arith.truncf %25 : vector<32x16xf32> to vector<32x16xbf16>
    %c1 = arith.constant 1 : index
    %c0_11 = arith.constant 0 : index
    %c0_12 = arith.constant 0 : index
    %27 = vector.load %arg3[%c1, %c0_11, %c0_12] : memref<3x16x16xbf16, #tpu.memory_space<vmem>>, vector<1x16x16xbf16>
    %28 = vector.shape_cast %27 : vector<1x16x16xbf16> to vector<16x16xbf16>
    %cst_13 = arith.constant dense<0.000000e+00> : vector<32x16xf32>
    %29 = tpu.matmul %26, %28, %cst_13 {dimension_numbers = #tpu.dot_dimension_numbers<[1], [0], [0], [1], [0, 0, 1, 1], [], []>} : vector<32x16xbf16>, vector<16x16xbf16>, vector<32x16xf32> -> vector<32x16xf32>
    %30 = arith.addf %16, %29 : vector<32x16xf32>
    %c4_i32 = arith.constant 4 : i32
    %31 = arith.addi %1, %c4_i32 : i32
    %c0_14 = arith.constant 0 : index
    %32 = arith.index_cast %31 : i32 to index
    %c0_15 = arith.constant 0 : index
    %33 = vector.load %arg2[%c0_14, %32, %c0_15] : memref<1x36x16xf32, #tpu.memory_space<vmem>>, vector<1x32x16xf32>
    %34 = vector.shape_cast %33 : vector<1x32x16xf32> to vector<32x16xf32>
    %cst_16 = arith.constant 0.000000e+00 : f32
    %35 = vector.broadcast %cst_16 : f32 to vector<32x16xf32>
    %36 = arith.cmpf oge, %34, %35 : vector<32x16xf32>
    %cst_17 = arith.constant 1.000000e-01 : f32
    %37 = vector.broadcast %cst_17 : f32 to vector<32x16xf32>
    %38 = arith.mulf %37, %34 : vector<32x16xf32>
    %39 = arith.select %36, %34, %38 : vector<32x16xi1>, vector<32x16xf32>
    %40 = arith.truncf %39 : vector<32x16xf32> to vector<32x16xbf16>
    %c2 = arith.constant 2 : index
    %c0_18 = arith.constant 0 : index
    %c0_19 = arith.constant 0 : index
    %41 = vector.load %arg3[%c2, %c0_18, %c0_19] : memref<3x16x16xbf16, #tpu.memory_space<vmem>>, vector<1x16x16xbf16>
    %42 = vector.shape_cast %41 : vector<1x16x16xbf16> to vector<16x16xbf16>
    %cst_20 = arith.constant dense<0.000000e+00> : vector<32x16xf32>
    %43 = tpu.matmul %40, %42, %cst_20 {dimension_numbers = #tpu.dot_dimension_numbers<[1], [0], [0], [1], [0, 0, 1, 1], [], []>} : vector<32x16xbf16>, vector<16x16xbf16>, vector<32x16xf32> -> vector<32x16xf32>
    %44 = arith.addf %30, %43 : vector<32x16xf32>
    %c0_21 = arith.constant 0 : index
    %c0_22 = arith.constant 0 : index
    %45 = vector.load %arg4[%c0_21, %c0_22] : memref<1x16xf32, #tpu.memory_space<vmem>>, vector<1x16xf32>
    %46 = vector.broadcast %45 : vector<1x16xf32> to vector<32x16xf32>
    %47 = arith.addf %44, %46 : vector<32x16xf32>
    %c0_23 = arith.constant 0 : index
    %c0_24 = arith.constant 0 : index
    %c0_25 = arith.constant 0 : index
    %48 = vector.load %arg5[%c0_23, %c0_24, %c0_25] : memref<1x32x16xf32, #tpu.memory_space<vmem>>, vector<1x32x16xf32>
    %49 = vector.shape_cast %48 : vector<1x32x16xf32> to vector<32x16xf32>
    %50 = arith.addf %47, %49 : vector<32x16xf32>
    %c0_26 = arith.constant 0 : index
    %c0_27 = arith.constant 0 : index
    %c0_28 = arith.constant 0 : index
    %51 = vector.load %arg6[%c0_26, %c0_27, %c0_28] : memref<1x32x16xf32, #tpu.memory_space<vmem>>, vector<1x32x16xf32>
    %52 = vector.shape_cast %51 : vector<1x32x16xf32> to vector<32x16xf32>
    %53 = vector.shape_cast %50 : vector<32x16xf32> to vector<1x32x16xf32>
    tpu.vector_store %arg6[%c0_26, %c0_27, %c0_28], %53 {strides = array<i32>} : memref<1x32x16xf32, #tpu.memory_space<vmem>>, vector<1x32x16xf32>,
    return
  }
  func.func @transform_0(%arg0: i32, %arg1: i32) -> (i32, i32, i32) {
    %c0_i32 = arith.constant 0 : i32
    %c0_i32_0 = arith.constant 0 : i32
    %c0_i32_1 = arith.constant 0 : i32
    return %arg0, %c0_i32, %c0_i32_0 : i32, i32, i32
  }
  func.func @transform_1(%arg0: i32, %arg1: i32) -> (i32, i32, i32) {
    %c0_i32 = arith.constant 0 : i32
    %c0_i32_0 = arith.constant 0 : i32
    %c0_i32_1 = arith.constant 0 : i32
    %c0_i32_2 = arith.constant 0 : i32
    return %c0_i32, %c0_i32_0, %c0_i32_1 : i32, i32, i32
  }
  func.func @transform_2(%arg0: i32, %arg1: i32) -> (i32, i32) {
    %c0_i32 = arith.constant 0 : i32
    %c0_i32_0 = arith.constant 0 : i32
    %c0_i32_1 = arith.constant 0 : i32
    return %c0_i32, %c0_i32_0 : i32, i32
  }
  func.func @transform_3(%arg0: i32, %arg1: i32) -> (i32, i32, i32) {
    %c0_i32 = arith.constant 0 : i32
    %c0_i32_0 = arith.constant 0 : i32
    return %arg0, %arg1, %c0_i32 : i32, i32, i32
  }
  func.func @transform_4(%arg0: i32, %arg1: i32) -> (i32, i32, i32) {
    %c0_i32 = arith.constant 0 : i32
    %c0_i32_0 = arith.constant 0 : i32
    return %arg0, %arg1, %c0_i32 : i32, i32, i32
  }
}

module attributes {stable_mosaic.version = 11 : i64} {
  func.func @_upsample_conv_kernel(%arg0: i32, %arg1: i32, %arg2: memref<1x34x16xf32, #tpu.memory_space<vmem>>, %arg3: memref<4x16x8xbf16, #tpu.memory_space<vmem>>, %arg4: memref<1x8xf32, #tpu.memory_space<vmem>>, %arg5: memref<1x32x16xf32, #tpu.memory_space<vmem>>) attributes {dimension_semantics = [#tpu.dimension_semantics<parallel>, #tpu.dimension_semantics<arbitrary>], iteration_bounds = array<i64: 2, 1>, scalar_prefetch = 0 : i64, scratch_operands = 0 : i64, tpu.core_type = #tpu.core_type<tc>, window_params = [{transform_indices = @transform_0, window_bounds = array<i64: 1, 34, 16>}, {pipeline_mode = #tpu.pipeline_mode<synchronous>, transform_indices = @transform_1, window_bounds = array<i64: 4, 16, 8>}, {pipeline_mode = #tpu.pipeline_mode<synchronous>, transform_indices = @transform_2, window_bounds = array<i64: 1, 8>}, {transform_indices = @transform_3, window_bounds = array<i64: 1, 32, 16>}]} {
    %c32_i32 = arith.constant 32 : i32
    %0 = arith.muli %arg1, %c32_i32 : i32
    %1 = tpu.assume_multiple %0, 8 : i32
    %cst = arith.constant 0.000000e+00 : f32
    %2 = vector.broadcast %cst : f32 to vector<32x8xf32>
    %c-1_i32 = arith.constant -1 : i32
    %3 = arith.addi %1, %c-1_i32 : i32
    %c1_i32 = arith.constant 1 : i32
    %4 = arith.addi %3, %c1_i32 : i32
    %c0 = arith.constant 0 : index
    %5 = arith.index_cast %4 : i32 to index
    %c0_0 = arith.constant 0 : index
    %6 = vector.load %arg2[%c0, %5, %c0_0] : memref<1x34x16xf32, #tpu.memory_space<vmem>>, vector<1x32x16xf32>
    %7 = vector.shape_cast %6 : vector<1x32x16xf32> to vector<32x16xf32>
    %cst_1 = arith.constant 0.000000e+00 : f32
    %8 = vector.broadcast %cst_1 : f32 to vector<32x16xf32>
    %9 = arith.cmpf oge, %7, %8 : vector<32x16xf32>
    %cst_2 = arith.constant 1.000000e-01 : f32
    %10 = vector.broadcast %cst_2 : f32 to vector<32x16xf32>
    %11 = arith.mulf %10, %7 : vector<32x16xf32>
    %12 = arith.select %9, %7, %11 : vector<32x16xi1>, vector<32x16xf32>
    %13 = arith.truncf %12 : vector<32x16xf32> to vector<32x16xbf16>
    %c0_3 = arith.constant 0 : index
    %c0_4 = arith.constant 0 : index
    %c0_5 = arith.constant 0 : index
    %14 = vector.load %arg3[%c0_3, %c0_4, %c0_5] : memref<4x16x8xbf16, #tpu.memory_space<vmem>>, vector<1x16x8xbf16>
    %15 = vector.shape_cast %14 : vector<1x16x8xbf16> to vector<16x8xbf16>
    %cst_6 = arith.constant dense<0.000000e+00> : vector<32x8xf32>
    %16 = tpu.matmul %13, %15, %cst_6 {dimension_numbers = #tpu.dot_dimension_numbers<[1], [0], [0], [1], [0, 0, 1, 1], [], []>} : vector<32x16xbf16>, vector<16x8xbf16>, vector<32x8xf32> -> vector<32x8xf32>
    %17 = arith.addf %2, %16 : vector<32x8xf32>
    %c0_i32 = arith.constant 0 : i32
    %18 = arith.addi %1, %c0_i32 : i32
    %c1_i32_7 = arith.constant 1 : i32
    %19 = arith.addi %18, %c1_i32_7 : i32
    %c0_8 = arith.constant 0 : index
    %20 = arith.index_cast %19 : i32 to index
    %c0_9 = arith.constant 0 : index
    %21 = vector.load %arg2[%c0_8, %20, %c0_9] : memref<1x34x16xf32, #tpu.memory_space<vmem>>, vector<1x32x16xf32>
    %22 = vector.shape_cast %21 : vector<1x32x16xf32> to vector<32x16xf32>
    %cst_10 = arith.constant 0.000000e+00 : f32
    %23 = vector.broadcast %cst_10 : f32 to vector<32x16xf32>
    %24 = arith.cmpf oge, %22, %23 : vector<32x16xf32>
    %cst_11 = arith.constant 1.000000e-01 : f32
    %25 = vector.broadcast %cst_11 : f32 to vector<32x16xf32>
    %26 = arith.mulf %25, %22 : vector<32x16xf32>
    %27 = arith.select %24, %22, %26 : vector<32x16xi1>, vector<32x16xf32>
    %28 = arith.truncf %27 : vector<32x16xf32> to vector<32x16xbf16>
    %c1 = arith.constant 1 : index
    %c0_12 = arith.constant 0 : index
    %c0_13 = arith.constant 0 : index
    %29 = vector.load %arg3[%c1, %c0_12, %c0_13] : memref<4x16x8xbf16, #tpu.memory_space<vmem>>, vector<1x16x8xbf16>
    %30 = vector.shape_cast %29 : vector<1x16x8xbf16> to vector<16x8xbf16>
    %cst_14 = arith.constant dense<0.000000e+00> : vector<32x8xf32>
    %31 = tpu.matmul %28, %30, %cst_14 {dimension_numbers = #tpu.dot_dimension_numbers<[1], [0], [0], [1], [0, 0, 1, 1], [], []>} : vector<32x16xbf16>, vector<16x8xbf16>, vector<32x8xf32> -> vector<32x8xf32>
    %32 = arith.addf %17, %31 : vector<32x8xf32>
    %c0_i32_15 = arith.constant 0 : i32
    %33 = arith.addi %1, %c0_i32_15 : i32
    %c1_i32_16 = arith.constant 1 : i32
    %34 = arith.addi %33, %c1_i32_16 : i32
    %c0_17 = arith.constant 0 : index
    %35 = arith.index_cast %34 : i32 to index
    %c0_18 = arith.constant 0 : index
    %36 = vector.load %arg2[%c0_17, %35, %c0_18] : memref<1x34x16xf32, #tpu.memory_space<vmem>>, vector<1x32x16xf32>
    %37 = vector.shape_cast %36 : vector<1x32x16xf32> to vector<32x16xf32>
    %cst_19 = arith.constant 0.000000e+00 : f32
    %38 = vector.broadcast %cst_19 : f32 to vector<32x16xf32>
    %39 = arith.cmpf oge, %37, %38 : vector<32x16xf32>
    %cst_20 = arith.constant 1.000000e-01 : f32
    %40 = vector.broadcast %cst_20 : f32 to vector<32x16xf32>
    %41 = arith.mulf %40, %37 : vector<32x16xf32>
    %42 = arith.select %39, %37, %41 : vector<32x16xi1>, vector<32x16xf32>
    %43 = arith.truncf %42 : vector<32x16xf32> to vector<32x16xbf16>
    %c2 = arith.constant 2 : index
    %c0_21 = arith.constant 0 : index
    %c0_22 = arith.constant 0 : index
    %44 = vector.load %arg3[%c2, %c0_21, %c0_22] : memref<4x16x8xbf16, #tpu.memory_space<vmem>>, vector<1x16x8xbf16>
    %45 = vector.shape_cast %44 : vector<1x16x8xbf16> to vector<16x8xbf16>
    %cst_23 = arith.constant dense<0.000000e+00> : vector<32x8xf32>
    %46 = tpu.matmul %43, %45, %cst_23 {dimension_numbers = #tpu.dot_dimension_numbers<[1], [0], [0], [1], [0, 0, 1, 1], [], []>} : vector<32x16xbf16>, vector<16x8xbf16>, vector<32x8xf32> -> vector<32x8xf32>
    %47 = arith.addf %32, %46 : vector<32x8xf32>
    %c1_i32_24 = arith.constant 1 : i32
    %48 = arith.addi %1, %c1_i32_24 : i32
    %c1_i32_25 = arith.constant 1 : i32
    %49 = arith.addi %48, %c1_i32_25 : i32
    %c0_26 = arith.constant 0 : index
    %50 = arith.index_cast %49 : i32 to index
    %c0_27 = arith.constant 0 : index
    %51 = vector.load %arg2[%c0_26, %50, %c0_27] : memref<1x34x16xf32, #tpu.memory_space<vmem>>, vector<1x32x16xf32>
    %52 = vector.shape_cast %51 : vector<1x32x16xf32> to vector<32x16xf32>
    %cst_28 = arith.constant 0.000000e+00 : f32
    %53 = vector.broadcast %cst_28 : f32 to vector<32x16xf32>
    %54 = arith.cmpf oge, %52, %53 : vector<32x16xf32>
    %cst_29 = arith.constant 1.000000e-01 : f32
    %55 = vector.broadcast %cst_29 : f32 to vector<32x16xf32>
    %56 = arith.mulf %55, %52 : vector<32x16xf32>
    %57 = arith.select %54, %52, %56 : vector<32x16xi1>, vector<32x16xf32>
    %58 = arith.truncf %57 : vector<32x16xf32> to vector<32x16xbf16>
    %c3 = arith.constant 3 : index
    %c0_30 = arith.constant 0 : index
    %c0_31 = arith.constant 0 : index
    %59 = vector.load %arg3[%c3, %c0_30, %c0_31] : memref<4x16x8xbf16, #tpu.memory_space<vmem>>, vector<1x16x8xbf16>
    %60 = vector.shape_cast %59 : vector<1x16x8xbf16> to vector<16x8xbf16>
    %cst_32 = arith.constant dense<0.000000e+00> : vector<32x8xf32>
    %61 = tpu.matmul %58, %60, %cst_32 {dimension_numbers = #tpu.dot_dimension_numbers<[1], [0], [0], [1], [0, 0, 1, 1], [], []>} : vector<32x16xbf16>, vector<16x8xbf16>, vector<32x8xf32> -> vector<32x8xf32>
    %62 = arith.addf %47, %61 : vector<32x8xf32>
    %c0_33 = arith.constant 0 : index
    %c0_34 = arith.constant 0 : index
    %63 = vector.load %arg4[%c0_33, %c0_34] : memref<1x8xf32, #tpu.memory_space<vmem>>, vector<1x8xf32>
    %64 = vector.broadcast %63 : vector<1x8xf32> to vector<32x8xf32>
    %65 = arith.addf %62, %64 : vector<32x8xf32>
    %c0_35 = arith.constant 0 : index
    %c0_36 = arith.constant 0 : index
    %c0_37 = arith.constant 0 : index
    %66 = vector.load %arg5[%c0_35, %c0_36, %c0_37] : memref<1x32x16xf32, #tpu.memory_space<vmem>>, vector<1x32x8xf32>
    %67 = vector.shape_cast %66 : vector<1x32x8xf32> to vector<32x8xf32>
    %68 = vector.shape_cast %65 : vector<32x8xf32> to vector<1x32x8xf32>
    tpu.vector_store %arg5[%c0_35, %c0_36, %c0_37], %68 {strides = array<i32>} : memref<1x32x16xf32, #tpu.memory_space<vmem>>, vector<1x32x8xf32>,
    %cst_38 = arith.constant 0.000000e+00 : f32
    %69 = vector.broadcast %cst_38 : f32 to vector<32x8xf32>
    %c0_i32_39 = arith.constant 0 : i32
    %70 = arith.addi %1, %c0_i32_39 : i32
    %c1_i32_40 = arith.constant 1 : i32
    %71 = arith.addi %70, %c1_i32_40 : i32
    %c0_41 = arith.constant 0 : index
    %72 = arith.index_cast %71 : i32 to index
    %c0_42 = arith.constant 0 : index
    %73 = vector.load %arg2[%c0_41, %72, %c0_42] : memref<1x34x16xf32, #tpu.memory_space<vmem>>, vector<1x32x16xf32>
    %74 = vector.shape_cast %73 : vector<1x32x16xf32> to vector<32x16xf32>
    %cst_43 = arith.constant 0.000000e+00 : f32
    %75 = vector.broadcast %cst_43 : f32 to vector<32x16xf32>
    %76 = arith.cmpf oge, %74, %75 : vector<32x16xf32>
    %cst_44 = arith.constant 1.000000e-01 : f32
    %77 = vector.broadcast %cst_44 : f32 to vector<32x16xf32>
    %78 = arith.mulf %77, %74 : vector<32x16xf32>
    %79 = arith.select %76, %74, %78 : vector<32x16xi1>, vector<32x16xf32>
    %80 = arith.truncf %79 : vector<32x16xf32> to vector<32x16xbf16>
    %c0_45 = arith.constant 0 : index
    %c0_46 = arith.constant 0 : index
    %c0_47 = arith.constant 0 : index
    %81 = vector.load %arg3[%c0_45, %c0_46, %c0_47] : memref<4x16x8xbf16, #tpu.memory_space<vmem>>, vector<1x16x8xbf16>
    %82 = vector.shape_cast %81 : vector<1x16x8xbf16> to vector<16x8xbf16>
    %cst_48 = arith.constant dense<0.000000e+00> : vector<32x8xf32>
    %83 = tpu.matmul %80, %82, %cst_48 {dimension_numbers = #tpu.dot_dimension_numbers<[1], [0], [0], [1], [0, 0, 1, 1], [], []>} : vector<32x16xbf16>, vector<16x8xbf16>, vector<32x8xf32> -> vector<32x8xf32>
    %84 = arith.addf %69, %83 : vector<32x8xf32>
    %c0_i32_49 = arith.constant 0 : i32
    %85 = arith.addi %1, %c0_i32_49 : i32
    %c1_i32_50 = arith.constant 1 : i32
    %86 = arith.addi %85, %c1_i32_50 : i32
    %c0_51 = arith.constant 0 : index
    %87 = arith.index_cast %86 : i32 to index
    %c0_52 = arith.constant 0 : index
    %88 = vector.load %arg2[%c0_51, %87, %c0_52] : memref<1x34x16xf32, #tpu.memory_space<vmem>>, vector<1x32x16xf32>
    %89 = vector.shape_cast %88 : vector<1x32x16xf32> to vector<32x16xf32>
    %cst_53 = arith.constant 0.000000e+00 : f32
    %90 = vector.broadcast %cst_53 : f32 to vector<32x16xf32>
    %91 = arith.cmpf oge, %89, %90 : vector<32x16xf32>
    %cst_54 = arith.constant 1.000000e-01 : f32
    %92 = vector.broadcast %cst_54 : f32 to vector<32x16xf32>
    %93 = arith.mulf %92, %89 : vector<32x16xf32>
    %94 = arith.select %91, %89, %93 : vector<32x16xi1>, vector<32x16xf32>
    %95 = arith.truncf %94 : vector<32x16xf32> to vector<32x16xbf16>
    %c1_55 = arith.constant 1 : index
    %c0_56 = arith.constant 0 : index
    %c0_57 = arith.constant 0 : index
    %96 = vector.load %arg3[%c1_55, %c0_56, %c0_57] : memref<4x16x8xbf16, #tpu.memory_space<vmem>>, vector<1x16x8xbf16>
    %97 = vector.shape_cast %96 : vector<1x16x8xbf16> to vector<16x8xbf16>
    %cst_58 = arith.constant dense<0.000000e+00> : vector<32x8xf32>
    %98 = tpu.matmul %95, %97, %cst_58 {dimension_numbers = #tpu.dot_dimension_numbers<[1], [0], [0], [1], [0, 0, 1, 1], [], []>} : vector<32x16xbf16>, vector<16x8xbf16>, vector<32x8xf32> -> vector<32x8xf32>
    %99 = arith.addf %84, %98 : vector<32x8xf32>
    %c1_i32_59 = arith.constant 1 : i32
    %100 = arith.addi %1, %c1_i32_59 : i32
    %c1_i32_60 = arith.constant 1 : i32
    %101 = arith.addi %100, %c1_i32_60 : i32
    %c0_61 = arith.constant 0 : index
    %102 = arith.index_cast %101 : i32 to index
    %c0_62 = arith.constant 0 : index
    %103 = vector.load %arg2[%c0_61, %102, %c0_62] : memref<1x34x16xf32, #tpu.memory_space<vmem>>, vector<1x32x16xf32>
    %104 = vector.shape_cast %103 : vector<1x32x16xf32> to vector<32x16xf32>
    %cst_63 = arith.constant 0.000000e+00 : f32
    %105 = vector.broadcast %cst_63 : f32 to vector<32x16xf32>
    %106 = arith.cmpf oge, %104, %105 : vector<32x16xf32>
    %cst_64 = arith.constant 1.000000e-01 : f32
    %107 = vector.broadcast %cst_64 : f32 to vector<32x16xf32>
    %108 = arith.mulf %107, %104 : vector<32x16xf32>
    %109 = arith.select %106, %104, %108 : vector<32x16xi1>, vector<32x16xf32>
    %110 = arith.truncf %109 : vector<32x16xf32> to vector<32x16xbf16>
    %c2_65 = arith.constant 2 : index
    %c0_66 = arith.constant 0 : index
    %c0_67 = arith.constant 0 : index
    %111 = vector.load %arg3[%c2_65, %c0_66, %c0_67] : memref<4x16x8xbf16, #tpu.memory_space<vmem>>, vector<1x16x8xbf16>
    %112 = vector.shape_cast %111 : vector<1x16x8xbf16> to vector<16x8xbf16>
    %cst_68 = arith.constant dense<0.000000e+00> : vector<32x8xf32>
    %113 = tpu.matmul %110, %112, %cst_68 {dimension_numbers = #tpu.dot_dimension_numbers<[1], [0], [0], [1], [0, 0, 1, 1], [], []>} : vector<32x16xbf16>, vector<16x8xbf16>, vector<32x8xf32> -> vector<32x8xf32>
    %114 = arith.addf %99, %113 : vector<32x8xf32>
    %c1_i32_69 = arith.constant 1 : i32
    %115 = arith.addi %1, %c1_i32_69 : i32
    %c1_i32_70 = arith.constant 1 : i32
    %116 = arith.addi %115, %c1_i32_70 : i32
    %c0_71 = arith.constant 0 : index
    %117 = arith.index_cast %116 : i32 to index
    %c0_72 = arith.constant 0 : index
    %118 = vector.load %arg2[%c0_71, %117, %c0_72] : memref<1x34x16xf32, #tpu.memory_space<vmem>>, vector<1x32x16xf32>
    %119 = vector.shape_cast %118 : vector<1x32x16xf32> to vector<32x16xf32>
    %cst_73 = arith.constant 0.000000e+00 : f32
    %120 = vector.broadcast %cst_73 : f32 to vector<32x16xf32>
    %121 = arith.cmpf oge, %119, %120 : vector<32x16xf32>
    %cst_74 = arith.constant 1.000000e-01 : f32
    %122 = vector.broadcast %cst_74 : f32 to vector<32x16xf32>
    %123 = arith.mulf %122, %119 : vector<32x16xf32>
    %124 = arith.select %121, %119, %123 : vector<32x16xi1>, vector<32x16xf32>
    %125 = arith.truncf %124 : vector<32x16xf32> to vector<32x16xbf16>
    %c3_75 = arith.constant 3 : index
    %c0_76 = arith.constant 0 : index
    %c0_77 = arith.constant 0 : index
    %126 = vector.load %arg3[%c3_75, %c0_76, %c0_77] : memref<4x16x8xbf16, #tpu.memory_space<vmem>>, vector<1x16x8xbf16>
    %127 = vector.shape_cast %126 : vector<1x16x8xbf16> to vector<16x8xbf16>
    %cst_78 = arith.constant dense<0.000000e+00> : vector<32x8xf32>
    %128 = tpu.matmul %125, %127, %cst_78 {dimension_numbers = #tpu.dot_dimension_numbers<[1], [0], [0], [1], [0, 0, 1, 1], [], []>} : vector<32x16xbf16>, vector<16x8xbf16>, vector<32x8xf32> -> vector<32x8xf32>
    %129 = arith.addf %114, %128 : vector<32x8xf32>
    %c0_79 = arith.constant 0 : index
    %c0_80 = arith.constant 0 : index
    %130 = vector.load %arg4[%c0_79, %c0_80] : memref<1x8xf32, #tpu.memory_space<vmem>>, vector<1x8xf32>
    %131 = vector.broadcast %130 : vector<1x8xf32> to vector<32x8xf32>
    %132 = arith.addf %129, %131 : vector<32x8xf32>
    %c0_81 = arith.constant 0 : index
    %c0_82 = arith.constant 0 : index
    %c8 = arith.constant 8 : index
    %133 = vector.load %arg5[%c0_81, %c0_82, %c8] : memref<1x32x16xf32, #tpu.memory_space<vmem>>, vector<1x32x8xf32>
    %134 = vector.shape_cast %133 : vector<1x32x8xf32> to vector<32x8xf32>
    %135 = vector.shape_cast %132 : vector<32x8xf32> to vector<1x32x8xf32>
    tpu.vector_store %arg5[%c0_81, %c0_82, %c8], %135 {strides = array<i32>} : memref<1x32x16xf32, #tpu.memory_space<vmem>>, vector<1x32x8xf32>,
    return
  }
  func.func @transform_0(%arg0: i32, %arg1: i32) -> (i32, i32, i32) {
    %c0_i32 = arith.constant 0 : i32
    %c0_i32_0 = arith.constant 0 : i32
    %c0_i32_1 = arith.constant 0 : i32
    return %arg0, %c0_i32, %c0_i32_0 : i32, i32, i32
  }
  func.func @transform_1(%arg0: i32, %arg1: i32) -> (i32, i32, i32) {
    %c0_i32 = arith.constant 0 : i32
    %c0_i32_0 = arith.constant 0 : i32
    %c0_i32_1 = arith.constant 0 : i32
    %c0_i32_2 = arith.constant 0 : i32
    return %c0_i32, %c0_i32_0, %c0_i32_1 : i32, i32, i32
  }
  func.func @transform_2(%arg0: i32, %arg1: i32) -> (i32, i32) {
    %c0_i32 = arith.constant 0 : i32
    %c0_i32_0 = arith.constant 0 : i32
    %c0_i32_1 = arith.constant 0 : i32
    return %c0_i32, %c0_i32_0 : i32, i32
  }
  func.func @transform_3(%arg0: i32, %arg1: i32) -> (i32, i32, i32) {
    %c0_i32 = arith.constant 0 : i32
    %c0_i32_0 = arith.constant 0 : i32
    return %arg0, %arg1, %c0_i32 : i32, i32, i32
  }
}

module attributes {stable_mosaic.version = 11 : i64} {
  func.func @_conv_kernel(%arg0: i32, %arg1: i32, %arg2: memref<1x66x8xf32, #tpu.memory_space<vmem>>, %arg3: memref<3x8x8xbf16, #tpu.memory_space<vmem>>, %arg4: memref<1x8xf32, #tpu.memory_space<vmem>>, %arg5: memref<1x64x8xf32, #tpu.memory_space<vmem>>, %arg6: memref<1x64x8xf32, #tpu.memory_space<vmem>>) attributes {dimension_semantics = [#tpu.dimension_semantics<parallel>, #tpu.dimension_semantics<arbitrary>], iteration_bounds = array<i64: 2, 1>, scalar_prefetch = 0 : i64, scratch_operands = 0 : i64, tpu.core_type = #tpu.core_type<tc>, window_params = [{transform_indices = @transform_0, window_bounds = array<i64: 1, 66, 8>}, {pipeline_mode = #tpu.pipeline_mode<synchronous>, transform_indices = @transform_1, window_bounds = array<i64: 3, 8, 8>}, {pipeline_mode = #tpu.pipeline_mode<synchronous>, transform_indices = @transform_2, window_bounds = array<i64: 1, 8>}, {transform_indices = @transform_3, window_bounds = array<i64: 1, 64, 8>}, {transform_indices = @transform_4, window_bounds = array<i64: 1, 64, 8>}]} {
    %c64_i32 = arith.constant 64 : i32
    %0 = arith.muli %arg1, %c64_i32 : i32
    %1 = tpu.assume_multiple %0, 8 : i32
    %cst = arith.constant 0.000000e+00 : f32
    %2 = vector.broadcast %cst : f32 to vector<64x8xf32>
    %c0_i32 = arith.constant 0 : i32
    %3 = arith.addi %1, %c0_i32 : i32
    %c0 = arith.constant 0 : index
    %4 = arith.index_cast %3 : i32 to index
    %c0_0 = arith.constant 0 : index
    %5 = vector.load %arg2[%c0, %4, %c0_0] : memref<1x66x8xf32, #tpu.memory_space<vmem>>, vector<1x64x8xf32>
    %6 = vector.shape_cast %5 : vector<1x64x8xf32> to vector<64x8xf32>
    %cst_1 = arith.constant 0.000000e+00 : f32
    %7 = vector.broadcast %cst_1 : f32 to vector<64x8xf32>
    %8 = arith.cmpf oge, %6, %7 : vector<64x8xf32>
    %cst_2 = arith.constant 1.000000e-01 : f32
    %9 = vector.broadcast %cst_2 : f32 to vector<64x8xf32>
    %10 = arith.mulf %9, %6 : vector<64x8xf32>
    %11 = arith.select %8, %6, %10 : vector<64x8xi1>, vector<64x8xf32>
    %12 = arith.truncf %11 : vector<64x8xf32> to vector<64x8xbf16>
    %c0_3 = arith.constant 0 : index
    %c0_4 = arith.constant 0 : index
    %c0_5 = arith.constant 0 : index
    %13 = vector.load %arg3[%c0_3, %c0_4, %c0_5] : memref<3x8x8xbf16, #tpu.memory_space<vmem>>, vector<1x8x8xbf16>
    %14 = vector.shape_cast %13 : vector<1x8x8xbf16> to vector<8x8xbf16>
    %cst_6 = arith.constant dense<0.000000e+00> : vector<64x8xf32>
    %15 = tpu.matmul %12, %14, %cst_6 {dimension_numbers = #tpu.dot_dimension_numbers<[1], [0], [0], [1], [0, 0, 1, 1], [], []>} : vector<64x8xbf16>, vector<8x8xbf16>, vector<64x8xf32> -> vector<64x8xf32>
    %16 = arith.addf %2, %15 : vector<64x8xf32>
    %c1_i32 = arith.constant 1 : i32
    %17 = arith.addi %1, %c1_i32 : i32
    %c0_7 = arith.constant 0 : index
    %18 = arith.index_cast %17 : i32 to index
    %c0_8 = arith.constant 0 : index
    %19 = vector.load %arg2[%c0_7, %18, %c0_8] : memref<1x66x8xf32, #tpu.memory_space<vmem>>, vector<1x64x8xf32>
    %20 = vector.shape_cast %19 : vector<1x64x8xf32> to vector<64x8xf32>
    %cst_9 = arith.constant 0.000000e+00 : f32
    %21 = vector.broadcast %cst_9 : f32 to vector<64x8xf32>
    %22 = arith.cmpf oge, %20, %21 : vector<64x8xf32>
    %cst_10 = arith.constant 1.000000e-01 : f32
    %23 = vector.broadcast %cst_10 : f32 to vector<64x8xf32>
    %24 = arith.mulf %23, %20 : vector<64x8xf32>
    %25 = arith.select %22, %20, %24 : vector<64x8xi1>, vector<64x8xf32>
    %26 = arith.truncf %25 : vector<64x8xf32> to vector<64x8xbf16>
    %c1 = arith.constant 1 : index
    %c0_11 = arith.constant 0 : index
    %c0_12 = arith.constant 0 : index
    %27 = vector.load %arg3[%c1, %c0_11, %c0_12] : memref<3x8x8xbf16, #tpu.memory_space<vmem>>, vector<1x8x8xbf16>
    %28 = vector.shape_cast %27 : vector<1x8x8xbf16> to vector<8x8xbf16>
    %cst_13 = arith.constant dense<0.000000e+00> : vector<64x8xf32>
    %29 = tpu.matmul %26, %28, %cst_13 {dimension_numbers = #tpu.dot_dimension_numbers<[1], [0], [0], [1], [0, 0, 1, 1], [], []>} : vector<64x8xbf16>, vector<8x8xbf16>, vector<64x8xf32> -> vector<64x8xf32>
    %30 = arith.addf %16, %29 : vector<64x8xf32>
    %c2_i32 = arith.constant 2 : i32
    %31 = arith.addi %1, %c2_i32 : i32
    %c0_14 = arith.constant 0 : index
    %32 = arith.index_cast %31 : i32 to index
    %c0_15 = arith.constant 0 : index
    %33 = vector.load %arg2[%c0_14, %32, %c0_15] : memref<1x66x8xf32, #tpu.memory_space<vmem>>, vector<1x64x8xf32>
    %34 = vector.shape_cast %33 : vector<1x64x8xf32> to vector<64x8xf32>
    %cst_16 = arith.constant 0.000000e+00 : f32
    %35 = vector.broadcast %cst_16 : f32 to vector<64x8xf32>
    %36 = arith.cmpf oge, %34, %35 : vector<64x8xf32>
    %cst_17 = arith.constant 1.000000e-01 : f32
    %37 = vector.broadcast %cst_17 : f32 to vector<64x8xf32>
    %38 = arith.mulf %37, %34 : vector<64x8xf32>
    %39 = arith.select %36, %34, %38 : vector<64x8xi1>, vector<64x8xf32>
    %40 = arith.truncf %39 : vector<64x8xf32> to vector<64x8xbf16>
    %c2 = arith.constant 2 : index
    %c0_18 = arith.constant 0 : index
    %c0_19 = arith.constant 0 : index
    %41 = vector.load %arg3[%c2, %c0_18, %c0_19] : memref<3x8x8xbf16, #tpu.memory_space<vmem>>, vector<1x8x8xbf16>
    %42 = vector.shape_cast %41 : vector<1x8x8xbf16> to vector<8x8xbf16>
    %cst_20 = arith.constant dense<0.000000e+00> : vector<64x8xf32>
    %43 = tpu.matmul %40, %42, %cst_20 {dimension_numbers = #tpu.dot_dimension_numbers<[1], [0], [0], [1], [0, 0, 1, 1], [], []>} : vector<64x8xbf16>, vector<8x8xbf16>, vector<64x8xf32> -> vector<64x8xf32>
    %44 = arith.addf %30, %43 : vector<64x8xf32>
    %c0_21 = arith.constant 0 : index
    %c0_22 = arith.constant 0 : index
    %45 = vector.load %arg4[%c0_21, %c0_22] : memref<1x8xf32, #tpu.memory_space<vmem>>, vector<1x8xf32>
    %46 = vector.broadcast %45 : vector<1x8xf32> to vector<64x8xf32>
    %47 = arith.addf %44, %46 : vector<64x8xf32>
    %c0_23 = arith.constant 0 : index
    %c0_24 = arith.constant 0 : index
    %c0_25 = arith.constant 0 : index
    %48 = vector.load %arg5[%c0_23, %c0_24, %c0_25] : memref<1x64x8xf32, #tpu.memory_space<vmem>>, vector<1x64x8xf32>
    %49 = vector.shape_cast %48 : vector<1x64x8xf32> to vector<64x8xf32>
    %50 = arith.addf %47, %49 : vector<64x8xf32>
    %c0_26 = arith.constant 0 : index
    %c0_27 = arith.constant 0 : index
    %c0_28 = arith.constant 0 : index
    %51 = vector.load %arg6[%c0_26, %c0_27, %c0_28] : memref<1x64x8xf32, #tpu.memory_space<vmem>>, vector<1x64x8xf32>
    %52 = vector.shape_cast %51 : vector<1x64x8xf32> to vector<64x8xf32>
    %53 = vector.shape_cast %50 : vector<64x8xf32> to vector<1x64x8xf32>
    tpu.vector_store %arg6[%c0_26, %c0_27, %c0_28], %53 {strides = array<i32>} : memref<1x64x8xf32, #tpu.memory_space<vmem>>, vector<1x64x8xf32>,
    return
  }
  func.func @transform_0(%arg0: i32, %arg1: i32) -> (i32, i32, i32) {
    %c0_i32 = arith.constant 0 : i32
    %c0_i32_0 = arith.constant 0 : i32
    %c0_i32_1 = arith.constant 0 : i32
    return %arg0, %c0_i32, %c0_i32_0 : i32, i32, i32
  }
  func.func @transform_1(%arg0: i32, %arg1: i32) -> (i32, i32, i32) {
    %c0_i32 = arith.constant 0 : i32
    %c0_i32_0 = arith.constant 0 : i32
    %c0_i32_1 = arith.constant 0 : i32
    %c0_i32_2 = arith.constant 0 : i32
    return %c0_i32, %c0_i32_0, %c0_i32_1 : i32, i32, i32
  }
  func.func @transform_2(%arg0: i32, %arg1: i32) -> (i32, i32) {
    %c0_i32 = arith.constant 0 : i32
    %c0_i32_0 = arith.constant 0 : i32
    %c0_i32_1 = arith.constant 0 : i32
    return %c0_i32, %c0_i32_0 : i32, i32
  }
  func.func @transform_3(%arg0: i32, %arg1: i32) -> (i32, i32, i32) {
    %c0_i32 = arith.constant 0 : i32
    %c0_i32_0 = arith.constant 0 : i32
    return %arg0, %arg1, %c0_i32 : i32, i32, i32
  }
  func.func @transform_4(%arg0: i32, %arg1: i32) -> (i32, i32, i32) {
    %c0_i32 = arith.constant 0 : i32
    %c0_i32_0 = arith.constant 0 : i32
    return %arg0, %arg1, %c0_i32 : i32, i32, i32
  }
}

module attributes {stable_mosaic.version = 11 : i64} {
  func.func @_conv_kernel(%arg0: i32, %arg1: i32, %arg2: memref<1x68x8xf32, #tpu.memory_space<vmem>>, %arg3: memref<3x8x8xbf16, #tpu.memory_space<vmem>>, %arg4: memref<1x8xf32, #tpu.memory_space<vmem>>, %arg5: memref<1x64x8xf32, #tpu.memory_space<vmem>>, %arg6: memref<1x64x8xf32, #tpu.memory_space<vmem>>) attributes {dimension_semantics = [#tpu.dimension_semantics<parallel>, #tpu.dimension_semantics<arbitrary>], iteration_bounds = array<i64: 2, 1>, scalar_prefetch = 0 : i64, scratch_operands = 0 : i64, tpu.core_type = #tpu.core_type<tc>, window_params = [{transform_indices = @transform_0, window_bounds = array<i64: 1, 68, 8>}, {pipeline_mode = #tpu.pipeline_mode<synchronous>, transform_indices = @transform_1, window_bounds = array<i64: 3, 8, 8>}, {pipeline_mode = #tpu.pipeline_mode<synchronous>, transform_indices = @transform_2, window_bounds = array<i64: 1, 8>}, {transform_indices = @transform_3, window_bounds = array<i64: 1, 64, 8>}, {transform_indices = @transform_4, window_bounds = array<i64: 1, 64, 8>}]} {
    %c64_i32 = arith.constant 64 : i32
    %0 = arith.muli %arg1, %c64_i32 : i32
    %1 = tpu.assume_multiple %0, 8 : i32
    %cst = arith.constant 0.000000e+00 : f32
    %2 = vector.broadcast %cst : f32 to vector<64x8xf32>
    %c0_i32 = arith.constant 0 : i32
    %3 = arith.addi %1, %c0_i32 : i32
    %c0 = arith.constant 0 : index
    %4 = arith.index_cast %3 : i32 to index
    %c0_0 = arith.constant 0 : index
    %5 = vector.load %arg2[%c0, %4, %c0_0] : memref<1x68x8xf32, #tpu.memory_space<vmem>>, vector<1x64x8xf32>
    %6 = vector.shape_cast %5 : vector<1x64x8xf32> to vector<64x8xf32>
    %cst_1 = arith.constant 0.000000e+00 : f32
    %7 = vector.broadcast %cst_1 : f32 to vector<64x8xf32>
    %8 = arith.cmpf oge, %6, %7 : vector<64x8xf32>
    %cst_2 = arith.constant 1.000000e-01 : f32
    %9 = vector.broadcast %cst_2 : f32 to vector<64x8xf32>
    %10 = arith.mulf %9, %6 : vector<64x8xf32>
    %11 = arith.select %8, %6, %10 : vector<64x8xi1>, vector<64x8xf32>
    %12 = arith.truncf %11 : vector<64x8xf32> to vector<64x8xbf16>
    %c0_3 = arith.constant 0 : index
    %c0_4 = arith.constant 0 : index
    %c0_5 = arith.constant 0 : index
    %13 = vector.load %arg3[%c0_3, %c0_4, %c0_5] : memref<3x8x8xbf16, #tpu.memory_space<vmem>>, vector<1x8x8xbf16>
    %14 = vector.shape_cast %13 : vector<1x8x8xbf16> to vector<8x8xbf16>
    %cst_6 = arith.constant dense<0.000000e+00> : vector<64x8xf32>
    %15 = tpu.matmul %12, %14, %cst_6 {dimension_numbers = #tpu.dot_dimension_numbers<[1], [0], [0], [1], [0, 0, 1, 1], [], []>} : vector<64x8xbf16>, vector<8x8xbf16>, vector<64x8xf32> -> vector<64x8xf32>
    %16 = arith.addf %2, %15 : vector<64x8xf32>
    %c2_i32 = arith.constant 2 : i32
    %17 = arith.addi %1, %c2_i32 : i32
    %c0_7 = arith.constant 0 : index
    %18 = arith.index_cast %17 : i32 to index
    %c0_8 = arith.constant 0 : index
    %19 = vector.load %arg2[%c0_7, %18, %c0_8] : memref<1x68x8xf32, #tpu.memory_space<vmem>>, vector<1x64x8xf32>
    %20 = vector.shape_cast %19 : vector<1x64x8xf32> to vector<64x8xf32>
    %cst_9 = arith.constant 0.000000e+00 : f32
    %21 = vector.broadcast %cst_9 : f32 to vector<64x8xf32>
    %22 = arith.cmpf oge, %20, %21 : vector<64x8xf32>
    %cst_10 = arith.constant 1.000000e-01 : f32
    %23 = vector.broadcast %cst_10 : f32 to vector<64x8xf32>
    %24 = arith.mulf %23, %20 : vector<64x8xf32>
    %25 = arith.select %22, %20, %24 : vector<64x8xi1>, vector<64x8xf32>
    %26 = arith.truncf %25 : vector<64x8xf32> to vector<64x8xbf16>
    %c1 = arith.constant 1 : index
    %c0_11 = arith.constant 0 : index
    %c0_12 = arith.constant 0 : index
    %27 = vector.load %arg3[%c1, %c0_11, %c0_12] : memref<3x8x8xbf16, #tpu.memory_space<vmem>>, vector<1x8x8xbf16>
    %28 = vector.shape_cast %27 : vector<1x8x8xbf16> to vector<8x8xbf16>
    %cst_13 = arith.constant dense<0.000000e+00> : vector<64x8xf32>
    %29 = tpu.matmul %26, %28, %cst_13 {dimension_numbers = #tpu.dot_dimension_numbers<[1], [0], [0], [1], [0, 0, 1, 1], [], []>} : vector<64x8xbf16>, vector<8x8xbf16>, vector<64x8xf32> -> vector<64x8xf32>
    %30 = arith.addf %16, %29 : vector<64x8xf32>
    %c4_i32 = arith.constant 4 : i32
    %31 = arith.addi %1, %c4_i32 : i32
    %c0_14 = arith.constant 0 : index
    %32 = arith.index_cast %31 : i32 to index
    %c0_15 = arith.constant 0 : index
    %33 = vector.load %arg2[%c0_14, %32, %c0_15] : memref<1x68x8xf32, #tpu.memory_space<vmem>>, vector<1x64x8xf32>
    %34 = vector.shape_cast %33 : vector<1x64x8xf32> to vector<64x8xf32>
    %cst_16 = arith.constant 0.000000e+00 : f32
    %35 = vector.broadcast %cst_16 : f32 to vector<64x8xf32>
    %36 = arith.cmpf oge, %34, %35 : vector<64x8xf32>
    %cst_17 = arith.constant 1.000000e-01 : f32
    %37 = vector.broadcast %cst_17 : f32 to vector<64x8xf32>
    %38 = arith.mulf %37, %34 : vector<64x8xf32>
    %39 = arith.select %36, %34, %38 : vector<64x8xi1>, vector<64x8xf32>
    %40 = arith.truncf %39 : vector<64x8xf32> to vector<64x8xbf16>
    %c2 = arith.constant 2 : index
    %c0_18 = arith.constant 0 : index
    %c0_19 = arith.constant 0 : index
    %41 = vector.load %arg3[%c2, %c0_18, %c0_19] : memref<3x8x8xbf16, #tpu.memory_space<vmem>>, vector<1x8x8xbf16>
    %42 = vector.shape_cast %41 : vector<1x8x8xbf16> to vector<8x8xbf16>
    %cst_20 = arith.constant dense<0.000000e+00> : vector<64x8xf32>
    %43 = tpu.matmul %40, %42, %cst_20 {dimension_numbers = #tpu.dot_dimension_numbers<[1], [0], [0], [1], [0, 0, 1, 1], [], []>} : vector<64x8xbf16>, vector<8x8xbf16>, vector<64x8xf32> -> vector<64x8xf32>
    %44 = arith.addf %30, %43 : vector<64x8xf32>
    %c0_21 = arith.constant 0 : index
    %c0_22 = arith.constant 0 : index
    %45 = vector.load %arg4[%c0_21, %c0_22] : memref<1x8xf32, #tpu.memory_space<vmem>>, vector<1x8xf32>
    %46 = vector.broadcast %45 : vector<1x8xf32> to vector<64x8xf32>
    %47 = arith.addf %44, %46 : vector<64x8xf32>
    %c0_23 = arith.constant 0 : index
    %c0_24 = arith.constant 0 : index
    %c0_25 = arith.constant 0 : index
    %48 = vector.load %arg5[%c0_23, %c0_24, %c0_25] : memref<1x64x8xf32, #tpu.memory_space<vmem>>, vector<1x64x8xf32>
    %49 = vector.shape_cast %48 : vector<1x64x8xf32> to vector<64x8xf32>
    %50 = arith.addf %47, %49 : vector<64x8xf32>
    %c0_26 = arith.constant 0 : index
    %c0_27 = arith.constant 0 : index
    %c0_28 = arith.constant 0 : index
    %51 = vector.load %arg6[%c0_26, %c0_27, %c0_28] : memref<1x64x8xf32, #tpu.memory_space<vmem>>, vector<1x64x8xf32>
    %52 = vector.shape_cast %51 : vector<1x64x8xf32> to vector<64x8xf32>
    %53 = vector.shape_cast %50 : vector<64x8xf32> to vector<1x64x8xf32>
    tpu.vector_store %arg6[%c0_26, %c0_27, %c0_28], %53 {strides = array<i32>} : memref<1x64x8xf32, #tpu.memory_space<vmem>>, vector<1x64x8xf32>,
    return
  }
  func.func @transform_0(%arg0: i32, %arg1: i32) -> (i32, i32, i32) {
    %c0_i32 = arith.constant 0 : i32
    %c0_i32_0 = arith.constant 0 : i32
    %c0_i32_1 = arith.constant 0 : i32
    return %arg0, %c0_i32, %c0_i32_0 : i32, i32, i32
  }
  func.func @transform_1(%arg0: i32, %arg1: i32) -> (i32, i32, i32) {
    %c0_i32 = arith.constant 0 : i32
    %c0_i32_0 = arith.constant 0 : i32
    %c0_i32_1 = arith.constant 0 : i32
    %c0_i32_2 = arith.constant 0 : i32
    return %c0_i32, %c0_i32_0, %c0_i32_1 : i32, i32, i32
  }
  func.func @transform_2(%arg0: i32, %arg1: i32) -> (i32, i32) {
    %c0_i32 = arith.constant 0 : i32
    %c0_i32_0 = arith.constant 0 : i32
    %c0_i32_1 = arith.constant 0 : i32
    return %c0_i32, %c0_i32_0 : i32, i32
  }
  func.func @transform_3(%arg0: i32, %arg1: i32) -> (i32, i32, i32) {
    %c0_i32 = arith.constant 0 : i32
    %c0_i32_0 = arith.constant 0 : i32
    return %arg0, %arg1, %c0_i32 : i32, i32, i32
  }
  func.func @transform_4(%arg0: i32, %arg1: i32) -> (i32, i32, i32) {
    %c0_i32 = arith.constant 0 : i32
    %c0_i32_0 = arith.constant 0 : i32
    return %arg0, %arg1, %c0_i32 : i32, i32, i32
  }
}

module attributes {stable_mosaic.version = 11 : i64} {
  func.func @_conv_kernel(%arg0: i32, %arg1: i32, %arg2: memref<1x70x8xf32, #tpu.memory_space<vmem>>, %arg3: memref<7x8x1xbf16, #tpu.memory_space<vmem>>, %arg4: memref<1x1xf32, #tpu.memory_space<vmem>>, %arg5: memref<1x64x1xf32, #tpu.memory_space<vmem>>) attributes {dimension_semantics = [#tpu.dimension_semantics<parallel>, #tpu.dimension_semantics<arbitrary>], iteration_bounds = array<i64: 2, 1>, scalar_prefetch = 0 : i64, scratch_operands = 0 : i64, tpu.core_type = #tpu.core_type<tc>, window_params = [{transform_indices = @transform_0, window_bounds = array<i64: 1, 70, 8>}, {pipeline_mode = #tpu.pipeline_mode<synchronous>, transform_indices = @transform_1, window_bounds = array<i64: 7, 8, 1>}, {pipeline_mode = #tpu.pipeline_mode<synchronous>, transform_indices = @transform_2, window_bounds = array<i64: 1, 1>}, {transform_indices = @transform_3, window_bounds = array<i64: 1, 64, 1>}]} {
    %c64_i32 = arith.constant 64 : i32
    %0 = arith.muli %arg1, %c64_i32 : i32
    %1 = tpu.assume_multiple %0, 8 : i32
    %cst = arith.constant 0.000000e+00 : f32
    %2 = vector.broadcast %cst : f32 to vector<64x1xf32>
    %c0_i32 = arith.constant 0 : i32
    %3 = arith.addi %1, %c0_i32 : i32
    %c0 = arith.constant 0 : index
    %4 = arith.index_cast %3 : i32 to index
    %c0_0 = arith.constant 0 : index
    %5 = vector.load %arg2[%c0, %4, %c0_0] : memref<1x70x8xf32, #tpu.memory_space<vmem>>, vector<1x64x8xf32>
    %6 = vector.shape_cast %5 : vector<1x64x8xf32> to vector<64x8xf32>
    %cst_1 = arith.constant 0.000000e+00 : f32
    %7 = vector.broadcast %cst_1 : f32 to vector<64x8xf32>
    %8 = arith.cmpf oge, %6, %7 : vector<64x8xf32>
    %cst_2 = arith.constant 1.000000e-01 : f32
    %9 = vector.broadcast %cst_2 : f32 to vector<64x8xf32>
    %10 = arith.mulf %9, %6 : vector<64x8xf32>
    %11 = arith.select %8, %6, %10 : vector<64x8xi1>, vector<64x8xf32>
    %12 = arith.truncf %11 : vector<64x8xf32> to vector<64x8xbf16>
    %c0_3 = arith.constant 0 : index
    %c0_4 = arith.constant 0 : index
    %c0_5 = arith.constant 0 : index
    %13 = vector.load %arg3[%c0_3, %c0_4, %c0_5] : memref<7x8x1xbf16, #tpu.memory_space<vmem>>, vector<1x8x1xbf16>
    %14 = vector.shape_cast %13 : vector<1x8x1xbf16> to vector<8x1xbf16>
    %cst_6 = arith.constant dense<0.000000e+00> : vector<64x1xf32>
    %15 = tpu.matmul %12, %14, %cst_6 {dimension_numbers = #tpu.dot_dimension_numbers<[1], [0], [0], [1], [0, 0, 1, 1], [], []>} : vector<64x8xbf16>, vector<8x1xbf16>, vector<64x1xf32> -> vector<64x1xf32>
    %16 = arith.addf %2, %15 : vector<64x1xf32>
    %c1_i32 = arith.constant 1 : i32
    %17 = arith.addi %1, %c1_i32 : i32
    %c0_7 = arith.constant 0 : index
    %18 = arith.index_cast %17 : i32 to index
    %c0_8 = arith.constant 0 : index
    %19 = vector.load %arg2[%c0_7, %18, %c0_8] : memref<1x70x8xf32, #tpu.memory_space<vmem>>, vector<1x64x8xf32>
    %20 = vector.shape_cast %19 : vector<1x64x8xf32> to vector<64x8xf32>
    %cst_9 = arith.constant 0.000000e+00 : f32
    %21 = vector.broadcast %cst_9 : f32 to vector<64x8xf32>
    %22 = arith.cmpf oge, %20, %21 : vector<64x8xf32>
    %cst_10 = arith.constant 1.000000e-01 : f32
    %23 = vector.broadcast %cst_10 : f32 to vector<64x8xf32>
    %24 = arith.mulf %23, %20 : vector<64x8xf32>
    %25 = arith.select %22, %20, %24 : vector<64x8xi1>, vector<64x8xf32>
    %26 = arith.truncf %25 : vector<64x8xf32> to vector<64x8xbf16>
    %c1 = arith.constant 1 : index
    %c0_11 = arith.constant 0 : index
    %c0_12 = arith.constant 0 : index
    %27 = vector.load %arg3[%c1, %c0_11, %c0_12] : memref<7x8x1xbf16, #tpu.memory_space<vmem>>, vector<1x8x1xbf16>
    %28 = vector.shape_cast %27 : vector<1x8x1xbf16> to vector<8x1xbf16>
    %cst_13 = arith.constant dense<0.000000e+00> : vector<64x1xf32>
    %29 = tpu.matmul %26, %28, %cst_13 {dimension_numbers = #tpu.dot_dimension_numbers<[1], [0], [0], [1], [0, 0, 1, 1], [], []>} : vector<64x8xbf16>, vector<8x1xbf16>, vector<64x1xf32> -> vector<64x1xf32>
    %30 = arith.addf %16, %29 : vector<64x1xf32>
    %c2_i32 = arith.constant 2 : i32
    %31 = arith.addi %1, %c2_i32 : i32
    %c0_14 = arith.constant 0 : index
    %32 = arith.index_cast %31 : i32 to index
    %c0_15 = arith.constant 0 : index
    %33 = vector.load %arg2[%c0_14, %32, %c0_15] : memref<1x70x8xf32, #tpu.memory_space<vmem>>, vector<1x64x8xf32>
    %34 = vector.shape_cast %33 : vector<1x64x8xf32> to vector<64x8xf32>
    %cst_16 = arith.constant 0.000000e+00 : f32
    %35 = vector.broadcast %cst_16 : f32 to vector<64x8xf32>
    %36 = arith.cmpf oge, %34, %35 : vector<64x8xf32>
    %cst_17 = arith.constant 1.000000e-01 : f32
    %37 = vector.broadcast %cst_17 : f32 to vector<64x8xf32>
    %38 = arith.mulf %37, %34 : vector<64x8xf32>
    %39 = arith.select %36, %34, %38 : vector<64x8xi1>, vector<64x8xf32>
    %40 = arith.truncf %39 : vector<64x8xf32> to vector<64x8xbf16>
    %c2 = arith.constant 2 : index
    %c0_18 = arith.constant 0 : index
    %c0_19 = arith.constant 0 : index
    %41 = vector.load %arg3[%c2, %c0_18, %c0_19] : memref<7x8x1xbf16, #tpu.memory_space<vmem>>, vector<1x8x1xbf16>
    %42 = vector.shape_cast %41 : vector<1x8x1xbf16> to vector<8x1xbf16>
    %cst_20 = arith.constant dense<0.000000e+00> : vector<64x1xf32>
    %43 = tpu.matmul %40, %42, %cst_20 {dimension_numbers = #tpu.dot_dimension_numbers<[1], [0], [0], [1], [0, 0, 1, 1], [], []>} : vector<64x8xbf16>, vector<8x1xbf16>, vector<64x1xf32> -> vector<64x1xf32>
    %44 = arith.addf %30, %43 : vector<64x1xf32>
    %c3_i32 = arith.constant 3 : i32
    %45 = arith.addi %1, %c3_i32 : i32
    %c0_21 = arith.constant 0 : index
    %46 = arith.index_cast %45 : i32 to index
    %c0_22 = arith.constant 0 : index
    %47 = vector.load %arg2[%c0_21, %46, %c0_22] : memref<1x70x8xf32, #tpu.memory_space<vmem>>, vector<1x64x8xf32>
    %48 = vector.shape_cast %47 : vector<1x64x8xf32> to vector<64x8xf32>
    %cst_23 = arith.constant 0.000000e+00 : f32
    %49 = vector.broadcast %cst_23 : f32 to vector<64x8xf32>
    %50 = arith.cmpf oge, %48, %49 : vector<64x8xf32>
    %cst_24 = arith.constant 1.000000e-01 : f32
    %51 = vector.broadcast %cst_24 : f32 to vector<64x8xf32>
    %52 = arith.mulf %51, %48 : vector<64x8xf32>
    %53 = arith.select %50, %48, %52 : vector<64x8xi1>, vector<64x8xf32>
    %54 = arith.truncf %53 : vector<64x8xf32> to vector<64x8xbf16>
    %c3 = arith.constant 3 : index
    %c0_25 = arith.constant 0 : index
    %c0_26 = arith.constant 0 : index
    %55 = vector.load %arg3[%c3, %c0_25, %c0_26] : memref<7x8x1xbf16, #tpu.memory_space<vmem>>, vector<1x8x1xbf16>
    %56 = vector.shape_cast %55 : vector<1x8x1xbf16> to vector<8x1xbf16>
    %cst_27 = arith.constant dense<0.000000e+00> : vector<64x1xf32>
    %57 = tpu.matmul %54, %56, %cst_27 {dimension_numbers = #tpu.dot_dimension_numbers<[1], [0], [0], [1], [0, 0, 1, 1], [], []>} : vector<64x8xbf16>, vector<8x1xbf16>, vector<64x1xf32> -> vector<64x1xf32>
    %58 = arith.addf %44, %57 : vector<64x1xf32>
    %c4_i32 = arith.constant 4 : i32
    %59 = arith.addi %1, %c4_i32 : i32
    %c0_28 = arith.constant 0 : index
    %60 = arith.index_cast %59 : i32 to index
    %c0_29 = arith.constant 0 : index
    %61 = vector.load %arg2[%c0_28, %60, %c0_29] : memref<1x70x8xf32, #tpu.memory_space<vmem>>, vector<1x64x8xf32>
    %62 = vector.shape_cast %61 : vector<1x64x8xf32> to vector<64x8xf32>
    %cst_30 = arith.constant 0.000000e+00 : f32
    %63 = vector.broadcast %cst_30 : f32 to vector<64x8xf32>
    %64 = arith.cmpf oge, %62, %63 : vector<64x8xf32>
    %cst_31 = arith.constant 1.000000e-01 : f32
    %65 = vector.broadcast %cst_31 : f32 to vector<64x8xf32>
    %66 = arith.mulf %65, %62 : vector<64x8xf32>
    %67 = arith.select %64, %62, %66 : vector<64x8xi1>, vector<64x8xf32>
    %68 = arith.truncf %67 : vector<64x8xf32> to vector<64x8xbf16>
    %c4 = arith.constant 4 : index
    %c0_32 = arith.constant 0 : index
    %c0_33 = arith.constant 0 : index
    %69 = vector.load %arg3[%c4, %c0_32, %c0_33] : memref<7x8x1xbf16, #tpu.memory_space<vmem>>, vector<1x8x1xbf16>
    %70 = vector.shape_cast %69 : vector<1x8x1xbf16> to vector<8x1xbf16>
    %cst_34 = arith.constant dense<0.000000e+00> : vector<64x1xf32>
    %71 = tpu.matmul %68, %70, %cst_34 {dimension_numbers = #tpu.dot_dimension_numbers<[1], [0], [0], [1], [0, 0, 1, 1], [], []>} : vector<64x8xbf16>, vector<8x1xbf16>, vector<64x1xf32> -> vector<64x1xf32>
    %72 = arith.addf %58, %71 : vector<64x1xf32>
    %c5_i32 = arith.constant 5 : i32
    %73 = arith.addi %1, %c5_i32 : i32
    %c0_35 = arith.constant 0 : index
    %74 = arith.index_cast %73 : i32 to index
    %c0_36 = arith.constant 0 : index
    %75 = vector.load %arg2[%c0_35, %74, %c0_36] : memref<1x70x8xf32, #tpu.memory_space<vmem>>, vector<1x64x8xf32>
    %76 = vector.shape_cast %75 : vector<1x64x8xf32> to vector<64x8xf32>
    %cst_37 = arith.constant 0.000000e+00 : f32
    %77 = vector.broadcast %cst_37 : f32 to vector<64x8xf32>
    %78 = arith.cmpf oge, %76, %77 : vector<64x8xf32>
    %cst_38 = arith.constant 1.000000e-01 : f32
    %79 = vector.broadcast %cst_38 : f32 to vector<64x8xf32>
    %80 = arith.mulf %79, %76 : vector<64x8xf32>
    %81 = arith.select %78, %76, %80 : vector<64x8xi1>, vector<64x8xf32>
    %82 = arith.truncf %81 : vector<64x8xf32> to vector<64x8xbf16>
    %c5 = arith.constant 5 : index
    %c0_39 = arith.constant 0 : index
    %c0_40 = arith.constant 0 : index
    %83 = vector.load %arg3[%c5, %c0_39, %c0_40] : memref<7x8x1xbf16, #tpu.memory_space<vmem>>, vector<1x8x1xbf16>
    %84 = vector.shape_cast %83 : vector<1x8x1xbf16> to vector<8x1xbf16>
    %cst_41 = arith.constant dense<0.000000e+00> : vector<64x1xf32>
    %85 = tpu.matmul %82, %84, %cst_41 {dimension_numbers = #tpu.dot_dimension_numbers<[1], [0], [0], [1], [0, 0, 1, 1], [], []>} : vector<64x8xbf16>, vector<8x1xbf16>, vector<64x1xf32> -> vector<64x1xf32>
    %86 = arith.addf %72, %85 : vector<64x1xf32>
    %c6_i32 = arith.constant 6 : i32
    %87 = arith.addi %1, %c6_i32 : i32
    %c0_42 = arith.constant 0 : index
    %88 = arith.index_cast %87 : i32 to index
    %c0_43 = arith.constant 0 : index
    %89 = vector.load %arg2[%c0_42, %88, %c0_43] : memref<1x70x8xf32, #tpu.memory_space<vmem>>, vector<1x64x8xf32>
    %90 = vector.shape_cast %89 : vector<1x64x8xf32> to vector<64x8xf32>
    %cst_44 = arith.constant 0.000000e+00 : f32
    %91 = vector.broadcast %cst_44 : f32 to vector<64x8xf32>
    %92 = arith.cmpf oge, %90, %91 : vector<64x8xf32>
    %cst_45 = arith.constant 1.000000e-01 : f32
    %93 = vector.broadcast %cst_45 : f32 to vector<64x8xf32>
    %94 = arith.mulf %93, %90 : vector<64x8xf32>
    %95 = arith.select %92, %90, %94 : vector<64x8xi1>, vector<64x8xf32>
    %96 = arith.truncf %95 : vector<64x8xf32> to vector<64x8xbf16>
    %c6 = arith.constant 6 : index
    %c0_46 = arith.constant 0 : index
    %c0_47 = arith.constant 0 : index
    %97 = vector.load %arg3[%c6, %c0_46, %c0_47] : memref<7x8x1xbf16, #tpu.memory_space<vmem>>, vector<1x8x1xbf16>
    %98 = vector.shape_cast %97 : vector<1x8x1xbf16> to vector<8x1xbf16>
    %cst_48 = arith.constant dense<0.000000e+00> : vector<64x1xf32>
    %99 = tpu.matmul %96, %98, %cst_48 {dimension_numbers = #tpu.dot_dimension_numbers<[1], [0], [0], [1], [0, 0, 1, 1], [], []>} : vector<64x8xbf16>, vector<8x1xbf16>, vector<64x1xf32> -> vector<64x1xf32>
    %100 = arith.addf %86, %99 : vector<64x1xf32>
    %c0_49 = arith.constant 0 : index
    %c0_50 = arith.constant 0 : index
    %101 = vector.load %arg4[%c0_49, %c0_50] : memref<1x1xf32, #tpu.memory_space<vmem>>, vector<1x1xf32>
    %102 = vector.broadcast %101 : vector<1x1xf32> to vector<64x1xf32>
    %103 = arith.addf %100, %102 : vector<64x1xf32>
    %104 = math.tanh %103 : vector<64x1xf32>
    %c0_51 = arith.constant 0 : index
    %c0_52 = arith.constant 0 : index
    %c0_53 = arith.constant 0 : index
    %105 = vector.load %arg5[%c0_51, %c0_52, %c0_53] : memref<1x64x1xf32, #tpu.memory_space<vmem>>, vector<1x64x1xf32>
    %106 = vector.shape_cast %105 : vector<1x64x1xf32> to vector<64x1xf32>
    %107 = vector.shape_cast %104 : vector<64x1xf32> to vector<1x64x1xf32>
    tpu.vector_store %arg5[%c0_51, %c0_52, %c0_53], %107 {strides = array<i32>} : memref<1x64x1xf32, #tpu.memory_space<vmem>>, vector<1x64x1xf32>,
    return
  }
  func.func @transform_0(%arg0: i32, %arg1: i32) -> (i32, i32, i32) {
    %c0_i32 = arith.constant 0 : i32
    %c0_i32_0 = arith.constant 0 : i32
    %c0_i32_1 = arith.constant 0 : i32
    return %arg0, %c0_i32, %c0_i32_0 : i32, i32, i32
  }
  func.func @transform_1(%arg0: i32, %arg1: i32) -> (i32, i32, i32) {
    %c0_i32 = arith.constant 0 : i32
    %c0_i32_0 = arith.constant 0 : i32
    %c0_i32_1 = arith.constant 0 : i32
    %c0_i32_2 = arith.constant 0 : i32
    return %c0_i32, %c0_i32_0, %c0_i32_1 : i32, i32, i32
  }
  func.func @transform_2(%arg0: i32, %arg1: i32) -> (i32, i32) {
    %c0_i32 = arith.constant 0 : i32
    %c0_i32_0 = arith.constant 0 : i32
    %c0_i32_1 = arith.constant 0 : i32
    return %c0_i32, %c0_i32_0 : i32, i32
  }
  func.func @transform_3(%arg0: i32, %arg1: i32) -> (i32, i32, i32) {
    %c0_i32 = arith.constant 0 : i32
    %c0_i32_0 = arith.constant 0 : i32
    return %arg0, %arg1, %c0_i32 : i32, i32, i32
  }
}

module attributes {stable_mosaic.version = 11 : i64} {
  func.func @_conv_kernel(%arg0: i32, %arg1: i32, %arg2: memref<1x9x32xf32, #tpu.memory_space<vmem>>, %arg3: memref<1x32x32xbf16, #tpu.memory_space<vmem>>, %arg4: memref<1x32xf32, #tpu.memory_space<vmem>>, %arg5: memref<1x9x32xf32, #tpu.memory_space<vmem>>) attributes {dimension_semantics = [#tpu.dimension_semantics<parallel>, #tpu.dimension_semantics<arbitrary>], iteration_bounds = array<i64: 2, 1>, scalar_prefetch = 0 : i64, scratch_operands = 0 : i64, tpu.core_type = #tpu.core_type<tc>, window_params = [{transform_indices = @transform_0, window_bounds = array<i64: 1, 9, 32>}, {pipeline_mode = #tpu.pipeline_mode<synchronous>, transform_indices = @transform_1, window_bounds = array<i64: 1, 32, 32>}, {pipeline_mode = #tpu.pipeline_mode<synchronous>, transform_indices = @transform_2, window_bounds = array<i64: 1, 32>}, {transform_indices = @transform_3, window_bounds = array<i64: 1, 9, 32>}]} {
    %c9_i32 = arith.constant 9 : i32
    %0 = arith.muli %arg1, %c9_i32 : i32
    %cst = arith.constant 0.000000e+00 : f32
    %1 = vector.broadcast %cst : f32 to vector<9x32xf32>
    %c0_i32 = arith.constant 0 : i32
    %2 = arith.addi %0, %c0_i32 : i32
    %c0 = arith.constant 0 : index
    %3 = arith.index_cast %2 : i32 to index
    %c0_0 = arith.constant 0 : index
    %4 = vector.load %arg2[%c0, %3, %c0_0] : memref<1x9x32xf32, #tpu.memory_space<vmem>>, vector<1x9x32xf32>
    %5 = vector.shape_cast %4 : vector<1x9x32xf32> to vector<9x32xf32>
    %6 = arith.truncf %5 : vector<9x32xf32> to vector<9x32xbf16>
    %c0_1 = arith.constant 0 : index
    %c0_2 = arith.constant 0 : index
    %c0_3 = arith.constant 0 : index
    %7 = vector.load %arg3[%c0_1, %c0_2, %c0_3] : memref<1x32x32xbf16, #tpu.memory_space<vmem>>, vector<1x32x32xbf16>
    %8 = vector.shape_cast %7 : vector<1x32x32xbf16> to vector<32x32xbf16>
    %cst_4 = arith.constant dense<0.000000e+00> : vector<9x32xf32>
    %9 = tpu.matmul %6, %8, %cst_4 {dimension_numbers = #tpu.dot_dimension_numbers<[1], [0], [0], [1], [0, 0, 1, 1], [], []>} : vector<9x32xbf16>, vector<32x32xbf16>, vector<9x32xf32> -> vector<9x32xf32>
    %10 = arith.addf %1, %9 : vector<9x32xf32>
    %c0_5 = arith.constant 0 : index
    %c0_6 = arith.constant 0 : index
    %11 = vector.load %arg4[%c0_5, %c0_6] : memref<1x32xf32, #tpu.memory_space<vmem>>, vector<1x32xf32>
    %12 = vector.broadcast %11 : vector<1x32xf32> to vector<9x32xf32>
    %13 = arith.addf %10, %12 : vector<9x32xf32>
    %cst_7 = arith.constant 0.000000e+00 : f32
    %14 = vector.broadcast %cst_7 : f32 to vector<9x32xf32>
    %15 = arith.maximumf %13, %14 : vector<9x32xf32>
    %c0_8 = arith.constant 0 : index
    %c0_9 = arith.constant 0 : index
    %c0_10 = arith.constant 0 : index
    %16 = vector.load %arg5[%c0_8, %c0_9, %c0_10] : memref<1x9x32xf32, #tpu.memory_space<vmem>>, vector<1x9x32xf32>
    %17 = vector.shape_cast %16 : vector<1x9x32xf32> to vector<9x32xf32>
    %18 = vector.shape_cast %15 : vector<9x32xf32> to vector<1x9x32xf32>
    tpu.vector_store %arg5[%c0_8, %c0_9, %c0_10], %18 {strides = array<i32>} : memref<1x9x32xf32, #tpu.memory_space<vmem>>, vector<1x9x32xf32>,
    return
  }
  func.func @transform_0(%arg0: i32, %arg1: i32) -> (i32, i32, i32) {
    %c0_i32 = arith.constant 0 : i32
    %c0_i32_0 = arith.constant 0 : i32
    %c0_i32_1 = arith.constant 0 : i32
    return %arg0, %c0_i32, %c0_i32_0 : i32, i32, i32
  }
  func.func @transform_1(%arg0: i32, %arg1: i32) -> (i32, i32, i32) {
    %c0_i32 = arith.constant 0 : i32
    %c0_i32_0 = arith.constant 0 : i32
    %c0_i32_1 = arith.constant 0 : i32
    %c0_i32_2 = arith.constant 0 : i32
    return %c0_i32, %c0_i32_0, %c0_i32_1 : i32, i32, i32
  }
  func.func @transform_2(%arg0: i32, %arg1: i32) -> (i32, i32) {
    %c0_i32 = arith.constant 0 : i32
    %c0_i32_0 = arith.constant 0 : i32
    %c0_i32_1 = arith.constant 0 : i32
    return %c0_i32, %c0_i32_0 : i32, i32
  }
  func.func @transform_3(%arg0: i32, %arg1: i32) -> (i32, i32, i32) {
    %c0_i32 = arith.constant 0 : i32
    %c0_i32_0 = arith.constant 0 : i32
    return %arg0, %arg1, %c0_i32 : i32, i32, i32
  }
}

module attributes {stable_mosaic.version = 11 : i64} {
  func.func @_conv_kernel(%arg0: i32, %arg1: i32, %arg2: memref<1x11x32xf32, #tpu.memory_space<vmem>>, %arg3: memref<3x32x32xbf16, #tpu.memory_space<vmem>>, %arg4: memref<1x32xf32, #tpu.memory_space<vmem>>, %arg5: memref<1x9x32xf32, #tpu.memory_space<vmem>>) attributes {dimension_semantics = [#tpu.dimension_semantics<parallel>, #tpu.dimension_semantics<arbitrary>], iteration_bounds = array<i64: 2, 1>, scalar_prefetch = 0 : i64, scratch_operands = 0 : i64, tpu.core_type = #tpu.core_type<tc>, window_params = [{transform_indices = @transform_0, window_bounds = array<i64: 1, 11, 32>}, {pipeline_mode = #tpu.pipeline_mode<synchronous>, transform_indices = @transform_1, window_bounds = array<i64: 3, 32, 32>}, {pipeline_mode = #tpu.pipeline_mode<synchronous>, transform_indices = @transform_2, window_bounds = array<i64: 1, 32>}, {transform_indices = @transform_3, window_bounds = array<i64: 1, 9, 32>}]} {
    %c9_i32 = arith.constant 9 : i32
    %0 = arith.muli %arg1, %c9_i32 : i32
    %cst = arith.constant 0.000000e+00 : f32
    %1 = vector.broadcast %cst : f32 to vector<9x32xf32>
    %c0_i32 = arith.constant 0 : i32
    %2 = arith.addi %0, %c0_i32 : i32
    %c0 = arith.constant 0 : index
    %3 = arith.index_cast %2 : i32 to index
    %c0_0 = arith.constant 0 : index
    %4 = vector.load %arg2[%c0, %3, %c0_0] : memref<1x11x32xf32, #tpu.memory_space<vmem>>, vector<1x9x32xf32>
    %5 = vector.shape_cast %4 : vector<1x9x32xf32> to vector<9x32xf32>
    %6 = arith.truncf %5 : vector<9x32xf32> to vector<9x32xbf16>
    %c0_1 = arith.constant 0 : index
    %c0_2 = arith.constant 0 : index
    %c0_3 = arith.constant 0 : index
    %7 = vector.load %arg3[%c0_1, %c0_2, %c0_3] : memref<3x32x32xbf16, #tpu.memory_space<vmem>>, vector<1x32x32xbf16>
    %8 = vector.shape_cast %7 : vector<1x32x32xbf16> to vector<32x32xbf16>
    %cst_4 = arith.constant dense<0.000000e+00> : vector<9x32xf32>
    %9 = tpu.matmul %6, %8, %cst_4 {dimension_numbers = #tpu.dot_dimension_numbers<[1], [0], [0], [1], [0, 0, 1, 1], [], []>} : vector<9x32xbf16>, vector<32x32xbf16>, vector<9x32xf32> -> vector<9x32xf32>
    %10 = arith.addf %1, %9 : vector<9x32xf32>
    %c1_i32 = arith.constant 1 : i32
    %11 = arith.addi %0, %c1_i32 : i32
    %c0_5 = arith.constant 0 : index
    %12 = arith.index_cast %11 : i32 to index
    %c0_6 = arith.constant 0 : index
    %13 = vector.load %arg2[%c0_5, %12, %c0_6] : memref<1x11x32xf32, #tpu.memory_space<vmem>>, vector<1x9x32xf32>
    %14 = vector.shape_cast %13 : vector<1x9x32xf32> to vector<9x32xf32>
    %15 = arith.truncf %14 : vector<9x32xf32> to vector<9x32xbf16>
    %c1 = arith.constant 1 : index
    %c0_7 = arith.constant 0 : index
    %c0_8 = arith.constant 0 : index
    %16 = vector.load %arg3[%c1, %c0_7, %c0_8] : memref<3x32x32xbf16, #tpu.memory_space<vmem>>, vector<1x32x32xbf16>
    %17 = vector.shape_cast %16 : vector<1x32x32xbf16> to vector<32x32xbf16>
    %cst_9 = arith.constant dense<0.000000e+00> : vector<9x32xf32>
    %18 = tpu.matmul %15, %17, %cst_9 {dimension_numbers = #tpu.dot_dimension_numbers<[1], [0], [0], [1], [0, 0, 1, 1], [], []>} : vector<9x32xbf16>, vector<32x32xbf16>, vector<9x32xf32> -> vector<9x32xf32>
    %19 = arith.addf %10, %18 : vector<9x32xf32>
    %c2_i32 = arith.constant 2 : i32
    %20 = arith.addi %0, %c2_i32 : i32
    %c0_10 = arith.constant 0 : index
    %21 = arith.index_cast %20 : i32 to index
    %c0_11 = arith.constant 0 : index
    %22 = vector.load %arg2[%c0_10, %21, %c0_11] : memref<1x11x32xf32, #tpu.memory_space<vmem>>, vector<1x9x32xf32>
    %23 = vector.shape_cast %22 : vector<1x9x32xf32> to vector<9x32xf32>
    %24 = arith.truncf %23 : vector<9x32xf32> to vector<9x32xbf16>
    %c2 = arith.constant 2 : index
    %c0_12 = arith.constant 0 : index
    %c0_13 = arith.constant 0 : index
    %25 = vector.load %arg3[%c2, %c0_12, %c0_13] : memref<3x32x32xbf16, #tpu.memory_space<vmem>>, vector<1x32x32xbf16>
    %26 = vector.shape_cast %25 : vector<1x32x32xbf16> to vector<32x32xbf16>
    %cst_14 = arith.constant dense<0.000000e+00> : vector<9x32xf32>
    %27 = tpu.matmul %24, %26, %cst_14 {dimension_numbers = #tpu.dot_dimension_numbers<[1], [0], [0], [1], [0, 0, 1, 1], [], []>} : vector<9x32xbf16>, vector<32x32xbf16>, vector<9x32xf32> -> vector<9x32xf32>
    %28 = arith.addf %19, %27 : vector<9x32xf32>
    %c0_15 = arith.constant 0 : index
    %c0_16 = arith.constant 0 : index
    %29 = vector.load %arg4[%c0_15, %c0_16] : memref<1x32xf32, #tpu.memory_space<vmem>>, vector<1x32xf32>
    %30 = vector.broadcast %29 : vector<1x32xf32> to vector<9x32xf32>
    %31 = arith.addf %28, %30 : vector<9x32xf32>
    %cst_17 = arith.constant 0.000000e+00 : f32
    %32 = vector.broadcast %cst_17 : f32 to vector<9x32xf32>
    %33 = arith.maximumf %31, %32 : vector<9x32xf32>
    %c0_18 = arith.constant 0 : index
    %c0_19 = arith.constant 0 : index
    %c0_20 = arith.constant 0 : index
    %34 = vector.load %arg5[%c0_18, %c0_19, %c0_20] : memref<1x9x32xf32, #tpu.memory_space<vmem>>, vector<1x9x32xf32>
    %35 = vector.shape_cast %34 : vector<1x9x32xf32> to vector<9x32xf32>
    %36 = vector.shape_cast %33 : vector<9x32xf32> to vector<1x9x32xf32>
    tpu.vector_store %arg5[%c0_18, %c0_19, %c0_20], %36 {strides = array<i32>} : memref<1x9x32xf32, #tpu.memory_space<vmem>>, vector<1x9x32xf32>,
    return
  }
  func.func @transform_0(%arg0: i32, %arg1: i32) -> (i32, i32, i32) {
    %c0_i32 = arith.constant 0 : i32
    %c0_i32_0 = arith.constant 0 : i32
    %c0_i32_1 = arith.constant 0 : i32
    return %arg0, %c0_i32, %c0_i32_0 : i32, i32, i32
  }
  func.func @transform_1(%arg0: i32, %arg1: i32) -> (i32, i32, i32) {
    %c0_i32 = arith.constant 0 : i32
    %c0_i32_0 = arith.constant 0 : i32
    %c0_i32_1 = arith.constant 0 : i32
    %c0_i32_2 = arith.constant 0 : i32
    return %c0_i32, %c0_i32_0, %c0_i32_1 : i32, i32, i32
  }
  func.func @transform_2(%arg0: i32, %arg1: i32) -> (i32, i32) {
    %c0_i32 = arith.constant 0 : i32
    %c0_i32_0 = arith.constant 0 : i32
    %c0_i32_1 = arith.constant 0 : i32
    return %c0_i32, %c0_i32_0 : i32, i32
  }
  func.func @transform_3(%arg0: i32, %arg1: i32) -> (i32, i32, i32) {
    %c0_i32 = arith.constant 0 : i32
    %c0_i32_0 = arith.constant 0 : i32
    return %arg0, %arg1, %c0_i32 : i32, i32, i32
  }
}

module attributes {stable_mosaic.version = 11 : i64} {
  func.func @_mha_kernel(%arg0: i32, %arg1: memref<1x9x32xf32, #tpu.memory_space<vmem>>, %arg2: memref<32x96xbf16, #tpu.memory_space<vmem>>, %arg3: memref<1x96xf32, #tpu.memory_space<vmem>>, %arg4: memref<32x32xbf16, #tpu.memory_space<vmem>>, %arg5: memref<1x32xf32, #tpu.memory_space<vmem>>, %arg6: memref<1x9x32xf32, #tpu.memory_space<vmem>>) attributes {dimension_semantics = [#tpu.dimension_semantics<parallel>], iteration_bounds = array<i64: 2>, scalar_prefetch = 0 : i64, scratch_operands = 0 : i64, tpu.core_type = #tpu.core_type<tc>, window_params = [{transform_indices = @transform_0, window_bounds = array<i64: 1, 9, 32>}, {pipeline_mode = #tpu.pipeline_mode<synchronous>, transform_indices = @transform_1, window_bounds = array<i64: 32, 96>}, {pipeline_mode = #tpu.pipeline_mode<synchronous>, transform_indices = @transform_2, window_bounds = array<i64: 1, 96>}, {pipeline_mode = #tpu.pipeline_mode<synchronous>, transform_indices = @transform_3, window_bounds = array<i64: 32, 32>}, {pipeline_mode = #tpu.pipeline_mode<synchronous>, transform_indices = @transform_4, window_bounds = array<i64: 1, 32>}, {transform_indices = @transform_5, window_bounds = array<i64: 1, 9, 32>}]} {
    %c0 = arith.constant 0 : index
    %c0_0 = arith.constant 0 : index
    %c0_1 = arith.constant 0 : index
    %0 = vector.load %arg1[%c0, %c0_0, %c0_1] : memref<1x9x32xf32, #tpu.memory_space<vmem>>, vector<1x9x32xf32>
    %1 = vector.shape_cast %0 : vector<1x9x32xf32> to vector<9x32xf32>
    %2 = arith.truncf %1 : vector<9x32xf32> to vector<9x32xbf16>
    %c0_2 = arith.constant 0 : index
    %c0_3 = arith.constant 0 : index
    %3 = vector.load %arg2[%c0_2, %c0_3] : memref<32x96xbf16, #tpu.memory_space<vmem>>, vector<32x96xbf16>
    %cst = arith.constant dense<0.000000e+00> : vector<9x96xf32>
    %4 = tpu.matmul %2, %3, %cst {dimension_numbers = #tpu.dot_dimension_numbers<[1], [0], [0], [1], [0, 0, 1, 1], [], []>} : vector<9x32xbf16>, vector<32x96xbf16>, vector<9x96xf32> -> vector<9x96xf32>
    %c0_4 = arith.constant 0 : index
    %c0_5 = arith.constant 0 : index
    %5 = vector.load %arg3[%c0_4, %c0_5] : memref<1x96xf32, #tpu.memory_space<vmem>>, vector<1x96xf32>
    %6 = vector.broadcast %5 : vector<1x96xf32> to vector<9x96xf32>
    %7 = arith.addf %4, %6 : vector<9x96xf32>
    %cst_6 = arith.constant 0.000000e+00 : f32
    %8 = vector.broadcast %cst_6 : f32 to vector<9x32xf32>
    %9 = vector.extract_strided_slice %7 {offsets = [0, 0], sizes = [9, 16], strides = [1, 1]} : vector<9x96xf32> to vector<9x16xf32>
    %10 = vector.extract_strided_slice %7 {offsets = [0, 32], sizes = [9, 16], strides = [1, 1]} : vector<9x96xf32> to vector<9x16xf32>
    %11 = vector.extract_strided_slice %7 {offsets = [0, 64], sizes = [9, 16], strides = [1, 1]} : vector<9x96xf32> to vector<9x16xf32>
    %12 = arith.truncf %9 : vector<9x16xf32> to vector<9x16xbf16>
    %13 = arith.truncf %10 : vector<9x16xf32> to vector<9x16xbf16>
    %cst_7 = arith.constant dense<0.000000e+00> : vector<9x9xf32>
    %14 = tpu.matmul %12, %13, %cst_7 {dimension_numbers = #tpu.dot_dimension_numbers<[1], [1], [0], [0], [0, 0, 1, 0], [], []>} : vector<9x16xbf16>, vector<9x16xbf16>, vector<9x9xf32> -> vector<9x9xf32>
    %cst_8 = arith.constant 2.500000e-01 : f32
    %15 = vector.broadcast %cst_8 : f32 to vector<9x9xf32>
    %16 = arith.mulf %14, %15 : vector<9x9xf32>
    %cst_9 = arith.constant dense<0xFF800000> : vector<9xf32>
    %17 = vector.multi_reduction <maximumf>, %16, %cst_9 [1] : vector<9x9xf32> to vector<9xf32>
    %18 = vector.shape_cast %17 : vector<9xf32> to vector<9x1xf32>
    %19 = vector.broadcast %18 : vector<9x1xf32> to vector<9x9xf32>
    %20 = arith.subf %16, %19 : vector<9x9xf32>
    %21 = math.exp %20 : vector<9x9xf32>
    %cst_10 = arith.constant dense<0.000000e+00> : vector<9xf32>
    %22 = vector.multi_reduction <add>, %21, %cst_10 [1] : vector<9x9xf32> to vector<9xf32>
    %23 = vector.shape_cast %22 : vector<9xf32> to vector<9x1xf32>
    %24 = tpu.reciprocal %23 {approx = true} : vector<9x1xf32> -> vector<9x1xf32>
    %25 = vector.broadcast %24 : vector<9x1xf32> to vector<9x9xf32>
    %26 = arith.mulf %21, %25 : vector<9x9xf32>
    %27 = arith.truncf %26 : vector<9x9xf32> to vector<9x9xbf16>
    %28 = arith.truncf %11 : vector<9x16xf32> to vector<9x16xbf16>
    %cst_11 = arith.constant dense<0.000000e+00> : vector<9x16xf32>
    %29 = tpu.matmul %27, %28, %cst_11 {dimension_numbers = #tpu.dot_dimension_numbers<[1], [0], [0], [1], [0, 0, 1, 1], [], []>} : vector<9x9xbf16>, vector<9x16xbf16>, vector<9x16xf32> -> vector<9x16xf32>
    %30 = arith.truncf %29 : vector<9x16xf32> to vector<9x16xbf16>
    %c0_12 = arith.constant 0 : index
    %c0_13 = arith.constant 0 : index
    %31 = vector.load %arg4[%c0_12, %c0_13] : memref<32x32xbf16, #tpu.memory_space<vmem>>, vector<16x32xbf16>
    %cst_14 = arith.constant dense<0.000000e+00> : vector<9x32xf32>
    %32 = tpu.matmul %30, %31, %cst_14 {dimension_numbers = #tpu.dot_dimension_numbers<[1], [0], [0], [1], [0, 0, 1, 1], [], []>} : vector<9x16xbf16>, vector<16x32xbf16>, vector<9x32xf32> -> vector<9x32xf32>
    %33 = arith.addf %8, %32 : vector<9x32xf32>
    %34 = vector.extract_strided_slice %7 {offsets = [0, 16], sizes = [9, 16], strides = [1, 1]} : vector<9x96xf32> to vector<9x16xf32>
    %35 = vector.extract_strided_slice %7 {offsets = [0, 48], sizes = [9, 16], strides = [1, 1]} : vector<9x96xf32> to vector<9x16xf32>
    %36 = vector.extract_strided_slice %7 {offsets = [0, 80], sizes = [9, 16], strides = [1, 1]} : vector<9x96xf32> to vector<9x16xf32>
    %37 = arith.truncf %34 : vector<9x16xf32> to vector<9x16xbf16>
    %38 = arith.truncf %35 : vector<9x16xf32> to vector<9x16xbf16>
    %cst_15 = arith.constant dense<0.000000e+00> : vector<9x9xf32>
    %39 = tpu.matmul %37, %38, %cst_15 {dimension_numbers = #tpu.dot_dimension_numbers<[1], [1], [0], [0], [0, 0, 1, 0], [], []>} : vector<9x16xbf16>, vector<9x16xbf16>, vector<9x9xf32> -> vector<9x9xf32>
    %cst_16 = arith.constant 2.500000e-01 : f32
    %40 = vector.broadcast %cst_16 : f32 to vector<9x9xf32>
    %41 = arith.mulf %39, %40 : vector<9x9xf32>
    %cst_17 = arith.constant dense<0xFF800000> : vector<9xf32>
    %42 = vector.multi_reduction <maximumf>, %41, %cst_17 [1] : vector<9x9xf32> to vector<9xf32>
    %43 = vector.shape_cast %42 : vector<9xf32> to vector<9x1xf32>
    %44 = vector.broadcast %43 : vector<9x1xf32> to vector<9x9xf32>
    %45 = arith.subf %41, %44 : vector<9x9xf32>
    %46 = math.exp %45 : vector<9x9xf32>
    %cst_18 = arith.constant dense<0.000000e+00> : vector<9xf32>
    %47 = vector.multi_reduction <add>, %46, %cst_18 [1] : vector<9x9xf32> to vector<9xf32>
    %48 = vector.shape_cast %47 : vector<9xf32> to vector<9x1xf32>
    %49 = tpu.reciprocal %48 {approx = true} : vector<9x1xf32> -> vector<9x1xf32>
    %50 = vector.broadcast %49 : vector<9x1xf32> to vector<9x9xf32>
    %51 = arith.mulf %46, %50 : vector<9x9xf32>
    %52 = arith.truncf %51 : vector<9x9xf32> to vector<9x9xbf16>
    %53 = arith.truncf %36 : vector<9x16xf32> to vector<9x16xbf16>
    %cst_19 = arith.constant dense<0.000000e+00> : vector<9x16xf32>
    %54 = tpu.matmul %52, %53, %cst_19 {dimension_numbers = #tpu.dot_dimension_numbers<[1], [0], [0], [1], [0, 0, 1, 1], [], []>} : vector<9x9xbf16>, vector<9x16xbf16>, vector<9x16xf32> -> vector<9x16xf32>
    %55 = arith.truncf %54 : vector<9x16xf32> to vector<9x16xbf16>
    %c16 = arith.constant 16 : index
    %c0_20 = arith.constant 0 : index
    %56 = vector.load %arg4[%c16, %c0_20] : memref<32x32xbf16, #tpu.memory_space<vmem>>, vector<16x32xbf16>
    %cst_21 = arith.constant dense<0.000000e+00> : vector<9x32xf32>
    %57 = tpu.matmul %55, %56, %cst_21 {dimension_numbers = #tpu.dot_dimension_numbers<[1], [0], [0], [1], [0, 0, 1, 1], [], []>} : vector<9x16xbf16>, vector<16x32xbf16>, vector<9x32xf32> -> vector<9x32xf32>
    %58 = arith.addf %33, %57 : vector<9x32xf32>
    %59 = arith.addf %1, %58 : vector<9x32xf32>
    %c0_22 = arith.constant 0 : index
    %c0_23 = arith.constant 0 : index
    %60 = vector.load %arg5[%c0_22, %c0_23] : memref<1x32xf32, #tpu.memory_space<vmem>>, vector<1x32xf32>
    %61 = vector.broadcast %60 : vector<1x32xf32> to vector<9x32xf32>
    %62 = arith.addf %59, %61 : vector<9x32xf32>
    %c0_24 = arith.constant 0 : index
    %c0_25 = arith.constant 0 : index
    %c0_26 = arith.constant 0 : index
    %63 = vector.load %arg6[%c0_24, %c0_25, %c0_26] : memref<1x9x32xf32, #tpu.memory_space<vmem>>, vector<1x9x32xf32>
    %64 = vector.shape_cast %63 : vector<1x9x32xf32> to vector<9x32xf32>
    %65 = vector.shape_cast %62 : vector<9x32xf32> to vector<1x9x32xf32>
    tpu.vector_store %arg6[%c0_24, %c0_25, %c0_26], %65 {strides = array<i32>} : memref<1x9x32xf32, #tpu.memory_space<vmem>>, vector<1x9x32xf32>,
    return
  }
  func.func @transform_0(%arg0: i32) -> (i32, i32, i32) {
    %c0_i32 = arith.constant 0 : i32
    %c0_i32_0 = arith.constant 0 : i32
    %c0_i32_1 = arith.constant 0 : i32
    return %arg0, %c0_i32, %c0_i32_0 : i32, i32, i32
  }
  func.func @transform_1(%arg0: i32) -> (i32, i32) {
    %c0_i32 = arith.constant 0 : i32
    %c0_i32_0 = arith.constant 0 : i32
    %c0_i32_1 = arith.constant 0 : i32
    return %c0_i32, %c0_i32_0 : i32, i32
  }
  func.func @transform_2(%arg0: i32) -> (i32, i32) {
    %c0_i32 = arith.constant 0 : i32
    %c0_i32_0 = arith.constant 0 : i32
    %c0_i32_1 = arith.constant 0 : i32
    return %c0_i32, %c0_i32_0 : i32, i32
  }
  func.func @transform_3(%arg0: i32) -> (i32, i32) {
    %c0_i32 = arith.constant 0 : i32
    %c0_i32_0 = arith.constant 0 : i32
    %c0_i32_1 = arith.constant 0 : i32
    return %c0_i32, %c0_i32_0 : i32, i32
  }
  func.func @transform_4(%arg0: i32) -> (i32, i32) {
    %c0_i32 = arith.constant 0 : i32
    %c0_i32_0 = arith.constant 0 : i32
    %c0_i32_1 = arith.constant 0 : i32
    return %c0_i32, %c0_i32_0 : i32, i32
  }
  func.func @transform_5(%arg0: i32) -> (i32, i32, i32) {
    %c0_i32 = arith.constant 0 : i32
    %c0_i32_0 = arith.constant 0 : i32
    %c0_i32_1 = arith.constant 0 : i32
    return %arg0, %c0_i32, %c0_i32_0 : i32, i32, i32
  }
}

module attributes {stable_mosaic.version = 11 : i64} {
  func.func @_conv_kernel(%arg0: i32, %arg1: i32, %arg2: memref<1x11x32xf32, #tpu.memory_space<vmem>>, %arg3: memref<3x32x32xbf16, #tpu.memory_space<vmem>>, %arg4: memref<1x32xf32, #tpu.memory_space<vmem>>, %arg5: memref<1x9x32xf32, #tpu.memory_space<vmem>>, %arg6: memref<1x9x32xf32, #tpu.memory_space<vmem>>) attributes {dimension_semantics = [#tpu.dimension_semantics<parallel>, #tpu.dimension_semantics<arbitrary>], iteration_bounds = array<i64: 2, 1>, scalar_prefetch = 0 : i64, scratch_operands = 0 : i64, tpu.core_type = #tpu.core_type<tc>, window_params = [{transform_indices = @transform_0, window_bounds = array<i64: 1, 11, 32>}, {pipeline_mode = #tpu.pipeline_mode<synchronous>, transform_indices = @transform_1, window_bounds = array<i64: 3, 32, 32>}, {pipeline_mode = #tpu.pipeline_mode<synchronous>, transform_indices = @transform_2, window_bounds = array<i64: 1, 32>}, {transform_indices = @transform_3, window_bounds = array<i64: 1, 9, 32>}, {transform_indices = @transform_4, window_bounds = array<i64: 1, 9, 32>}]} {
    %c9_i32 = arith.constant 9 : i32
    %0 = arith.muli %arg1, %c9_i32 : i32
    %cst = arith.constant 0.000000e+00 : f32
    %1 = vector.broadcast %cst : f32 to vector<9x32xf32>
    %c0_i32 = arith.constant 0 : i32
    %2 = arith.addi %0, %c0_i32 : i32
    %c0 = arith.constant 0 : index
    %3 = arith.index_cast %2 : i32 to index
    %c0_0 = arith.constant 0 : index
    %4 = vector.load %arg2[%c0, %3, %c0_0] : memref<1x11x32xf32, #tpu.memory_space<vmem>>, vector<1x9x32xf32>
    %5 = vector.shape_cast %4 : vector<1x9x32xf32> to vector<9x32xf32>
    %6 = arith.truncf %5 : vector<9x32xf32> to vector<9x32xbf16>
    %c0_1 = arith.constant 0 : index
    %c0_2 = arith.constant 0 : index
    %c0_3 = arith.constant 0 : index
    %7 = vector.load %arg3[%c0_1, %c0_2, %c0_3] : memref<3x32x32xbf16, #tpu.memory_space<vmem>>, vector<1x32x32xbf16>
    %8 = vector.shape_cast %7 : vector<1x32x32xbf16> to vector<32x32xbf16>
    %cst_4 = arith.constant dense<0.000000e+00> : vector<9x32xf32>
    %9 = tpu.matmul %6, %8, %cst_4 {dimension_numbers = #tpu.dot_dimension_numbers<[1], [0], [0], [1], [0, 0, 1, 1], [], []>} : vector<9x32xbf16>, vector<32x32xbf16>, vector<9x32xf32> -> vector<9x32xf32>
    %10 = arith.addf %1, %9 : vector<9x32xf32>
    %c1_i32 = arith.constant 1 : i32
    %11 = arith.addi %0, %c1_i32 : i32
    %c0_5 = arith.constant 0 : index
    %12 = arith.index_cast %11 : i32 to index
    %c0_6 = arith.constant 0 : index
    %13 = vector.load %arg2[%c0_5, %12, %c0_6] : memref<1x11x32xf32, #tpu.memory_space<vmem>>, vector<1x9x32xf32>
    %14 = vector.shape_cast %13 : vector<1x9x32xf32> to vector<9x32xf32>
    %15 = arith.truncf %14 : vector<9x32xf32> to vector<9x32xbf16>
    %c1 = arith.constant 1 : index
    %c0_7 = arith.constant 0 : index
    %c0_8 = arith.constant 0 : index
    %16 = vector.load %arg3[%c1, %c0_7, %c0_8] : memref<3x32x32xbf16, #tpu.memory_space<vmem>>, vector<1x32x32xbf16>
    %17 = vector.shape_cast %16 : vector<1x32x32xbf16> to vector<32x32xbf16>
    %cst_9 = arith.constant dense<0.000000e+00> : vector<9x32xf32>
    %18 = tpu.matmul %15, %17, %cst_9 {dimension_numbers = #tpu.dot_dimension_numbers<[1], [0], [0], [1], [0, 0, 1, 1], [], []>} : vector<9x32xbf16>, vector<32x32xbf16>, vector<9x32xf32> -> vector<9x32xf32>
    %19 = arith.addf %10, %18 : vector<9x32xf32>
    %c2_i32 = arith.constant 2 : i32
    %20 = arith.addi %0, %c2_i32 : i32
    %c0_10 = arith.constant 0 : index
    %21 = arith.index_cast %20 : i32 to index
    %c0_11 = arith.constant 0 : index
    %22 = vector.load %arg2[%c0_10, %21, %c0_11] : memref<1x11x32xf32, #tpu.memory_space<vmem>>, vector<1x9x32xf32>
    %23 = vector.shape_cast %22 : vector<1x9x32xf32> to vector<9x32xf32>
    %24 = arith.truncf %23 : vector<9x32xf32> to vector<9x32xbf16>
    %c2 = arith.constant 2 : index
    %c0_12 = arith.constant 0 : index
    %c0_13 = arith.constant 0 : index
    %25 = vector.load %arg3[%c2, %c0_12, %c0_13] : memref<3x32x32xbf16, #tpu.memory_space<vmem>>, vector<1x32x32xbf16>
    %26 = vector.shape_cast %25 : vector<1x32x32xbf16> to vector<32x32xbf16>
    %cst_14 = arith.constant dense<0.000000e+00> : vector<9x32xf32>
    %27 = tpu.matmul %24, %26, %cst_14 {dimension_numbers = #tpu.dot_dimension_numbers<[1], [0], [0], [1], [0, 0, 1, 1], [], []>} : vector<9x32xbf16>, vector<32x32xbf16>, vector<9x32xf32> -> vector<9x32xf32>
    %28 = arith.addf %19, %27 : vector<9x32xf32>
    %c0_15 = arith.constant 0 : index
    %c0_16 = arith.constant 0 : index
    %29 = vector.load %arg4[%c0_15, %c0_16] : memref<1x32xf32, #tpu.memory_space<vmem>>, vector<1x32xf32>
    %30 = vector.broadcast %29 : vector<1x32xf32> to vector<9x32xf32>
    %31 = arith.addf %28, %30 : vector<9x32xf32>
    %c0_17 = arith.constant 0 : index
    %c0_18 = arith.constant 0 : index
    %c0_19 = arith.constant 0 : index
    %32 = vector.load %arg5[%c0_17, %c0_18, %c0_19] : memref<1x9x32xf32, #tpu.memory_space<vmem>>, vector<1x9x32xf32>
    %33 = vector.shape_cast %32 : vector<1x9x32xf32> to vector<9x32xf32>
    %34 = arith.addf %31, %33 : vector<9x32xf32>
    %c0_20 = arith.constant 0 : index
    %c0_21 = arith.constant 0 : index
    %c0_22 = arith.constant 0 : index
    %35 = vector.load %arg6[%c0_20, %c0_21, %c0_22] : memref<1x9x32xf32, #tpu.memory_space<vmem>>, vector<1x9x32xf32>
    %36 = vector.shape_cast %35 : vector<1x9x32xf32> to vector<9x32xf32>
    %37 = vector.shape_cast %34 : vector<9x32xf32> to vector<1x9x32xf32>
    tpu.vector_store %arg6[%c0_20, %c0_21, %c0_22], %37 {strides = array<i32>} : memref<1x9x32xf32, #tpu.memory_space<vmem>>, vector<1x9x32xf32>,
    return
  }
  func.func @transform_0(%arg0: i32, %arg1: i32) -> (i32, i32, i32) {
    %c0_i32 = arith.constant 0 : i32
    %c0_i32_0 = arith.constant 0 : i32
    %c0_i32_1 = arith.constant 0 : i32
    return %arg0, %c0_i32, %c0_i32_0 : i32, i32, i32
  }
  func.func @transform_1(%arg0: i32, %arg1: i32) -> (i32, i32, i32) {
    %c0_i32 = arith.constant 0 : i32
    %c0_i32_0 = arith.constant 0 : i32
    %c0_i32_1 = arith.constant 0 : i32
    %c0_i32_2 = arith.constant 0 : i32
    return %c0_i32, %c0_i32_0, %c0_i32_1 : i32, i32, i32
  }
  func.func @transform_2(%arg0: i32, %arg1: i32) -> (i32, i32) {
    %c0_i32 = arith.constant 0 : i32
    %c0_i32_0 = arith.constant 0 : i32
    %c0_i32_1 = arith.constant 0 : i32
    return %c0_i32, %c0_i32_0 : i32, i32
  }
  func.func @transform_3(%arg0: i32, %arg1: i32) -> (i32, i32, i32) {
    %c0_i32 = arith.constant 0 : i32
    %c0_i32_0 = arith.constant 0 : i32
    return %arg0, %arg1, %c0_i32 : i32, i32, i32
  }
  func.func @transform_4(%arg0: i32, %arg1: i32) -> (i32, i32, i32) {
    %c0_i32 = arith.constant 0 : i32
    %c0_i32_0 = arith.constant 0 : i32
    return %arg0, %arg1, %c0_i32 : i32, i32, i32
  }
}

module attributes {stable_mosaic.version = 11 : i64} {
  func.func @_conv_kernel(%arg0: i32, %arg1: i32, %arg2: memref<1x18x32xf32, #tpu.memory_space<vmem>>, %arg3: memref<3x32x32xbf16, #tpu.memory_space<vmem>>, %arg4: memref<1x32xf32, #tpu.memory_space<vmem>>, %arg5: memref<1x16x32xf32, #tpu.memory_space<vmem>>, %arg6: memref<1x16x32xf32, #tpu.memory_space<vmem>>) attributes {dimension_semantics = [#tpu.dimension_semantics<parallel>, #tpu.dimension_semantics<arbitrary>], iteration_bounds = array<i64: 2, 1>, scalar_prefetch = 0 : i64, scratch_operands = 0 : i64, tpu.core_type = #tpu.core_type<tc>, window_params = [{transform_indices = @transform_0, window_bounds = array<i64: 1, 18, 32>}, {pipeline_mode = #tpu.pipeline_mode<synchronous>, transform_indices = @transform_1, window_bounds = array<i64: 3, 32, 32>}, {pipeline_mode = #tpu.pipeline_mode<synchronous>, transform_indices = @transform_2, window_bounds = array<i64: 1, 32>}, {transform_indices = @transform_3, window_bounds = array<i64: 1, 16, 32>}, {transform_indices = @transform_4, window_bounds = array<i64: 1, 16, 32>}]} {
    %c16_i32 = arith.constant 16 : i32
    %0 = arith.muli %arg1, %c16_i32 : i32
    %1 = tpu.assume_multiple %0, 8 : i32
    %cst = arith.constant 0.000000e+00 : f32
    %2 = vector.broadcast %cst : f32 to vector<16x32xf32>
    %c0_i32 = arith.constant 0 : i32
    %3 = arith.addi %1, %c0_i32 : i32
    %c0 = arith.constant 0 : index
    %4 = arith.index_cast %3 : i32 to index
    %c0_0 = arith.constant 0 : index
    %5 = vector.load %arg2[%c0, %4, %c0_0] : memref<1x18x32xf32, #tpu.memory_space<vmem>>, vector<1x16x32xf32>
    %6 = vector.shape_cast %5 : vector<1x16x32xf32> to vector<16x32xf32>
    %7 = arith.truncf %6 : vector<16x32xf32> to vector<16x32xbf16>
    %c0_1 = arith.constant 0 : index
    %c0_2 = arith.constant 0 : index
    %c0_3 = arith.constant 0 : index
    %8 = vector.load %arg3[%c0_1, %c0_2, %c0_3] : memref<3x32x32xbf16, #tpu.memory_space<vmem>>, vector<1x32x32xbf16>
    %9 = vector.shape_cast %8 : vector<1x32x32xbf16> to vector<32x32xbf16>
    %cst_4 = arith.constant dense<0.000000e+00> : vector<16x32xf32>
    %10 = tpu.matmul %7, %9, %cst_4 {dimension_numbers = #tpu.dot_dimension_numbers<[1], [0], [0], [1], [0, 0, 1, 1], [], []>} : vector<16x32xbf16>, vector<32x32xbf16>, vector<16x32xf32> -> vector<16x32xf32>
    %11 = arith.addf %2, %10 : vector<16x32xf32>
    %c1_i32 = arith.constant 1 : i32
    %12 = arith.addi %1, %c1_i32 : i32
    %c0_5 = arith.constant 0 : index
    %13 = arith.index_cast %12 : i32 to index
    %c0_6 = arith.constant 0 : index
    %14 = vector.load %arg2[%c0_5, %13, %c0_6] : memref<1x18x32xf32, #tpu.memory_space<vmem>>, vector<1x16x32xf32>
    %15 = vector.shape_cast %14 : vector<1x16x32xf32> to vector<16x32xf32>
    %16 = arith.truncf %15 : vector<16x32xf32> to vector<16x32xbf16>
    %c1 = arith.constant 1 : index
    %c0_7 = arith.constant 0 : index
    %c0_8 = arith.constant 0 : index
    %17 = vector.load %arg3[%c1, %c0_7, %c0_8] : memref<3x32x32xbf16, #tpu.memory_space<vmem>>, vector<1x32x32xbf16>
    %18 = vector.shape_cast %17 : vector<1x32x32xbf16> to vector<32x32xbf16>
    %cst_9 = arith.constant dense<0.000000e+00> : vector<16x32xf32>
    %19 = tpu.matmul %16, %18, %cst_9 {dimension_numbers = #tpu.dot_dimension_numbers<[1], [0], [0], [1], [0, 0, 1, 1], [], []>} : vector<16x32xbf16>, vector<32x32xbf16>, vector<16x32xf32> -> vector<16x32xf32>
    %20 = arith.addf %11, %19 : vector<16x32xf32>
    %c2_i32 = arith.constant 2 : i32
    %21 = arith.addi %1, %c2_i32 : i32
    %c0_10 = arith.constant 0 : index
    %22 = arith.index_cast %21 : i32 to index
    %c0_11 = arith.constant 0 : index
    %23 = vector.load %arg2[%c0_10, %22, %c0_11] : memref<1x18x32xf32, #tpu.memory_space<vmem>>, vector<1x16x32xf32>
    %24 = vector.shape_cast %23 : vector<1x16x32xf32> to vector<16x32xf32>
    %25 = arith.truncf %24 : vector<16x32xf32> to vector<16x32xbf16>
    %c2 = arith.constant 2 : index
    %c0_12 = arith.constant 0 : index
    %c0_13 = arith.constant 0 : index
    %26 = vector.load %arg3[%c2, %c0_12, %c0_13] : memref<3x32x32xbf16, #tpu.memory_space<vmem>>, vector<1x32x32xbf16>
    %27 = vector.shape_cast %26 : vector<1x32x32xbf16> to vector<32x32xbf16>
    %cst_14 = arith.constant dense<0.000000e+00> : vector<16x32xf32>
    %28 = tpu.matmul %25, %27, %cst_14 {dimension_numbers = #tpu.dot_dimension_numbers<[1], [0], [0], [1], [0, 0, 1, 1], [], []>} : vector<16x32xbf16>, vector<32x32xbf16>, vector<16x32xf32> -> vector<16x32xf32>
    %29 = arith.addf %20, %28 : vector<16x32xf32>
    %c0_15 = arith.constant 0 : index
    %c0_16 = arith.constant 0 : index
    %30 = vector.load %arg4[%c0_15, %c0_16] : memref<1x32xf32, #tpu.memory_space<vmem>>, vector<1x32xf32>
    %31 = vector.broadcast %30 : vector<1x32xf32> to vector<16x32xf32>
    %32 = arith.addf %29, %31 : vector<16x32xf32>
    %c0_17 = arith.constant 0 : index
    %c0_18 = arith.constant 0 : index
    %c0_19 = arith.constant 0 : index
    %33 = vector.load %arg5[%c0_17, %c0_18, %c0_19] : memref<1x16x32xf32, #tpu.memory_space<vmem>>, vector<1x16x32xf32>
    %34 = vector.shape_cast %33 : vector<1x16x32xf32> to vector<16x32xf32>
    %35 = arith.addf %32, %34 : vector<16x32xf32>
    %c0_20 = arith.constant 0 : index
    %c0_21 = arith.constant 0 : index
    %c0_22 = arith.constant 0 : index
    %36 = vector.load %arg6[%c0_20, %c0_21, %c0_22] : memref<1x16x32xf32, #tpu.memory_space<vmem>>, vector<1x16x32xf32>
    %37 = vector.shape_cast %36 : vector<1x16x32xf32> to vector<16x32xf32>
    %38 = vector.shape_cast %35 : vector<16x32xf32> to vector<1x16x32xf32>
    tpu.vector_store %arg6[%c0_20, %c0_21, %c0_22], %38 {strides = array<i32>} : memref<1x16x32xf32, #tpu.memory_space<vmem>>, vector<1x16x32xf32>,
    return
  }
  func.func @transform_0(%arg0: i32, %arg1: i32) -> (i32, i32, i32) {
    %c0_i32 = arith.constant 0 : i32
    %c0_i32_0 = arith.constant 0 : i32
    %c0_i32_1 = arith.constant 0 : i32
    return %arg0, %c0_i32, %c0_i32_0 : i32, i32, i32
  }
  func.func @transform_1(%arg0: i32, %arg1: i32) -> (i32, i32, i32) {
    %c0_i32 = arith.constant 0 : i32
    %c0_i32_0 = arith.constant 0 : i32
    %c0_i32_1 = arith.constant 0 : i32
    %c0_i32_2 = arith.constant 0 : i32
    return %c0_i32, %c0_i32_0, %c0_i32_1 : i32, i32, i32
  }
  func.func @transform_2(%arg0: i32, %arg1: i32) -> (i32, i32) {
    %c0_i32 = arith.constant 0 : i32
    %c0_i32_0 = arith.constant 0 : i32
    %c0_i32_1 = arith.constant 0 : i32
    return %c0_i32, %c0_i32_0 : i32, i32
  }
  func.func @transform_3(%arg0: i32, %arg1: i32) -> (i32, i32, i32) {
    %c0_i32 = arith.constant 0 : i32
    %c0_i32_0 = arith.constant 0 : i32
    return %arg0, %arg1, %c0_i32 : i32, i32, i32
  }
  func.func @transform_4(%arg0: i32, %arg1: i32) -> (i32, i32, i32) {
    %c0_i32 = arith.constant 0 : i32
    %c0_i32_0 = arith.constant 0 : i32
    return %arg0, %arg1, %c0_i32 : i32, i32, i32
  }
}

module attributes {stable_mosaic.version = 11 : i64} {
  func.func @_mha_kernel(%arg0: i32, %arg1: memref<1x16x32xf32, #tpu.memory_space<vmem>>, %arg2: memref<32x96xbf16, #tpu.memory_space<vmem>>, %arg3: memref<1x96xf32, #tpu.memory_space<vmem>>, %arg4: memref<32x32xbf16, #tpu.memory_space<vmem>>, %arg5: memref<1x32xf32, #tpu.memory_space<vmem>>, %arg6: memref<1x16x32xf32, #tpu.memory_space<vmem>>) attributes {dimension_semantics = [#tpu.dimension_semantics<parallel>], iteration_bounds = array<i64: 2>, scalar_prefetch = 0 : i64, scratch_operands = 0 : i64, tpu.core_type = #tpu.core_type<tc>, window_params = [{transform_indices = @transform_0, window_bounds = array<i64: 1, 16, 32>}, {pipeline_mode = #tpu.pipeline_mode<synchronous>, transform_indices = @transform_1, window_bounds = array<i64: 32, 96>}, {pipeline_mode = #tpu.pipeline_mode<synchronous>, transform_indices = @transform_2, window_bounds = array<i64: 1, 96>}, {pipeline_mode = #tpu.pipeline_mode<synchronous>, transform_indices = @transform_3, window_bounds = array<i64: 32, 32>}, {pipeline_mode = #tpu.pipeline_mode<synchronous>, transform_indices = @transform_4, window_bounds = array<i64: 1, 32>}, {transform_indices = @transform_5, window_bounds = array<i64: 1, 16, 32>}]} {
    %c0 = arith.constant 0 : index
    %c0_0 = arith.constant 0 : index
    %c0_1 = arith.constant 0 : index
    %0 = vector.load %arg1[%c0, %c0_0, %c0_1] : memref<1x16x32xf32, #tpu.memory_space<vmem>>, vector<1x16x32xf32>
    %1 = vector.shape_cast %0 : vector<1x16x32xf32> to vector<16x32xf32>
    %2 = arith.truncf %1 : vector<16x32xf32> to vector<16x32xbf16>
    %c0_2 = arith.constant 0 : index
    %c0_3 = arith.constant 0 : index
    %3 = vector.load %arg2[%c0_2, %c0_3] : memref<32x96xbf16, #tpu.memory_space<vmem>>, vector<32x96xbf16>
    %cst = arith.constant dense<0.000000e+00> : vector<16x96xf32>
    %4 = tpu.matmul %2, %3, %cst {dimension_numbers = #tpu.dot_dimension_numbers<[1], [0], [0], [1], [0, 0, 1, 1], [], []>} : vector<16x32xbf16>, vector<32x96xbf16>, vector<16x96xf32> -> vector<16x96xf32>
    %c0_4 = arith.constant 0 : index
    %c0_5 = arith.constant 0 : index
    %5 = vector.load %arg3[%c0_4, %c0_5] : memref<1x96xf32, #tpu.memory_space<vmem>>, vector<1x96xf32>
    %6 = vector.broadcast %5 : vector<1x96xf32> to vector<16x96xf32>
    %7 = arith.addf %4, %6 : vector<16x96xf32>
    %cst_6 = arith.constant 0.000000e+00 : f32
    %8 = vector.broadcast %cst_6 : f32 to vector<16x32xf32>
    %9 = vector.extract_strided_slice %7 {offsets = [0, 0], sizes = [16, 16], strides = [1, 1]} : vector<16x96xf32> to vector<16x16xf32>
    %10 = vector.extract_strided_slice %7 {offsets = [0, 32], sizes = [16, 16], strides = [1, 1]} : vector<16x96xf32> to vector<16x16xf32>
    %11 = vector.extract_strided_slice %7 {offsets = [0, 64], sizes = [16, 16], strides = [1, 1]} : vector<16x96xf32> to vector<16x16xf32>
    %12 = arith.truncf %9 : vector<16x16xf32> to vector<16x16xbf16>
    %13 = arith.truncf %10 : vector<16x16xf32> to vector<16x16xbf16>
    %cst_7 = arith.constant dense<0.000000e+00> : vector<16x16xf32>
    %14 = tpu.matmul %12, %13, %cst_7 {dimension_numbers = #tpu.dot_dimension_numbers<[1], [1], [0], [0], [0, 0, 1, 0], [], []>} : vector<16x16xbf16>, vector<16x16xbf16>, vector<16x16xf32> -> vector<16x16xf32>
    %cst_8 = arith.constant 2.500000e-01 : f32
    %15 = vector.broadcast %cst_8 : f32 to vector<16x16xf32>
    %16 = arith.mulf %14, %15 : vector<16x16xf32>
    %cst_9 = arith.constant dense<0xFF800000> : vector<16xf32>
    %17 = vector.multi_reduction <maximumf>, %16, %cst_9 [1] : vector<16x16xf32> to vector<16xf32>
    %18 = vector.shape_cast %17 : vector<16xf32> to vector<16x1xf32>
    %19 = vector.broadcast %18 : vector<16x1xf32> to vector<16x16xf32>
    %20 = arith.subf %16, %19 : vector<16x16xf32>
    %21 = math.exp %20 : vector<16x16xf32>
    %cst_10 = arith.constant dense<0.000000e+00> : vector<16xf32>
    %22 = vector.multi_reduction <add>, %21, %cst_10 [1] : vector<16x16xf32> to vector<16xf32>
    %23 = vector.shape_cast %22 : vector<16xf32> to vector<16x1xf32>
    %24 = tpu.reciprocal %23 {approx = true} : vector<16x1xf32> -> vector<16x1xf32>
    %25 = vector.broadcast %24 : vector<16x1xf32> to vector<16x16xf32>
    %26 = arith.mulf %21, %25 : vector<16x16xf32>
    %27 = arith.truncf %26 : vector<16x16xf32> to vector<16x16xbf16>
    %28 = arith.truncf %11 : vector<16x16xf32> to vector<16x16xbf16>
    %cst_11 = arith.constant dense<0.000000e+00> : vector<16x16xf32>
    %29 = tpu.matmul %27, %28, %cst_11 {dimension_numbers = #tpu.dot_dimension_numbers<[1], [0], [0], [1], [0, 0, 1, 1], [], []>} : vector<16x16xbf16>, vector<16x16xbf16>, vector<16x16xf32> -> vector<16x16xf32>
    %30 = arith.truncf %29 : vector<16x16xf32> to vector<16x16xbf16>
    %c0_12 = arith.constant 0 : index
    %c0_13 = arith.constant 0 : index
    %31 = vector.load %arg4[%c0_12, %c0_13] : memref<32x32xbf16, #tpu.memory_space<vmem>>, vector<16x32xbf16>
    %cst_14 = arith.constant dense<0.000000e+00> : vector<16x32xf32>
    %32 = tpu.matmul %30, %31, %cst_14 {dimension_numbers = #tpu.dot_dimension_numbers<[1], [0], [0], [1], [0, 0, 1, 1], [], []>} : vector<16x16xbf16>, vector<16x32xbf16>, vector<16x32xf32> -> vector<16x32xf32>
    %33 = arith.addf %8, %32 : vector<16x32xf32>
    %34 = vector.extract_strided_slice %7 {offsets = [0, 16], sizes = [16, 16], strides = [1, 1]} : vector<16x96xf32> to vector<16x16xf32>
    %35 = vector.extract_strided_slice %7 {offsets = [0, 48], sizes = [16, 16], strides = [1, 1]} : vector<16x96xf32> to vector<16x16xf32>
    %36 = vector.extract_strided_slice %7 {offsets = [0, 80], sizes = [16, 16], strides = [1, 1]} : vector<16x96xf32> to vector<16x16xf32>
    %37 = arith.truncf %34 : vector<16x16xf32> to vector<16x16xbf16>
    %38 = arith.truncf %35 : vector<16x16xf32> to vector<16x16xbf16>
    %cst_15 = arith.constant dense<0.000000e+00> : vector<16x16xf32>
    %39 = tpu.matmul %37, %38, %cst_15 {dimension_numbers = #tpu.dot_dimension_numbers<[1], [1], [0], [0], [0, 0, 1, 0], [], []>} : vector<16x16xbf16>, vector<16x16xbf16>, vector<16x16xf32> -> vector<16x16xf32>
    %cst_16 = arith.constant 2.500000e-01 : f32
    %40 = vector.broadcast %cst_16 : f32 to vector<16x16xf32>
    %41 = arith.mulf %39, %40 : vector<16x16xf32>
    %cst_17 = arith.constant dense<0xFF800000> : vector<16xf32>
    %42 = vector.multi_reduction <maximumf>, %41, %cst_17 [1] : vector<16x16xf32> to vector<16xf32>
    %43 = vector.shape_cast %42 : vector<16xf32> to vector<16x1xf32>
    %44 = vector.broadcast %43 : vector<16x1xf32> to vector<16x16xf32>
    %45 = arith.subf %41, %44 : vector<16x16xf32>
    %46 = math.exp %45 : vector<16x16xf32>
    %cst_18 = arith.constant dense<0.000000e+00> : vector<16xf32>
    %47 = vector.multi_reduction <add>, %46, %cst_18 [1] : vector<16x16xf32> to vector<16xf32>
    %48 = vector.shape_cast %47 : vector<16xf32> to vector<16x1xf32>
    %49 = tpu.reciprocal %48 {approx = true} : vector<16x1xf32> -> vector<16x1xf32>
    %50 = vector.broadcast %49 : vector<16x1xf32> to vector<16x16xf32>
    %51 = arith.mulf %46, %50 : vector<16x16xf32>
    %52 = arith.truncf %51 : vector<16x16xf32> to vector<16x16xbf16>
    %53 = arith.truncf %36 : vector<16x16xf32> to vector<16x16xbf16>
    %cst_19 = arith.constant dense<0.000000e+00> : vector<16x16xf32>
    %54 = tpu.matmul %52, %53, %cst_19 {dimension_numbers = #tpu.dot_dimension_numbers<[1], [0], [0], [1], [0, 0, 1, 1], [], []>} : vector<16x16xbf16>, vector<16x16xbf16>, vector<16x16xf32> -> vector<16x16xf32>
    %55 = arith.truncf %54 : vector<16x16xf32> to vector<16x16xbf16>
    %c16 = arith.constant 16 : index
    %c0_20 = arith.constant 0 : index
    %56 = vector.load %arg4[%c16, %c0_20] : memref<32x32xbf16, #tpu.memory_space<vmem>>, vector<16x32xbf16>
    %cst_21 = arith.constant dense<0.000000e+00> : vector<16x32xf32>
    %57 = tpu.matmul %55, %56, %cst_21 {dimension_numbers = #tpu.dot_dimension_numbers<[1], [0], [0], [1], [0, 0, 1, 1], [], []>} : vector<16x16xbf16>, vector<16x32xbf16>, vector<16x32xf32> -> vector<16x32xf32>
    %58 = arith.addf %33, %57 : vector<16x32xf32>
    %59 = arith.addf %1, %58 : vector<16x32xf32>
    %c0_22 = arith.constant 0 : index
    %c0_23 = arith.constant 0 : index
    %60 = vector.load %arg5[%c0_22, %c0_23] : memref<1x32xf32, #tpu.memory_space<vmem>>, vector<1x32xf32>
    %61 = vector.broadcast %60 : vector<1x32xf32> to vector<16x32xf32>
    %62 = arith.addf %59, %61 : vector<16x32xf32>
    %c0_24 = arith.constant 0 : index
    %c0_25 = arith.constant 0 : index
    %c0_26 = arith.constant 0 : index
    %63 = vector.load %arg6[%c0_24, %c0_25, %c0_26] : memref<1x16x32xf32, #tpu.memory_space<vmem>>, vector<1x16x32xf32>
    %64 = vector.shape_cast %63 : vector<1x16x32xf32> to vector<16x32xf32>
    %65 = vector.shape_cast %62 : vector<16x32xf32> to vector<1x16x32xf32>
    tpu.vector_store %arg6[%c0_24, %c0_25, %c0_26], %65 {strides = array<i32>} : memref<1x16x32xf32, #tpu.memory_space<vmem>>, vector<1x16x32xf32>,
    return
  }
  func.func @transform_0(%arg0: i32) -> (i32, i32, i32) {
    %c0_i32 = arith.constant 0 : i32
    %c0_i32_0 = arith.constant 0 : i32
    %c0_i32_1 = arith.constant 0 : i32
    return %arg0, %c0_i32, %c0_i32_0 : i32, i32, i32
  }
  func.func @transform_1(%arg0: i32) -> (i32, i32) {
    %c0_i32 = arith.constant 0 : i32
    %c0_i32_0 = arith.constant 0 : i32
    %c0_i32_1 = arith.constant 0 : i32
    return %c0_i32, %c0_i32_0 : i32, i32
  }
  func.func @transform_2(%arg0: i32) -> (i32, i32) {
    %c0_i32 = arith.constant 0 : i32
    %c0_i32_0 = arith.constant 0 : i32
    %c0_i32_1 = arith.constant 0 : i32
    return %c0_i32, %c0_i32_0 : i32, i32
  }
  func.func @transform_3(%arg0: i32) -> (i32, i32) {
    %c0_i32 = arith.constant 0 : i32
    %c0_i32_0 = arith.constant 0 : i32
    %c0_i32_1 = arith.constant 0 : i32
    return %c0_i32, %c0_i32_0 : i32, i32
  }
  func.func @transform_4(%arg0: i32) -> (i32, i32) {
    %c0_i32 = arith.constant 0 : i32
    %c0_i32_0 = arith.constant 0 : i32
    %c0_i32_1 = arith.constant 0 : i32
    return %c0_i32, %c0_i32_0 : i32, i32
  }
  func.func @transform_5(%arg0: i32) -> (i32, i32, i32) {
    %c0_i32 = arith.constant 0 : i32
    %c0_i32_0 = arith.constant 0 : i32
    %c0_i32_1 = arith.constant 0 : i32
    return %arg0, %c0_i32, %c0_i32_0 : i32, i32, i32
  }
}

module attributes {stable_mosaic.version = 11 : i64} {
  func.func @_conv_kernel(%arg0: i32, %arg1: i32, %arg2: memref<1x16x32xf32, #tpu.memory_space<vmem>>, %arg3: memref<1x32x16xbf16, #tpu.memory_space<vmem>>, %arg4: memref<1x16xf32, #tpu.memory_space<vmem>>, %arg5: memref<1x16x16xf32, #tpu.memory_space<vmem>>) attributes {dimension_semantics = [#tpu.dimension_semantics<parallel>, #tpu.dimension_semantics<arbitrary>], iteration_bounds = array<i64: 2, 1>, scalar_prefetch = 0 : i64, scratch_operands = 0 : i64, tpu.core_type = #tpu.core_type<tc>, window_params = [{transform_indices = @transform_0, window_bounds = array<i64: 1, 16, 32>}, {pipeline_mode = #tpu.pipeline_mode<synchronous>, transform_indices = @transform_1, window_bounds = array<i64: 1, 32, 16>}, {pipeline_mode = #tpu.pipeline_mode<synchronous>, transform_indices = @transform_2, window_bounds = array<i64: 1, 16>}, {transform_indices = @transform_3, window_bounds = array<i64: 1, 16, 16>}]} {
    %c16_i32 = arith.constant 16 : i32
    %0 = arith.muli %arg1, %c16_i32 : i32
    %1 = tpu.assume_multiple %0, 8 : i32
    %cst = arith.constant 0.000000e+00 : f32
    %2 = vector.broadcast %cst : f32 to vector<16x16xf32>
    %c0_i32 = arith.constant 0 : i32
    %3 = arith.addi %1, %c0_i32 : i32
    %c0 = arith.constant 0 : index
    %4 = arith.index_cast %3 : i32 to index
    %c0_0 = arith.constant 0 : index
    %5 = vector.load %arg2[%c0, %4, %c0_0] : memref<1x16x32xf32, #tpu.memory_space<vmem>>, vector<1x16x32xf32>
    %6 = vector.shape_cast %5 : vector<1x16x32xf32> to vector<16x32xf32>
    %7 = arith.truncf %6 : vector<16x32xf32> to vector<16x32xbf16>
    %c0_1 = arith.constant 0 : index
    %c0_2 = arith.constant 0 : index
    %c0_3 = arith.constant 0 : index
    %8 = vector.load %arg3[%c0_1, %c0_2, %c0_3] : memref<1x32x16xbf16, #tpu.memory_space<vmem>>, vector<1x32x16xbf16>
    %9 = vector.shape_cast %8 : vector<1x32x16xbf16> to vector<32x16xbf16>
    %cst_4 = arith.constant dense<0.000000e+00> : vector<16x16xf32>
    %10 = tpu.matmul %7, %9, %cst_4 {dimension_numbers = #tpu.dot_dimension_numbers<[1], [0], [0], [1], [0, 0, 1, 1], [], []>} : vector<16x32xbf16>, vector<32x16xbf16>, vector<16x16xf32> -> vector<16x16xf32>
    %11 = arith.addf %2, %10 : vector<16x16xf32>
    %c0_5 = arith.constant 0 : index
    %c0_6 = arith.constant 0 : index
    %12 = vector.load %arg4[%c0_5, %c0_6] : memref<1x16xf32, #tpu.memory_space<vmem>>, vector<1x16xf32>
    %13 = vector.broadcast %12 : vector<1x16xf32> to vector<16x16xf32>
    %14 = arith.addf %11, %13 : vector<16x16xf32>
    %c0_7 = arith.constant 0 : index
    %c0_8 = arith.constant 0 : index
    %c0_9 = arith.constant 0 : index
    %15 = vector.load %arg5[%c0_7, %c0_8, %c0_9] : memref<1x16x16xf32, #tpu.memory_space<vmem>>, vector<1x16x16xf32>
    %16 = vector.shape_cast %15 : vector<1x16x16xf32> to vector<16x16xf32>
    %17 = vector.shape_cast %14 : vector<16x16xf32> to vector<1x16x16xf32>
    tpu.vector_store %arg5[%c0_7, %c0_8, %c0_9], %17 {strides = array<i32>} : memref<1x16x16xf32, #tpu.memory_space<vmem>>, vector<1x16x16xf32>,
    return
  }
  func.func @transform_0(%arg0: i32, %arg1: i32) -> (i32, i32, i32) {
    %c0_i32 = arith.constant 0 : i32
    %c0_i32_0 = arith.constant 0 : i32
    %c0_i32_1 = arith.constant 0 : i32
    return %arg0, %c0_i32, %c0_i32_0 : i32, i32, i32
  }
  func.func @transform_1(%arg0: i32, %arg1: i32) -> (i32, i32, i32) {
    %c0_i32 = arith.constant 0 : i32
    %c0_i32_0 = arith.constant 0 : i32
    %c0_i32_1 = arith.constant 0 : i32
    %c0_i32_2 = arith.constant 0 : i32
    return %c0_i32, %c0_i32_0, %c0_i32_1 : i32, i32, i32
  }
  func.func @transform_2(%arg0: i32, %arg1: i32) -> (i32, i32) {
    %c0_i32 = arith.constant 0 : i32
    %c0_i32_0 = arith.constant 0 : i32
    %c0_i32_1 = arith.constant 0 : i32
    return %c0_i32, %c0_i32_0 : i32, i32
  }
  func.func @transform_3(%arg0: i32, %arg1: i32) -> (i32, i32, i32) {
    %c0_i32 = arith.constant 0 : i32
    %c0_i32_0 = arith.constant 0 : i32
    return %arg0, %arg1, %c0_i32 : i32, i32, i32
  }
}

module attributes {stable_mosaic.version = 11 : i64} {
  func.func @_conv_kernel(%arg0: i32, %arg1: i32, %arg2: memref<1x8x32xf32, #tpu.memory_space<vmem>>, %arg3: memref<1x32x1xbf16, #tpu.memory_space<vmem>>, %arg4: memref<1x1xf32, #tpu.memory_space<vmem>>, %arg5: memref<1x8x1xf32, #tpu.memory_space<vmem>>) attributes {dimension_semantics = [#tpu.dimension_semantics<parallel>, #tpu.dimension_semantics<arbitrary>], iteration_bounds = array<i64: 2, 1>, scalar_prefetch = 0 : i64, scratch_operands = 0 : i64, tpu.core_type = #tpu.core_type<tc>, window_params = [{transform_indices = @transform_0, window_bounds = array<i64: 1, 8, 32>}, {pipeline_mode = #tpu.pipeline_mode<synchronous>, transform_indices = @transform_1, window_bounds = array<i64: 1, 32, 1>}, {pipeline_mode = #tpu.pipeline_mode<synchronous>, transform_indices = @transform_2, window_bounds = array<i64: 1, 1>}, {transform_indices = @transform_3, window_bounds = array<i64: 1, 8, 1>}]} {
    %c8_i32 = arith.constant 8 : i32
    %0 = arith.muli %arg1, %c8_i32 : i32
    %1 = tpu.assume_multiple %0, 8 : i32
    %cst = arith.constant 0.000000e+00 : f32
    %2 = vector.broadcast %cst : f32 to vector<8x1xf32>
    %c0_i32 = arith.constant 0 : i32
    %3 = arith.addi %1, %c0_i32 : i32
    %c0 = arith.constant 0 : index
    %4 = arith.index_cast %3 : i32 to index
    %c0_0 = arith.constant 0 : index
    %5 = vector.load %arg2[%c0, %4, %c0_0] : memref<1x8x32xf32, #tpu.memory_space<vmem>>, vector<1x8x32xf32>
    %6 = vector.shape_cast %5 : vector<1x8x32xf32> to vector<8x32xf32>
    %7 = arith.truncf %6 : vector<8x32xf32> to vector<8x32xbf16>
    %c0_1 = arith.constant 0 : index
    %c0_2 = arith.constant 0 : index
    %c0_3 = arith.constant 0 : index
    %8 = vector.load %arg3[%c0_1, %c0_2, %c0_3] : memref<1x32x1xbf16, #tpu.memory_space<vmem>>, vector<1x32x1xbf16>
    %9 = vector.shape_cast %8 : vector<1x32x1xbf16> to vector<32x1xbf16>
    %cst_4 = arith.constant dense<0.000000e+00> : vector<8x1xf32>
    %10 = tpu.matmul %7, %9, %cst_4 {dimension_numbers = #tpu.dot_dimension_numbers<[1], [0], [0], [1], [0, 0, 1, 1], [], []>} : vector<8x32xbf16>, vector<32x1xbf16>, vector<8x1xf32> -> vector<8x1xf32>
    %11 = arith.addf %2, %10 : vector<8x1xf32>
    %c0_5 = arith.constant 0 : index
    %c0_6 = arith.constant 0 : index
    %12 = vector.load %arg4[%c0_5, %c0_6] : memref<1x1xf32, #tpu.memory_space<vmem>>, vector<1x1xf32>
    %13 = vector.broadcast %12 : vector<1x1xf32> to vector<8x1xf32>
    %14 = arith.addf %11, %13 : vector<8x1xf32>
    %c0_7 = arith.constant 0 : index
    %c0_8 = arith.constant 0 : index
    %c0_9 = arith.constant 0 : index
    %15 = vector.load %arg5[%c0_7, %c0_8, %c0_9] : memref<1x8x1xf32, #tpu.memory_space<vmem>>, vector<1x8x1xf32>
    %16 = vector.shape_cast %15 : vector<1x8x1xf32> to vector<8x1xf32>
    %17 = vector.shape_cast %14 : vector<8x1xf32> to vector<1x8x1xf32>
    tpu.vector_store %arg5[%c0_7, %c0_8, %c0_9], %17 {strides = array<i32>} : memref<1x8x1xf32, #tpu.memory_space<vmem>>, vector<1x8x1xf32>,
    return
  }
  func.func @transform_0(%arg0: i32, %arg1: i32) -> (i32, i32, i32) {
    %c0_i32 = arith.constant 0 : i32
    %c0_i32_0 = arith.constant 0 : i32
    %c0_i32_1 = arith.constant 0 : i32
    return %arg0, %c0_i32, %c0_i32_0 : i32, i32, i32
  }
  func.func @transform_1(%arg0: i32, %arg1: i32) -> (i32, i32, i32) {
    %c0_i32 = arith.constant 0 : i32
    %c0_i32_0 = arith.constant 0 : i32
    %c0_i32_1 = arith.constant 0 : i32
    %c0_i32_2 = arith.constant 0 : i32
    return %c0_i32, %c0_i32_0, %c0_i32_1 : i32, i32, i32
  }
  func.func @transform_2(%arg0: i32, %arg1: i32) -> (i32, i32) {
    %c0_i32 = arith.constant 0 : i32
    %c0_i32_0 = arith.constant 0 : i32
    %c0_i32_1 = arith.constant 0 : i32
    return %c0_i32, %c0_i32_0 : i32, i32
  }
  func.func @transform_3(%arg0: i32, %arg1: i32) -> (i32, i32, i32) {
    %c0_i32 = arith.constant 0 : i32
    %c0_i32_0 = arith.constant 0 : i32
    return %arg0, %arg1, %c0_i32 : i32, i32, i32
  }
}

</mosaic_0001>

<bundles_post_ra>
// kernel: _lambda_.30
= control target key start
LH: loop header
LB: loop body
LE: loop exit
PB: predicated region body
PF: predicated region fallthrough
CT: control target
= control target key end

     0   :  { %s600_s12 = smov 0   ;;  %s602_s13 = smov 0   ;;  %s652_s0 = inlined_call_operand.vmem [shape: f32[2,18,16], index: 0, kind: input, shape index: {}]   ;;  %s653_s1 = inlined_call_operand.vmem [shape: bf16[3,16,32], index: 1, kind: input, shape index: {}]   ;;  %s654_s2 = inlined_call_operand.vmem [shape: f32[1,32], index: 2, kind: input, shape index: {}]   ;;  %s655_s3 = inlined_call_operand.vmem [shape: f32[2,16,32], index: 3, kind: output, shape index: {}]  }
   0x1   :  { %s604_s14 = smov 0  }
   0x2 LB: > { %s25_s15 = sadd.s32 1, %s572_s13  ;;  %p478_p0 = scmp.ge.s32.totalorder %s576_s14, 1  ;;  %s576_s14 = sphi %s604_s14, %s13_s14   ;;  %s572_s13 = sphi %s602_s13, %s657_s13   ;;  %s568_s12 = sphi %s600_s12, %s656_s12  }
   0x3   : > { %p27_p1 = scmp.ge.s32.totalorder %s25_s15, 2  ;;  %p151_p2 = scmp.lt.s32.totalorder %s576_s14, 3 }
   0x5   : > { %s659_s15 = smov (%p27_p1, %s25_s15), 0  ;;  %p152_p3 = pnand %p478_p0, %p151_p2 }
   0x6   : > { %v551_v0 = vld [vmem:[%s653_s1 + $0x8] sm:$0xff] (!%p152_p3)   ;;  %v578_v1 = vmov (!%p152_p3), 0.0   ;;  %v552_v2 = vld [vmem:[%s653_s1] sm:$0xff] (!%p152_p3)   ;;  %vm579_vm0 = vmmov (!%p152_p3), 0   ;;  %p179_p4 = scmp.lt.s32.totalorder (!%p152_p3), %s568_s12, 1  ;;  %v553_v3 = vld [vmem:[%s653_s1 + $0x10] sm:$0xff] (!%p152_p3)  }
   0x7   : > { %155 = sbr.rel (%p152_p3) target bundleno = 250 (0xfa), region = 32  ;;  %506 = vmatprep.subr.bf16.mxu0 (!%p152_p3), %v578_v1  ;;  %512 = vmatprep.subr.bf16.mxu1 (!%p152_p3), %v578_v1  ;;  %vm216_vm1 = vcmask (!%p152_p3), 130048   ;;  %v496_v24 = vld [vmem:[%s654_s2] ss:$0 sm:$0xff] (!%p152_p3)  ;;  %vm382_vm2 = vcmask (!%p152_p3), 261120  }
   0x8   : > { %507 = vmatpush3.bf16.msra.mxu0 (!%p152_p3), %v551_v0  ;;  %508 = vmatprep.mubr.msk.bf16.mxu0 (!%p152_p3), %vm579_vm0, %v578_v1 }
   0x9   : > { %513 = vmatpush3.bf16.msra.mxu1 (!%p152_p3), %v552_v2  ;;  %514 = vmatprep.mubr.msk.bf16.mxu1 (!%p152_p3), %vm579_vm0, %v578_v1 }
   0xa   : > { %518 = vmatprep.subr.bf16.mxu0 (!%p152_p3), %v578_v1 }
   0xe   : > { %s661_s12 = smov (!%p179_p4, %s568_s12), 1 }
   0xf   : > { %s524_s20 = smul.u32 24, %s661_s12  ;;  %s499_s28 = sshll.u32 %s661_s12, 4 }
  0x10   : > { %s192_s4 = scalar_lea.vmem %s655_s3, %s499_s28 }
  0x11   : > { %s183_s23 = scalar_lea.vmem %s652_s0, %s524_s20 }
  0x12   : > { %v482_v4 = vld [vmem:[%s183_s23 + $0x1] sm:$0xff]  ;;  %v483_v5 = vld [vmem:[%s183_s23 + $0x9] sm:$0xff] }
  0x13   : > { %v197_v6 = vld [vmem:[%s183_s23] sm:$0xff]  ;;  %v206_v7 = vpack.c.bf16 %v483_v5, %v482_v4  ;;  %v198_v8 = vld [vmem:[%s183_s23 + $0x8] sm:$0xff] }
  0x14   : > { %v199_v9 = vpack.c.bf16 %v198_v8, %v197_v6  ;;  %v490_v10 = vld [vmem:[%s183_s23 + $0x2] sm:$0xff]  ;;  %v491_v11 = vld [vmem:[%s183_s23 + $0xa] sm:$0xff] }
  0x15   : > { %509 = vmatmul.mubr.msk.bf16.vlgmr.msra.gmra.mrb[0].mxu0 %vm216_vm1, %v206_v7  ;;  %v315_v12 = vpack.c.bf16 %v491_v11, %v490_v10 }
  0x16   : > { %515 = vmatmul.mubr.msk.bf16.vlgmr.msra.gmra.mrb[0].mxu1 %vm216_vm1, %v199_v9  ;;  %519 = vmatpush3.bf16.msra.mxu0 %v553_v3 }
  0x17   : > { %520 = vmatprep.mubr.msk.bf16.mxu0 %vm579_vm0, %v578_v1 }
  0x1d   : > { %521 = vmatmul.mubr.msk.bf16.vlgmr.msra.gmra.mrb[4].mxu0 %vm216_vm1, %v315_v12 }
  0xe8   : > { %v254_v13 = vpop.f32.mrb[0].mxu0 }
  0xe9   : > { %v304_v14 = vpop.f32.mrb[0].mxu1  ;;  %v510_v15 = vpop.f32.mrb[1].mxu0 }
  0xea   : > { %v305_v16 = vadd.f32 %v304_v14, %v254_v13  ;;  %v516_v17 = vpop.f32.mrb[1].mxu1  ;;  %v257_v18 = vpop.f32.mrb[2].mxu0 }
  0xeb   : > { %v307_v19 = vpop.f32.mrb[2].mxu1  ;;  %v511_v20 = vpop.f32.mrb[3].mxu0 }
  0xec   : > { %v308_v21 = vadd.f32 %v307_v19, %v257_v18  ;;  %v517_v22 = vpop.f32.mrb[3].mxu1 }
  0xf0   : > { %v362_v23 = vpop.f32.mrb[4].mxu0 }
  0xf1   : > { %v369_v25 = vadd.f32 %v362_v23, %v305_v16  ;;  %v522_v26 = vpop.f32.mrb[5].mxu0 }
  0xf2   : > { %v365_v27 = vpop.f32.mrb[6].mxu0 }
  0xf3   : > { %v378_v28 = vadd.f32 %v496_v24, %v369_v25  ;;  %v370_v29 = vadd.f32 %v365_v27, %v308_v21  ;;  %v523_v30 = vpop.f32.mrb[7].mxu0 }
  0xf5   : > { %v380_v31 = vmax.f32 %v378_v28, 0.0  ;;  %v379_v32 = vadd.f32 %v496_v24, %v370_v29 }
  0xf7   : > { %383 = vst.msk [vmem:[%s192_s4] sm:$0xff] %vm382_vm2, %v380_v31  ;;  %v381_v33 = vmax.f32 %v379_v32, 0.0 }
  0xf9   : > { %384 = vst.msk [vmem:[%s192_s4 + $0x8] sm:$0xff] %vm382_vm2, %v381_v33 }
  0xfa PF: > { %s13_s14 = sadd.s32 1, %s576_s14   ;;  %s656_s12 = smov %s572_s13 }
  0xfb   : > { %p10_p5 = scmp.ge.s32.totalorder %s13_s14, 4   ;;  %s657_s13 = smov %s659_s15 }
  0xfd   :  { %12 = sbr.rel (!%p10_p5) target bundleno = 2 (0x2), region = 67 }

// kernel: _lambda_.32
= control target key start
LH: loop header
LB: loop body
LE: loop exit
PB: predicated region body
PF: predicated region fallthrough
CT: control target
= control target key end

     0   :  { %s693_s18 = smov 0   ;;  %s695_s19 = smov 0   ;;  %s747_s0 = inlined_call_operand.vmem [shape: f32[2,16,32], index: 0, kind: input, shape index: {}]   ;;  %s748_s1 = inlined_call_operand.vmem [shape: bf16[1,32,16], index: 1, kind: input, shape index: {}]   ;;  %s749_s2 = inlined_call_operand.vmem [shape: f32[1,16], index: 2, kind: input, shape index: {}]   ;;  %s750_s3 = inlined_call_operand.vmem [shape: f32[2,16,8], index: 3, kind: input, shape index: {}]   ;;  %s751_s4 = inlined_call_operand.vmem [shape: f32[2,16,16], index: 4, kind: output, shape index: {0}]   ;;  %s752_s5 = inlined_call_operand.vmem [shape: f32[2,16,8], index: 5, kind: output, shape index: {1}]  }
   0x1   :  { %s697_s20 = smov 0  }
   0x2 LB: > { %s28_s21 = sadd.s32 1, %s653_s19  ;;  %p571_p0 = scmp.ge.s32.totalorder %s657_s20, 1  ;;  %s657_s20 = sphi %s697_s20, %s16_s20   ;;  %s653_s19 = sphi %s695_s19, %s754_s19   ;;  %s649_s18 = sphi %s693_s18, %s753_s18  }
   0x3   : > { %p30_p1 = scmp.ge.s32.totalorder %s28_s21, 2  ;;  %p223_p2 = scmp.lt.s32.totalorder %s657_s20, 3 }
   0x5   : > { %s756_s21 = smov (%p30_p1, %s28_s21), 0  ;;  %p224_p3 = pnand %p571_p0, %p223_p2 }
   0x6   : > { %v629_v0 = vld [vmem:[%s748_s1] sm:$0xff] (!%p224_p3)   ;;  %v659_v1 = vmov (!%p224_p3), 0.0   ;;  %v630_v2 = vld [vmem:[%s748_s1 + $0x8] sm:$0xff] (!%p224_p3)   ;;  %vm660_vm0 = vmmov (!%p224_p3), 0   ;;  %p273_p4 = scmp.lt.s32.totalorder (!%p224_p3), %s649_s18, 1  ;;  %vm337_vm1 = vcmask (!%p224_p3), 261120  }
   0x7   : > { %227 = sbr.rel (%p224_p3) target bundleno = 373 (0x175), region = 36  ;;  %593 = vmatprep.subr.bf16.mxu0 (!%p224_p3), %v659_v1  ;;  %597 = vmatprep.mubr.msk.bf16.mxu0 (!%p224_p3), %vm660_vm0, %v659_v1  ;;  %s661_s8 = smov (!%p224_p3), 8   ;;  %v580_v8 = vld [vmem:[%s749_s2] ss:$0 sm:$0xff] (!%p224_p3)  ;;  %vm382_vm2 = vcmask (!%p224_p3), 130048   ;;  %vm413_vm3 = vcmask (!%p224_p3), 64512  }
   0x8   : > { %594 = vmatpush3.bf16.msra.mxu0 (!%p224_p3), %v629_v0  ;;  %s662_s14 = smov (!%p224_p3), 120  }
   0x9   : > { %595 = vmatprep.subr.bf16.mxu0 (!%p224_p3), %v659_v1 }
   0xc   : > { %596 = vmatpush3.bf16.msra.mxu0 (!%p224_p3), %v630_v2 }
   0xe   : > { %s758_s18 = smov (!%p273_p4, %s649_s18), 1 }
   0xf   : > { %s717_s26 = sshll.u32 %s758_s18, 4 }
  0x10   : > { %s277_s29 = scalar_lea.vmem %s747_s0, %s717_s26  ;;  %s286_s7 = scalar_lea.vmem %s750_s3, %s717_s26 }
  0x11   : > { %v311_v3 = vld [vmem:[%s277_s29] sm:$0xff]  ;;  %v312_v4 = vld [vmem:[%s277_s29 + $0x8] sm:$0xff]  ;;  %s296_s13 = scalar_lea.vmem %s751_s4, %s717_s26  ;;  %s306_s17 = scalar_lea.vmem %s752_s5, %s717_s26 }
  0x12   : > { %v391_v5 = vld [vmem:[%s286_s7] sm:$0xff]  ;;  %v313_v6 = vpack.c.bf16 %v312_v4, %v311_v3  ;;  %v392_v7 = vld [vmem:[%s286_s7 + $0x8] sm:$0xff] }
  0x13   : > { %395 = vrot.lane.b32.xlu0 %v391_v5, %s661_s8 }
  0x14   : > { %598 = vmatmul.mubr.msk.bf16.vlgmr.msra.gmra.mrb[0].mxu0 %vm337_vm1, %v313_v6 }
  0x17   : > { %397 = vrot.lane.b32.xlu0 %v392_v7, %s661_s8 }
  0x85   : > { %v396_v19 = vpop.permute.xlu0 %395 }
  0x89   : > { %v398_v23 = vpop.permute.xlu0 %397 }
  0xe7   : > { %v375_v9 = vpop.f32.mrb[0].mxu0 }
  0xe8   : > { %v376_v10 = vadd.f32 %v580_v8, %v375_v9  ;;  %v599_v11 = vpop.f32.mrb[1].mxu0 }
  0xe9   : > { %v378_v12 = vpop.f32.mrb[2].mxu0 }
  0xea   : > { %383 = vst.msk [vmem:[%s296_s13] sm:$0xff] %vm382_vm2, %v376_v10  ;;  %v385_v13 = vmul.f32 0.5, %v376_v10  ;;  %v379_v14 = vadd.f32 %v580_v8, %v378_v12  ;;  %v600_v15 = vpop.f32.mrb[3].mxu0 }
  0xec   : > { %v387_v16 = vmul.f32 1.442695, %v385_v13  ;;  %384 = vst.msk [vmem:[%s296_s13 + $0x8] sm:$0xff] %vm382_vm2, %v379_v14  ;;  %v386_v17 = vmul.f32 0.5, %v379_v14 }
  0xee   : > { %631 = vpow2.f32 %v387_v16  ;;  %v389_v18 = vmul.f32 1.442695, %v386_v17 }
  0xf0   : > { %633 = vpow2.f32 %v389_v18 }
  0xf8   : > { %v632_v20 = vpop.eup %631 }
  0xf9   : > { %v401_v21 = vmul.f32 %v632_v20, %v396_v19 }
  0xfa   : > { %v634_v22 = vpop.eup %633 }
  0xfb   : > { %405 = vrot.lane.b32.xlu1 %v401_v21, %s662_s14  ;;  %v402_v24 = vmul.f32 %v634_v22, %v398_v23 }
  0xff   : > { %407 = vrot.lane.b32.xlu1 %v402_v24, %s662_s14 }
 0x16d   : > { %v406_v25 = vpop.permute.xlu1 %405 }
 0x16e   : > { %v411_v26 = vadd.f32 %v406_v25, %v376_v10 }
 0x170   : > { %414 = vst.msk [vmem:[%s306_s17] sm:$0xff] %vm413_vm3, %v411_v26 }
 0x171   : > { %v408_v27 = vpop.permute.xlu1 %407 }
 0x172   : > { %v412_v28 = vadd.f32 %v408_v27, %v379_v14 }
 0x174   : > { %415 = vst.msk [vmem:[%s306_s17 + $0x8] sm:$0xff] %vm413_vm3, %v412_v28 }
 0x175 PF: > { %s16_s20 = sadd.s32 1, %s657_s20   ;;  %s753_s18 = smov %s653_s19 }
 0x176   : > { %p13_p5 = scmp.ge.s32.totalorder %s16_s20, 4   ;;  %s754_s19 = smov %s756_s21 }
 0x178   :  { %15 = sbr.rel (!%p13_p5) target bundleno = 2 (0x2), region = 82 }

// kernel: _lambda_.31
= control target key start
LH: loop header
LB: loop body
LE: loop exit
PB: predicated region body
PF: predicated region fallthrough
CT: control target
= control target key end

     0   :  { %s642_s12 = smov 0   ;;  %s644_s13 = smov 0   ;;  %s708_s0 = inlined_call_operand.vmem [shape: f32[2,18,32], index: 0, kind: input, shape index: {}]   ;;  %s709_s1 = inlined_call_operand.vmem [shape: bf16[3,32,32], index: 1, kind: input, shape index: {}]   ;;  %s710_s2 = inlined_call_operand.vmem [shape: f32[1,32], index: 2, kind: input, shape index: {}]   ;;  %s711_s3 = inlined_call_operand.vmem [shape: f32[2,16,32], index: 3, kind: output, shape index: {}]  }
   0x1   :  { %s646_s14 = smov 0  }
   0x2 LB: > { %s25_s15 = sadd.s32 1, %s614_s13  ;;  %p501_p0 = scmp.ge.s32.totalorder %s618_s14, 1  ;;  %s618_s14 = sphi %s646_s14, %s13_s14   ;;  %s614_s13 = sphi %s644_s13, %s713_s13   ;;  %s610_s12 = sphi %s642_s12, %s712_s12  }
   0x3   : > { %p27_p1 = scmp.ge.s32.totalorder %s25_s15, 2  ;;  %p151_p2 = scmp.lt.s32.totalorder %s618_s14, 3 }
   0x5   : > { %s715_s15 = smov (%p27_p1, %s25_s15), 0  ;;  %p152_p3 = pnand %p501_p0, %p151_p2 }
   0x6   : > { %v590_v0 = vld [vmem:[%s709_s1 + $0x10] sm:$0xff] (!%p152_p3)   ;;  %v620_v1 = vmov (!%p152_p3), 0.0   ;;  %v591_v2 = vld [vmem:[%s709_s1] sm:$0xff] (!%p152_p3)   ;;  %v592_v3 = vld [vmem:[%s709_s1 + $0x18] sm:$0xff] (!%p152_p3)   ;;  %vm621_vm0 = vmmov (!%p152_p3), 0   ;;  %p179_p4 = scmp.lt.s32.totalorder (!%p152_p3), %s610_s12, 1 }
   0x7   : > { %155 = sbr.rel (%p152_p3) target bundleno = 250 (0xfa), region = 32  ;;  %539 = vmatprep.subr.bf16.mxu0 (!%p152_p3), %v620_v1  ;;  %547 = vmatprep.subr.bf16.mxu1 (!%p152_p3), %v620_v1  ;;  %v593_v4 = vld [vmem:[%s709_s1 + $0x8] sm:$0xff] (!%p152_p3)   ;;  %v594_v5 = vld [vmem:[%s709_s1 + $0x20] sm:$0xff] (!%p152_p3)   ;;  %vm226_vm1 = vcmask (!%p152_p3), 261120  }
   0x8   : > { %540 = vmatpush3.bf16.msra.mxu0 (!%p152_p3), %v590_v0  ;;  %543 = vmatprep.mubr.msk.bf16.mxu0 (!%p152_p3), %vm621_vm0, %v620_v1  ;;  %v595_v12 = vld [vmem:[%s709_s1 + $0x28] sm:$0xff] (!%p152_p3)   ;;  %v526_v27 = vld [vmem:[%s710_s2] ss:$0 sm:$0xff] (!%p152_p3) }
   0x9   : > { %548 = vmatpush3.bf16.msra.mxu1 (!%p152_p3), %v591_v2  ;;  %541 = vmatprep.subr.bf16.mxu0 (!%p152_p3), %v620_v1 }
   0xa   : > { %549 = vmatprep.subr.bf16.mxu1 (!%p152_p3), %v620_v1  ;;  %551 = vmatprep.mubr.msk.bf16.mxu1 (!%p152_p3), %vm621_vm0, %v620_v1 }
   0xc   : > { %542 = vmatpush3.bf16.msra.mxu0 (!%p152_p3), %v592_v3 }
   0xd   : > { %550 = vmatpush3.bf16.msra.mxu1 (!%p152_p3), %v593_v4  ;;  %555 = vmatprep.subr.bf16.mxu0 (!%p152_p3), %v620_v1 }
   0xe   : > { %s717_s12 = smov (!%p179_p4, %s610_s12), 1 }
   0xf   : > { %s563_s24 = smul.u32 24, %s717_s12  ;;  %s529_s7 = sshll.u32 %s717_s12, 4 }
  0x10   : > { %s192_s10 = scalar_lea.vmem %s711_s3, %s529_s7 }
  0x11   : > { %s183_s27 = scalar_lea.vmem %s708_s0, %s563_s24 }
  0x12   : > { %v505_v6 = vld [vmem:[%s183_s27 + $0x1] sm:$0xff]  ;;  %v506_v7 = vld [vmem:[%s183_s27 + $0x9] sm:$0xff] }
  0x13   : > { %v197_v8 = vld [vmem:[%s183_s27] sm:$0xff]  ;;  %v208_v9 = vpack.c.bf16 %v506_v7, %v505_v6  ;;  %v198_v10 = vld [vmem:[%s183_s27 + $0x8] sm:$0xff] }
  0x14   : > { %v199_v11 = vpack.c.bf16 %v198_v10, %v197_v8  ;;  %v517_v13 = vld [vmem:[%s183_s27 + $0x2] sm:$0xff]  ;;  %v518_v14 = vld [vmem:[%s183_s27 + $0xa] sm:$0xff] }
  0x15   : > { %544 = vmatmul.mubr.msk.bf16.vlgmr.msra.gmra.mrb[0].mxu0 %vm226_vm1, %v208_v9  ;;  %v331_v15 = vpack.c.bf16 %v518_v14, %v517_v13 }
  0x16   : > { %552 = vmatmul.mubr.msk.bf16.vlgmr.msra.gmra.mrb[0].mxu1 %vm226_vm1, %v199_v11  ;;  %556 = vmatpush3.bf16.msra.mxu0 %v594_v5 }
  0x17   : > { %557 = vmatprep.subr.bf16.mxu0 %v620_v1  ;;  %559 = vmatprep.mubr.msk.bf16.mxu0 %vm621_vm0, %v620_v1 }
  0x1a   : > { %558 = vmatpush3.bf16.msra.mxu0 %v595_v12 }
  0x1d   : > { %560 = vmatmul.mubr.msk.bf16.vlgmr.msra.gmra.mrb[4].mxu0 %vm226_vm1, %v331_v15 }
  0xe8   : > { %v264_v16 = vpop.f32.mrb[0].mxu0 }
  0xe9   : > { %v320_v17 = vpop.f32.mrb[0].mxu1  ;;  %v545_v18 = vpop.f32.mrb[1].mxu0 }
  0xea   : > { %v321_v19 = vadd.f32 %v320_v17, %v264_v16  ;;  %v553_v20 = vpop.f32.mrb[1].mxu1  ;;  %v267_v21 = vpop.f32.mrb[2].mxu0 }
  0xeb   : > { %v323_v22 = vpop.f32.mrb[2].mxu1  ;;  %v546_v23 = vpop.f32.mrb[3].mxu0 }
  0xec   : > { %v324_v24 = vadd.f32 %v323_v22, %v267_v21  ;;  %v554_v25 = vpop.f32.mrb[3].mxu1 }
  0xf0   : > { %v386_v26 = vpop.f32.mrb[4].mxu0 }
  0xf1   : > { %v393_v28 = vadd.f32 %v386_v26, %v321_v19  ;;  %v561_v29 = vpop.f32.mrb[5].mxu0 }
  0xf2   : > { %v389_v30 = vpop.f32.mrb[6].mxu0 }
  0xf3   : > { %v402_v31 = vadd.f32 %v526_v27, %v393_v28  ;;  %v394_v32 = vadd.f32 %v389_v30, %v324_v24  ;;  %v562_v33 = vpop.f32.mrb[7].mxu0 }
  0xf5   : > { %v404_v34 = vmax.f32 %v402_v31, 0.0  ;;  %v403_v35 = vadd.f32 %v526_v27, %v394_v32 }
  0xf7   : > { %406 = vst.msk [vmem:[%s192_s10] sm:$0xff] %vm226_vm1, %v404_v34  ;;  %v405_v36 = vmax.f32 %v403_v35, 0.0 }
  0xf9   : > { %407 = vst.msk [vmem:[%s192_s10 + $0x8] sm:$0xff] %vm226_vm1, %v405_v36 }
  0xfa PF: > { %s13_s14 = sadd.s32 1, %s618_s14   ;;  %s712_s12 = smov %s614_s13 }
  0xfb   : > { %p10_p5 = scmp.ge.s32.totalorder %s13_s14, 4   ;;  %s713_s13 = smov %s715_s15 }
  0xfd   :  { %12 = sbr.rel (!%p10_p5) target bundleno = 2 (0x2), region = 67 }

// kernel: _lambda_.36
= control target key start
LH: loop header
LB: loop body
LE: loop exit
PB: predicated region body
PF: predicated region fallthrough
CT: control target
= control target key end

     0   :  { %s581_s12 = smov 0   ;;  %s583_s13 = smov 0   ;;  %s636_s0 = inlined_call_operand.vmem [shape: f32[2,18,4], index: 0, kind: input, shape index: {}]   ;;  %s637_s1 = inlined_call_operand.vmem [shape: bf16[3,4,16], index: 1, kind: input, shape index: {}]   ;;  %s638_s2 = inlined_call_operand.vmem [shape: f32[1,16], index: 2, kind: input, shape index: {}]   ;;  %s639_s3 = inlined_call_operand.vmem [shape: f32[2,16,16], index: 3, kind: output, shape index: {}]  }
   0x1   :  { %s585_s14 = smov 0  }
   0x2 LB: > { %s25_s15 = sadd.s32 1, %s553_s13  ;;  %p467_p0 = scmp.ge.s32.totalorder %s557_s14, 1  ;;  %s557_s14 = sphi %s585_s14, %s13_s14   ;;  %s553_s13 = sphi %s583_s13, %s641_s13   ;;  %s549_s12 = sphi %s581_s12, %s640_s12  }
   0x3   : > { %p27_p1 = scmp.ge.s32.totalorder %s25_s15, 2  ;;  %p151_p2 = scmp.lt.s32.totalorder %s557_s14, 3 }
   0x5   : > { %s643_s15 = smov (%p27_p1, %s25_s15), 0  ;;  %p152_p3 = pnand %p467_p0, %p151_p2 }
   0x6   : > { %v473_v0 = vld [vmem:[%s637_s1 + $0x2] sm:$0x3] (!%p152_p3)  ;;  %vm212_vm0 = vcmask (!%p152_p3), 1041408   ;;  %v200_v1 = vld [vmem:[%s637_s1] sm:$0x3] (!%p152_p3)  ;;  %v559_v2 = vmov (!%p152_p3), 0.0  }
   0x7   : > { %155 = sbr.rel (%p152_p3) target bundleno = 250 (0xfa), region = 32  ;;  %490 = vmatprep.subr.bf16.mxu0 (!%p152_p3), %v559_v2  ;;  %v214_v3 = vsel (!%p152_p3), %vm212_vm0, %v473_v0, 0  ;;  %496 = vmatprep.subr.bf16.mxu1 (!%p152_p3), %v559_v2  ;;  %v261_v4 = vsel (!%p152_p3), %vm212_vm0, %v200_v1, 0  ;;  %p179_p4 = scmp.lt.s32.totalorder (!%p152_p3), %s549_s12, 1  ;;  %vm560_vm1 = vmmov (!%p152_p3), 0   ;;  %vm208_vm2 = vcmask (!%p152_p3), 31744  }
   0x8   : > { %491 = vmatpush3.bf16.msra.mxu0 (!%p152_p3), %v214_v3  ;;  %497 = vmatpush3.bf16.msra.mxu1 (!%p152_p3), %v261_v4  ;;  %v478_v5 = vld [vmem:[%s637_s1 + $0x4] sm:$0x3] (!%p152_p3)  ;;  %v480_v27 = vld [vmem:[%s638_s2] ss:$0 sm:$0xff] (!%p152_p3)  ;;  %vm371_vm3 = vcmask (!%p152_p3), 130048  }
   0x9   : > { %492 = vmatprep.mubr.msk.bf16.mxu0 (!%p152_p3), %vm560_vm1, %v559_v2  ;;  %498 = vmatprep.mubr.msk.bf16.mxu1 (!%p152_p3), %vm560_vm1, %v559_v2  ;;  %v315_v11 = vsel (!%p152_p3), %vm212_vm0, %v478_v5, 0 }
   0xa   : > { %502 = vmatprep.subr.bf16.mxu0 (!%p152_p3), %v559_v2 }
   0xe   : > { %s645_s12 = smov (!%p179_p4, %s549_s12), 1 }
   0xf   : > { %s508_s20 = smul.u32 24, %s645_s12  ;;  %s483_s28 = sshll.u32 %s645_s12, 4 }
  0x10   : > { %s192_s4 = scalar_lea.vmem %s639_s3, %s483_s28 }
  0x11   : > { %s183_s25 = scalar_lea.vmem %s636_s0, %s508_s20 }
  0x12   : > { %v471_v6 = vld [vmem:[%s183_s25 + $0x1] sm:$0xff]  ;;  %v472_v7 = vld [vmem:[%s183_s25 + $0x9] sm:$0xff] }
  0x13   : > { %v197_v8 = vld [vmem:[%s183_s25] sm:$0xff]  ;;  %v205_v9 = vpack.c.bf16 %v472_v7, %v471_v6  ;;  %v198_v10 = vld [vmem:[%s183_s25 + $0x8] sm:$0xff] }
  0x14   : > { %v199_v12 = vpack.c.bf16 %v198_v10, %v197_v8  ;;  %v476_v13 = vld [vmem:[%s183_s25 + $0x2] sm:$0xff]  ;;  %v477_v14 = vld [vmem:[%s183_s25 + $0xa] sm:$0xff] }
  0x15   : > { %493 = vmatmul.mubr.msk.bf16.vlgmr.msra.gmra.mrb[0].mxu0 %vm208_vm2, %v205_v9  ;;  %v308_v15 = vpack.c.bf16 %v477_v14, %v476_v13 }
  0x16   : > { %499 = vmatmul.mubr.msk.bf16.vlgmr.msra.gmra.mrb[0].mxu1 %vm208_vm2, %v199_v12  ;;  %503 = vmatpush3.bf16.msra.mxu0 %v315_v11 }
  0x17   : > { %504 = vmatprep.mubr.msk.bf16.mxu0 %vm560_vm1, %v559_v2 }
  0x1d   : > { %505 = vmatmul.mubr.msk.bf16.vlgmr.msra.gmra.mrb[4].mxu0 %vm208_vm2, %v308_v15 }
  0xe8   : > { %v250_v16 = vpop.f32.mrb[0].mxu0 }
  0xe9   : > { %v297_v17 = vpop.f32.mrb[0].mxu1  ;;  %v494_v18 = vpop.f32.mrb[1].mxu0 }
  0xea   : > { %v298_v19 = vadd.f32 %v297_v17, %v250_v16  ;;  %v500_v20 = vpop.f32.mrb[1].mxu1  ;;  %v253_v21 = vpop.f32.mrb[2].mxu0 }
  0xeb   : > { %v300_v22 = vpop.f32.mrb[2].mxu1  ;;  %v495_v23 = vpop.f32.mrb[3].mxu0 }
  0xec   : > { %v301_v24 = vadd.f32 %v300_v22, %v253_v21  ;;  %v501_v25 = vpop.f32.mrb[3].mxu1 }
  0xf0   : > { %v351_v26 = vpop.f32.mrb[4].mxu0 }
  0xf1   : > { %v358_v28 = vadd.f32 %v351_v26, %v298_v19  ;;  %v506_v29 = vpop.f32.mrb[5].mxu0 }
  0xf2   : > { %v354_v30 = vpop.f32.mrb[6].mxu0 }
  0xf3   : > { %v367_v31 = vadd.f32 %v480_v27, %v358_v28  ;;  %v359_v32 = vadd.f32 %v354_v30, %v301_v24  ;;  %v507_v33 = vpop.f32.mrb[7].mxu0 }
  0xf5   : > { %v369_v34 = vmax.f32 %v367_v31, 0.0  ;;  %v368_v35 = vadd.f32 %v480_v27, %v359_v32 }
  0xf7   : > { %372 = vst.msk [vmem:[%s192_s4] sm:$0xff] %vm371_vm3, %v369_v34  ;;  %v370_v36 = vmax.f32 %v368_v35, 0.0 }
  0xf9   : > { %373 = vst.msk [vmem:[%s192_s4 + $0x8] sm:$0xff] %vm371_vm3, %v370_v36 }
  0xfa PF: > { %s13_s14 = sadd.s32 1, %s557_s14   ;;  %s640_s12 = smov %s553_s13 }
  0xfb   : > { %p10_p5 = scmp.ge.s32.totalorder %s13_s14, 4   ;;  %s641_s13 = smov %s643_s15 }
  0xfd   :  { %12 = sbr.rel (!%p10_p5) target bundleno = 2 (0x2), region = 67 }

// kernel: _lambda_.37
= control target key start
LH: loop header
LB: loop body
LE: loop exit
PB: predicated region body
PF: predicated region fallthrough
CT: control target
= control target key end

     0   :  { %s804_s18 = smov 0   ;;  %s806_s19 = smov 0   ;;  %s867_s0 = inlined_call_operand.vmem [shape: f32[2,18,16], index: 0, kind: input, shape index: {}]   ;;  %s868_s1 = inlined_call_operand.vmem [shape: bf16[3,16,8], index: 1, kind: input, shape index: {}]   ;;  %s869_s2 = inlined_call_operand.vmem [shape: f32[1,8], index: 2, kind: input, shape index: {}]   ;;  %s870_s3 = inlined_call_operand.vmem [shape: f32[2,16,4], index: 3, kind: input, shape index: {}]   ;;  %s871_s4 = inlined_call_operand.vmem [shape: f32[2,16,4], index: 4, kind: output, shape index: {0}]   ;;  %s872_s5 = inlined_call_operand.vmem [shape: f32[2,1,1], index: 5, kind: output, shape index: {1}]  }
   0x1   :  { %s808_s20 = smov 0  }
   0x2 LB: > { %s28_s21 = sadd.s32 1, %s765_s19  ;;  %p663_p0 = scmp.ge.s32.totalorder %s769_s20, 1  ;;  %s769_s20 = sphi %s808_s20, %s16_s20   ;;  %s765_s19 = sphi %s806_s19, %s874_s19   ;;  %s761_s18 = sphi %s804_s18, %s873_s18  }
   0x3   : > { %p30_p1 = scmp.ge.s32.totalorder %s28_s21, 2  ;;  %p221_p2 = scmp.lt.s32.totalorder %s769_s20, 3 }
   0x5   : > { %s876_s21 = smov (%p30_p1, %s28_s21), 0  ;;  %p222_p3 = pnand %p663_p0, %p221_p2 }
   0x6   : > { %v740_v0 = vld [vmem:[%s868_s1 + $0x8] sm:$0xff] (!%p222_p3)   ;;  %v771_v1 = vmov (!%p222_p3), 0.0   ;;  %v741_v2 = vld [vmem:[%s868_s1] sm:$0xff] (!%p222_p3)   ;;  %vm772_vm0 = vmmov (!%p222_p3), 0   ;;  %p265_p4 = scmp.lt.s32.totalorder (!%p222_p3), %s761_s18, 1  ;;  %v742_v3 = vld [vmem:[%s868_s1 + $0x10] sm:$0xff] (!%p222_p3)  }
   0x7   : > { %225 = sbr.rel (%p222_p3) target bundleno = 407 (0x197), region = 36  ;;  %694 = vmatprep.subr.bf16.mxu0 (!%p222_p3), %v771_v1  ;;  %700 = vmatprep.subr.bf16.mxu1 (!%p222_p3), %v771_v1  ;;  %vm315_vm1 = vcmask (!%p222_p3), 130048   ;;  %v683_v24 = vld [vmem:[%s869_s2] ss:$0 sm:$0xff] (!%p222_p3)  ;;  %vm497_vm2 = vcmask (!%p222_p3), 31744   ;;  %s773_s9 = smov (!%p222_p3), 124  }
   0x8   : > { %695 = vmatpush3.bf16.msra.mxu0 (!%p222_p3), %v740_v0  ;;  %696 = vmatprep.mubr.msk.bf16.mxu0 (!%p222_p3), %vm772_vm0, %v771_v1  ;;  %vm517_vm3 = vcmask (!%p222_p3), 0  }
   0x9   : > { %701 = vmatpush3.bf16.msra.mxu1 (!%p222_p3), %v741_v2  ;;  %702 = vmatprep.mubr.msk.bf16.mxu1 (!%p222_p3), %vm772_vm0, %v771_v1 }
   0xa   : > { %706 = vmatprep.subr.bf16.mxu0 (!%p222_p3), %v771_v1 }
   0xe   : > { %s878_s18 = smov (!%p265_p4, %s761_s18), 1 }
   0xf   : > { %s712_s26 = smul.u32 24, %s878_s18  ;;  %s686_s10 = sshll.u32 %s878_s18, 4 }
  0x10   : > { %s278_s13 = scalar_lea.vmem %s870_s3, %s686_s10  ;;  %s288_s16 = scalar_lea.vmem %s871_s4, %s686_s10 }
  0x11   : > { %s269_s29 = scalar_lea.vmem %s867_s0, %s712_s26  ;;  %v479_v37 = vld [vmem:[%s278_s13] sm:$0xff]  ;;  %v480_v41 = vld [vmem:[%s278_s13 + $0x8] sm:$0xff]  ;;  %s292_s23 = scalar_lea.vmem %s872_s5, %s878_s18 }
  0x12   : > { %v669_v4 = vld [vmem:[%s269_s29 + $0x1] sm:$0xff]  ;;  %v670_v5 = vld [vmem:[%s269_s29 + $0x9] sm:$0xff] }
  0x13   : > { %v296_v6 = vld [vmem:[%s269_s29] sm:$0xff]  ;;  %v305_v7 = vpack.c.bf16 %v670_v5, %v669_v4  ;;  %v297_v8 = vld [vmem:[%s269_s29 + $0x8] sm:$0xff] }
  0x14   : > { %v298_v9 = vpack.c.bf16 %v297_v8, %v296_v6  ;;  %v677_v10 = vld [vmem:[%s269_s29 + $0x2] sm:$0xff]  ;;  %v678_v11 = vld [vmem:[%s269_s29 + $0xa] sm:$0xff] }
  0x15   : > { %697 = vmatmul.mubr.msk.bf16.vlgmr.msra.gmra.mrb[0].mxu0 %vm315_vm1, %v305_v7  ;;  %v414_v12 = vpack.c.bf16 %v678_v11, %v677_v10 }
  0x16   : > { %703 = vmatmul.mubr.msk.bf16.vlgmr.msra.gmra.mrb[0].mxu1 %vm315_vm1, %v298_v9  ;;  %707 = vmatpush3.bf16.msra.mxu0 %v742_v3 }
  0x17   : > { %708 = vmatprep.mubr.msk.bf16.mxu0 %vm772_vm0, %v771_v1 }
  0x1d   : > { %709 = vmatmul.mubr.msk.bf16.vlgmr.msra.gmra.mrb[4].mxu0 %vm315_vm1, %v414_v12 }
  0xe8   : > { %v353_v13 = vpop.f32.mrb[0].mxu0 }
  0xe9   : > { %v403_v14 = vpop.f32.mrb[0].mxu1  ;;  %v698_v15 = vpop.f32.mrb[1].mxu0 }
  0xea   : > { %v404_v16 = vadd.f32 %v403_v14, %v353_v13  ;;  %v704_v17 = vpop.f32.mrb[1].mxu1  ;;  %v356_v18 = vpop.f32.mrb[2].mxu0 }
  0xeb   : > { %v406_v19 = vpop.f32.mrb[2].mxu1  ;;  %v699_v20 = vpop.f32.mrb[3].mxu0 }
  0xec   : > { %v407_v21 = vadd.f32 %v406_v19, %v356_v18  ;;  %v705_v22 = vpop.f32.mrb[3].mxu1 }
  0xf0   : > { %v461_v23 = vpop.f32.mrb[4].mxu0 }
  0xf1   : > { %v468_v25 = vadd.f32 %v461_v23, %v404_v16  ;;  %v710_v26 = vpop.f32.mrb[5].mxu0 }
  0xf2   : > { %v464_v27 = vpop.f32.mrb[6].mxu0 }
  0xf3   : > { %v477_v28 = vadd.f32 %v683_v24, %v468_v25  ;;  %v469_v29 = vadd.f32 %v464_v27, %v407_v21  ;;  %v711_v30 = vpop.f32.mrb[7].mxu0 }
  0xf5   : > { %v478_v31 = vadd.f32 %v683_v24, %v469_v29  ;;  %489 = vrot.lane.b32.xlu1 %v477_v28, %s773_s9  ;;  %v500_v32 = vsel %vm497_vm2, %v477_v28, 0.0  ;;  %v481_v34 = vmul.f32 1.442695, %v477_v28 }
  0xf6   : > { %501 = vadd.xlane.f32.xlu0 %v500_v32 }
  0xf7   : > { %v503_v33 = vsel %vm497_vm2, %v478_v31, 0.0  ;;  %743 = vpow2.f32 %v481_v34  ;;  %v483_v35 = vmul.f32 1.442695, %v478_v31 }
  0xf9   : > { %491 = vrot.lane.b32.xlu1 %v478_v31, %s773_s9  ;;  %745 = vpow2.f32 %v483_v35 }
  0xfa   : > { %504 = vadd.xlane.f32.xlu0 %v503_v33 }
 0x101   : > { %v744_v36 = vpop.eup %743 }
 0x102   : > { %v485_v38 = vmul.f32 %v744_v36, %v479_v37 }
 0x103   : > { %v746_v39 = vpop.eup %745 }
 0x104   : > { %v486_v43 = vmul.f32 %v746_v39, %v480_v41 }
 0x167   : > { %v490_v40 = vpop.permute.xlu1 %489 }
 0x168   : > { %v495_v42 = vadd.f32 %v490_v40, %v485_v38 }
 0x16a   : > { %498 = vst.msk [vmem:[%s288_s16] sm:$0xff] %vm497_vm2, %v495_v42 }
 0x16b   : > { %v492_v44 = vpop.permute.xlu1 %491 }
 0x16c   : > { %v496_v45 = vadd.f32 %v492_v44, %v486_v43 }
 0x16e   : > { %499 = vst.msk [vmem:[%s288_s16 + $0x8] sm:$0xff] %vm497_vm2, %v496_v45 }
 0x183   : > { %v502_v46 = vpop.xlane.xlu0 %501 }
 0x187   : > { %v505_v47 = vpop.xlane.xlu0 %504 }
 0x188   : > { %v506_v48 = vadd.f32 %v505_v47, %v502_v46 }
 0x18a   : > { %v507_v49 = vrot.slane %v506_v48, 4 }
 0x18c   : > { %v508_v50 = vadd.f32 %v507_v49, %v506_v48 }
 0x18e   : > { %v509_v51 = vrot.slane %v508_v50, 2 }
 0x190   : > { %v510_v52 = vadd.f32 %v509_v51, %v508_v50 }
 0x192   : > { %v511_v53 = vrot.slane %v510_v52, 1 }
 0x194   : > { %v512_v54 = vadd.f32 %v511_v53, %v510_v52 }
 0x196   : > { %518 = vst.msk [vmem:[%s292_s23] sm:$0x1] %vm517_vm3, %v512_v54 }
 0x197 PF: > { %s16_s20 = sadd.s32 1, %s769_s20   ;;  %s873_s18 = smov %s765_s19 }
 0x198   : > { %p13_p5 = scmp.ge.s32.totalorder %s16_s20, 4   ;;  %s874_s19 = smov %s876_s21 }
 0x19a   :  { %15 = sbr.rel (!%p13_p5) target bundleno = 2 (0x2), region = 94 }

// kernel: _lambda_.52
= control target key start
LH: loop header
LB: loop body
LE: loop exit
PB: predicated region body
PF: predicated region fallthrough
CT: control target
= control target key end

     0   :  { %s863_s12 = smov 0   ;;  %s865_s13 = smov 0   ;;  %s975_s0 = inlined_call_operand.vmem [shape: f32[2,22,8], index: 0, kind: input, shape index: {}]   ;;  %s976_s1 = inlined_call_operand.vmem [shape: bf16[7,8,32], index: 1, kind: input, shape index: {}]   ;;  %s977_s2 = inlined_call_operand.vmem [shape: f32[1,32], index: 2, kind: input, shape index: {}]   ;;  %s978_s3 = inlined_call_operand.vmem [shape: f32[2,16,32], index: 3, kind: output, shape index: {}]  }
   0x1   :  { %s867_s14 = smov 0  }
   0x2 LB: > { %s25_s15 = sadd.s32 1, %s835_s13  ;;  %p701_p0 = scmp.ge.s32.totalorder %s839_s14, 1  ;;  %s839_s14 = sphi %s867_s14, %s13_s14   ;;  %s835_s13 = sphi %s865_s13, %s980_s13   ;;  %s831_s12 = sphi %s863_s12, %s979_s12  }
   0x3   : > { %p27_p1 = scmp.ge.s32.totalorder %s25_s15, 2  ;;  %p151_p2 = scmp.lt.s32.totalorder %s839_s14, 3 }
   0x5   : > { %s982_s15 = smov (%p27_p1, %s25_s15), 0  ;;  %p152_p3 = pnand %p701_p0, %p151_p2 }
   0x6   : > { %v707_v0 = vld [vmem:[%s976_s1 + $0x4] sm:$0xf] (!%p152_p3)  ;;  %vm212_vm0 = vcmask (!%p152_p3), 1043456   ;;  %v200_v1 = vld [vmem:[%s976_s1] sm:$0xf] (!%p152_p3)  ;;  %v841_v2 = vmov (!%p152_p3), 0.0  }
   0x7   : > { %155 = sbr.rel (%p152_p3) target bundleno = 264 (0x108), region = 32  ;;  %748 = vmatprep.subr.bf16.mxu0 (!%p152_p3), %v841_v2  ;;  %v214_v3 = vsel (!%p152_p3), %vm212_vm0, %v707_v0, 0  ;;  %754 = vmatprep.subr.bf16.mxu1 (!%p152_p3), %v841_v2  ;;  %v261_v4 = vsel (!%p152_p3), %vm212_vm0, %v200_v1, 0  ;;  %p179_p4 = scmp.lt.s32.totalorder (!%p152_p3), %s831_s12, 1  ;;  %vm842_vm1 = vmmov (!%p152_p3), 0   ;;  %vm208_vm2 = vcmask (!%p152_p3), 64512  }
   0x8   : > { %749 = vmatpush3.bf16.msra.mxu0 (!%p152_p3), %v214_v3  ;;  %755 = vmatpush3.bf16.msra.mxu1 (!%p152_p3), %v261_v4  ;;  %v712_v5 = vld [vmem:[%s976_s1 + $0x8] sm:$0xf] (!%p152_p3)  ;;  %v716_v6 = vld [vmem:[%s976_s1 + $0xc] sm:$0xf] (!%p152_p3)  ;;  %v720_v19 = vld [vmem:[%s976_s1 + $0x10] sm:$0xf] (!%p152_p3) }
   0x9   : > { %750 = vmatprep.mubr.msk.bf16.mxu0 (!%p152_p3), %vm842_vm1, %v841_v2  ;;  %756 = vmatprep.mubr.msk.bf16.mxu1 (!%p152_p3), %vm842_vm1, %v841_v2  ;;  %v315_v12 = vsel (!%p152_p3), %vm212_vm0, %v712_v5, 0  ;;  %v371_v14 = vsel (!%p152_p3), %vm212_vm0, %v716_v6, 0  ;;  %v724_v21 = vld [vmem:[%s976_s1 + $0x14] sm:$0xf] (!%p152_p3)  ;;  %v427_v23 = vsel (!%p152_p3), %vm212_vm0, %v720_v19, 0  ;;  %vm593_vm3 = vcmask (!%p152_p3), 261120  }
   0xa   : > { %760 = vmatprep.subr.bf16.mxu0 (!%p152_p3), %v841_v2  ;;  %766 = vmatprep.subr.bf16.mxu1 (!%p152_p3), %v841_v2  ;;  %v483_v24 = vsel (!%p152_p3), %vm212_vm0, %v724_v21, 0  ;;  %v728_v29 = vld [vmem:[%s976_s1 + $0x18] sm:$0xf] (!%p152_p3) }
   0xb   : > { %v539_v32 = vsel (!%p152_p3), %vm212_vm0, %v728_v29, 0 }
   0xe   : > { %s984_s12 = smov (!%p179_p4, %s831_s12), 1 }
   0xf   : > { %s790_s20 = smul.u32 24, %s984_s12  ;;  %s733_s7 = sshll.u32 %s984_s12, 4 }
  0x10   : > { %s192_s16 = scalar_lea.vmem %s978_s3, %s733_s7 }
  0x11   : > { %s906_s25 = scalar_lea.vmem %s975_s0, %s790_s20 }
  0x12   : > { %v705_v7 = vld [vmem:[%s906_s25 + $0x1] sm:$0xff]  ;;  %v706_v8 = vld [vmem:[%s906_s25 + $0x9] sm:$0xff] }
  0x13   : > { %v197_v9 = vld [vmem:[%s906_s25] sm:$0xff]  ;;  %v205_v10 = vpack.c.bf16 %v706_v8, %v705_v7  ;;  %v198_v11 = vld [vmem:[%s906_s25 + $0x8] sm:$0xff] }
  0x14   : > { %v199_v13 = vpack.c.bf16 %v198_v11, %v197_v9  ;;  %v710_v15 = vld [vmem:[%s906_s25 + $0x2] sm:$0xff]  ;;  %v711_v16 = vld [vmem:[%s906_s25 + $0xa] sm:$0xff]  ;;  %v730_v7 = vld [vmem:[%s977_s2] ss:$0 sm:$0xff] }
  0x15   : > { %751 = vmatmul.mubr.msk.bf16.vlgmr.msra.gmra.mrb[0].mxu0 %vm208_vm2, %v205_v10  ;;  %v714_v17 = vld [vmem:[%s906_s25 + $0x3] sm:$0xff]  ;;  %v715_v18 = vld [vmem:[%s906_s25 + $0xb] sm:$0xff]  ;;  %v308_v20 = vpack.c.bf16 %v711_v16, %v710_v15 }
  0x16   : > { %757 = vmatmul.mubr.msk.bf16.vlgmr.msra.gmra.mrb[0].mxu1 %vm208_vm2, %v199_v13  ;;  %761 = vmatpush3.bf16.msra.mxu0 %v315_v12  ;;  %v364_v22 = vpack.c.bf16 %v715_v18, %v714_v17  ;;  %v718_v25 = vld [vmem:[%s906_s25 + $0x4] sm:$0xff]  ;;  %v719_v26 = vld [vmem:[%s906_s25 + $0xc] sm:$0xff] }
  0x17   : > { %767 = vmatpush3.bf16.msra.mxu1 %v371_v14  ;;  %762 = vmatprep.mubr.msk.bf16.mxu0 %vm842_vm1, %v841_v2  ;;  %v722_v27 = vld [vmem:[%s906_s25 + $0x5] sm:$0xff]  ;;  %v723_v28 = vld [vmem:[%s906_s25 + $0xd] sm:$0xff]  ;;  %v420_v30 = vpack.c.bf16 %v719_v26, %v718_v25 }
  0x18   : > { %772 = vmatprep.subr.bf16.mxu0 %v841_v2  ;;  %768 = vmatprep.mubr.msk.bf16.mxu1 %vm842_vm1, %v841_v2  ;;  %v476_v31 = vpack.c.bf16 %v723_v28, %v722_v27  ;;  %v726_v33 = vld [vmem:[%s906_s25 + $0x6] sm:$0xff]  ;;  %v727_v34 = vld [vmem:[%s906_s25 + $0xe] sm:$0xff] }
  0x19   : > { %778 = vmatprep.subr.bf16.mxu1 %v841_v2  ;;  %v532_v35 = vpack.c.bf16 %v727_v34, %v726_v33 }
  0x1d   : > { %763 = vmatmul.mubr.msk.bf16.vlgmr.msra.gmra.mrb[4].mxu0 %vm208_vm2, %v308_v20 }
  0x1e   : > { %773 = vmatpush3.bf16.msra.mxu0 %v427_v23  ;;  %769 = vmatmul.mubr.msk.bf16.vlgmr.msra.gmra.mrb[4].mxu1 %vm208_vm2, %v364_v22 }
  0x1f   : > { %779 = vmatpush3.bf16.msra.mxu1 %v483_v24  ;;  %774 = vmatprep.mubr.msk.bf16.mxu0 %vm842_vm1, %v841_v2 }
  0x20   : > { %784 = vmatprep.subr.bf16.mxu0 %v841_v2  ;;  %780 = vmatprep.mubr.msk.bf16.mxu1 %vm842_vm1, %v841_v2 }
  0x25   : > { %775 = vmatmul.mubr.msk.bf16.vlgmr.msra.gmra.mrb[8].mxu0 %vm208_vm2, %v420_v30 }
  0x26   : > { %785 = vmatpush3.bf16.msra.mxu0 %v539_v32  ;;  %781 = vmatmul.mubr.msk.bf16.vlgmr.msra.gmra.mrb[8].mxu1 %vm208_vm2, %v476_v31 }
  0x27   : > { %786 = vmatprep.mubr.msk.bf16.mxu0 %vm842_vm1, %v841_v2 }
  0x2d   : > { %787 = vmatmul.mubr.msk.bf16.vlgmr.msra.gmra.mrb[12].mxu0 %vm208_vm2, %v532_v35 }
  0xe8   : > { %v250_v36 = vpop.f32.mrb[0].mxu0 }
  0xe9   : > { %v297_v37 = vpop.f32.mrb[0].mxu1  ;;  %v752_v38 = vpop.f32.mrb[1].mxu0 }
  0xea   : > { %v298_v39 = vadd.f32 %v297_v37, %v250_v36  ;;  %v758_v40 = vpop.f32.mrb[1].mxu1  ;;  %v253_v41 = vpop.f32.mrb[2].mxu0 }
  0xeb   : > { %v300_v42 = vpop.f32.mrb[2].mxu1  ;;  %v753_v43 = vpop.f32.mrb[3].mxu0 }
  0xec   : > { %v301_v44 = vadd.f32 %v300_v42, %v253_v41  ;;  %v759_v45 = vpop.f32.mrb[3].mxu1 }
  0xf0   : > { %v351_v46 = vpop.f32.mrb[4].mxu0 }
  0xf1   : > { %v358_v47 = vadd.f32 %v351_v46, %v298_v39  ;;  %v764_v48 = vpop.f32.mrb[5].mxu0  ;;  %v407_v49 = vpop.f32.mrb[4].mxu1 }
  0xf2   : > { %v354_v50 = vpop.f32.mrb[6].mxu0  ;;  %v770_v51 = vpop.f32.mrb[5].mxu1 }
  0xf3   : > { %v359_v52 = vadd.f32 %v354_v50, %v301_v44  ;;  %v414_v53 = vadd.f32 %v407_v49, %v358_v47  ;;  %v765_v54 = vpop.f32.mrb[7].mxu0  ;;  %v410_v55 = vpop.f32.mrb[6].mxu1 }
  0xf4   : > { %v771_v56 = vpop.f32.mrb[7].mxu1 }
  0xf5   : > { %v415_v57 = vadd.f32 %v410_v55, %v359_v52 }
  0xf8   : > { %v463_v58 = vpop.f32.mrb[8].mxu0 }
  0xf9   : > { %v470_v59 = vadd.f32 %v463_v58, %v414_v53  ;;  %v776_v60 = vpop.f32.mrb[9].mxu0  ;;  %v519_v61 = vpop.f32.mrb[8].mxu1 }
  0xfa   : > { %v466_v62 = vpop.f32.mrb[10].mxu0  ;;  %v782_v63 = vpop.f32.mrb[9].mxu1 }
  0xfb   : > { %v471_v0 = vadd.f32 %v466_v62, %v415_v57  ;;  %v526_v1 = vadd.f32 %v519_v61, %v470_v59  ;;  %v777_v2 = vpop.f32.mrb[11].mxu0  ;;  %v522_v3 = vpop.f32.mrb[10].mxu1 }
  0xfc   : > { %v783_v4 = vpop.f32.mrb[11].mxu1 }
  0xfd   : > { %v527_v5 = vadd.f32 %v522_v3, %v471_v0 }
 0x100   : > { %v575_v6 = vpop.f32.mrb[12].mxu0 }
 0x101   : > { %v582_v8 = vadd.f32 %v575_v6, %v526_v1  ;;  %v788_v9 = vpop.f32.mrb[13].mxu0 }
 0x102   : > { %v578_v10 = vpop.f32.mrb[14].mxu0 }
 0x103   : > { %v591_v11 = vadd.f32 %v730_v7, %v582_v8  ;;  %v583_v12 = vadd.f32 %v578_v10, %v527_v5  ;;  %v789_v13 = vpop.f32.mrb[15].mxu0 }
 0x105   : > { %594 = vst.msk [vmem:[%s192_s16] sm:$0xff] %vm593_vm3, %v591_v11  ;;  %v592_v14 = vadd.f32 %v730_v7, %v583_v12 }
 0x107   : > { %595 = vst.msk [vmem:[%s192_s16 + $0x8] sm:$0xff] %vm593_vm3, %v592_v14 }
 0x108 PF: > { %s13_s14 = sadd.s32 1, %s839_s14   ;;  %s979_s12 = smov %s835_s13 }
 0x109   : > { %p10_p5 = scmp.ge.s32.totalorder %s13_s14, 4   ;;  %s980_s13 = smov %s982_s15 }
 0x10b   :  { %12 = sbr.rel (!%p10_p5) target bundleno = 2 (0x2), region = 75 }

// kernel: _lambda_.53
= control target key start
LH: loop header
LB: loop body
LE: loop exit
PB: predicated region body
PF: predicated region fallthrough
CT: control target
= control target key end

     0   :  { %s1098_s12 = smov 0   ;;  %s1100_s13 = smov 0   ;;  %s1232_s0 = inlined_call_operand.vmem [shape: f32[2,18,32], index: 0, kind: input, shape index: {}]   ;;  %s1233_s1 = inlined_call_operand.vmem [shape: bf16[4,32,16], index: 1, kind: input, shape index: {}]   ;;  %s1234_s2 = inlined_call_operand.vmem [shape: f32[1,16], index: 2, kind: input, shape index: {}]   ;;  %s1235_s3 = inlined_call_operand.vmem [shape: f32[2,16,32], index: 3, kind: output, shape index: {}]  }
   0x1   :  { %s1102_s14 = smov 0  }
   0x2 LB: > { %s25_s15 = sadd.s32 1, %s1069_s13  ;;  %p854_p0 = scmp.ge.s32.totalorder %s1073_s14, 1  ;;  %s1073_s14 = sphi %s1102_s14, %s13_s14   ;;  %s1069_s13 = sphi %s1100_s13, %s1237_s13   ;;  %s1065_s12 = sphi %s1098_s12, %s1236_s12  }
   0x3   : > { %p27_p1 = scmp.ge.s32.totalorder %s25_s15, 2  ;;  %p151_p2 = scmp.lt.s32.totalorder %s1073_s14, 3 }
   0x5   : > { %s1239_s15 = smov (%p27_p1, %s25_s15), 0  ;;  %p152_p3 = pnand %p854_p0, %p151_p2 }
   0x6   : > { %v1035_v0 = vld [vmem:[%s1233_s1 + $0x10] sm:$0xff] (!%p152_p3)   ;;  %v1075_v1 = vmov (!%p152_p3), 0.0   ;;  %v1036_v2 = vld [vmem:[%s1233_s1] sm:$0xff] (!%p152_p3)   ;;  %v1037_v3 = vld [vmem:[%s1233_s1 + $0x18] sm:$0xff] (!%p152_p3)   ;;  %vm1076_vm0 = vmmov (!%p152_p3), 0   ;;  %p179_p4 = scmp.lt.s32.totalorder (!%p152_p3), %s1065_s12, 1 }
   0x7   : > { %155 = sbr.rel (%p152_p3) target bundleno = 387 (0x183), region = 32  ;;  %943 = vmatprep.subr.bf16.mxu0 (!%p152_p3), %v1075_v1  ;;  %951 = vmatprep.subr.bf16.mxu1 (!%p152_p3), %v1075_v1  ;;  %v1038_v4 = vld [vmem:[%s1233_s1 + $0x8] sm:$0xff] (!%p152_p3)   ;;  %vm238_vm1 = vcmask (!%p152_p3), 261120   ;;  %v1039_v17 = vld [vmem:[%s1233_s1 + $0x20] sm:$0xff] (!%p152_p3)   ;;  %v1040_v20 = vld [vmem:[%s1233_s1 + $0x30] sm:$0xff] (!%p152_p3)   ;;  %vm482_vm8 = vcmask (!%p152_p3), 130048  }
   0x8   : > { %944 = vmatpush3.bf16.msra.mxu0 (!%p152_p3), %v1035_v0  ;;  %947 = vmatprep.mubr.msk.bf16.mxu0 (!%p152_p3), %vm1076_vm0, %v1075_v1  ;;  %v1041_v25 = vld [vmem:[%s1233_s1 + $0x28] sm:$0xff] (!%p152_p3)   ;;  %v1042_v26 = vld [vmem:[%s1233_s1 + $0x38] sm:$0xff] (!%p152_p3)   ;;  %v1043_v29 = vld [vmem:[%s1233_s1 + $0x10] sm:$0xff] (!%p152_p3)   ;;  %vm758_vm9 = vcmask (!%p152_p3), 261248  }
   0x9   : > { %952 = vmatpush3.bf16.msra.mxu1 (!%p152_p3), %v1036_v2  ;;  %945 = vmatprep.subr.bf16.mxu0 (!%p152_p3), %v1075_v1  ;;  %v1044_v31 = vld [vmem:[%s1233_s1] sm:$0xff] (!%p152_p3)   ;;  %v1045_v32 = vld [vmem:[%s1233_s1 + $0x18] sm:$0xff] (!%p152_p3)   ;;  %v1046_v33 = vld [vmem:[%s1233_s1 + $0x8] sm:$0xff] (!%p152_p3)  }
   0xa   : > { %953 = vmatprep.subr.bf16.mxu1 (!%p152_p3), %v1075_v1  ;;  %955 = vmatprep.mubr.msk.bf16.mxu1 (!%p152_p3), %vm1076_vm0, %v1075_v1  ;;  %v1047_v34 = vld [vmem:[%s1233_s1 + $0x20] sm:$0xff] (!%p152_p3)   ;;  %v1048_v35 = vld [vmem:[%s1233_s1 + $0x30] sm:$0xff] (!%p152_p3)   ;;  %v1049_v36 = vld [vmem:[%s1233_s1 + $0x28] sm:$0xff] (!%p152_p3)  }
   0xb   : > { %v1050_v37 = vld [vmem:[%s1233_s1 + $0x38] sm:$0xff] (!%p152_p3)   ;;  %v886_v52 = vld [vmem:[%s1234_s2] ss:$0 sm:$0xff] (!%p152_p3) }
   0xc   : > { %946 = vmatpush3.bf16.msra.mxu0 (!%p152_p3), %v1037_v3 }
   0xd   : > { %954 = vmatpush3.bf16.msra.mxu1 (!%p152_p3), %v1038_v4  ;;  %959 = vmatprep.subr.bf16.mxu0 (!%p152_p3), %v1075_v1 }
   0xe   : > { %s1241_s12 = smov (!%p179_p4, %s1065_s12), 1  ;;  %967 = vmatprep.subr.bf16.mxu1 %v1075_v1 }
   0xf   : > { %s1007_s24 = smul.u32 24, %s1241_s12  ;;  %s918_s29 = sshll.u32 %s1241_s12, 4 }
  0x10   : > { %s1217_s7 = scalar_lea.vmem %s1235_s3, %s918_s29  ;;  %s1077_s12 = smov 16  }
  0x11   : > { %s183_s27 = scalar_lea.vmem %s1232_s0, %s1007_s24 }
  0x12   : > { %v858_v5 = vld [vmem:[%s183_s27 + $0x1] sm:$0xff]  ;;  %v859_v6 = vld [vmem:[%s183_s27 + $0x9] sm:$0xff] }
  0x13   : > { %v197_v7 = vld [vmem:[%s183_s27] sm:$0xff]  ;;  %vm214_vm2 = vcmp.ge.f32.partialorder %v858_v5, 0.0  ;;  %vm215_vm3 = vcmp.ge.f32.partialorder %v859_v6, 0.0  ;;  %v216_v8 = vmul.f32 0.1, %v858_v5  ;;  %v198_v10 = vld [vmem:[%s183_s27 + $0x8] sm:$0xff] }
  0x14   : > { %v217_v9 = vmul.f32 0.1, %v859_v6  ;;  %vm199_vm4 = vcmp.ge.f32.partialorder %v197_v7, 0.0  ;;  %v201_v11 = vmul.f32 0.1, %v197_v7  ;;  %v877_v12 = vld [vmem:[%s183_s27 + $0x2] sm:$0xff] }
  0x15   : > { %v878_v13 = vld [vmem:[%s183_s27 + $0xa] sm:$0xff]  ;;  %v218_v14 = vsel %vm214_vm2, %v858_v5, %v216_v8  ;;  %vm200_vm5 = vcmp.ge.f32.partialorder %v198_v10, 0.0  ;;  %v202_v16 = vmul.f32 0.1, %v198_v10  ;;  %v405_v22 = vmul.f32 0.1, %v877_v12 }
  0x16   : > { %v219_v15 = vsel %vm215_vm3, %v859_v6, %v217_v9  ;;  %v203_v19 = vsel %vm199_vm4, %v197_v7, %v201_v11  ;;  %v406_v23 = vmul.f32 0.1, %v878_v13  ;;  %vm403_vm6 = vcmp.ge.f32.partialorder %v877_v12, 0.0 }
  0x17   : > { %v220_v18 = vpack.c.bf16 %v219_v15, %v218_v14  ;;  %v204_v21 = vsel %vm200_vm5, %v198_v10, %v202_v16  ;;  %vm404_vm7 = vcmp.ge.f32.partialorder %v878_v13, 0.0  ;;  %v407_v27 = vsel %vm403_vm6, %v877_v12, %v405_v22 }
  0x18   : > { %v205_v24 = vpack.c.bf16 %v204_v21, %v203_v19  ;;  %v408_v28 = vsel %vm404_vm7, %v878_v13, %v406_v23 }
  0x19   : > { %948 = vmatmul.mubr.msk.bf16.vlgmr.msra.gmra.mrb[0].mxu0 %vm238_vm1, %v220_v18  ;;  %v409_v30 = vpack.c.bf16 %v408_v28, %v407_v27 }
  0x1a   : > { %960 = vmatpush3.bf16.msra.mxu0 %v1039_v17  ;;  %963 = vmatprep.mubr.msk.bf16.mxu0 %vm1076_vm0, %v1075_v1 }
  0x1b   : > { %956 = vmatmul.mubr.msk.bf16.vlgmr.msra.gmra.mrb[0].mxu1 %vm238_vm1, %v205_v24  ;;  %961 = vmatprep.subr.bf16.mxu0 %v1075_v1 }
  0x1c   : > { %968 = vmatpush3.bf16.msra.mxu1 %v1040_v20  ;;  %971 = vmatprep.mubr.msk.bf16.mxu1 %vm1076_vm0, %v1075_v1 }
  0x1d   : > { %969 = vmatprep.subr.bf16.mxu1 %v1075_v1 }
  0x1e   : > { %962 = vmatpush3.bf16.msra.mxu0 %v1041_v25 }
  0x1f   : > { %975 = vmatprep.subr.bf16.mxu0 %v1075_v1 }
  0x20   : > { %970 = vmatpush3.bf16.msra.mxu1 %v1042_v26 }
  0x21   : > { %964 = vmatmul.mubr.msk.bf16.vlgmr.msra.gmra.mrb[4].mxu0 %vm238_vm1, %v220_v18  ;;  %983 = vmatprep.subr.bf16.mxu1 %v1075_v1 }
  0x22   : > { %976 = vmatpush3.bf16.msra.mxu0 %v1043_v29  ;;  %979 = vmatprep.mubr.msk.bf16.mxu0 %vm1076_vm0, %v1075_v1 }
  0x23   : > { %972 = vmatmul.mubr.msk.bf16.vlgmr.msra.gmra.mrb[4].mxu1 %vm238_vm1, %v409_v30  ;;  %977 = vmatprep.subr.bf16.mxu0 %v1075_v1 }
  0x24   : > { %984 = vmatpush3.bf16.msra.mxu1 %v1044_v31  ;;  %987 = vmatprep.mubr.msk.bf16.mxu1 %vm1076_vm0, %v1075_v1 }
  0x25   : > { %985 = vmatprep.subr.bf16.mxu1 %v1075_v1 }
  0x26   : > { %978 = vmatpush3.bf16.msra.mxu0 %v1045_v32 }
  0x27   : > { %991 = vmatprep.subr.bf16.mxu0 %v1075_v1 }
  0x28   : > { %986 = vmatpush3.bf16.msra.mxu1 %v1046_v33 }
  0x29   : > { %980 = vmatmul.mubr.msk.bf16.vlgmr.msra.gmra.mrb[8].mxu0 %vm238_vm1, %v220_v18  ;;  %999 = vmatprep.subr.bf16.mxu1 %v1075_v1 }
  0x2a   : > { %992 = vmatpush3.bf16.msra.mxu0 %v1047_v34  ;;  %995 = vmatprep.mubr.msk.bf16.mxu0 %vm1076_vm0, %v1075_v1 }
  0x2b   : > { %988 = vmatmul.mubr.msk.bf16.vlgmr.msra.gmra.mrb[8].mxu1 %vm238_vm1, %v220_v18  ;;  %993 = vmatprep.subr.bf16.mxu0 %v1075_v1 }
  0x2c   : > { %1000 = vmatpush3.bf16.msra.mxu1 %v1048_v35  ;;  %1003 = vmatprep.mubr.msk.bf16.mxu1 %vm1076_vm0, %v1075_v1 }
  0x2d   : > { %1001 = vmatprep.subr.bf16.mxu1 %v1075_v1 }
  0x2e   : > { %994 = vmatpush3.bf16.msra.mxu0 %v1049_v36 }
  0x30   : > { %1002 = vmatpush3.bf16.msra.mxu1 %v1050_v37 }
  0x31   : > { %996 = vmatmul.mubr.msk.bf16.vlgmr.msra.gmra.mrb[12].mxu0 %vm238_vm1, %v409_v30 }
  0x33   : > { %1004 = vmatmul.mubr.msk.bf16.vlgmr.msra.gmra.mrb[12].mxu1 %vm238_vm1, %v409_v30 }
  0xec   : > { %v276_v38 = vpop.f32.mrb[0].mxu0 }
  0xed   : > { %v949_v39 = vpop.f32.mrb[1].mxu0 }
  0xee   : > { %v332_v40 = vpop.f32.mrb[0].mxu1  ;;  %v279_v41 = vpop.f32.mrb[2].mxu0 }
  0xef   : > { %v333_v42 = vadd.f32 %v332_v40, %v276_v38  ;;  %v957_v43 = vpop.f32.mrb[1].mxu1  ;;  %v950_v44 = vpop.f32.mrb[3].mxu0 }
  0xf0   : > { %v335_v45 = vpop.f32.mrb[2].mxu1 }
  0xf1   : > { %v336_v46 = vadd.f32 %v335_v45, %v279_v41  ;;  %v958_v47 = vpop.f32.mrb[3].mxu1 }
  0xf4   : > { %v390_v48 = vpop.f32.mrb[4].mxu0 }
  0xf5   : > { %v397_v49 = vadd.f32 %v390_v48, %v333_v42  ;;  %v965_v50 = vpop.f32.mrb[5].mxu0 }
  0xf6   : > { %v464_v51 = vpop.f32.mrb[4].mxu1  ;;  %v393_v53 = vpop.f32.mrb[6].mxu0 }
  0xf7   : > { %v471_v54 = vadd.f32 %v464_v51, %v397_v49  ;;  %v973_v55 = vpop.f32.mrb[5].mxu1  ;;  %v398_v56 = vadd.f32 %v393_v53, %v336_v46  ;;  %v966_v57 = vpop.f32.mrb[7].mxu0 }
  0xf8   : > { %v467_v58 = vpop.f32.mrb[6].mxu1 }
  0xf9   : > { %v480_v59 = vadd.f32 %v886_v52, %v471_v54  ;;  %v472_v60 = vadd.f32 %v467_v58, %v398_v56  ;;  %v974_v61 = vpop.f32.mrb[7].mxu1 }
  0xfb   : > { %483 = vst.msk [vmem:[%s1217_s7] sm:$0xff] %vm482_vm8, %v480_v59  ;;  %v481_v62 = vadd.f32 %v886_v52, %v472_v60 }
  0xfc   : > { %v551_v63 = vpop.f32.mrb[8].mxu0 }
  0xfd   : > { %484 = vst.msk [vmem:[%s1217_s7 + $0x8] sm:$0xff] %vm482_vm8, %v481_v62  ;;  %v981_v0 = vpop.f32.mrb[9].mxu0 }
  0xfe   : > { %v604_v1 = vpop.f32.mrb[8].mxu1  ;;  %v554_v2 = vpop.f32.mrb[10].mxu0 }
  0xff   : > { %v605_v3 = vadd.f32 %v604_v1, %v551_v63  ;;  %v989_v4 = vpop.f32.mrb[9].mxu1  ;;  %v982_v5 = vpop.f32.mrb[11].mxu0 }
 0x100   : > { %v607_v6 = vpop.f32.mrb[10].mxu1 }
 0x101   : > { %v608_v7 = vadd.f32 %v607_v6, %v554_v2  ;;  %v990_v8 = vpop.f32.mrb[11].mxu1 }
 0x104   : > { %v673_v9 = vpop.f32.mrb[12].mxu0 }
 0x105   : > { %v680_v10 = vadd.f32 %v673_v9, %v605_v3  ;;  %v997_v11 = vpop.f32.mrb[13].mxu0 }
 0x106   : > { %v732_v12 = vpop.f32.mrb[12].mxu1  ;;  %v676_v13 = vpop.f32.mrb[14].mxu0 }
 0x107   : > { %v739_v14 = vadd.f32 %v732_v12, %v680_v10  ;;  %v1005_v15 = vpop.f32.mrb[13].mxu1  ;;  %v681_v16 = vadd.f32 %v676_v13, %v608_v7  ;;  %v998_v17 = vpop.f32.mrb[15].mxu0 }
 0x108   : > { %v735_v18 = vpop.f32.mrb[14].mxu1 }
 0x109   : > { %v740_v19 = vadd.f32 %v735_v18, %v681_v16  ;;  %v1006_v20 = vpop.f32.mrb[15].mxu1  ;;  %v748_v21 = vadd.f32 %v886_v52, %v739_v14 }
 0x10b   : > { %752 = vrot.lane.b32.xlu0 %v748_v21, %s1077_s12  ;;  %v749_v22 = vadd.f32 %v886_v52, %v740_v19 }
 0x10f   : > { %754 = vrot.lane.b32.xlu0 %v749_v22, %s1077_s12 }
 0x17d   : > { %v753_v23 = vpop.permute.xlu0 %752 }
 0x17e   : > { %759 = vst.msk [vmem:[%s1217_s7] sm:$0xff] %vm758_vm9, %v753_v23 }
 0x181   : > { %v755_v24 = vpop.permute.xlu0 %754 }
 0x182   : > { %760 = vst.msk [vmem:[%s1217_s7 + $0x8] sm:$0xff] %vm758_vm9, %v755_v24 }
 0x183 PF: > { %s13_s14 = sadd.s32 1, %s1073_s14   ;;  %s1236_s12 = smov %s1069_s13 }
 0x184   : > { %p10_p5 = scmp.ge.s32.totalorder %s13_s14, 4   ;;  %s1237_s13 = smov %s1239_s15 }
 0x186   :  { %12 = sbr.rel (!%p10_p5) target bundleno = 2 (0x2), region = 68 }

// kernel: _lambda_.54
= control target key start
LH: loop header
LB: loop body
LE: loop exit
PB: predicated region body
PF: predicated region fallthrough
CT: control target
= control target key end

     0   :  { %s792_s15 = smov 0   ;;  %s794_s16 = smov 0   ;;  %s869_s0 = inlined_call_operand.vmem [shape: f32[2,34,16], index: 0, kind: input, shape index: {}]   ;;  %s870_s1 = inlined_call_operand.vmem [shape: bf16[3,16,16], index: 1, kind: input, shape index: {}]   ;;  %s871_s2 = inlined_call_operand.vmem [shape: f32[1,16], index: 2, kind: input, shape index: {}]   ;;  %s872_s3 = inlined_call_operand.vmem [shape: f32[2,32,16], index: 3, kind: input, shape index: {}]   ;;  %s873_s4 = inlined_call_operand.vmem [shape: f32[2,32,16], index: 4, kind: output, shape index: {}]  }
   0x1   :  { %s796_s17 = smov 0  }
   0x2 LB: > { %s26_s18 = sadd.s32 1, %s761_s16  ;;  %p648_p0 = scmp.ge.s32.totalorder %s765_s17, 1  ;;  %s765_s17 = sphi %s796_s17, %s14_s17   ;;  %s761_s16 = sphi %s794_s16, %s875_s16   ;;  %s757_s15 = sphi %s792_s15, %s874_s15  }
   0x3   : > { %p28_p1 = scmp.ge.s32.totalorder %s26_s18, 2  ;;  %p193_p2 = scmp.lt.s32.totalorder %s765_s17, 3 }
   0x5   : > { %s877_s18 = smov (%p28_p1, %s26_s18), 0  ;;  %p194_p3 = pnand %p648_p0, %p193_p2 }
   0x6   : > { %v740_v0 = vld [vmem:[%s870_s1] sm:$0xff] (!%p194_p3)   ;;  %p232_p4 = scmp.lt.s32.totalorder (!%p194_p3), %s757_s15, 1  ;;  %v741_v1 = vld [vmem:[%s870_s1 + $0x10] sm:$0xff] (!%p194_p3)   ;;  %v742_v2 = vld [vmem:[%s870_s1 + $0x8] sm:$0xff] (!%p194_p3)   ;;  %vm309_vm0 = vcmask (!%p194_p3), 130048  }
   0x7   : > { %197 = sbr.rel (%p194_p3) target bundleno = 260 (0x104), region = 36  ;;  %695 = vmatprep.subr.bf16.mxu0 (!%p194_p3), %v740_v0  ;;  %689 = vmatprep.subr.bf16.mxu1 (!%p194_p3), %v742_v2  ;;  %v675_v50 = vld [vmem:[%s871_s2] ss:$0 sm:$0xff] (!%p194_p3) }
   0x8   : > { %696 = vmatpush3.bf16.msra.mxu0 (!%p194_p3), %v740_v0  ;;  %690 = vmatpush3.bf16.msra.mxu1 (!%p194_p3), %v742_v2 }
   0x9   : > { %701 = vmatprep.subr.bf16.mxu0 (!%p194_p3), %v741_v1 }
   0xe   : > { %s879_s15 = smov (!%p232_p4, %s757_s15), 1 }
   0xf   : > { %s715_s25 = smul.u32 40, %s879_s15  ;;  %s678_s29 = sshll.u32 %s879_s15, 5 }
  0x10   : > { %s245_s6 = scalar_lea.vmem %s872_s3, %s678_s29  ;;  %s255_s11 = scalar_lea.vmem %s873_s4, %s678_s29 }
  0x11   : > { %s825_s28 = scalar_lea.vmem %s869_s0, %s715_s25  ;;  %v527_v53 = vld [vmem:[%s245_s6 + $0x10] sm:$0xff]  ;;  %v525_v57 = vld [vmem:[%s245_s6] sm:$0xff]  ;;  %v528_v61 = vld [vmem:[%s245_s6 + $0x18] sm:$0xff] }
  0x12   : > { %v260_v3 = vld [vmem:[%s825_s28] sm:$0xff]  ;;  %v261_v4 = vld [vmem:[%s825_s28 + $0x8] sm:$0xff]  ;;  %v262_v5 = vld [vmem:[%s825_s28 + $0x10] sm:$0xff] }
  0x13   : > { %vm264_vm1 = vcmp.ge.f32.partialorder %v260_v3, 0.0  ;;  %vm265_vm2 = vcmp.ge.f32.partialorder %v261_v4, 0.0  ;;  %v268_v6 = vmul.f32 0.1, %v260_v3  ;;  %v269_v7 = vmul.f32 0.1, %v261_v4 }
  0x14   : > { %v263_v8 = vld [vmem:[%s825_s28 + $0x18] sm:$0xff]  ;;  %vm266_vm3 = vcmp.ge.f32.partialorder %v262_v5, 0.0  ;;  %v270_v9 = vmul.f32 0.1, %v262_v5  ;;  %v654_v10 = vld [vmem:[%s825_s28 + $0x1] sm:$0xff]  ;;  %v655_v11 = vld [vmem:[%s825_s28 + $0x9] sm:$0xff] }
  0x15   : > { %v272_v12 = vsel %vm264_vm1, %v260_v3, %v268_v6  ;;  %v273_v13 = vsel %vm265_vm2, %v261_v4, %v269_v7  ;;  %vm267_vm4 = vcmp.ge.f32.partialorder %v263_v8, 0.0  ;;  %v271_v14 = vmul.f32 0.1, %v263_v8  ;;  %v656_v15 = vld [vmem:[%s825_s28 + $0x11] sm:$0xff]  ;;  %v657_v16 = vld [vmem:[%s825_s28 + $0x19] sm:$0xff]  ;;  %v666_v19 = vld [vmem:[%s825_s28 + $0x2] sm:$0xff] }
  0x16   : > { %v276_v17 = vpack.c.bf16 %v273_v13, %v272_v12  ;;  %v274_v18 = vsel %vm266_vm3, %v262_v5, %v270_v9  ;;  %vm286_vm5 = vcmp.ge.f32.partialorder %v654_v10, 0.0  ;;  %vm287_vm6 = vcmp.ge.f32.partialorder %v655_v11, 0.0  ;;  %v667_v20 = vld [vmem:[%s825_s28 + $0xa] sm:$0xff]  ;;  %v668_v27 = vld [vmem:[%s825_s28 + $0x12] sm:$0xff]  ;;  %v669_v30 = vld [vmem:[%s825_s28 + $0x1a] sm:$0xff] }
  0x17   : > { %v275_v21 = vsel %vm267_vm4, %v263_v8, %v271_v14  ;;  %v290_v22 = vmul.f32 0.1, %v654_v10  ;;  %v291_v23 = vmul.f32 0.1, %v655_v11  ;;  %vm288_vm7 = vcmp.ge.f32.partialorder %v656_v15, 0.0 }
  0x18   : > { %697 = vmatprep.mubr.msk.bf16.mxu0 %vm309_vm0, %v276_v17  ;;  %v277_v24 = vpack.c.bf16 %v275_v21, %v274_v18  ;;  %vm289_vm8 = vcmp.ge.f32.partialorder %v657_v16, 0.0  ;;  %v292_v25 = vmul.f32 0.1, %v656_v15  ;;  %v293_v26 = vmul.f32 0.1, %v657_v16 }
  0x19   : > { %v294_v28 = vsel %vm286_vm5, %v654_v10, %v290_v22  ;;  %v295_v29 = vsel %vm287_vm6, %v655_v11, %v291_v23  ;;  %vm432_vm9 = vcmp.ge.f32.partialorder %v666_v19, 0.0  ;;  %vm433_vm10 = vcmp.ge.f32.partialorder %v667_v20, 0.0 }
  0x1a   : > { %698 = vmatmul.mubr.msk.bf16.vlgmr.msra.gmra.mrb[0].mxu0 %vm309_vm0, %v277_v24  ;;  %v298_v31 = vpack.c.bf16 %v295_v29, %v294_v28  ;;  %v296_v32 = vsel %vm288_vm7, %v656_v15, %v292_v25  ;;  %v297_v33 = vsel %vm289_vm8, %v657_v16, %v293_v26  ;;  %v436_v34 = vmul.f32 0.1, %v666_v19 }
  0x1b   : > { %702 = vmatpush3.bf16.msra.mxu0 %v741_v1  ;;  %v299_v35 = vpack.c.bf16 %v297_v33, %v296_v32  ;;  %v437_v36 = vmul.f32 0.1, %v667_v20  ;;  %vm434_vm11 = vcmp.ge.f32.partialorder %v668_v27, 0.0  ;;  %vm435_vm12 = vcmp.ge.f32.partialorder %v669_v30, 0.0  ;;  %v526_v1 = vld [vmem:[%s245_s6 + $0x8] sm:$0xff] }
  0x1c   : > { %691 = vmatprep.mubr.msk.bf16.mxu1 %vm309_vm0, %v298_v31  ;;  %v440_v37 = vsel %vm432_vm9, %v666_v19, %v436_v34  ;;  %v438_v38 = vmul.f32 0.1, %v668_v27  ;;  %v439_v39 = vmul.f32 0.1, %v669_v30 }
  0x1d   : > { %692 = vmatmul.mubr.msk.bf16.vlgmr.msra.gmra.mrb[0].mxu1 %vm309_vm0, %v299_v35  ;;  %v441_v40 = vsel %vm433_vm10, %v667_v20, %v437_v36 }
  0x1e   : > { %v444_v41 = vpack.c.bf16 %v441_v40, %v440_v37  ;;  %v442_v42 = vsel %vm434_vm11, %v668_v27, %v438_v38  ;;  %v443_v43 = vsel %vm435_vm12, %v669_v30, %v439_v39 }
  0x1f   : > { %v445_v44 = vpack.c.bf16 %v443_v43, %v442_v42 }
  0x20   : > { %703 = vmatprep.mubr.msk.bf16.mxu0 %vm309_vm0, %v444_v41 }
  0x26   : > { %704 = vmatmul.mubr.msk.bf16.vlgmr.msra.gmra.mrb[0].mxu0 %vm309_vm0, %v445_v44 }
  0xf0   : > { %v693_v45 = vpop.f32.mrb[0].mxu1 }
  0xf1   : > { %v350_v46 = vpop.f32.mrb[1].mxu1 }
  0xf2   : > { %v694_v47 = vpop.f32.mrb[2].mxu1 }
  0xf3   : > { %v353_v48 = vpop.f32.mrb[3].mxu1 }
  0xf9   : > { %v705_v49 = vpop.f32.mrb[0].mxu0 }
  0xfa   : > { %v707_v51 = vadd.f32 %v705_v49, %v693_v45  ;;  %v495_v52 = vpop.f32.mrb[1].mxu0 }
  0xfb   : > { %v708_v54 = vadd.f32 %v495_v52, %v350_v46  ;;  %v706_v55 = vpop.f32.mrb[2].mxu0 }
  0xfc   : > { %v523_v56 = vadd.f32 %v707_v51, %v675_v50  ;;  %v709_v58 = vadd.f32 %v706_v55, %v694_v47  ;;  %v498_v59 = vpop.f32.mrb[3].mxu0 }
  0xfd   : > { %v521_v60 = vadd.f32 %v708_v54, %v675_v50  ;;  %v710_v62 = vadd.f32 %v498_v59, %v353_v48 }
  0xfe   : > { %v531_v63 = vadd.f32 %v527_v53, %v523_v56  ;;  %v524_v0 = vadd.f32 %v709_v58, %v675_v50 }
  0xff   : > { %v529_v2 = vadd.f32 %v525_v57, %v521_v60  ;;  %v522_v3 = vadd.f32 %v710_v62, %v675_v50 }
 0x100   : > { %535 = vst.msk [vmem:[%s255_s11 + $0x10] sm:$0xff] %vm309_vm0, %v531_v63  ;;  %v532_v4 = vadd.f32 %v528_v61, %v524_v0 }
 0x101   : > { %533 = vst.msk [vmem:[%s255_s11] sm:$0xff] %vm309_vm0, %v529_v2  ;;  %v530_v5 = vadd.f32 %v526_v1, %v522_v3 }
 0x102   : > { %536 = vst.msk [vmem:[%s255_s11 + $0x18] sm:$0xff] %vm309_vm0, %v532_v4 }
 0x103   : > { %534 = vst.msk [vmem:[%s255_s11 + $0x8] sm:$0xff] %vm309_vm0, %v530_v5 }
 0x104 PF: > { %s14_s17 = sadd.s32 1, %s765_s17   ;;  %s874_s15 = smov %s761_s16 }
 0x105   : > { %p11_p5 = scmp.ge.s32.totalorder %s14_s17, 4   ;;  %s875_s16 = smov %s877_s18 }
 0x107   :  { %13 = sbr.rel (!%p11_p5) target bundleno = 2 (0x2), region = 74 }

// kernel: _lambda_.55
= control target key start
LH: loop header
LB: loop body
LE: loop exit
PB: predicated region body
PF: predicated region fallthrough
CT: control target
= control target key end

     0   :  { %s792_s15 = smov 0   ;;  %s794_s16 = smov 0   ;;  %s869_s0 = inlined_call_operand.vmem [shape: f32[2,36,16], index: 0, kind: input, shape index: {}]   ;;  %s870_s1 = inlined_call_operand.vmem [shape: bf16[3,16,16], index: 1, kind: input, shape index: {}]   ;;  %s871_s2 = inlined_call_operand.vmem [shape: f32[1,16], index: 2, kind: input, shape index: {}]   ;;  %s872_s3 = inlined_call_operand.vmem [shape: f32[2,32,16], index: 3, kind: input, shape index: {}]   ;;  %s873_s4 = inlined_call_operand.vmem [shape: f32[2,32,16], index: 4, kind: output, shape index: {}]  }
   0x1   :  { %s796_s17 = smov 0  }
   0x2 LB: > { %s26_s18 = sadd.s32 1, %s761_s16  ;;  %p648_p0 = scmp.ge.s32.totalorder %s765_s17, 1  ;;  %s765_s17 = sphi %s796_s17, %s14_s17   ;;  %s761_s16 = sphi %s794_s16, %s875_s16   ;;  %s757_s15 = sphi %s792_s15, %s874_s15  }
   0x3   : > { %p28_p1 = scmp.ge.s32.totalorder %s26_s18, 2  ;;  %p193_p2 = scmp.lt.s32.totalorder %s765_s17, 3 }
   0x5   : > { %s877_s18 = smov (%p28_p1, %s26_s18), 0  ;;  %p194_p3 = pnand %p648_p0, %p193_p2 }
   0x6   : > { %v740_v0 = vld [vmem:[%s870_s1] sm:$0xff] (!%p194_p3)   ;;  %p232_p4 = scmp.lt.s32.totalorder (!%p194_p3), %s757_s15, 1  ;;  %v741_v1 = vld [vmem:[%s870_s1 + $0x10] sm:$0xff] (!%p194_p3)   ;;  %v742_v2 = vld [vmem:[%s870_s1 + $0x8] sm:$0xff] (!%p194_p3)   ;;  %vm309_vm0 = vcmask (!%p194_p3), 130048  }
   0x7   : > { %197 = sbr.rel (%p194_p3) target bundleno = 260 (0x104), region = 36  ;;  %695 = vmatprep.subr.bf16.mxu0 (!%p194_p3), %v740_v0  ;;  %689 = vmatprep.subr.bf16.mxu1 (!%p194_p3), %v742_v2  ;;  %v675_v50 = vld [vmem:[%s871_s2] ss:$0 sm:$0xff] (!%p194_p3) }
   0x8   : > { %696 = vmatpush3.bf16.msra.mxu0 (!%p194_p3), %v740_v0  ;;  %690 = vmatpush3.bf16.msra.mxu1 (!%p194_p3), %v742_v2 }
   0x9   : > { %701 = vmatprep.subr.bf16.mxu0 (!%p194_p3), %v741_v1 }
   0xe   : > { %s879_s15 = smov (!%p232_p4, %s757_s15), 1 }
   0xf   : > { %s715_s25 = smul.u32 40, %s879_s15  ;;  %s678_s29 = sshll.u32 %s879_s15, 5 }
  0x10   : > { %s245_s6 = scalar_lea.vmem %s872_s3, %s678_s29  ;;  %s255_s11 = scalar_lea.vmem %s873_s4, %s678_s29 }
  0x11   : > { %s825_s28 = scalar_lea.vmem %s869_s0, %s715_s25  ;;  %v527_v53 = vld [vmem:[%s245_s6 + $0x10] sm:$0xff]  ;;  %v525_v57 = vld [vmem:[%s245_s6] sm:$0xff]  ;;  %v528_v61 = vld [vmem:[%s245_s6 + $0x18] sm:$0xff] }
  0x12   : > { %v260_v3 = vld [vmem:[%s825_s28] sm:$0xff]  ;;  %v261_v4 = vld [vmem:[%s825_s28 + $0x8] sm:$0xff]  ;;  %v262_v5 = vld [vmem:[%s825_s28 + $0x10] sm:$0xff] }
  0x13   : > { %vm264_vm1 = vcmp.ge.f32.partialorder %v260_v3, 0.0  ;;  %vm265_vm2 = vcmp.ge.f32.partialorder %v261_v4, 0.0  ;;  %v268_v6 = vmul.f32 0.1, %v260_v3  ;;  %v269_v7 = vmul.f32 0.1, %v261_v4 }
  0x14   : > { %v263_v8 = vld [vmem:[%s825_s28 + $0x18] sm:$0xff]  ;;  %vm266_vm3 = vcmp.ge.f32.partialorder %v262_v5, 0.0  ;;  %v270_v9 = vmul.f32 0.1, %v262_v5  ;;  %v654_v10 = vld [vmem:[%s825_s28 + $0x2] sm:$0xff]  ;;  %v655_v11 = vld [vmem:[%s825_s28 + $0xa] sm:$0xff] }
  0x15   : > { %v272_v12 = vsel %vm264_vm1, %v260_v3, %v268_v6  ;;  %v273_v13 = vsel %vm265_vm2, %v261_v4, %v269_v7  ;;  %vm267_vm4 = vcmp.ge.f32.partialorder %v263_v8, 0.0  ;;  %v271_v14 = vmul.f32 0.1, %v263_v8  ;;  %v656_v15 = vld [vmem:[%s825_s28 + $0x12] sm:$0xff]  ;;  %v657_v16 = vld [vmem:[%s825_s28 + $0x1a] sm:$0xff]  ;;  %v666_v19 = vld [vmem:[%s825_s28 + $0x4] sm:$0xff] }
  0x16   : > { %v276_v17 = vpack.c.bf16 %v273_v13, %v272_v12  ;;  %v274_v18 = vsel %vm266_vm3, %v262_v5, %v270_v9  ;;  %vm286_vm5 = vcmp.ge.f32.partialorder %v654_v10, 0.0  ;;  %vm287_vm6 = vcmp.ge.f32.partialorder %v655_v11, 0.0  ;;  %v667_v20 = vld [vmem:[%s825_s28 + $0xc] sm:$0xff]  ;;  %v668_v27 = vld [vmem:[%s825_s28 + $0x14] sm:$0xff]  ;;  %v669_v30 = vld [vmem:[%s825_s28 + $0x1c] sm:$0xff] }
  0x17   : > { %v275_v21 = vsel %vm267_vm4, %v263_v8, %v271_v14  ;;  %v290_v22 = vmul.f32 0.1, %v654_v10  ;;  %v291_v23 = vmul.f32 0.1, %v655_v11  ;;  %vm288_vm7 = vcmp.ge.f32.partialorder %v656_v15, 0.0 }
  0x18   : > { %697 = vmatprep.mubr.msk.bf16.mxu0 %vm309_vm0, %v276_v17  ;;  %v277_v24 = vpack.c.bf16 %v275_v21, %v274_v18  ;;  %vm289_vm8 = vcmp.ge.f32.partialorder %v657_v16, 0.0  ;;  %v292_v25 = vmul.f32 0.1, %v656_v15  ;;  %v293_v26 = vmul.f32 0.1, %v657_v16 }
  0x19   : > { %v294_v28 = vsel %vm286_vm5, %v654_v10, %v290_v22  ;;  %v295_v29 = vsel %vm287_vm6, %v655_v11, %v291_v23  ;;  %vm432_vm9 = vcmp.ge.f32.partialorder %v666_v19, 0.0  ;;  %vm433_vm10 = vcmp.ge.f32.partialorder %v667_v20, 0.0 }
  0x1a   : > { %698 = vmatmul.mubr.msk.bf16.vlgmr.msra.gmra.mrb[0].mxu0 %vm309_vm0, %v277_v24  ;;  %v298_v31 = vpack.c.bf16 %v295_v29, %v294_v28  ;;  %v296_v32 = vsel %vm288_vm7, %v656_v15, %v292_v25  ;;  %v297_v33 = vsel %vm289_vm8, %v657_v16, %v293_v26  ;;  %v436_v34 = vmul.f32 0.1, %v666_v19 }
  0x1b   : > { %702 = vmatpush3.bf16.msra.mxu0 %v741_v1  ;;  %v299_v35 = vpack.c.bf16 %v297_v33, %v296_v32  ;;  %v437_v36 = vmul.f32 0.1, %v667_v20  ;;  %vm434_vm11 = vcmp.ge.f32.partialorder %v668_v27, 0.0  ;;  %vm435_vm12 = vcmp.ge.f32.partialorder %v669_v30, 0.0  ;;  %v526_v1 = vld [vmem:[%s245_s6 + $0x8] sm:$0xff] }
  0x1c   : > { %691 = vmatprep.mubr.msk.bf16.mxu1 %vm309_vm0, %v298_v31  ;;  %v440_v37 = vsel %vm432_vm9, %v666_v19, %v436_v34  ;;  %v438_v38 = vmul.f32 0.1, %v668_v27  ;;  %v439_v39 = vmul.f32 0.1, %v669_v30 }
  0x1d   : > { %692 = vmatmul.mubr.msk.bf16.vlgmr.msra.gmra.mrb[0].mxu1 %vm309_vm0, %v299_v35  ;;  %v441_v40 = vsel %vm433_vm10, %v667_v20, %v437_v36 }
  0x1e   : > { %v444_v41 = vpack.c.bf16 %v441_v40, %v440_v37  ;;  %v442_v42 = vsel %vm434_vm11, %v668_v27, %v438_v38  ;;  %v443_v43 = vsel %vm435_vm12, %v669_v30, %v439_v39 }
  0x1f   : > { %v445_v44 = vpack.c.bf16 %v443_v43, %v442_v42 }
  0x20   : > { %703 = vmatprep.mubr.msk.bf16.mxu0 %vm309_vm0, %v444_v41 }
  0x26   : > { %704 = vmatmul.mubr.msk.bf16.vlgmr.msra.gmra.mrb[0].mxu0 %vm309_vm0, %v445_v44 }
  0xf0   : > { %v693_v45 = vpop.f32.mrb[0].mxu1 }
  0xf1   : > { %v350_v46 = vpop.f32.mrb[1].mxu1 }
  0xf2   : > { %v694_v47 = vpop.f32.mrb[2].mxu1 }
  0xf3   : > { %v353_v48 = vpop.f32.mrb[3].mxu1 }
  0xf9   : > { %v705_v49 = vpop.f32.mrb[0].mxu0 }
  0xfa   : > { %v707_v51 = vadd.f32 %v705_v49, %v693_v45  ;;  %v495_v52 = vpop.f32.mrb[1].mxu0 }
  0xfb   : > { %v708_v54 = vadd.f32 %v495_v52, %v350_v46  ;;  %v706_v55 = vpop.f32.mrb[2].mxu0 }
  0xfc   : > { %v523_v56 = vadd.f32 %v707_v51, %v675_v50  ;;  %v709_v58 = vadd.f32 %v706_v55, %v694_v47  ;;  %v498_v59 = vpop.f32.mrb[3].mxu0 }
  0xfd   : > { %v521_v60 = vadd.f32 %v708_v54, %v675_v50  ;;  %v710_v62 = vadd.f32 %v498_v59, %v353_v48 }
  0xfe   : > { %v531_v63 = vadd.f32 %v527_v53, %v523_v56  ;;  %v524_v0 = vadd.f32 %v709_v58, %v675_v50 }
  0xff   : > { %v529_v2 = vadd.f32 %v525_v57, %v521_v60  ;;  %v522_v3 = vadd.f32 %v710_v62, %v675_v50 }
 0x100   : > { %535 = vst.msk [vmem:[%s255_s11 + $0x10] sm:$0xff] %vm309_vm0, %v531_v63  ;;  %v532_v4 = vadd.f32 %v528_v61, %v524_v0 }
 0x101   : > { %533 = vst.msk [vmem:[%s255_s11] sm:$0xff] %vm309_vm0, %v529_v2  ;;  %v530_v5 = vadd.f32 %v526_v1, %v522_v3 }
 0x102   : > { %536 = vst.msk [vmem:[%s255_s11 + $0x18] sm:$0xff] %vm309_vm0, %v532_v4 }
 0x103   : > { %534 = vst.msk [vmem:[%s255_s11 + $0x8] sm:$0xff] %vm309_vm0, %v530_v5 }
 0x104 PF: > { %s14_s17 = sadd.s32 1, %s765_s17   ;;  %s874_s15 = smov %s761_s16 }
 0x105   : > { %p11_p5 = scmp.ge.s32.totalorder %s14_s17, 4   ;;  %s875_s16 = smov %s877_s18 }
 0x107   :  { %13 = sbr.rel (!%p11_p5) target bundleno = 2 (0x2), region = 74 }

// kernel: _lambda_.57
= control target key start
LH: loop header
LB: loop body
LE: loop exit
PB: predicated region body
PF: predicated region fallthrough
CT: control target
= control target key end

     0   :  { %s959_s15 = smov 0   ;;  %s961_s16 = smov 0   ;;  %s1094_s0 = inlined_call_operand.vmem [shape: f32[2,66,8], index: 0, kind: input, shape index: {}]   ;;  %s1095_s1 = inlined_call_operand.vmem [shape: bf16[3,8,8], index: 1, kind: input, shape index: {}]   ;;  %s1096_s2 = inlined_call_operand.vmem [shape: f32[1,8], index: 2, kind: input, shape index: {}]   ;;  %s1097_s3 = inlined_call_operand.vmem [shape: f32[2,64,8], index: 3, kind: input, shape index: {}]   ;;  %s1098_s4 = inlined_call_operand.vmem [shape: f32[2,64,8], index: 4, kind: output, shape index: {}]  }
   0x1   :  { %s963_s17 = smov 0  }
   0x2 LB: > { %s26_s18 = sadd.s32 1, %s928_s16  ;;  %p777_p0 = scmp.ge.s32.totalorder %s932_s17, 1  ;;  %s932_s17 = sphi %s963_s17, %s14_s17   ;;  %s928_s16 = sphi %s961_s16, %s1100_s16   ;;  %s924_s15 = sphi %s959_s15, %s1099_s15  }
   0x3   : > { %p28_p1 = scmp.ge.s32.totalorder %s26_s18, 2  ;;  %p193_p2 = scmp.lt.s32.totalorder %s932_s17, 3 }
   0x5   : > { %s1102_s18 = smov (%p28_p1, %s26_s18), 0  ;;  %p194_p3 = pnand %p777_p0, %p193_p2 }
   0x6   : > { %v791_v0 = vld [vmem:[%s1095_s1 + $0x4] sm:$0xf] (!%p194_p3)  ;;  %vm350_vm0 = vcmask (!%p194_p3), 1043456   ;;  %v296_v1 = vld [vmem:[%s1095_s1] sm:$0xf] (!%p194_p3)  ;;  %p232_p4 = scmp.lt.s32.totalorder (!%p194_p3), %s924_s15, 1 }
   0x7   : > { %197 = sbr.rel (%p194_p3) target bundleno = 271 (0x10f), region = 36  ;;  %881 = vmatprep.subr.msk.bf16.mxu1 (!%p194_p3), %vm350_vm0, %v791_v0  ;;  %882 = vmatprep.subr.msk.bf16.mxu0 (!%p194_p3), %vm350_vm0, %v296_v1  ;;  %v352_v2 = vsel (!%p194_p3), %vm350_vm0, %v791_v0, 0  ;;  %v987_v3 = vsel (!%p194_p3), %vm350_vm0, %v296_v1, 0  ;;  %v808_v4 = vld [vmem:[%s1095_s1 + $0x8] sm:$0xf] (!%p194_p3)  ;;  %vm337_vm1 = vcmask (!%p194_p3), 64512  }
   0x8   : > { %834 = vmatpush3.bf16.msra.mxu1 (!%p194_p3), %v352_v2  ;;  %844 = vmatpush3.bf16.msra.mxu0 (!%p194_p3), %v987_v3  ;;  %v552_v8 = vsel (!%p194_p3), %vm350_vm0, %v808_v4, 0 }
   0x9   : > { %883 = vmatprep.subr.msk.bf16.mxu1 (!%p194_p3), %vm350_vm0, %v296_v1  ;;  %884 = vmatprep.subr.msk.bf16.mxu0 (!%p194_p3), %vm350_vm0, %v808_v4 }
   0xe   : > { %s1104_s15 = smov (!%p232_p4, %s924_s15), 1 }
   0xf   : > { %s885_s25 = smul.u32 72, %s1104_s15  ;;  %s816_s29 = sshll.u32 %s1104_s15, 6 }
  0x10   : > { %s1051_s6 = scalar_lea.vmem %s1097_s3, %s816_s29  ;;  %s1061_s11 = scalar_lea.vmem %s1098_s4, %s816_s29 }
  0x11   : > { %s1001_s28 = scalar_lea.vmem %s1094_s0, %s885_s25 }
  0x12   : > { %v783_v5 = vld [vmem:[%s1001_s28 + $0x1] sm:$0xff]  ;;  %v784_v6 = vld [vmem:[%s1001_s28 + $0x9] sm:$0xff]  ;;  %v785_v13 = vld [vmem:[%s1001_s28 + $0x11] sm:$0xff] }
  0x13   : > { %v260_v7 = vld [vmem:[%s1001_s28] sm:$0xff]  ;;  %vm307_vm2 = vcmp.ge.f32.partialorder %v783_v5, 0.0  ;;  %vm308_vm3 = vcmp.ge.f32.partialorder %v784_v6, 0.0  ;;  %v315_v9 = vmul.f32 0.1, %v783_v5  ;;  %v261_v11 = vld [vmem:[%s1001_s28 + $0x8] sm:$0xff] }
  0x14   : > { %v316_v10 = vmul.f32 0.1, %v784_v6  ;;  %vm268_vm4 = vcmp.ge.f32.partialorder %v260_v7, 0.0  ;;  %v276_v12 = vmul.f32 0.1, %v260_v7  ;;  %v786_v14 = vld [vmem:[%s1001_s28 + $0x19] sm:$0xff] }
  0x15   : > { %v323_v15 = vsel %vm307_vm2, %v783_v5, %v315_v9  ;;  %vm269_vm5 = vcmp.ge.f32.partialorder %v261_v11, 0.0  ;;  %v277_v17 = vmul.f32 0.1, %v261_v11  ;;  %v262_v18 = vld [vmem:[%s1001_s28 + $0x10] sm:$0xff]  ;;  %v263_v19 = vld [vmem:[%s1001_s28 + $0x18] sm:$0xff]  ;;  %vm309_vm6 = vcmp.ge.f32.partialorder %v785_v13, 0.0 }
  0x16   : > { %v324_v16 = vsel %vm308_vm3, %v784_v6, %v316_v10  ;;  %v284_v21 = vsel %vm268_vm4, %v260_v7, %v276_v12  ;;  %vm310_vm7 = vcmp.ge.f32.partialorder %v786_v14, 0.0  ;;  %v787_v22 = vld [vmem:[%s1001_s28 + $0x21] sm:$0xff]  ;;  %v788_v23 = vld [vmem:[%s1001_s28 + $0x29] sm:$0xff]  ;;  %v317_v25 = vmul.f32 0.1, %v785_v13  ;;  %v789_v27 = vld [vmem:[%s1001_s28 + $0x31] sm:$0xff] }
  0x17   : > { %v331_v20 = vpack.c.bf16 %v324_v16, %v323_v15  ;;  %v285_v24 = vsel %vm269_vm5, %v261_v11, %v277_v17  ;;  %v318_v26 = vmul.f32 0.1, %v786_v14  ;;  %vm270_vm8 = vcmp.ge.f32.partialorder %v262_v18, 0.0  ;;  %v790_v31 = vld [vmem:[%s1001_s28 + $0x39] sm:$0xff]  ;;  %v800_v34 = vld [vmem:[%s1001_s28 + $0x2] sm:$0xff]  ;;  %v801_v39 = vld [vmem:[%s1001_s28 + $0xa] sm:$0xff] }
  0x18   : > { %v292_v28 = vpack.c.bf16 %v285_v24, %v284_v21  ;;  %vm271_vm9 = vcmp.ge.f32.partialorder %v263_v19, 0.0  ;;  %v278_v29 = vmul.f32 0.1, %v262_v18  ;;  %v279_v30 = vmul.f32 0.1, %v263_v19  ;;  %v802_v42 = vld [vmem:[%s1001_s28 + $0x12] sm:$0xff] }
  0x19   : > { %835 = vmatprep.mubr.msk.bf16.mxu1 %vm337_vm1, %v331_v20  ;;  %v325_v32 = vsel %vm309_vm6, %v785_v13, %v317_v25  ;;  %v326_v33 = vsel %vm310_vm7, %v786_v14, %v318_v26  ;;  %vm311_vm10 = vcmp.ge.f32.partialorder %v787_v22, 0.0  ;;  %vm312_vm11 = vcmp.ge.f32.partialorder %v788_v23, 0.0  ;;  %v803_v46 = vld [vmem:[%s1001_s28 + $0x1a] sm:$0xff]  ;;  %v265_v54 = vld [vmem:[%s1001_s28 + $0x28] sm:$0xff]  ;;  %v266_v4 = vld [vmem:[%s1001_s28 + $0x30] sm:$0xff] }
  0x1a   : > { %845 = vmatprep.mubr.msk.bf16.mxu0 %vm337_vm1, %v292_v28  ;;  %v332_v35 = vpack.c.bf16 %v326_v33, %v325_v32  ;;  %v286_v36 = vsel %vm270_vm8, %v262_v18, %v278_v29  ;;  %v287_v37 = vsel %vm271_vm9, %v263_v19, %v279_v30  ;;  %v319_v38 = vmul.f32 0.1, %v787_v22  ;;  %v264_v50 = vld [vmem:[%s1001_s28 + $0x20] sm:$0xff]  ;;  %v805_v59 = vld [vmem:[%s1001_s28 + $0x2a] sm:$0xff]  ;;  %v267_v5 = vld [vmem:[%s1001_s28 + $0x38] sm:$0xff] }
  0x1b   : > { %v293_v40 = vpack.c.bf16 %v287_v37, %v286_v36  ;;  %v320_v41 = vmul.f32 0.1, %v788_v23  ;;  %vm313_vm12 = vcmp.ge.f32.partialorder %v789_v27, 0.0  ;;  %vm314_vm13 = vcmp.ge.f32.partialorder %v790_v31, 0.0  ;;  %v804_v55 = vld [vmem:[%s1001_s28 + $0x22] sm:$0xff]  ;;  %v806_v9 = vld [vmem:[%s1001_s28 + $0x32] sm:$0xff] }
  0x1c   : > { %836 = vmatmul.mubr.msk.bf16.vlgmr.msra.gmra.mrb[0].mxu1 %vm337_vm1, %v332_v35  ;;  %v327_v43 = vsel %vm311_vm10, %v787_v22, %v319_v38  ;;  %v321_v44 = vmul.f32 0.1, %v789_v27  ;;  %v322_v45 = vmul.f32 0.1, %v790_v31  ;;  %vm509_vm14 = vcmp.ge.f32.partialorder %v800_v34, 0.0  ;;  %v807_v10 = vld [vmem:[%s1001_s28 + $0x3a] sm:$0xff] }
  0x1d   : > { %864 = vmatpush3.bf16.msra.mxu1 %v987_v3  ;;  %846 = vmatmul.mubr.msk.bf16.vlgmr.msra.gmra.mrb[0].mxu0 %vm337_vm1, %v293_v40  ;;  %v328_v47 = vsel %vm312_vm11, %v788_v23, %v320_v41  ;;  %vm510_vm15 = vcmp.ge.f32.partialorder %v801_v39, 0.0  ;;  %v517_v48 = vmul.f32 0.1, %v800_v34  ;;  %v518_v49 = vmul.f32 0.1, %v801_v39  ;;  %v642_v38 = vld [vmem:[%s1051_s6] sm:$0xff] }
  0x1e   : > { %854 = vmatpush3.bf16.msra.mxu0 %v552_v8  ;;  %v333_v51 = vpack.c.bf16 %v328_v47, %v327_v43  ;;  %v329_v52 = vsel %vm313_vm12, %v789_v27, %v321_v44  ;;  %v330_v53 = vsel %vm314_vm13, %v790_v31, %v322_v45  ;;  %vm511_vm0 = vcmp.ge.f32.partialorder %v802_v42, 0.0  ;;  %v813_v31 = vld [vmem:[%s1096_s2] ss:$0 sm:$0xff] }
  0x1f   : > { %v334_v56 = vpack.c.bf16 %v330_v53, %v329_v52  ;;  %v525_v57 = vsel %vm509_vm14, %v800_v34, %v517_v48  ;;  %v526_v58 = vsel %vm510_vm15, %v801_v39, %v518_v49  ;;  %vm512_vm2 = vcmp.ge.f32.partialorder %v803_v46, 0.0  ;;  %v644_v34 = vld [vmem:[%s1051_s6 + $0x10] sm:$0xff] }
  0x20   : > { %839 = vmatprep.mubr.msk.bf16.mxu1 %vm337_vm1, %v333_v51  ;;  %v533_v60 = vpack.c.bf16 %v526_v58, %v525_v57  ;;  %v519_v61 = vmul.f32 0.1, %v802_v42  ;;  %v520_v62 = vmul.f32 0.1, %v803_v46  ;;  %vm272_vm3 = vcmp.ge.f32.partialorder %v264_v50, 0.0  ;;  %v648_v57 = vld [vmem:[%s1051_s6 + $0x30] sm:$0xff] }
  0x21   : > { %vm273_vm4 = vcmp.ge.f32.partialorder %v265_v54, 0.0  ;;  %v280_v63 = vmul.f32 0.1, %v264_v50  ;;  %v281_v0 = vmul.f32 0.1, %v265_v54  ;;  %vm513_vm5 = vcmp.ge.f32.partialorder %v804_v55, 0.0 }
  0x22   : > { %855 = vmatprep.mubr.msk.bf16.mxu0 %vm337_vm1, %v533_v60  ;;  %v527_v1 = vsel %vm511_vm0, %v802_v42, %v519_v61  ;;  %v528_v2 = vsel %vm512_vm2, %v803_v46, %v520_v62  ;;  %vm514_vm6 = vcmp.ge.f32.partialorder %v805_v59, 0.0  ;;  %v521_v3 = vmul.f32 0.1, %v804_v55  ;;  %v645_v42 = vld [vmem:[%s1051_s6 + $0x18] sm:$0xff]  ;;  %v643_v46 = vld [vmem:[%s1051_s6 + $0x8] sm:$0xff]  ;;  %v646_v62 = vld [vmem:[%s1051_s6 + $0x20] sm:$0xff] }
  0x23   : > { %v288_v6 = vsel %vm272_vm3, %v264_v50, %v280_v63  ;;  %v289_v7 = vsel %vm273_vm4, %v265_v54, %v281_v0  ;;  %v522_v8 = vmul.f32 0.1, %v805_v59  ;;  %v534_v11 = vpack.c.bf16 %v528_v2, %v527_v1  ;;  %v649_v2 = vld [vmem:[%s1051_s6 + $0x38] sm:$0xff] }
  0x24   : > { %840 = vmatmul.mubr.msk.bf16.gmra.mrb[4].mxu1 %vm337_vm1, %v334_v56  ;;  %v294_v12 = vpack.c.bf16 %v289_v7, %v288_v6  ;;  %v529_v13 = vsel %vm513_vm5, %v804_v55, %v521_v3  ;;  %vm274_vm7 = vcmp.ge.f32.partialorder %v266_v4, 0.0  ;;  %v282_v15 = vmul.f32 0.1, %v266_v4  ;;  %v647_v6 = vld [vmem:[%s1051_s6 + $0x28] sm:$0xff] }
  0x25   : > { %v530_v14 = vsel %vm514_vm6, %v805_v59, %v522_v8  ;;  %v283_v16 = vmul.f32 0.1, %v267_v5  ;;  %vm275_vm8 = vcmp.ge.f32.partialorder %v267_v5, 0.0  ;;  %v523_v18 = vmul.f32 0.1, %v806_v9 }
  0x26   : > { %849 = vmatprep.mubr.msk.bf16.mxu1 %vm337_vm1, %v294_v12  ;;  %v535_v17 = vpack.c.bf16 %v530_v14, %v529_v13  ;;  %v524_v19 = vmul.f32 0.1, %v807_v10  ;;  %vm515_vm9 = vcmp.ge.f32.partialorder %v806_v9, 0.0  ;;  %vm516_vm10 = vcmp.ge.f32.partialorder %v807_v10, 0.0 }
  0x27   : > { %v290_v20 = vsel %vm274_vm7, %v266_v4, %v282_v15  ;;  %v291_v21 = vsel %vm275_vm8, %v267_v5, %v283_v16  ;;  %v531_v22 = vsel %vm515_vm9, %v806_v9, %v523_v18 }
  0x28   : > { %v532_v23 = vsel %vm516_vm10, %v807_v10, %v524_v19  ;;  %v295_v24 = vpack.c.bf16 %v291_v21, %v290_v20 }
  0x29   : > { %856 = vmatmul.mubr.msk.bf16.vlgmr.msra.gmra.mrb[0].mxu0 %vm337_vm1, %v534_v11  ;;  %v536_v25 = vpack.c.bf16 %v532_v23, %v531_v22 }
  0x2a   : > { %859 = vmatprep.mubr.msk.bf16.mxu0 %vm337_vm1, %v535_v17 }
  0x30   : > { %850 = vmatmul.mubr.msk.bf16.vlgmr.msra.gmra.mrb[4].mxu1 %vm337_vm1, %v295_v24 }
  0x31   : > { %860 = vmatmul.mubr.msk.bf16.gmra.mrb[4].mxu0 %vm337_vm1, %v536_v25 }
  0xef   : > { %v837_v26 = vpop.f32.mrb[0].mxu1 }
  0xf0   : > { %v388_v27 = vpop.f32.mrb[1].mxu1 }
  0xf1   : > { %v838_v28 = vpop.f32.mrb[2].mxu1 }
  0xf2   : > { %v391_v29 = vpop.f32.mrb[3].mxu1 }
  0xfc   : > { %v857_v30 = vpop.f32.mrb[0].mxu0 }
  0xfd   : > { %v865_v32 = vadd.f32 %v857_v30, %v837_v26  ;;  %v588_v33 = vpop.f32.mrb[1].mxu0 }
  0xfe   : > { %v866_v35 = vadd.f32 %v588_v33, %v388_v27  ;;  %v858_v36 = vpop.f32.mrb[2].mxu0 }
  0xff   : > { %v636_v37 = vadd.f32 %v865_v32, %v813_v31  ;;  %v867_v39 = vadd.f32 %v858_v36, %v838_v28  ;;  %v591_v40 = vpop.f32.mrb[3].mxu0 }
 0x100   : > { %v634_v41 = vadd.f32 %v866_v35, %v813_v31  ;;  %v868_v43 = vadd.f32 %v591_v40, %v391_v29 }
 0x101   : > { %v652_v44 = vadd.f32 %v644_v34, %v636_v37  ;;  %v637_v45 = vadd.f32 %v867_v39, %v813_v31 }
 0x102   : > { %v650_v47 = vadd.f32 %v642_v38, %v634_v41  ;;  %v635_v48 = vadd.f32 %v868_v43, %v813_v31 }
 0x103   : > { %660 = vst.msk [vmem:[%s1061_s11 + $0x10] sm:$0xff] %vm337_vm1, %v652_v44  ;;  %v653_v49 = vadd.f32 %v645_v42, %v637_v45  ;;  %v851_v50 = vpop.f32.mrb[4].mxu1 }
 0x104   : > { %658 = vst.msk [vmem:[%s1061_s11] sm:$0xff] %vm337_vm1, %v650_v47  ;;  %v651_v51 = vadd.f32 %v643_v46, %v635_v48  ;;  %v861_v52 = vpop.f32.mrb[4].mxu0  ;;  %v484_v53 = vpop.f32.mrb[5].mxu1 }
 0x105   : > { %661 = vst.msk [vmem:[%s1061_s11 + $0x18] sm:$0xff] %vm337_vm1, %v653_v49  ;;  %v869_v54 = vadd.f32 %v861_v52, %v851_v50  ;;  %v604_v55 = vpop.f32.mrb[5].mxu0  ;;  %v852_v56 = vpop.f32.mrb[6].mxu1 }
 0x106   : > { %659 = vst.msk [vmem:[%s1061_s11 + $0x8] sm:$0xff] %vm337_vm1, %v651_v51  ;;  %v870_v58 = vadd.f32 %v604_v55, %v484_v53  ;;  %v862_v59 = vpop.f32.mrb[6].mxu0  ;;  %v487_v60 = vpop.f32.mrb[7].mxu1 }
 0x107   : > { %v640_v61 = vadd.f32 %v869_v54, %v813_v31  ;;  %v871_v63 = vadd.f32 %v862_v59, %v852_v56  ;;  %v607_v0 = vpop.f32.mrb[7].mxu0 }
 0x108   : > { %v638_v1 = vadd.f32 %v870_v58, %v813_v31  ;;  %v872_v3 = vadd.f32 %v607_v0, %v487_v60 }
 0x109   : > { %v656_v4 = vadd.f32 %v648_v57, %v640_v61  ;;  %v641_v5 = vadd.f32 %v871_v63, %v813_v31 }
 0x10a   : > { %v654_v7 = vadd.f32 %v646_v62, %v638_v1  ;;  %v639_v8 = vadd.f32 %v872_v3, %v813_v31 }
 0x10b   : > { %664 = vst.msk [vmem:[%s1061_s11 + $0x30] sm:$0xff] %vm337_vm1, %v656_v4  ;;  %v657_v9 = vadd.f32 %v649_v2, %v641_v5 }
 0x10c   : > { %662 = vst.msk [vmem:[%s1061_s11 + $0x20] sm:$0xff] %vm337_vm1, %v654_v7  ;;  %v655_v10 = vadd.f32 %v647_v6, %v639_v8 }
 0x10d   : > { %665 = vst.msk [vmem:[%s1061_s11 + $0x38] sm:$0xff] %vm337_vm1, %v657_v9 }
 0x10e   : > { %663 = vst.msk [vmem:[%s1061_s11 + $0x28] sm:$0xff] %vm337_vm1, %v655_v10 }
 0x10f PF: > { %s14_s17 = sadd.s32 1, %s932_s17   ;;  %s1099_s15 = smov %s928_s16 }
 0x110   : > { %p11_p5 = scmp.ge.s32.totalorder %s14_s17, 4   ;;  %s1100_s16 = smov %s1102_s18 }
 0x112   :  { %13 = sbr.rel (!%p11_p5) target bundleno = 2 (0x2), region = 74 }

// kernel: _lambda_.56
= control target key start
LH: loop header
LB: loop body
LE: loop exit
PB: predicated region body
PF: predicated region fallthrough
CT: control target
= control target key end

     0   :  { %s1174_s12 = smov 0   ;;  %s1176_s13 = smov 0   ;;  %s1282_s0 = inlined_call_operand.vmem [shape: f32[2,34,16], index: 0, kind: input, shape index: {}]   ;;  %s1283_s1 = inlined_call_operand.vmem [shape: bf16[4,16,8], index: 1, kind: input, shape index: {}]   ;;  %s1284_s2 = inlined_call_operand.vmem [shape: f32[1,8], index: 2, kind: input, shape index: {}]   ;;  %s1285_s3 = inlined_call_operand.vmem [shape: f32[2,32,16], index: 3, kind: output, shape index: {}]  }
   0x1   :  { %s1178_s14 = smov 0  }
   0x2 LB: > { %s25_s15 = sadd.s32 1, %s1147_s13  ;;  %p938_p0 = scmp.ge.s32.totalorder %s1151_s14, 1  ;;  %s1151_s14 = sphi %s1178_s14, %s13_s14   ;;  %s1147_s13 = sphi %s1176_s13, %s1287_s13   ;;  %s1143_s12 = sphi %s1174_s12, %s1286_s12  }
   0x3   : > { %p27_p1 = scmp.ge.s32.totalorder %s25_s15, 2  ;;  %p151_p2 = scmp.lt.s32.totalorder %s1151_s14, 3 }
   0x5   : > { %s1289_s15 = smov (%p27_p1, %s25_s15), 0  ;;  %p152_p3 = pnand %p938_p0, %p151_p2 }
   0x6   : > { %v1121_v0 = vld [vmem:[%s1283_s1 + $0x8] sm:$0xff] (!%p152_p3)   ;;  %p179_p4 = scmp.lt.s32.totalorder (!%p152_p3), %s1143_s12, 1  ;;  %v1122_v1 = vld [vmem:[%s1283_s1] sm:$0xff] (!%p152_p3)   ;;  %vm246_vm2 = vcmask (!%p152_p3), 130048   ;;  %v1123_v18 = vld [vmem:[%s1283_s1 + $0x10] sm:$0xff] (!%p152_p3)   ;;  %vm524_vm13 = vcmask (!%p152_p3), 64512  }
   0x7   : > { %155 = sbr.rel (%p152_p3) target bundleno = 397 (0x18d), region = 32  ;;  %1047 = vmatprep.subr.bf16.mxu1 (!%p152_p3), %v1121_v0  ;;  %v1125_v2 = vld [vmem:[%s1283_s1 + $0x8] sm:$0xff] (!%p152_p3)   ;;  %v1126_v3 = vld [vmem:[%s1283_s1] sm:$0xff] (!%p152_p3)   ;;  %v1127_v24 = vld [vmem:[%s1283_s1 + $0x10] sm:$0xff] (!%p152_p3)   ;;  %vm840_vm14 = vcmask (!%p152_p3), 130112  }
   0x8   : > { %1048 = vmatpush3.bf16.msra.mxu1 (!%p152_p3), %v1121_v0  ;;  %1023 = vmatprep.subr.bf16.mxu0 (!%p152_p3), %v1125_v2  ;;  %v1124_v41 = vld [vmem:[%s1283_s1 + $0x18] sm:$0xff] (!%p152_p3)   ;;  %v995_v50 = vld [vmem:[%s1284_s2] ss:$0 sm:$0xff] (!%p152_p3) }
   0x9   : > { %1053 = vmatprep.subr.bf16.mxu1 (!%p152_p3), %v1122_v1  ;;  %1024 = vmatpush3.bf16.msra.mxu0 (!%p152_p3), %v1125_v2  ;;  %v1128_v44 = vld [vmem:[%s1283_s1 + $0x18] sm:$0xff] (!%p152_p3)  }
   0xa   : > { %1029 = vmatprep.subr.bf16.mxu0 (!%p152_p3), %v1126_v3 }
   0xe   : > { %s1291_s12 = smov (!%p179_p4, %s1143_s12), 1 }
   0xf   : > { %s1095_s20 = smul.u32 40, %s1291_s12  ;;  %s998_s9 = sshll.u32 %s1291_s12, 5 }
  0x10   : > { %s1259_s18 = scalar_lea.vmem %s1285_s3, %s998_s9  ;;  %s1153_s12 = smov 8  }
  0x11   : > { %s1210_s27 = scalar_lea.vmem %s1282_s0, %s1095_s20 }
  0x12   : > { %v969_v4 = vld [vmem:[%s1210_s27 + $0x1] sm:$0xff]  ;;  %v970_v5 = vld [vmem:[%s1210_s27 + $0x9] sm:$0xff]  ;;  %v971_v6 = vld [vmem:[%s1210_s27 + $0x11] sm:$0xff] }
  0x13   : > { %vm533_vm0 = vcmp.ge.f32.partialorder %v969_v4, 0.0  ;;  %vm534_vm1 = vcmp.ge.f32.partialorder %v970_v5, 0.0  ;;  %v537_v7 = vmul.f32 0.1, %v969_v4  ;;  %v538_v8 = vmul.f32 0.1, %v970_v5 }
  0x14   : > { %v972_v9 = vld [vmem:[%s1210_s27 + $0x19] sm:$0xff]  ;;  %vm535_vm3 = vcmp.ge.f32.partialorder %v971_v6, 0.0  ;;  %v539_v10 = vmul.f32 0.1, %v971_v6  ;;  %v981_v19 = vld [vmem:[%s1210_s27 + $0x2] sm:$0xff]  ;;  %v982_v22 = vld [vmem:[%s1210_s27 + $0xa] sm:$0xff] }
  0x15   : > { %v541_v11 = vsel %vm533_vm0, %v969_v4, %v537_v7  ;;  %v542_v12 = vsel %vm534_vm1, %v970_v5, %v538_v8  ;;  %vm536_vm4 = vcmp.ge.f32.partialorder %v972_v9, 0.0  ;;  %v540_v13 = vmul.f32 0.1, %v972_v9  ;;  %v197_v16 = vld [vmem:[%s1210_s27] sm:$0xff]  ;;  %v198_v20 = vld [vmem:[%s1210_s27 + $0x8] sm:$0xff]  ;;  %v199_v23 = vld [vmem:[%s1210_s27 + $0x10] sm:$0xff] }
  0x16   : > { %v545_v14 = vpack.c.bf16 %v542_v12, %v541_v11  ;;  %v543_v15 = vsel %vm535_vm3, %v971_v6, %v539_v10  ;;  %vm201_vm5 = vcmp.ge.f32.partialorder %v197_v16, 0.0  ;;  %v200_v25 = vld [vmem:[%s1210_s27 + $0x18] sm:$0xff]  ;;  %v675_v26 = vmul.f32 0.1, %v981_v19 }
  0x17   : > { %v544_v17 = vsel %vm536_vm4, %v972_v9, %v540_v13  ;;  %vm202_vm6 = vcmp.ge.f32.partialorder %v198_v20, 0.0  ;;  %v205_v27 = vmul.f32 0.1, %v197_v16  ;;  %v676_v28 = vmul.f32 0.1, %v982_v22  ;;  %v983_v42 = vld [vmem:[%s1210_s27 + $0x12] sm:$0xff] }
  0x18   : > { %1049 = vmatprep.mubr.msk.bf16.mxu1 %vm246_vm2, %v545_v14  ;;  %v546_v21 = vpack.c.bf16 %v544_v17, %v543_v15  ;;  %1025 = vmatprep.mubr.msk.bf16.mxu0 %vm246_vm2, %v545_v14  ;;  %v206_v29 = vmul.f32 0.1, %v198_v20  ;;  %vm203_vm7 = vcmp.ge.f32.partialorder %v199_v23, 0.0  ;;  %vm204_vm8 = vcmp.ge.f32.partialorder %v200_v25, 0.0  ;;  %v984_v43 = vld [vmem:[%s1210_s27 + $0x1a] sm:$0xff] }
  0x19   : > { %v209_v30 = vsel %vm201_vm5, %v197_v16, %v205_v27  ;;  %v207_v31 = vmul.f32 0.1, %v199_v23  ;;  %v208_v32 = vmul.f32 0.1, %v200_v25  ;;  %vm671_vm9 = vcmp.ge.f32.partialorder %v981_v19, 0.0 }
  0x1a   : > { %1050 = vmatmul.mubr.msk.bf16.vlgmr.msra.gmra.mrb[0].mxu1 %vm246_vm2, %v546_v21  ;;  %1026 = vmatmul.mubr.msk.bf16.vlgmr.msra.gmra.mrb[0].mxu0 %vm246_vm2, %v546_v21  ;;  %vm672_vm10 = vcmp.ge.f32.partialorder %v982_v22, 0.0  ;;  %v210_v33 = vsel %vm202_vm6, %v198_v20, %v206_v29  ;;  %v679_v37 = vsel %vm671_vm9, %v981_v19, %v675_v26  ;;  %v677_v45 = vmul.f32 0.1, %v983_v42 }
  0x1b   : > { %1054 = vmatpush3.bf16.msra.mxu1 %v1122_v1  ;;  %1055 = vmatprep.mubr.msk.bf16.mxu1 %vm246_vm2, %v545_v14  ;;  %v213_v34 = vpack.c.bf16 %v210_v33, %v209_v30  ;;  %v211_v35 = vsel %vm203_vm7, %v199_v23, %v207_v31  ;;  %v212_v36 = vsel %vm204_vm8, %v200_v25, %v208_v32  ;;  %v678_v46 = vmul.f32 0.1, %v984_v43 }
  0x1c   : > { %1059 = vmatprep.subr.bf16.mxu1 %v1123_v18  ;;  %1030 = vmatpush3.bf16.msra.mxu0 %v1126_v3  ;;  %v680_v38 = vsel %vm672_vm10, %v982_v22, %v676_v28  ;;  %v214_v39 = vpack.c.bf16 %v212_v36, %v211_v35  ;;  %vm673_vm11 = vcmp.ge.f32.partialorder %v983_v42, 0.0  ;;  %vm674_vm12 = vcmp.ge.f32.partialorder %v984_v43, 0.0 }
  0x1d   : > { %1035 = vmatprep.subr.bf16.mxu0 %v1127_v24  ;;  %1031 = vmatprep.mubr.msk.bf16.mxu0 %vm246_vm2, %v213_v34  ;;  %v683_v40 = vpack.c.bf16 %v680_v38, %v679_v37  ;;  %v681_v47 = vsel %vm673_vm11, %v983_v42, %v677_v45  ;;  %v682_v48 = vsel %vm674_vm12, %v984_v43, %v678_v46 }
  0x1e   : > { %v684_v49 = vpack.c.bf16 %v682_v48, %v681_v47 }
  0x26   : > { %1056 = vmatmul.mubr.msk.bf16.vlgmr.msra.gmra.mrb[0].mxu1 %vm246_vm2, %v546_v21  ;;  %1032 = vmatmul.mubr.msk.bf16.vlgmr.msra.gmra.mrb[0].mxu0 %vm246_vm2, %v214_v39 }
  0x27   : > { %1060 = vmatpush3.bf16.msra.mxu1 %v1123_v18  ;;  %1061 = vmatprep.mubr.msk.bf16.mxu1 %vm246_vm2, %v683_v40 }
  0x28   : > { %1065 = vmatprep.subr.bf16.mxu1 %v1124_v41  ;;  %1036 = vmatpush3.bf16.msra.mxu0 %v1127_v24 }
  0x29   : > { %1037 = vmatprep.mubr.msk.bf16.mxu0 %vm246_vm2, %v545_v14  ;;  %1041 = vmatprep.subr.bf16.mxu0 %v1128_v44 }
  0x32   : > { %1062 = vmatmul.mubr.msk.bf16.vlgmr.msra.gmra.mrb[0].mxu1 %vm246_vm2, %v684_v49  ;;  %1038 = vmatmul.mubr.msk.bf16.vlgmr.msra.gmra.mrb[0].mxu0 %vm246_vm2, %v546_v21 }
  0x33   : > { %1066 = vmatpush3.bf16.msra.mxu1 %v1124_v41  ;;  %1067 = vmatprep.mubr.msk.bf16.mxu1 %vm246_vm2, %v683_v40 }
  0x34   : > { %1042 = vmatpush3.bf16.msra.mxu0 %v1128_v44  ;;  %1043 = vmatprep.mubr.msk.bf16.mxu0 %vm246_vm2, %v683_v40 }
  0x3e   : > { %1068 = vmatmul.mubr.msk.bf16.vlgmr.msra.gmra.mrb[0].mxu1 %vm246_vm2, %v684_v49  ;;  %1044 = vmatmul.mubr.msk.bf16.vlgmr.msra.gmra.mrb[0].mxu0 %vm246_vm2, %v684_v49 }
 0x111   : > { %v1069_v51 = vpop.f32.mrb[0].mxu1  ;;  %v1045_v52 = vpop.f32.mrb[0].mxu0 }
 0x112   : > { %v822_v53 = vadd.f32 %v1069_v51, %v995_v50  ;;  %v794_v54 = vpop.f32.mrb[1].mxu1  ;;  %v522_v55 = vadd.f32 %v1045_v52, %v995_v50  ;;  %v494_v56 = vpop.f32.mrb[1].mxu0 }
 0x113   : > { %v820_v57 = vadd.f32 %v995_v50, %v794_v54  ;;  %v1070_v58 = vpop.f32.mrb[2].mxu1  ;;  %v520_v59 = vadd.f32 %v995_v50, %v494_v56  ;;  %v1046_v60 = vpop.f32.mrb[2].mxu0 }
 0x114   : > { %832 = vrot.lane.b32.xlu1 %v822_v53, %s1153_s12  ;;  %v797_v61 = vpop.f32.mrb[3].mxu1  ;;  %527 = vst.msk [vmem:[%s1259_s18 + $0x10] sm:$0xff] %vm524_vm13, %v522_v55  ;;  %v523_v62 = vadd.f32 %v1046_v60, %v995_v50  ;;  %v497_v63 = vpop.f32.mrb[3].mxu0  ;;  %v823_v1 = vadd.f32 %v1070_v58, %v995_v50 }
 0x115   : > { %828 = vrot.lane.b32.xlu0 %v820_v57, %s1153_s12  ;;  %525 = vst.msk [vmem:[%s1259_s18] sm:$0xff] %vm524_vm13, %v520_v59  ;;  %v521_v0 = vadd.f32 %v995_v50, %v497_v63  ;;  %v821_v2 = vadd.f32 %v995_v50, %v797_v61 }
 0x116   : > { %528 = vst.msk [vmem:[%s1259_s18 + $0x18] sm:$0xff] %vm524_vm13, %v523_v62 }
 0x117   : > { %526 = vst.msk [vmem:[%s1259_s18 + $0x8] sm:$0xff] %vm524_vm13, %v521_v0 }
 0x118   : > { %834 = vrot.lane.b32.xlu1 %v823_v1, %s1153_s12 }
 0x119   : > { %830 = vrot.lane.b32.xlu0 %v821_v2, %s1153_s12 }
 0x186   : > { %v833_v3 = vpop.permute.xlu1 %832 }
 0x187   : > { %843 = vst.msk [vmem:[%s1259_s18 + $0x10] sm:$0xff] %vm840_vm14, %v833_v3  ;;  %v829_v4 = vpop.permute.xlu0 %828 }
 0x188   : > { %841 = vst.msk [vmem:[%s1259_s18] sm:$0xff] %vm840_vm14, %v829_v4 }
 0x18a   : > { %v835_v5 = vpop.permute.xlu1 %834 }
 0x18b   : > { %844 = vst.msk [vmem:[%s1259_s18 + $0x18] sm:$0xff] %vm840_vm14, %v835_v5  ;;  %v831_v6 = vpop.permute.xlu0 %830 }
 0x18c   : > { %842 = vst.msk [vmem:[%s1259_s18 + $0x8] sm:$0xff] %vm840_vm14, %v831_v6 }
 0x18d PF: > { %s13_s14 = sadd.s32 1, %s1151_s14   ;;  %s1286_s12 = smov %s1147_s13 }
 0x18e   : > { %p10_p5 = scmp.ge.s32.totalorder %s13_s14, 4   ;;  %s1287_s13 = smov %s1289_s15 }
 0x190   :  { %12 = sbr.rel (!%p10_p5) target bundleno = 2 (0x2), region = 68 }

// kernel: _lambda_.58
= control target key start
LH: loop header
LB: loop body
LE: loop exit
PB: predicated region body
PF: predicated region fallthrough
CT: control target
= control target key end

     0   :  { %s959_s15 = smov 0   ;;  %s961_s16 = smov 0   ;;  %s1094_s0 = inlined_call_operand.vmem [shape: f32[2,68,8], index: 0, kind: input, shape index: {}]   ;;  %s1095_s1 = inlined_call_operand.vmem [shape: bf16[3,8,8], index: 1, kind: input, shape index: {}]   ;;  %s1096_s2 = inlined_call_operand.vmem [shape: f32[1,8], index: 2, kind: input, shape index: {}]   ;;  %s1097_s3 = inlined_call_operand.vmem [shape: f32[2,64,8], index: 3, kind: input, shape index: {}]   ;;  %s1098_s4 = inlined_call_operand.vmem [shape: f32[2,64,8], index: 4, kind: output, shape index: {}]  }
   0x1   :  { %s963_s17 = smov 0  }
   0x2 LB: > { %s26_s18 = sadd.s32 1, %s928_s16  ;;  %p777_p0 = scmp.ge.s32.totalorder %s932_s17, 1  ;;  %s932_s17 = sphi %s963_s17, %s14_s17   ;;  %s928_s16 = sphi %s961_s16, %s1100_s16   ;;  %s924_s15 = sphi %s959_s15, %s1099_s15  }
   0x3   : > { %p28_p1 = scmp.ge.s32.totalorder %s26_s18, 2  ;;  %p193_p2 = scmp.lt.s32.totalorder %s932_s17, 3 }
   0x5   : > { %s1102_s18 = smov (%p28_p1, %s26_s18), 0  ;;  %p194_p3 = pnand %p777_p0, %p193_p2 }
   0x6   : > { %v791_v0 = vld [vmem:[%s1095_s1 + $0x4] sm:$0xf] (!%p194_p3)  ;;  %vm350_vm0 = vcmask (!%p194_p3), 1043456   ;;  %v296_v1 = vld [vmem:[%s1095_s1] sm:$0xf] (!%p194_p3)  ;;  %p232_p4 = scmp.lt.s32.totalorder (!%p194_p3), %s924_s15, 1 }
   0x7   : > { %197 = sbr.rel (%p194_p3) target bundleno = 271 (0x10f), region = 36  ;;  %881 = vmatprep.subr.msk.bf16.mxu1 (!%p194_p3), %vm350_vm0, %v791_v0  ;;  %882 = vmatprep.subr.msk.bf16.mxu0 (!%p194_p3), %vm350_vm0, %v296_v1  ;;  %v352_v2 = vsel (!%p194_p3), %vm350_vm0, %v791_v0, 0  ;;  %v987_v3 = vsel (!%p194_p3), %vm350_vm0, %v296_v1, 0  ;;  %v808_v4 = vld [vmem:[%s1095_s1 + $0x8] sm:$0xf] (!%p194_p3)  ;;  %vm337_vm1 = vcmask (!%p194_p3), 64512  }
   0x8   : > { %834 = vmatpush3.bf16.msra.mxu1 (!%p194_p3), %v352_v2  ;;  %844 = vmatpush3.bf16.msra.mxu0 (!%p194_p3), %v987_v3  ;;  %v552_v8 = vsel (!%p194_p3), %vm350_vm0, %v808_v4, 0 }
   0x9   : > { %883 = vmatprep.subr.msk.bf16.mxu1 (!%p194_p3), %vm350_vm0, %v296_v1  ;;  %884 = vmatprep.subr.msk.bf16.mxu0 (!%p194_p3), %vm350_vm0, %v808_v4 }
   0xe   : > { %s1104_s15 = smov (!%p232_p4, %s924_s15), 1 }
   0xf   : > { %s885_s25 = smul.u32 72, %s1104_s15  ;;  %s816_s29 = sshll.u32 %s1104_s15, 6 }
  0x10   : > { %s1051_s6 = scalar_lea.vmem %s1097_s3, %s816_s29  ;;  %s1061_s11 = scalar_lea.vmem %s1098_s4, %s816_s29 }
  0x11   : > { %s1001_s28 = scalar_lea.vmem %s1094_s0, %s885_s25 }
  0x12   : > { %v783_v5 = vld [vmem:[%s1001_s28 + $0x2] sm:$0xff]  ;;  %v784_v6 = vld [vmem:[%s1001_s28 + $0xa] sm:$0xff]  ;;  %v785_v13 = vld [vmem:[%s1001_s28 + $0x12] sm:$0xff] }
  0x13   : > { %v260_v7 = vld [vmem:[%s1001_s28] sm:$0xff]  ;;  %vm307_vm2 = vcmp.ge.f32.partialorder %v783_v5, 0.0  ;;  %vm308_vm3 = vcmp.ge.f32.partialorder %v784_v6, 0.0  ;;  %v315_v9 = vmul.f32 0.1, %v783_v5  ;;  %v261_v11 = vld [vmem:[%s1001_s28 + $0x8] sm:$0xff] }
  0x14   : > { %v316_v10 = vmul.f32 0.1, %v784_v6  ;;  %vm268_vm4 = vcmp.ge.f32.partialorder %v260_v7, 0.0  ;;  %v276_v12 = vmul.f32 0.1, %v260_v7  ;;  %v786_v14 = vld [vmem:[%s1001_s28 + $0x1a] sm:$0xff] }
  0x15   : > { %v323_v15 = vsel %vm307_vm2, %v783_v5, %v315_v9  ;;  %vm269_vm5 = vcmp.ge.f32.partialorder %v261_v11, 0.0  ;;  %v277_v17 = vmul.f32 0.1, %v261_v11  ;;  %v262_v18 = vld [vmem:[%s1001_s28 + $0x10] sm:$0xff]  ;;  %v263_v19 = vld [vmem:[%s1001_s28 + $0x18] sm:$0xff]  ;;  %vm309_vm6 = vcmp.ge.f32.partialorder %v785_v13, 0.0 }
  0x16   : > { %v324_v16 = vsel %vm308_vm3, %v784_v6, %v316_v10  ;;  %v284_v21 = vsel %vm268_vm4, %v260_v7, %v276_v12  ;;  %vm310_vm7 = vcmp.ge.f32.partialorder %v786_v14, 0.0  ;;  %v787_v22 = vld [vmem:[%s1001_s28 + $0x22] sm:$0xff]  ;;  %v788_v23 = vld [vmem:[%s1001_s28 + $0x2a] sm:$0xff]  ;;  %v317_v25 = vmul.f32 0.1, %v785_v13  ;;  %v789_v27 = vld [vmem:[%s1001_s28 + $0x32] sm:$0xff] }
  0x17   : > { %v331_v20 = vpack.c.bf16 %v324_v16, %v323_v15  ;;  %v285_v24 = vsel %vm269_vm5, %v261_v11, %v277_v17  ;;  %v318_v26 = vmul.f32 0.1, %v786_v14  ;;  %vm270_vm8 = vcmp.ge.f32.partialorder %v262_v18, 0.0  ;;  %v790_v31 = vld [vmem:[%s1001_s28 + $0x3a] sm:$0xff]  ;;  %v800_v34 = vld [vmem:[%s1001_s28 + $0x4] sm:$0xff]  ;;  %v801_v39 = vld [vmem:[%s1001_s28 + $0xc] sm:$0xff] }
  0x18   : > { %v292_v28 = vpack.c.bf16 %v285_v24, %v284_v21  ;;  %vm271_vm9 = vcmp.ge.f32.partialorder %v263_v19, 0.0  ;;  %v278_v29 = vmul.f32 0.1, %v262_v18  ;;  %v279_v30 = vmul.f32 0.1, %v263_v19  ;;  %v802_v42 = vld [vmem:[%s1001_s28 + $0x14] sm:$0xff] }
  0x19   : > { %835 = vmatprep.mubr.msk.bf16.mxu1 %vm337_vm1, %v331_v20  ;;  %v325_v32 = vsel %vm309_vm6, %v785_v13, %v317_v25  ;;  %v326_v33 = vsel %vm310_vm7, %v786_v14, %v318_v26  ;;  %vm311_vm10 = vcmp.ge.f32.partialorder %v787_v22, 0.0  ;;  %vm312_vm11 = vcmp.ge.f32.partialorder %v788_v23, 0.0  ;;  %v803_v46 = vld [vmem:[%s1001_s28 + $0x1c] sm:$0xff]  ;;  %v265_v54 = vld [vmem:[%s1001_s28 + $0x28] sm:$0xff]  ;;  %v266_v4 = vld [vmem:[%s1001_s28 + $0x30] sm:$0xff] }
  0x1a   : > { %845 = vmatprep.mubr.msk.bf16.mxu0 %vm337_vm1, %v292_v28  ;;  %v332_v35 = vpack.c.bf16 %v326_v33, %v325_v32  ;;  %v286_v36 = vsel %vm270_vm8, %v262_v18, %v278_v29  ;;  %v287_v37 = vsel %vm271_vm9, %v263_v19, %v279_v30  ;;  %v319_v38 = vmul.f32 0.1, %v787_v22  ;;  %v264_v50 = vld [vmem:[%s1001_s28 + $0x20] sm:$0xff]  ;;  %v805_v59 = vld [vmem:[%s1001_s28 + $0x2c] sm:$0xff]  ;;  %v267_v5 = vld [vmem:[%s1001_s28 + $0x38] sm:$0xff] }
  0x1b   : > { %v293_v40 = vpack.c.bf16 %v287_v37, %v286_v36  ;;  %v320_v41 = vmul.f32 0.1, %v788_v23  ;;  %vm313_vm12 = vcmp.ge.f32.partialorder %v789_v27, 0.0  ;;  %vm314_vm13 = vcmp.ge.f32.partialorder %v790_v31, 0.0  ;;  %v804_v55 = vld [vmem:[%s1001_s28 + $0x24] sm:$0xff]  ;;  %v806_v9 = vld [vmem:[%s1001_s28 + $0x34] sm:$0xff] }
  0x1c   : > { %836 = vmatmul.mubr.msk.bf16.vlgmr.msra.gmra.mrb[0].mxu1 %vm337_vm1, %v332_v35  ;;  %v327_v43 = vsel %vm311_vm10, %v787_v22, %v319_v38  ;;  %v321_v44 = vmul.f32 0.1, %v789_v27  ;;  %v322_v45 = vmul.f32 0.1, %v790_v31  ;;  %vm509_vm14 = vcmp.ge.f32.partialorder %v800_v34, 0.0  ;;  %v807_v10 = vld [vmem:[%s1001_s28 + $0x3c] sm:$0xff] }
  0x1d   : > { %864 = vmatpush3.bf16.msra.mxu1 %v987_v3  ;;  %846 = vmatmul.mubr.msk.bf16.vlgmr.msra.gmra.mrb[0].mxu0 %vm337_vm1, %v293_v40  ;;  %v328_v47 = vsel %vm312_vm11, %v788_v23, %v320_v41  ;;  %vm510_vm15 = vcmp.ge.f32.partialorder %v801_v39, 0.0  ;;  %v517_v48 = vmul.f32 0.1, %v800_v34  ;;  %v518_v49 = vmul.f32 0.1, %v801_v39  ;;  %v642_v38 = vld [vmem:[%s1051_s6] sm:$0xff] }
  0x1e   : > { %854 = vmatpush3.bf16.msra.mxu0 %v552_v8  ;;  %v333_v51 = vpack.c.bf16 %v328_v47, %v327_v43  ;;  %v329_v52 = vsel %vm313_vm12, %v789_v27, %v321_v44  ;;  %v330_v53 = vsel %vm314_vm13, %v790_v31, %v322_v45  ;;  %vm511_vm0 = vcmp.ge.f32.partialorder %v802_v42, 0.0  ;;  %v813_v31 = vld [vmem:[%s1096_s2] ss:$0 sm:$0xff] }
  0x1f   : > { %v334_v56 = vpack.c.bf16 %v330_v53, %v329_v52  ;;  %v525_v57 = vsel %vm509_vm14, %v800_v34, %v517_v48  ;;  %v526_v58 = vsel %vm510_vm15, %v801_v39, %v518_v49  ;;  %vm512_vm2 = vcmp.ge.f32.partialorder %v803_v46, 0.0  ;;  %v644_v34 = vld [vmem:[%s1051_s6 + $0x10] sm:$0xff] }
  0x20   : > { %839 = vmatprep.mubr.msk.bf16.mxu1 %vm337_vm1, %v333_v51  ;;  %v533_v60 = vpack.c.bf16 %v526_v58, %v525_v57  ;;  %v519_v61 = vmul.f32 0.1, %v802_v42  ;;  %v520_v62 = vmul.f32 0.1, %v803_v46  ;;  %vm272_vm3 = vcmp.ge.f32.partialorder %v264_v50, 0.0  ;;  %v648_v57 = vld [vmem:[%s1051_s6 + $0x30] sm:$0xff] }
  0x21   : > { %vm273_vm4 = vcmp.ge.f32.partialorder %v265_v54, 0.0  ;;  %v280_v63 = vmul.f32 0.1, %v264_v50  ;;  %v281_v0 = vmul.f32 0.1, %v265_v54  ;;  %vm513_vm5 = vcmp.ge.f32.partialorder %v804_v55, 0.0 }
  0x22   : > { %855 = vmatprep.mubr.msk.bf16.mxu0 %vm337_vm1, %v533_v60  ;;  %v527_v1 = vsel %vm511_vm0, %v802_v42, %v519_v61  ;;  %v528_v2 = vsel %vm512_vm2, %v803_v46, %v520_v62  ;;  %vm514_vm6 = vcmp.ge.f32.partialorder %v805_v59, 0.0  ;;  %v521_v3 = vmul.f32 0.1, %v804_v55  ;;  %v645_v42 = vld [vmem:[%s1051_s6 + $0x18] sm:$0xff]  ;;  %v643_v46 = vld [vmem:[%s1051_s6 + $0x8] sm:$0xff]  ;;  %v646_v62 = vld [vmem:[%s1051_s6 + $0x20] sm:$0xff] }
  0x23   : > { %v288_v6 = vsel %vm272_vm3, %v264_v50, %v280_v63  ;;  %v289_v7 = vsel %vm273_vm4, %v265_v54, %v281_v0  ;;  %v522_v8 = vmul.f32 0.1, %v805_v59  ;;  %v534_v11 = vpack.c.bf16 %v528_v2, %v527_v1  ;;  %v649_v2 = vld [vmem:[%s1051_s6 + $0x38] sm:$0xff] }
  0x24   : > { %840 = vmatmul.mubr.msk.bf16.gmra.mrb[4].mxu1 %vm337_vm1, %v334_v56  ;;  %v294_v12 = vpack.c.bf16 %v289_v7, %v288_v6  ;;  %v529_v13 = vsel %vm513_vm5, %v804_v55, %v521_v3  ;;  %vm274_vm7 = vcmp.ge.f32.partialorder %v266_v4, 0.0  ;;  %v282_v15 = vmul.f32 0.1, %v266_v4  ;;  %v647_v6 = vld [vmem:[%s1051_s6 + $0x28] sm:$0xff] }
  0x25   : > { %v530_v14 = vsel %vm514_vm6, %v805_v59, %v522_v8  ;;  %v283_v16 = vmul.f32 0.1, %v267_v5  ;;  %vm275_vm8 = vcmp.ge.f32.partialorder %v267_v5, 0.0  ;;  %v523_v18 = vmul.f32 0.1, %v806_v9 }
  0x26   : > { %849 = vmatprep.mubr.msk.bf16.mxu1 %vm337_vm1, %v294_v12  ;;  %v535_v17 = vpack.c.bf16 %v530_v14, %v529_v13  ;;  %v524_v19 = vmul.f32 0.1, %v807_v10  ;;  %vm515_vm9 = vcmp.ge.f32.partialorder %v806_v9, 0.0  ;;  %vm516_vm10 = vcmp.ge.f32.partialorder %v807_v10, 0.0 }
  0x27   : > { %v290_v20 = vsel %vm274_vm7, %v266_v4, %v282_v15  ;;  %v291_v21 = vsel %vm275_vm8, %v267_v5, %v283_v16  ;;  %v531_v22 = vsel %vm515_vm9, %v806_v9, %v523_v18 }
  0x28   : > { %v532_v23 = vsel %vm516_vm10, %v807_v10, %v524_v19  ;;  %v295_v24 = vpack.c.bf16 %v291_v21, %v290_v20 }
  0x29   : > { %856 = vmatmul.mubr.msk.bf16.vlgmr.msra.gmra.mrb[0].mxu0 %vm337_vm1, %v534_v11  ;;  %v536_v25 = vpack.c.bf16 %v532_v23, %v531_v22 }
  0x2a   : > { %859 = vmatprep.mubr.msk.bf16.mxu0 %vm337_vm1, %v535_v17 }
  0x30   : > { %850 = vmatmul.mubr.msk.bf16.vlgmr.msra.gmra.mrb[4].mxu1 %vm337_vm1, %v295_v24 }
  0x31   : > { %860 = vmatmul.mubr.msk.bf16.gmra.mrb[4].mxu0 %vm337_vm1, %v536_v25 }
  0xef   : > { %v837_v26 = vpop.f32.mrb[0].mxu1 }
  0xf0   : > { %v388_v27 = vpop.f32.mrb[1].mxu1 }
  0xf1   : > { %v838_v28 = vpop.f32.mrb[2].mxu1 }
  0xf2   : > { %v391_v29 = vpop.f32.mrb[3].mxu1 }
  0xfc   : > { %v857_v30 = vpop.f32.mrb[0].mxu0 }
  0xfd   : > { %v865_v32 = vadd.f32 %v857_v30, %v837_v26  ;;  %v588_v33 = vpop.f32.mrb[1].mxu0 }
  0xfe   : > { %v866_v35 = vadd.f32 %v588_v33, %v388_v27  ;;  %v858_v36 = vpop.f32.mrb[2].mxu0 }
  0xff   : > { %v636_v37 = vadd.f32 %v865_v32, %v813_v31  ;;  %v867_v39 = vadd.f32 %v858_v36, %v838_v28  ;;  %v591_v40 = vpop.f32.mrb[3].mxu0 }
 0x100   : > { %v634_v41 = vadd.f32 %v866_v35, %v813_v31  ;;  %v868_v43 = vadd.f32 %v591_v40, %v391_v29 }
 0x101   : > { %v652_v44 = vadd.f32 %v644_v34, %v636_v37  ;;  %v637_v45 = vadd.f32 %v867_v39, %v813_v31 }
 0x102   : > { %v650_v47 = vadd.f32 %v642_v38, %v634_v41  ;;  %v635_v48 = vadd.f32 %v868_v43, %v813_v31 }
 0x103   : > { %660 = vst.msk [vmem:[%s1061_s11 + $0x10] sm:$0xff] %vm337_vm1, %v652_v44  ;;  %v653_v49 = vadd.f32 %v645_v42, %v637_v45  ;;  %v851_v50 = vpop.f32.mrb[4].mxu1 }
 0x104   : > { %658 = vst.msk [vmem:[%s1061_s11] sm:$0xff] %vm337_vm1, %v650_v47  ;;  %v651_v51 = vadd.f32 %v643_v46, %v635_v48  ;;  %v861_v52 = vpop.f32.mrb[4].mxu0  ;;  %v484_v53 = vpop.f32.mrb[5].mxu1 }
 0x105   : > { %661 = vst.msk [vmem:[%s1061_s11 + $0x18] sm:$0xff] %vm337_vm1, %v653_v49  ;;  %v869_v54 = vadd.f32 %v861_v52, %v851_v50  ;;  %v604_v55 = vpop.f32.mrb[5].mxu0  ;;  %v852_v56 = vpop.f32.mrb[6].mxu1 }
 0x106   : > { %659 = vst.msk [vmem:[%s1061_s11 + $0x8] sm:$0xff] %vm337_vm1, %v651_v51  ;;  %v870_v58 = vadd.f32 %v604_v55, %v484_v53  ;;  %v862_v59 = vpop.f32.mrb[6].mxu0  ;;  %v487_v60 = vpop.f32.mrb[7].mxu1 }
 0x107   : > { %v640_v61 = vadd.f32 %v869_v54, %v813_v31  ;;  %v871_v63 = vadd.f32 %v862_v59, %v852_v56  ;;  %v607_v0 = vpop.f32.mrb[7].mxu0 }
 0x108   : > { %v638_v1 = vadd.f32 %v870_v58, %v813_v31  ;;  %v872_v3 = vadd.f32 %v607_v0, %v487_v60 }
 0x109   : > { %v656_v4 = vadd.f32 %v648_v57, %v640_v61  ;;  %v641_v5 = vadd.f32 %v871_v63, %v813_v31 }
 0x10a   : > { %v654_v7 = vadd.f32 %v646_v62, %v638_v1  ;;  %v639_v8 = vadd.f32 %v872_v3, %v813_v31 }
 0x10b   : > { %664 = vst.msk [vmem:[%s1061_s11 + $0x30] sm:$0xff] %vm337_vm1, %v656_v4  ;;  %v657_v9 = vadd.f32 %v649_v2, %v641_v5 }
 0x10c   : > { %662 = vst.msk [vmem:[%s1061_s11 + $0x20] sm:$0xff] %vm337_vm1, %v654_v7  ;;  %v655_v10 = vadd.f32 %v647_v6, %v639_v8 }
 0x10d   : > { %665 = vst.msk [vmem:[%s1061_s11 + $0x38] sm:$0xff] %vm337_vm1, %v657_v9 }
 0x10e   : > { %663 = vst.msk [vmem:[%s1061_s11 + $0x28] sm:$0xff] %vm337_vm1, %v655_v10 }
 0x10f PF: > { %s14_s17 = sadd.s32 1, %s932_s17   ;;  %s1099_s15 = smov %s928_s16 }
 0x110   : > { %p11_p5 = scmp.ge.s32.totalorder %s14_s17, 4   ;;  %s1100_s16 = smov %s1102_s18 }
 0x112   :  { %13 = sbr.rel (!%p11_p5) target bundleno = 2 (0x2), region = 74 }

// kernel: _lambda_.59
= control target key start
LH: loop header
LB: loop body
LE: loop exit
PB: predicated region body
PF: predicated region fallthrough
CT: control target
= control target key end

     0   :  { %s1556_s14 = smov 0   ;;  %s1558_s15 = smov 0   ;;  %s1773_s0 = inlined_call_operand.vmem [shape: f32[2,70,8], index: 0, kind: input, shape index: {}]   ;;  %s1774_s1 = inlined_call_operand.vmem [shape: bf16[7,8,1], index: 1, kind: input, shape index: {}]   ;;  %s1775_s2 = inlined_call_operand.<no memory space> [shape: f32[1,1], index: 2, kind: input, shape index: {}]   ;;  %s1776_s3 = inlined_call_operand.vmem [shape: f32[2,64,1], index: 3, kind: output, shape index: {}]  }
   0x1   :  { %v8_v0 = vstv %s1775_s2  ;;  %s1560_s16 = smov 0  }
   0x2   :  { %9 = vst [vmem:[#allocation2] sm:$0x1] %v8_v0 }
   0x3 LB: > { %s27_s2 = sadd.s32 1, %s1527_s15  ;;  %p1215_p0 = scmp.ge.s32.totalorder %s1531_s16, 1  ;;  %s1531_s16 = sphi %s1560_s16, %s15_s16   ;;  %s1527_s15 = sphi %s1558_s15, %s1778_s15   ;;  %s1523_s14 = sphi %s1556_s14, %s1777_s14  }
   0x4   : > { %p29_p1 = scmp.ge.s32.totalorder %s27_s2, 2  ;;  %p153_p2 = scmp.lt.s32.totalorder %s1531_s16, 3 }
   0x6   : > { %s1780_s2 = smov (%p29_p1, %s27_s2), 0  ;;  %p154_p3 = pnand %p1215_p0, %p153_p2 }
   0x7   : > { %v1227_v1 = vld [vmem:[%s1774_s1 + $0x4] sm:$0xf] (!%p154_p3)  ;;  %vm289_vm0 = vcmask (!%p154_p3), 1043456   ;;  %v1580_v2 = vld [vmem:[%s1774_s1 + $0xc] sm:$0xf] (!%p154_p3)  ;;  %p181_p4 = scmp.lt.s32.totalorder (!%p154_p3), %s1523_s14, 1 }
   0x8   : > { %157 = sbr.rel (%p154_p3) target bundleno = 313 (0x139), region = 32  ;;  %1460 = vmatprep.subr.msk.bf16.mxu1 (!%p154_p3), %vm289_vm0, %v1227_v1  ;;  %1463 = vmatprep.subr.msk.bf16.mxu0 (!%p154_p3), %vm289_vm0, %v1580_v2  ;;  %v291_v3 = vsel (!%p154_p3), %vm289_vm0, %v1227_v1, 0  ;;  %v1588_v4 = vsel (!%p154_p3), %vm289_vm0, %v1580_v2, 0  ;;  %v235_v5 = vld [vmem:[%s1774_s1] sm:$0xf] (!%p154_p3)  ;;  %vm276_vm1 = vcmask (!%p154_p3), 64512  }
   0x9   : > { %1341 = vmatpush3.bf16.msra.mxu1 (!%p154_p3), %v291_v3  ;;  %1371 = vmatpush3.bf16.msra.mxu0 (!%p154_p3), %v1588_v4  ;;  %v1270_v6 = vld [vmem:[%s1774_s1 + $0x10] sm:$0xf] (!%p154_p3)  ;;  %v1604_v7 = vld [vmem:[%s1774_s1 + $0x14] sm:$0xf] (!%p154_p3)  ;;  %v1610_v8 = vld [vmem:[%s1774_s1 + $0x8] sm:$0xf] (!%p154_p3) }
   0xa   : > { %1461 = vmatprep.subr.msk.bf16.mxu1 (!%p154_p3), %vm289_vm0, %v235_v5  ;;  %1465 = vmatprep.subr.msk.bf16.mxu0 (!%p154_p3), %vm289_vm0, %v1270_v6  ;;  %v1615_v9 = vld [vmem:[%s1774_s1 + $0x18] sm:$0xf] (!%p154_p3)  ;;  %v371_v10 = vsel (!%p154_p3), %vm289_vm0, %v235_v5, 0  ;;  %v1624_v11 = vsel (!%p154_p3), %vm289_vm0, %v1270_v6, 0  ;;  %v1631_v15 = vsel (!%p154_p3), %vm289_vm0, %v1604_v7, 0  ;;  %v1635_v16 = vsel (!%p154_p3), %vm289_vm0, %v1610_v8, 0 }
   0xb   : > { %v1639_v17 = vsel (!%p154_p3), %vm289_vm0, %v1615_v9, 0 }
   0xf   : > { %s1782_s14 = smov (!%p181_p4, %s1523_s14), 1 }
  0x10   : > { %s1468_s27 = smul.u32 72, %s1782_s14  ;;  %s1304_s8 = sshll.u32 %s1782_s14, 6 }
  0x11   : > { %s194_s11 = scalar_lea.vmem %s1776_s3, %s1304_s8 }
  0x12   : > { %s1620_s7 = scalar_lea.vmem %s1773_s0, %s1468_s27 }
  0x13   : > { %v1219_v12 = vld [vmem:[%s1620_s7 + $0x1] sm:$0xff]  ;;  %v1220_v13 = vld [vmem:[%s1620_s7 + $0x9] sm:$0xff]  ;;  %v1221_v22 = vld [vmem:[%s1620_s7 + $0x11] sm:$0xff] }
  0x14   : > { %v1249_v14 = vld [vmem:[%s1620_s7 + $0x3] sm:$0xff]  ;;  %vm246_vm2 = vcmp.ge.f32.partialorder %v1219_v12, 0.0  ;;  %vm247_vm3 = vcmp.ge.f32.partialorder %v1220_v13, 0.0  ;;  %v254_v18 = vmul.f32 0.1, %v1219_v12  ;;  %v1250_v20 = vld [vmem:[%s1620_s7 + $0xb] sm:$0xff] }
  0x15   : > { %v255_v19 = vmul.f32 0.1, %v1220_v13  ;;  %vm576_vm4 = vcmp.ge.f32.partialorder %v1249_v14, 0.0  ;;  %v584_v21 = vmul.f32 0.1, %v1249_v14  ;;  %v1222_v23 = vld [vmem:[%s1620_s7 + $0x19] sm:$0xff] }
  0x16   : > { %v262_v24 = vsel %vm246_vm2, %v1219_v12, %v254_v18  ;;  %vm577_vm5 = vcmp.ge.f32.partialorder %v1250_v20, 0.0  ;;  %v585_v26 = vmul.f32 0.1, %v1250_v20  ;;  %v1251_v27 = vld [vmem:[%s1620_s7 + $0x13] sm:$0xff]  ;;  %v1252_v28 = vld [vmem:[%s1620_s7 + $0x1b] sm:$0xff]  ;;  %vm248_vm6 = vcmp.ge.f32.partialorder %v1221_v22, 0.0 }
  0x17   : > { %v263_v25 = vsel %vm247_vm3, %v1220_v13, %v255_v19  ;;  %v592_v30 = vsel %vm576_vm4, %v1249_v14, %v584_v21  ;;  %vm249_vm7 = vcmp.ge.f32.partialorder %v1222_v23, 0.0  ;;  %v1223_v31 = vld [vmem:[%s1620_s7 + $0x21] sm:$0xff]  ;;  %v1224_v32 = vld [vmem:[%s1620_s7 + $0x29] sm:$0xff]  ;;  %v256_v34 = vmul.f32 0.1, %v1221_v22  ;;  %v1225_v36 = vld [vmem:[%s1620_s7 + $0x31] sm:$0xff] }
  0x18   : > { %v270_v29 = vpack.c.bf16 %v263_v25, %v262_v24  ;;  %v593_v33 = vsel %vm577_vm5, %v1250_v20, %v585_v26  ;;  %v257_v35 = vmul.f32 0.1, %v1222_v23  ;;  %vm578_vm8 = vcmp.ge.f32.partialorder %v1251_v27, 0.0  ;;  %v1226_v40 = vld [vmem:[%s1620_s7 + $0x39] sm:$0xff]  ;;  %v1262_v43 = vld [vmem:[%s1620_s7 + $0x4] sm:$0xff]  ;;  %v1263_v48 = vld [vmem:[%s1620_s7 + $0xc] sm:$0xff] }
  0x19   : > { %v600_v37 = vpack.c.bf16 %v593_v33, %v592_v30  ;;  %vm579_vm9 = vcmp.ge.f32.partialorder %v1252_v28, 0.0  ;;  %v586_v38 = vmul.f32 0.1, %v1251_v27  ;;  %v587_v39 = vmul.f32 0.1, %v1252_v28  ;;  %v1264_v51 = vld [vmem:[%s1620_s7 + $0x14] sm:$0xff] }
  0x1a   : > { %1342 = vmatprep.mubr.msk.bf16.mxu1 %vm276_vm1, %v270_v29  ;;  %v264_v41 = vsel %vm248_vm6, %v1221_v22, %v256_v34  ;;  %v265_v42 = vsel %vm249_vm7, %v1222_v23, %v257_v35  ;;  %vm250_vm10 = vcmp.ge.f32.partialorder %v1223_v31, 0.0  ;;  %vm251_vm11 = vcmp.ge.f32.partialorder %v1224_v32, 0.0  ;;  %v1265_v55 = vld [vmem:[%s1620_s7 + $0x1c] sm:$0xff]  ;;  %v200_v63 = vld [vmem:[%s1620_s7 + $0x8] sm:$0xff]  ;;  %v201_v0 = vld [vmem:[%s1620_s7 + $0x10] sm:$0xff] }
  0x1b   : > { %1372 = vmatprep.mubr.msk.bf16.mxu0 %vm276_vm1, %v600_v37  ;;  %v271_v44 = vpack.c.bf16 %v265_v42, %v264_v41  ;;  %v594_v45 = vsel %vm578_vm8, %v1251_v27, %v586_v38  ;;  %v595_v46 = vsel %vm579_vm9, %v1252_v28, %v587_v39  ;;  %v258_v47 = vmul.f32 0.1, %v1223_v31  ;;  %v199_v59 = vld [vmem:[%s1620_s7] sm:$0xff]  ;;  %v202_v6 = vld [vmem:[%s1620_s7 + $0x18] sm:$0xff]  ;;  %v204_v30 = vld [vmem:[%s1620_s7 + $0x28] sm:$0xff] }
  0x1c   : > { %v601_v49 = vpack.c.bf16 %v595_v46, %v594_v45  ;;  %v259_v50 = vmul.f32 0.1, %v1224_v32  ;;  %vm252_vm12 = vcmp.ge.f32.partialorder %v1225_v36, 0.0  ;;  %vm253_vm13 = vcmp.ge.f32.partialorder %v1226_v40, 0.0  ;;  %v1268_v21 = vld [vmem:[%s1620_s7 + $0x34] sm:$0xff]  ;;  %v1269_v26 = vld [vmem:[%s1620_s7 + $0x3c] sm:$0xff] }
  0x1d   : > { %1343 = vmatmul.mubr.msk.bf16.vlgmr.msra.gmra.mrb[0].mxu1 %vm276_vm1, %v271_v44  ;;  %v266_v52 = vsel %vm250_vm10, %v1223_v31, %v258_v47  ;;  %v260_v53 = vmul.f32 0.1, %v1225_v36  ;;  %v261_v54 = vmul.f32 0.1, %v1226_v40  ;;  %vm704_vm14 = vcmp.ge.f32.partialorder %v1262_v43, 0.0  ;;  %v203_v29 = vld [vmem:[%s1620_s7 + $0x20] sm:$0xff] }
  0x1e   : > { %1351 = vmatpush3.bf16.msra.mxu1 %v371_v10  ;;  %1373 = vmatmul.mubr.msk.bf16.vlgmr.msra.gmra.mrb[0].mxu0 %vm276_vm1, %v601_v49  ;;  %v267_v56 = vsel %vm251_vm11, %v1224_v32, %v259_v50  ;;  %vm705_vm15 = vcmp.ge.f32.partialorder %v1263_v48, 0.0  ;;  %v712_v57 = vmul.f32 0.1, %v1262_v43  ;;  %v713_v58 = vmul.f32 0.1, %v1263_v48  ;;  %v1266_v10 = vld [vmem:[%s1620_s7 + $0x24] sm:$0xff] }
  0x1f   : > { %1381 = vmatpush3.bf16.msra.mxu0 %v1624_v11  ;;  %v272_v60 = vpack.c.bf16 %v267_v56, %v266_v52  ;;  %v268_v61 = vsel %vm252_vm12, %v1225_v36, %v260_v53  ;;  %v269_v62 = vsel %vm253_vm13, %v1226_v40, %v261_v54  ;;  %vm706_vm2 = vcmp.ge.f32.partialorder %v1264_v51, 0.0  ;;  %1462 = vmatprep.subr.msk.bf16.mxu1 %vm289_vm0, %v1610_v8  ;;  %v1267_v8 = vld [vmem:[%s1620_s7 + $0x2c] sm:$0xff]  ;;  %v206_v37 = vld [vmem:[%s1620_s7 + $0x38] sm:$0xff] }
  0x20   : > { %v273_v1 = vpack.c.bf16 %v269_v62, %v268_v61  ;;  %v720_v3 = vsel %vm704_vm14, %v1262_v43, %v712_v57  ;;  %v721_v5 = vsel %vm705_vm15, %v1263_v48, %v713_v58  ;;  %1466 = vmatprep.subr.msk.bf16.mxu0 %vm289_vm0, %v1604_v7  ;;  %vm707_vm3 = vcmp.ge.f32.partialorder %v1265_v55, 0.0  ;;  %v205_v34 = vld [vmem:[%s1620_s7 + $0x30] sm:$0xff]  ;;  %v1275_v41 = vld [vmem:[%s1620_s7 + $0x5] sm:$0xff]  ;;  %v1278_v52 = vld [vmem:[%s1620_s7 + $0x1d] sm:$0xff] }
  0x21   : > { %1346 = vmatprep.mubr.msk.bf16.mxu1 %vm276_vm1, %v272_v60  ;;  %v728_v11 = vpack.c.bf16 %v721_v5, %v720_v3  ;;  %v714_v12 = vmul.f32 0.1, %v1264_v51  ;;  %v715_v13 = vmul.f32 0.1, %v1265_v55  ;;  %vm207_vm4 = vcmp.ge.f32.partialorder %v199_v59, 0.0  ;;  %v1276_v45 = vld [vmem:[%s1620_s7 + $0xd] sm:$0xff] }
  0x22   : > { %vm208_vm5 = vcmp.ge.f32.partialorder %v200_v63, 0.0  ;;  %v215_v14 = vmul.f32 0.1, %v199_v59  ;;  %v216_v18 = vmul.f32 0.1, %v200_v63  ;;  %vm209_vm6 = vcmp.ge.f32.partialorder %v201_v0, 0.0 }
  0x23   : > { %1382 = vmatprep.mubr.msk.bf16.mxu0 %vm276_vm1, %v728_v11  ;;  %v722_v7 = vsel %vm706_vm2, %v1264_v51, %v714_v12  ;;  %v723_v19 = vsel %vm707_vm3, %v1265_v55, %v715_v13  ;;  %vm210_vm7 = vcmp.ge.f32.partialorder %v202_v6, 0.0  ;;  %v217_v20 = vmul.f32 0.1, %v201_v0  ;;  %v1277_v48 = vld [vmem:[%s1620_s7 + $0x15] sm:$0xff]  ;;  %v1237_v60 = vld [vmem:[%s1620_s7 + $0xa] sm:$0xff] }
  0x24   : > { %v729_v22 = vpack.c.bf16 %v723_v19, %v722_v7  ;;  %v223_v23 = vsel %vm207_vm4, %v199_v59, %v215_v14  ;;  %v224_v24 = vsel %vm208_vm5, %v200_v63, %v216_v18  ;;  %v218_v25 = vmul.f32 0.1, %v202_v6  ;;  %v1238_v61 = vld [vmem:[%s1620_s7 + $0x12] sm:$0xff]  ;;  %v1282_v19 = vld [vmem:[%s1620_s7 + $0x3d] sm:$0xff] }
  0x25   : > { %1347 = vmatmul.mubr.msk.bf16.gmra.mrb[4].mxu1 %vm276_vm1, %v273_v1  ;;  %v231_v27 = vpack.c.bf16 %v224_v24, %v223_v23  ;;  %v225_v28 = vsel %vm209_vm6, %v201_v0, %v217_v20  ;;  %vm708_vm8 = vcmp.ge.f32.partialorder %v1266_v10, 0.0  ;;  %vm709_vm9 = vcmp.ge.f32.partialorder %v1267_v8, 0.0  ;;  %v1279_v0 = vld [vmem:[%s1620_s7 + $0x25] sm:$0xff] }
  0x26   : > { %v226_v31 = vsel %vm210_vm7, %v202_v6, %v218_v25  ;;  %v716_v32 = vmul.f32 0.1, %v1266_v10  ;;  %v717_v33 = vmul.f32 0.1, %v1267_v8  ;;  %vm710_vm10 = vcmp.ge.f32.partialorder %v1268_v21, 0.0  ;;  %v1280_v6 = vld [vmem:[%s1620_s7 + $0x2d] sm:$0xff] }
  0x27   : > { %1352 = vmatprep.mubr.msk.bf16.mxu1 %vm276_vm1, %v231_v27  ;;  %vm711_vm11 = vcmp.ge.f32.partialorder %v1269_v26, 0.0  ;;  %v718_v35 = vmul.f32 0.1, %v1268_v21  ;;  %v719_v36 = vmul.f32 0.1, %v1269_v26  ;;  %v232_v38 = vpack.c.bf16 %v226_v31, %v225_v28  ;;  %v1241_v23 = vld [vmem:[%s1620_s7 + $0x2a] sm:$0xff] }
  0x28   : > { %v724_v39 = vsel %vm708_vm8, %v1266_v10, %v716_v32  ;;  %v725_v40 = vsel %vm709_vm9, %v1267_v8, %v717_v33  ;;  %vm211_vm12 = vcmp.ge.f32.partialorder %v203_v29, 0.0  ;;  %vm212_vm13 = vcmp.ge.f32.partialorder %v204_v30, 0.0  ;;  %v1281_v8 = vld [vmem:[%s1620_s7 + $0x35] sm:$0xff] }
  0x29   : > { %v730_v42 = vpack.c.bf16 %v725_v40, %v724_v39  ;;  %v726_v43 = vsel %vm710_vm10, %v1268_v21, %v718_v35  ;;  %v219_v44 = vmul.f32 0.1, %v203_v29  ;;  %v727_v46 = vsel %vm711_vm11, %v1269_v26, %v719_v36  ;;  %v1242_v27 = vld [vmem:[%s1620_s7 + $0x32] sm:$0xff]  ;;  %v1243_v31 = vld [vmem:[%s1620_s7 + $0x3a] sm:$0xff]  ;;  %v1288_v35 = vld [vmem:[%s1620_s7 + $0x6] sm:$0xff] }
  0x2a   : > { %1383 = vmatmul.mubr.msk.bf16.vlgmr.msra.gmra.mrb[0].mxu0 %vm276_vm1, %v729_v22  ;;  %v220_v47 = vmul.f32 0.1, %v204_v30  ;;  %vm213_vm14 = vcmp.ge.f32.partialorder %v205_v34, 0.0  ;;  %vm214_vm15 = vcmp.ge.f32.partialorder %v206_v37, 0.0  ;;  %v221_v50 = vmul.f32 0.1, %v205_v34 }
  0x2b   : > { %1391 = vmatpush3.bf16.msra.mxu0 %v1631_v15  ;;  %1386 = vmatprep.mubr.msk.bf16.mxu0 %vm276_vm1, %v730_v42  ;;  %v227_v49 = vsel %vm211_vm12, %v203_v29, %v219_v44  ;;  %v222_v51 = vmul.f32 0.1, %v206_v37  ;;  %vm832_vm2 = vcmp.ge.f32.partialorder %v1275_v41, 0.0  ;;  %vm833_vm3 = vcmp.ge.f32.partialorder %v1276_v45, 0.0  ;;  %v1236_v15 = vld [vmem:[%s1620_s7 + $0x2] sm:$0xff]  ;;  %v1289_v39 = vld [vmem:[%s1620_s7 + $0xe] sm:$0xff] }
  0x2c   : > { %v228_v53 = vsel %vm212_vm13, %v204_v30, %v220_v47  ;;  %v840_v54 = vmul.f32 0.1, %v1275_v41  ;;  %v841_v55 = vmul.f32 0.1, %v1276_v45  ;;  %1467 = vmatprep.subr.msk.bf16.mxu0 %vm289_vm0, %v1615_v9  ;;  %v731_v56 = vpack.c.bf16 %v727_v46, %v726_v43  ;;  %v1239_v9 = vld [vmem:[%s1620_s7 + $0x1a] sm:$0xff]  ;;  %v1240_v22 = vld [vmem:[%s1620_s7 + $0x22] sm:$0xff] }
  0x2d   : > { %1353 = vmatmul.mubr.msk.bf16.vlgmr.msra.gmra.mrb[0].mxu1 %vm276_vm1, %v232_v38  ;;  %v233_v57 = vpack.c.bf16 %v228_v53, %v227_v49  ;;  %v229_v58 = vsel %vm213_vm14, %v205_v34, %v221_v50  ;;  %v230_v59 = vsel %vm214_vm15, %v206_v37, %v222_v51  ;;  %vm834_vm4 = vcmp.ge.f32.partialorder %v1277_v48, 0.0  ;;  %v1290_v50 = vld [vmem:[%s1620_s7 + $0x16] sm:$0xff]  ;;  %v1254_v51 = vld [vmem:[%s1620_s7 + $0x2b] sm:$0xff] }
  0x2e   : > { %1361 = vmatpush3.bf16.msra.mxu1 %v1635_v16  ;;  %v848_v62 = vsel %vm832_vm2, %v1275_v41, %v840_v54  ;;  %v849_v63 = vsel %vm833_vm3, %v1276_v45, %v841_v55  ;;  %vm835_vm5 = vcmp.ge.f32.partialorder %v1278_v52, 0.0  ;;  %v842_v3 = vmul.f32 0.1, %v1277_v48  ;;  %v1291_v54 = vld [vmem:[%s1620_s7 + $0x1e] sm:$0xff] }
  0x2f   : > { %1356 = vmatprep.mubr.msk.bf16.mxu1 %vm276_vm1, %v233_v57  ;;  %v856_v1 = vpack.c.bf16 %v849_v63, %v848_v62  ;;  %v843_v5 = vmul.f32 0.1, %v1278_v52  ;;  %vm448_vm6 = vcmp.ge.f32.partialorder %v1236_v15, 0.0  ;;  %1464 = vmatprep.subr.msk.bf16.mxu1 %vm289_vm0, %v1580_v2  ;;  %vm449_vm7 = vcmp.ge.f32.partialorder %v1237_v60, 0.0  ;;  %v1292_v57 = vld [vmem:[%s1620_s7 + $0x26] sm:$0xff] }
  0x30   : > { %v456_v16 = vmul.f32 0.1, %v1236_v15  ;;  %v457_v10 = vmul.f32 0.1, %v1237_v60  ;;  %vm450_vm8 = vcmp.ge.f32.partialorder %v1238_v61, 0.0  ;;  %v234_v11 = vpack.c.bf16 %v230_v59, %v229_v58  ;;  %v1293_v58 = vld [vmem:[%s1620_s7 + $0x2e] sm:$0xff] }
  0x31   : > { %v850_v12 = vsel %vm834_vm4, %v1277_v48, %v842_v3  ;;  %vm451_vm9 = vcmp.ge.f32.partialorder %v1239_v9, 0.0  ;;  %v458_v13 = vmul.f32 0.1, %v1238_v61  ;;  %v851_v14 = vsel %vm835_vm5, %v1278_v52, %v843_v5  ;;  %v1253_v48 = vld [vmem:[%s1620_s7 + $0x23] sm:$0xff] }
  0x32   : > { %1387 = vmatmul.mubr.msk.bf16.gmra.mrb[4].mxu0 %vm276_vm1, %v731_v56  ;;  %v464_v2 = vsel %vm448_vm6, %v1236_v15, %v456_v16  ;;  %v465_v18 = vsel %vm449_vm7, %v1237_v60, %v457_v10  ;;  %v459_v7 = vmul.f32 0.1, %v1239_v9  ;;  %vm836_vm0 = vcmp.ge.f32.partialorder %v1279_v0, 0.0  ;;  %v1255_v16 = vld [vmem:[%s1620_s7 + $0x33] sm:$0xff]  ;;  %v1256_v10 = vld [vmem:[%s1620_s7 + $0x3b] sm:$0xff] }
  0x33   : > { %1392 = vmatprep.mubr.msk.bf16.mxu0 %vm276_vm1, %v856_v1  ;;  %v472_v20 = vpack.c.bf16 %v465_v18, %v464_v2  ;;  %v466_v21 = vsel %vm450_vm8, %v1238_v61, %v458_v13  ;;  %vm837_vm10 = vcmp.ge.f32.partialorder %v1280_v6, 0.0  ;;  %v844_v25 = vmul.f32 0.1, %v1279_v0  ;;  %v1294_v13 = vld [vmem:[%s1620_s7 + $0x36] sm:$0xff] }
  0x34   : > { %v467_v24 = vsel %vm451_vm9, %v1239_v9, %v459_v7  ;;  %v845_v26 = vmul.f32 0.1, %v1280_v6  ;;  %vm838_vm11 = vcmp.ge.f32.partialorder %v1281_v8, 0.0  ;;  %v857_v28 = vpack.c.bf16 %v851_v14, %v850_v12 }
  0x35   : > { %1357 = vmatmul.mubr.msk.bf16.gmra.mrb[4].mxu1 %vm276_vm1, %v234_v11  ;;  %vm839_vm12 = vcmp.ge.f32.partialorder %v1282_v19, 0.0  ;;  %v846_v29 = vmul.f32 0.1, %v1281_v8  ;;  %v847_v30 = vmul.f32 0.1, %v1282_v19  ;;  %v473_v32 = vpack.c.bf16 %v467_v24, %v466_v21 }
  0x36   : > { %1362 = vmatprep.mubr.msk.bf16.mxu1 %vm276_vm1, %v472_v20  ;;  %v852_v33 = vsel %vm836_vm0, %v1279_v0, %v844_v25  ;;  %v853_v34 = vsel %vm837_vm10, %v1280_v6, %v845_v26  ;;  %vm452_vm13 = vcmp.ge.f32.partialorder %v1240_v22, 0.0  ;;  %vm453_vm14 = vcmp.ge.f32.partialorder %v1241_v23, 0.0 }
  0x37   : > { %v858_v36 = vpack.c.bf16 %v853_v34, %v852_v33  ;;  %v854_v37 = vsel %vm838_vm11, %v1281_v8, %v846_v29  ;;  %v460_v38 = vmul.f32 0.1, %v1240_v22  ;;  %v855_v40 = vsel %vm839_vm12, %v1282_v19, %v847_v30  ;;  %v1295_v8 = vld [vmem:[%s1620_s7 + $0x3e] sm:$0xff] }
  0x38   : > { %v461_v41 = vmul.f32 0.1, %v1241_v23  ;;  %vm454_vm15 = vcmp.ge.f32.partialorder %v1242_v27, 0.0  ;;  %vm455_vm2 = vcmp.ge.f32.partialorder %v1243_v31, 0.0  ;;  %v462_v43 = vmul.f32 0.1, %v1242_v27 }
  0x39   : > { %v468_v42 = vsel %vm452_vm13, %v1240_v22, %v460_v38  ;;  %v463_v44 = vmul.f32 0.1, %v1243_v31  ;;  %vm960_vm3 = vcmp.ge.f32.partialorder %v1288_v35, 0.0  ;;  %vm961_vm4 = vcmp.ge.f32.partialorder %v1289_v39, 0.0 }
  0x3a   : > { %1393 = vmatmul.mubr.msk.bf16.vlgmr.msra.gmra.mrb[0].mxu0 %vm276_vm1, %v857_v28  ;;  %v469_v45 = vsel %vm453_vm14, %v1241_v23, %v461_v41  ;;  %v968_v46 = vmul.f32 0.1, %v1288_v35  ;;  %v969_v47 = vmul.f32 0.1, %v1289_v39  ;;  %v859_v55 = vpack.c.bf16 %v855_v40, %v854_v37 }
  0x3b   : > { %1401 = vmatpush3.bf16.msra.mxu0 %v1639_v17  ;;  %1396 = vmatprep.mubr.msk.bf16.mxu0 %vm276_vm1, %v858_v36  ;;  %v474_v49 = vpack.c.bf16 %v469_v45, %v468_v42  ;;  %v470_v15 = vsel %vm454_vm15, %v1242_v27, %v462_v43  ;;  %v471_v56 = vsel %vm455_vm2, %v1243_v31, %v463_v44  ;;  %vm580_vm5 = vcmp.ge.f32.partialorder %v1253_v48, 0.0 }
  0x3c   : > { %v976_v52 = vsel %vm960_vm3, %v1288_v35, %v968_v46  ;;  %v977_v53 = vsel %vm961_vm4, %v1289_v39, %v969_v47  ;;  %vm962_vm6 = vcmp.ge.f32.partialorder %v1290_v50, 0.0  ;;  %vm581_vm7 = vcmp.ge.f32.partialorder %v1254_v51, 0.0 }
  0x3d   : > { %1363 = vmatmul.mubr.msk.bf16.vlgmr.msra.gmra.mrb[0].mxu1 %vm276_vm1, %v473_v32  ;;  %v588_v17 = vmul.f32 0.1, %v1253_v48  ;;  %v589_v59 = vmul.f32 0.1, %v1254_v51  ;;  %v984_v60 = vpack.c.bf16 %v977_v53, %v976_v52  ;;  %vm963_vm8 = vcmp.ge.f32.partialorder %v1291_v54, 0.0 }
  0x3e   : > { %1411 = vmatpush3.bf16.msra.mxu1 %v1588_v4  ;;  %1366 = vmatprep.mubr.msk.bf16.mxu1 %vm276_vm1, %v474_v49  ;;  %v970_v61 = vmul.f32 0.1, %v1290_v50  ;;  %v971_v62 = vmul.f32 0.1, %v1291_v54  ;;  %v972_v0 = vmul.f32 0.1, %v1292_v57  ;;  %v475_v3 = vpack.c.bf16 %v471_v56, %v470_v15 }
  0x3f   : > { %v596_v63 = vsel %vm580_vm5, %v1253_v48, %v588_v17  ;;  %v597_v9 = vsel %vm581_vm7, %v1254_v51, %v589_v59  ;;  %v973_v1 = vmul.f32 0.1, %v1293_v58  ;;  %vm964_vm9 = vcmp.ge.f32.partialorder %v1292_v57, 0.0  ;;  %v1301_v32 = vld [vmem:[#allocation2] ss:$0 sm:$0xff] }
  0x40   : > { %vm965_vm0 = vcmp.ge.f32.partialorder %v1293_v58, 0.0  ;;  %v602_v4 = vpack.c.bf16 %v597_v9, %v596_v63  ;;  %v978_v5 = vsel %vm962_vm6, %v1290_v50, %v970_v61  ;;  %v979_v6 = vsel %vm963_vm8, %v1291_v54, %v971_v62 }
  0x41   : > { %v980_v11 = vsel %vm964_vm9, %v1292_v57, %v972_v0  ;;  %v981_v12 = vsel %vm965_vm0, %v1293_v58, %v973_v1  ;;  %v985_v14 = vpack.c.bf16 %v979_v6, %v978_v5  ;;  %vm582_vm10 = vcmp.ge.f32.partialorder %v1255_v16, 0.0 }
  0x42   : > { %1397 = vmatmul.mubr.msk.bf16.gmra.mrb[4].mxu0 %vm276_vm1, %v859_v55  ;;  %v590_v2 = vmul.f32 0.1, %v1255_v16  ;;  %v591_v18 = vmul.f32 0.1, %v1256_v10  ;;  %v986_v7 = vpack.c.bf16 %v981_v12, %v980_v11  ;;  %vm583_vm11 = vcmp.ge.f32.partialorder %v1256_v10, 0.0 }
  0x43   : > { %1402 = vmatprep.mubr.msk.bf16.mxu0 %vm276_vm1, %v984_v60  ;;  %v974_v19 = vmul.f32 0.1, %v1294_v13  ;;  %v975_v20 = vmul.f32 0.1, %v1295_v8  ;;  %vm966_vm12 = vcmp.ge.f32.partialorder %v1294_v13, 0.0  ;;  %vm967_vm13 = vcmp.ge.f32.partialorder %v1295_v8, 0.0 }
  0x44   : > { %v598_v21 = vsel %vm582_vm10, %v1255_v16, %v590_v2  ;;  %v599_v22 = vsel %vm583_vm11, %v1256_v10, %v591_v18 }
  0x45   : > { %1367 = vmatmul.mubr.msk.bf16.gmra.mrb[4].mxu1 %vm276_vm1, %v475_v3  ;;  %v982_v23 = vsel %vm966_vm12, %v1294_v13, %v974_v19  ;;  %v983_v24 = vsel %vm967_vm13, %v1295_v8, %v975_v20  ;;  %v603_v25 = vpack.c.bf16 %v599_v22, %v598_v21 }
  0x46   : > { %1376 = vmatprep.mubr.msk.bf16.mxu1 %vm276_vm1, %v602_v4  ;;  %v987_v26 = vpack.c.bf16 %v983_v24, %v982_v23 }
  0x4a   : > { %1403 = vmatmul.mubr.msk.bf16.vlgmr.msra.gmra.mrb[0].mxu0 %vm276_vm1, %v985_v14 }
  0x4b   : > { %1406 = vmatprep.mubr.msk.bf16.mxu0 %vm276_vm1, %v986_v7 }
  0x51   : > { %1377 = vmatmul.mubr.msk.bf16.vlgmr.msra.gmra.mrb[4].mxu1 %vm276_vm1, %v603_v25 }
  0x52   : > { %1407 = vmatmul.mubr.msk.bf16.gmra.mrb[4].mxu0 %vm276_vm1, %v987_v26  ;;  %vm1101_vm1 = vcmask 7168  }
 0x110   : > { %v1364_v27 = vpop.f32.mrb[0].mxu1 }
 0x111   : > { %v527_v28 = vpop.f32.mrb[1].mxu1 }
 0x112   : > { %v1365_v29 = vpop.f32.mrb[2].mxu1 }
 0x113   : > { %v530_v30 = vpop.f32.mrb[3].mxu1 }
 0x11d   : > { %v1404_v31 = vpop.f32.mrb[0].mxu0 }
 0x11e   : > { %v1412_v33 = vadd.f32 %v1404_v31, %v1364_v27  ;;  %v1039_v34 = vpop.f32.mrb[1].mxu0 }
 0x11f   : > { %v1413_v35 = vadd.f32 %v1039_v34, %v527_v28  ;;  %v1405_v36 = vpop.f32.mrb[2].mxu0 }
 0x120   : > { %v1087_v37 = vadd.f32 %v1412_v33, %v1301_v32  ;;  %v1414_v38 = vadd.f32 %v1405_v36, %v1365_v29  ;;  %v1042_v39 = vpop.f32.mrb[3].mxu0 }
 0x121   : > { %v1085_v40 = vadd.f32 %v1413_v35, %v1301_v32  ;;  %v1415_v41 = vadd.f32 %v1042_v39, %v530_v30 }
 0x122   : > { %1493 = vtanh.f32 %v1087_v37  ;;  %v1088_v42 = vadd.f32 %v1414_v38, %v1301_v32 }
 0x123   : > { %1495 = vtanh.f32 %v1085_v40  ;;  %v1086_v43 = vadd.f32 %v1415_v41, %v1301_v32 }
 0x124   : > { %1497 = vtanh.f32 %v1088_v42  ;;  %v1378_v44 = vpop.f32.mrb[4].mxu1 }
 0x125   : > { %1499 = vtanh.f32 %v1086_v43  ;;  %v1408_v45 = vpop.f32.mrb[4].mxu0  ;;  %v671_v46 = vpop.f32.mrb[5].mxu1 }
 0x126   : > { %v1416_v47 = vadd.f32 %v1408_v45, %v1378_v44  ;;  %v1055_v48 = vpop.f32.mrb[5].mxu0  ;;  %v1379_v49 = vpop.f32.mrb[6].mxu1 }
 0x127   : > { %v1417_v50 = vadd.f32 %v1055_v48, %v671_v46  ;;  %v1409_v51 = vpop.f32.mrb[6].mxu0  ;;  %v674_v52 = vpop.f32.mrb[7].mxu1 }
 0x128   : > { %v1091_v53 = vadd.f32 %v1416_v47, %v1301_v32  ;;  %v1418_v54 = vadd.f32 %v1409_v51, %v1379_v49  ;;  %v1058_v55 = vpop.f32.mrb[7].mxu0 }
 0x129   : > { %v1089_v15 = vadd.f32 %v1417_v50, %v1301_v32  ;;  %v1419_v56 = vadd.f32 %v1058_v55, %v674_v52 }
 0x12a   : > { %1501 = vtanh.f32 %v1091_v53  ;;  %v1092_v57 = vadd.f32 %v1418_v54, %v1301_v32 }
 0x12b   : > { %1503 = vtanh.f32 %v1089_v15  ;;  %v1090_v58 = vadd.f32 %v1419_v56, %v1301_v32 }
 0x12c   : > { %v1494_v17 = vpop.eup %1493  ;;  %1505 = vtanh.f32 %v1092_v57 }
 0x12d   : > { %v1496_v59 = vpop.eup %1495  ;;  %1104 = vst.msk [vmem:[%s194_s11 + $0x10] sm:$0xff] %vm1101_vm1, %v1494_v17  ;;  %1507 = vtanh.f32 %v1090_v58 }
 0x12e   : > { %v1498_v60 = vpop.eup %1497  ;;  %1102 = vst.msk [vmem:[%s194_s11] sm:$0xff] %vm1101_vm1, %v1496_v59 }
 0x12f   : > { %v1500_v61 = vpop.eup %1499  ;;  %1105 = vst.msk [vmem:[%s194_s11 + $0x18] sm:$0xff] %vm1101_vm1, %v1498_v60 }
 0x130   : > { %1103 = vst.msk [vmem:[%s194_s11 + $0x8] sm:$0xff] %vm1101_vm1, %v1500_v61 }
 0x134   : > { %v1502_v62 = vpop.eup %1501 }
 0x135   : > { %v1504_v63 = vpop.eup %1503  ;;  %1108 = vst.msk [vmem:[%s194_s11 + $0x30] sm:$0xff] %vm1101_vm1, %v1502_v62 }
 0x136   : > { %v1506_v9 = vpop.eup %1505  ;;  %1106 = vst.msk [vmem:[%s194_s11 + $0x20] sm:$0xff] %vm1101_vm1, %v1504_v63 }
 0x137   : > { %v1508_v0 = vpop.eup %1507  ;;  %1109 = vst.msk [vmem:[%s194_s11 + $0x38] sm:$0xff] %vm1101_vm1, %v1506_v9 }
 0x138   : > { %1107 = vst.msk [vmem:[%s194_s11 + $0x28] sm:$0xff] %vm1101_vm1, %v1508_v0 }
 0x139 PF: > { %s15_s16 = sadd.s32 1, %s1531_s16   ;;  %s1777_s14 = smov %s1527_s15 }
 0x13a   : > { %p12_p5 = scmp.ge.s32.totalorder %s15_s16, 4   ;;  %s1778_s15 = smov %s1780_s2 }
 0x13c   :  { %14 = sbr.rel (!%p12_p5) target bundleno = 3 (0x3), region = 75 }

// kernel: _lambda_.40
= control target key start
LH: loop header
LB: loop body
LE: loop exit
PB: predicated region body
PF: predicated region fallthrough
CT: control target
= control target key end

     0   :  { %s458_s12 = smov 0   ;;  %s460_s13 = smov 0   ;;  %s500_s0 = inlined_call_operand.vmem [shape: f32[2,9,32], index: 0, kind: input, shape index: {}]   ;;  %s501_s1 = inlined_call_operand.vmem [shape: bf16[1,32,32], index: 1, kind: input, shape index: {}]   ;;  %s502_s2 = inlined_call_operand.vmem [shape: f32[1,32], index: 2, kind: input, shape index: {}]   ;;  %s503_s3 = inlined_call_operand.vmem [shape: f32[2,9,32], index: 3, kind: output, shape index: {}]  }
   0x1   :  { %s462_s14 = smov 0  }
   0x2 LB: > { %s25_s15 = sadd.s32 1, %s430_s13  ;;  %p360_p0 = scmp.ge.s32.totalorder %s434_s14, 1  ;;  %s434_s14 = sphi %s462_s14, %s13_s14   ;;  %s430_s13 = sphi %s460_s13, %s505_s13   ;;  %s426_s12 = sphi %s458_s12, %s504_s12  }
   0x3   : > { %p27_p1 = scmp.ge.s32.totalorder %s25_s15, 2  ;;  %p151_p2 = scmp.lt.s32.totalorder %s434_s14, 3 }
   0x5   : > { %s507_s15 = smov (%p27_p1, %s25_s15), 0  ;;  %p152_p3 = pnand %p360_p0, %p151_p2 }
   0x6   : > { %v410_v0 = vld [vmem:[%s501_s1] sm:$0xff] (!%p152_p3)   ;;  %v436_v1 = vmov (!%p152_p3), 0.0   ;;  %v411_v2 = vld [vmem:[%s501_s1 + $0x8] sm:$0xff] (!%p152_p3)   ;;  %vm437_vm0 = vmmov (!%p152_p3), 0   ;;  %p179_p4 = scmp.lt.s32.totalorder (!%p152_p3), %s426_s12, 1  ;;  %vm223_vm1 = vcmask (!%p152_p3), 261120  }
   0x7   : > { %155 = sbr.rel (%p152_p3) target bundleno = 239 (0xef), region = 32  ;;  %376 = vmatprep.subr.bf16.mxu0 (!%p152_p3), %v436_v1  ;;  %380 = vmatprep.mubr.msk.bf16.mxu0 (!%p152_p3), %vm437_vm0, %v436_v1  ;;  %v365_v6 = vld [vmem:[%s502_s2] ss:$0 sm:$0xff] (!%p152_p3)  ;;  %vm271_vm2 = vcmask (!%p152_p3), 253952  }
   0x8   : > { %377 = vmatpush3.bf16.msra.mxu0 (!%p152_p3), %v410_v0 }
   0x9   : > { %378 = vmatprep.subr.bf16.mxu0 (!%p152_p3), %v436_v1 }
   0xc   : > { %379 = vmatpush3.bf16.msra.mxu0 (!%p152_p3), %v411_v2 }
   0xe   : > { %s509_s12 = smov (!%p179_p4, %s426_s12), 1 }
   0xf   : > { %s371_s20 = sshll.u32 %s509_s12, 4 }
  0x10   : > { %s183_s23 = scalar_lea.vmem %s500_s0, %s371_s20  ;;  %s192_s28 = scalar_lea.vmem %s503_s3, %s371_s20 }
  0x11   : > { %v197_v3 = vld [vmem:[%s183_s23] sm:$0xff]  ;;  %v198_v4 = vld [vmem:[%s183_s23 + $0x8] sm:$0x1] }
  0x12   : > { %v199_v5 = vpack.c.bf16 %v198_v4, %v197_v3 }
  0x14   : > { %381 = vmatmul.mubr.msk.bf16.vlgmr.msra.gmra.mrb[0].mxu0 %vm223_vm1, %v199_v5 }
  0xe7   : > { %v261_v7 = vpop.f32.mrb[0].mxu0 }
  0xe8   : > { %v262_v8 = vadd.f32 %v365_v6, %v261_v7  ;;  %v382_v9 = vpop.f32.mrb[1].mxu0 }
  0xe9   : > { %v264_v10 = vpop.f32.mrb[2].mxu0 }
  0xea   : > { %v268_v11 = vmax.f32 %v262_v8, 0.0  ;;  %v265_v12 = vadd.f32 %v365_v6, %v264_v10  ;;  %v383_v13 = vpop.f32.mrb[3].mxu0 }
  0xec   : > { %270 = vst.msk [vmem:[%s192_s28] sm:$0xff] %vm223_vm1, %v268_v11  ;;  %v269_v14 = vmax.f32 %v265_v12, 0.0 }
  0xee   : > { %272 = vst.msk [vmem:[%s192_s28 + $0x8] sm:$0x1] %vm271_vm2, %v269_v14 }
  0xef PF: > { %s13_s14 = sadd.s32 1, %s434_s14   ;;  %s504_s12 = smov %s430_s13 }
  0xf0   : > { %p10_p5 = scmp.ge.s32.totalorder %s13_s14, 4   ;;  %s505_s13 = smov %s507_s15 }
  0xf2   :  { %12 = sbr.rel (!%p10_p5) target bundleno = 2 (0x2), region = 63 }

// kernel: _lambda_.42
= control target key start
LH: loop header
LB: loop body
LE: loop exit
PB: predicated region body
PF: predicated region fallthrough
CT: control target
= control target key end

     0   :  { %s644_s12 = smov 0   ;;  %s646_s13 = smov 0   ;;  %s712_s0 = inlined_call_operand.vmem [shape: f32[2,11,32], index: 0, kind: input, shape index: {}]   ;;  %s713_s1 = inlined_call_operand.vmem [shape: bf16[3,32,32], index: 1, kind: input, shape index: {}]   ;;  %s714_s2 = inlined_call_operand.vmem [shape: f32[1,32], index: 2, kind: input, shape index: {}]   ;;  %s715_s3 = inlined_call_operand.vmem [shape: f32[2,9,32], index: 3, kind: output, shape index: {}]  }
   0x1   :  { %s648_s14 = smov 0  }
   0x2 LB: > { %s25_s15 = sadd.s32 1, %s616_s13  ;;  %p502_p0 = scmp.ge.s32.totalorder %s620_s14, 1  ;;  %s620_s14 = sphi %s648_s14, %s13_s14   ;;  %s616_s13 = sphi %s646_s13, %s717_s13   ;;  %s612_s12 = sphi %s644_s12, %s716_s12  }
   0x3   : > { %p27_p1 = scmp.ge.s32.totalorder %s25_s15, 2  ;;  %p151_p2 = scmp.lt.s32.totalorder %s620_s14, 3 }
   0x5   : > { %s719_s15 = smov (%p27_p1, %s25_s15), 0  ;;  %p152_p3 = pnand %p502_p0, %p151_p2 }
   0x6   : > { %v592_v0 = vld [vmem:[%s713_s1 + $0x10] sm:$0xff] (!%p152_p3)   ;;  %v622_v1 = vmov (!%p152_p3), 0.0   ;;  %v593_v2 = vld [vmem:[%s713_s1] sm:$0xff] (!%p152_p3)   ;;  %v594_v3 = vld [vmem:[%s713_s1 + $0x18] sm:$0xff] (!%p152_p3)   ;;  %vm623_vm0 = vmmov (!%p152_p3), 0   ;;  %p179_p4 = scmp.lt.s32.totalorder (!%p152_p3), %s612_s12, 1 }
   0x7   : > { %155 = sbr.rel (%p152_p3) target bundleno = 249 (0xf9), region = 32  ;;  %542 = vmatprep.subr.bf16.mxu0 (!%p152_p3), %v622_v1  ;;  %550 = vmatprep.subr.bf16.mxu1 (!%p152_p3), %v622_v1  ;;  %v595_v4 = vld [vmem:[%s713_s1 + $0x8] sm:$0xff] (!%p152_p3)   ;;  %v596_v5 = vld [vmem:[%s713_s1 + $0x20] sm:$0xff] (!%p152_p3)   ;;  %vm226_vm1 = vcmask (!%p152_p3), 261120   ;;  %vm407_vm2 = vcmask (!%p152_p3), 253952  }
   0x8   : > { %543 = vmatpush3.bf16.msra.mxu0 (!%p152_p3), %v592_v0  ;;  %546 = vmatprep.mubr.msk.bf16.mxu0 (!%p152_p3), %vm623_vm0, %v622_v1  ;;  %v597_v12 = vld [vmem:[%s713_s1 + $0x28] sm:$0xff] (!%p152_p3)   ;;  %v528_v27 = vld [vmem:[%s714_s2] ss:$0 sm:$0xff] (!%p152_p3) }
   0x9   : > { %551 = vmatpush3.bf16.msra.mxu1 (!%p152_p3), %v593_v2  ;;  %544 = vmatprep.subr.bf16.mxu0 (!%p152_p3), %v622_v1 }
   0xa   : > { %552 = vmatprep.subr.bf16.mxu1 (!%p152_p3), %v622_v1  ;;  %554 = vmatprep.mubr.msk.bf16.mxu1 (!%p152_p3), %vm623_vm0, %v622_v1 }
   0xc   : > { %545 = vmatpush3.bf16.msra.mxu0 (!%p152_p3), %v594_v3 }
   0xd   : > { %553 = vmatpush3.bf16.msra.mxu1 (!%p152_p3), %v595_v4  ;;  %558 = vmatprep.subr.bf16.mxu0 (!%p152_p3), %v622_v1 }
   0xe   : > { %s721_s12 = smov (!%p179_p4, %s612_s12), 1 }
   0xf   : > { %s531_s24 = sshll.u32 %s721_s12, 4 }
  0x10   : > { %s183_s27 = scalar_lea.vmem %s712_s0, %s531_s24  ;;  %s192_s9 = scalar_lea.vmem %s715_s3, %s531_s24 }
  0x11   : > { %v507_v6 = vld [vmem:[%s183_s27 + $0x1] sm:$0xff]  ;;  %v508_v7 = vld [vmem:[%s183_s27 + $0x9] sm:$0x1]  ;;  %v520_v14 = vld [vmem:[%s183_s27 + $0xa] sm:$0x1] }
  0x12   : > { %v197_v8 = vld [vmem:[%s183_s27] sm:$0xff]  ;;  %v208_v9 = vpack.c.bf16 %v508_v7, %v507_v6  ;;  %v198_v10 = vld [vmem:[%s183_s27 + $0x8] sm:$0x1] }
  0x13   : > { %v199_v11 = vpack.c.bf16 %v198_v10, %v197_v8  ;;  %v519_v13 = vld [vmem:[%s183_s27 + $0x2] sm:$0xff] }
  0x14   : > { %547 = vmatmul.mubr.msk.bf16.vlgmr.msra.gmra.mrb[0].mxu0 %vm226_vm1, %v208_v9  ;;  %v331_v15 = vpack.c.bf16 %v520_v14, %v519_v13 }
  0x15   : > { %555 = vmatmul.mubr.msk.bf16.vlgmr.msra.gmra.mrb[0].mxu1 %vm226_vm1, %v199_v11  ;;  %559 = vmatpush3.bf16.msra.mxu0 %v596_v5 }
  0x16   : > { %560 = vmatprep.subr.bf16.mxu0 %v622_v1  ;;  %562 = vmatprep.mubr.msk.bf16.mxu0 %vm623_vm0, %v622_v1 }
  0x19   : > { %561 = vmatpush3.bf16.msra.mxu0 %v597_v12 }
  0x1c   : > { %563 = vmatmul.mubr.msk.bf16.vlgmr.msra.gmra.mrb[4].mxu0 %vm226_vm1, %v331_v15 }
  0xe7   : > { %v264_v16 = vpop.f32.mrb[0].mxu0 }
  0xe8   : > { %v320_v17 = vpop.f32.mrb[0].mxu1  ;;  %v548_v18 = vpop.f32.mrb[1].mxu0 }
  0xe9   : > { %v321_v19 = vadd.f32 %v320_v17, %v264_v16  ;;  %v556_v20 = vpop.f32.mrb[1].mxu1  ;;  %v267_v21 = vpop.f32.mrb[2].mxu0 }
  0xea   : > { %v323_v22 = vpop.f32.mrb[2].mxu1  ;;  %v549_v23 = vpop.f32.mrb[3].mxu0 }
  0xeb   : > { %v324_v24 = vadd.f32 %v323_v22, %v267_v21  ;;  %v557_v25 = vpop.f32.mrb[3].mxu1 }
  0xef   : > { %v386_v26 = vpop.f32.mrb[4].mxu0 }
  0xf0   : > { %v393_v28 = vadd.f32 %v386_v26, %v321_v19  ;;  %v564_v29 = vpop.f32.mrb[5].mxu0 }
  0xf1   : > { %v389_v30 = vpop.f32.mrb[6].mxu0 }
  0xf2   : > { %v402_v31 = vadd.f32 %v528_v27, %v393_v28  ;;  %v394_v32 = vadd.f32 %v389_v30, %v324_v24  ;;  %v565_v33 = vpop.f32.mrb[7].mxu0 }
  0xf4   : > { %v404_v34 = vmax.f32 %v402_v31, 0.0  ;;  %v403_v35 = vadd.f32 %v528_v27, %v394_v32 }
  0xf6   : > { %406 = vst.msk [vmem:[%s192_s9] sm:$0xff] %vm226_vm1, %v404_v34  ;;  %v405_v36 = vmax.f32 %v403_v35, 0.0 }
  0xf8   : > { %408 = vst.msk [vmem:[%s192_s9 + $0x8] sm:$0x1] %vm407_vm2, %v405_v36 }
  0xf9 PF: > { %s13_s14 = sadd.s32 1, %s620_s14   ;;  %s716_s12 = smov %s616_s13 }
  0xfa   : > { %p10_p5 = scmp.ge.s32.totalorder %s13_s14, 4   ;;  %s717_s13 = smov %s719_s15 }
  0xfc   :  { %12 = sbr.rel (!%p10_p5) target bundleno = 2 (0x2), region = 67 }

// kernel: _lambda_.41
= control target key start
LH: loop header
LB: loop body
LE: loop exit
PB: predicated region body
PF: predicated region fallthrough
CT: control target
= control target key end

     0   :  { %s896_s18 = smov 0   ;;  %s994_s0 = inlined_call_operand.vmem [shape: f32[2,9,32], index: 0, kind: input, shape index: {}]   ;;  %s995_s1 = inlined_call_operand.vmem [shape: bf16[32,96], index: 1, kind: input, shape index: {}]   ;;  %s996_s2 = inlined_call_operand.vmem [shape: f32[1,96], index: 2, kind: input, shape index: {}]   ;;  %s997_s3 = inlined_call_operand.vmem [shape: bf16[32,32], index: 3, kind: input, shape index: {}]   ;;  %s998_s4 = inlined_call_operand.vmem [shape: f32[1,32], index: 4, kind: input, shape index: {}]   ;;  %s999_s5 = inlined_call_operand.vmem [shape: f32[2,9,32], index: 5, kind: output, shape index: {}]  }
   0x1 LB: > { %s729_s19 = sadd.s32 4294967295, %s856_s18   ;;  %p733_p0 = scmp.ge.s32.totalorder %s856_s18, 1  ;;  %s856_s18 = sphi %s896_s18, %s15_s18  }
   0x2   : > { %p187_p1 = scmp.lt.s32.totalorder %s856_s18, 3 }
   0x4   : > { %p188_p2 = pnand %p733_p0, %p187_p1 }
   0x5   : > { %v830_v0 = vld [vmem:[%s995_s1] sm:$0xff] (!%p188_p2)   ;;  %v858_v1 = vmov (!%p188_p2), 0.0   ;;  %v831_v2 = vld [vmem:[%s995_s1 + $0x8] sm:$0xff] (!%p188_p2)   ;;  %vm859_vm0 = vmmov (!%p188_p2), 0   ;;  %p215_p3 = scmp.lt.s32.totalorder (!%p188_p2), %s729_s19, 1  ;;  %vm252_vm1 = vcmask (!%p188_p2), 261120  }
   0x6   : > { %191 = sbr.rel (%p188_p2) target bundleno = 1337 (0x539), region = 40  ;;  %770 = vmatprep.subr.bf16.mxu0 (!%p188_p2), %v858_v1  ;;  %778 = vmatprep.subr.bf16.mxu1 (!%p188_p2), %v858_v1  ;;  %v738_v6 = vld [vmem:[%s996_s2] ss:$0 sm:$0xff] (!%p188_p2)  ;;  %s860_s30 = smov (!%p188_p2), 112   ;;  %vm301_vm2 = vcmask (!%p188_p2), 130048   ;;  %vm351_vm3 = vcmask (!%p188_p2), 72704  }
   0x7   : > { %771 = vmatpush3.bf16.msra.mxu0 (!%p188_p2), %v830_v0  ;;  %774 = vmatprep.mubr.msk.bf16.mxu0 (!%p188_p2), %vm859_vm0, %v858_v1  ;;  %s861_s6 = smov (!%p188_p2), 96   ;;  %s862_s7 = smov (!%p188_p2), 80   ;;  %vm355_vm4 = vcmask (!%p188_p2), 65536   ;;  %vm381_vm5 = vcmask (!%p188_p2), 1043456   ;;  %vm382_vm6 = vcmask (!%p188_p2), 1044480   ;;  %v865_v57 = vmov (!%p188_p2), 65535  }
   0x8   : > { %772 = vmatprep.subr.bf16.mxu0 (!%p188_p2), %v858_v1  ;;  %780 = vmatprep.mubr.msk.bf16.mxu1 (!%p188_p2), %vm859_vm0, %v858_v1  ;;  %s863_s8 = smov (!%p188_p2), 48   ;;  %s864_s9 = smov (!%p188_p2), 64   ;;  %v383_v58 = vsel (!%p188_p2), %vm381_vm5, 4294967295, %v865_v57  ;;  %vm672_vm7 = vcmask (!%p188_p2), 253952  }
   0x9   : > { %v384_v61 = vsel (!%p188_p2), %vm382_vm6, %v383_v58, 0 }
   0xb   : > { %773 = vmatpush3.bf16.msra.mxu0 (!%p188_p2), %v831_v2 }
   0xc   : > { %784 = vmatprep.subr.bf16.mxu0 (!%p188_p2), %v858_v1 }
   0xd   : > { %s1001_s19 = smov (!%p215_p3, %s729_s19), 1 }
   0xe   : > { %s753_s24 = sshll.u32 %s1001_s19, 4 }
   0xf   : > { %s219_s27 = scalar_lea.vmem %s994_s0, %s753_s24  ;;  %s224_s20 = scalar_lea.vmem %s999_s5, %s753_s24 }
  0x10   : > { %v926_v3 = vld [vmem:[%s219_s27] sm:$0xff]  ;;  %v928_v4 = vld [vmem:[%s219_s27 + $0x8] sm:$0x1] }
  0x11   : > { %v228_v5 = vpack.c.bf16 %v928_v4, %v926_v3 }
  0x13   : > { %775 = vmatmul.mubr.msk.bf16.vlgmr.msra.gmra.mrb[0].mxu0 %vm252_vm1, %v228_v5 }
  0x14   : > { %786 = vmatprep.mubr.msk.bf16.mxu0 %vm859_vm0, %v858_v1 }
  0xe6   : > { %v290_v7 = vpop.f32.mrb[0].mxu0 }
  0xe7   : > { %v776_v8 = vpop.f32.mrb[1].mxu0  ;;  %v291_v10 = vadd.f32 %v738_v6, %v290_v7 }
  0xe8   : > { %v293_v9 = vpop.f32.mrb[2].mxu0 }
  0xe9   : > { %v294_v11 = vadd.f32 %v738_v6, %v293_v9  ;;  %v777_v12 = vpop.f32.mrb[3].mxu0 }
  0xeb   : > { %v938_v13 = vpack.c.bf16 %v294_v11, %v291_v10 }
  0xed   : > { %432 = vrot.lane.b32.xlu1 %v938_v13, %s860_s30  ;;  %299 = vrot.lane.b32.xlu0 %v938_v13, %s861_s6 }
  0xf1   : > { %434 = vrot.lane.b32.xlu0 %v938_v13, %s862_s7 }
 0x15f   : > { %v300_v14 = vpop.permute.xlu0 %299  ;;  %v433_v18 = vpop.permute.xlu1 %432 }
 0x160   : > { %v306_v15 = vsel %vm301_vm2, %v300_v14, 0 }
 0x161   : > { %779 = vmatpush3.bf16.xpose.msra.mxu1 %v306_v15  ;;  %v832_v15 = vld [vmem:[%s997_s3] sm:$0xff]  }
 0x162   : > { %790 = vmatprep.subr.bf16.mxu1 %v858_v1 }
 0x163   : > { %v435_v16 = vpop.permute.xlu0 %434 }
 0x164   : > { %v440_v17 = vsel %vm301_vm2, %v435_v16, 0  ;;  %v833_v16 = vld [vmem:[%s997_s3 + $0x8] sm:$0xff]  }
 0x168   : > { %781 = vmatmul.mubr.msk.bf16.vlgmr.msra.gmra.mrb[0].mxu1 %vm301_vm2, %v938_v13 }
 0x169   : > { %791 = vmatpush3.bf16.xpose.msra.mxu1 %v440_v17  ;;  %792 = vmatprep.mubr.msk.bf16.mxu1 %vm859_vm0, %v858_v1 }
 0x16a   : > { %802 = vmatprep.subr.bf16.mxu1 %v858_v1 }
 0x170   : > { %793 = vmatmul.mubr.msk.bf16.vlgmr.msra.gmra.mrb[4].mxu1 %vm301_vm2, %v433_v18 }
 0x171   : > { %804 = vmatprep.mubr.msk.bf16.mxu1 %vm859_vm0, %v858_v1  ;;  %803 = vmatpush3.bf16.msra.mxu1 %v833_v16 }
 0x23b   : > { %v342_v19 = vpop.f32.mrb[0].mxu1 }
 0x23c   : > { %v349_v20 = vmul.f32 0.25, %v342_v19  ;;  %v782_v21 = vpop.f32.mrb[1].mxu1 }
 0x23d   : > { %v345_v22 = vpop.f32.mrb[2].mxu1 }
 0x23e   : > { %v350_v23 = vmul.f32 0.25, %v345_v22  ;;  %v783_v24 = vpop.f32.mrb[3].mxu1  ;;  %v352_v25 = vsel %vm351_vm3, %v349_v20, -inf }
 0x23f   : > { %353 = vmax.xlane.f32.xlu1 %v352_v25 }
 0x240   : > { %v356_v26 = vsel %vm355_vm4, %v350_v23, -inf }
 0x241   : > { %357 = vmax.xlane.f32.xlu0 %v356_v26 }
 0x243   : > { %v476_v27 = vpop.f32.mrb[4].mxu1 }
 0x244   : > { %v483_v28 = vmul.f32 0.25, %v476_v27  ;;  %v794_v29 = vpop.f32.mrb[5].mxu1 }
 0x245   : > { %v479_v30 = vpop.f32.mrb[6].mxu1 }
 0x246   : > { %v484_v31 = vmul.f32 0.25, %v479_v30  ;;  %v795_v32 = vpop.f32.mrb[7].mxu1  ;;  %v485_v33 = vsel %vm351_vm3, %v483_v28, -inf }
 0x247   : > { %486 = vmax.xlane.f32.xlu0 %v485_v33  ;;  %v750_v33 = vld [vmem:[%s998_s4] ss:$0 sm:$0xff] }
 0x248   : > { %v488_v34 = vsel %vm355_vm4, %v484_v31, -inf }
 0x249   : > { %489 = vmax.xlane.f32.xlu1 %v488_v34 }
 0x2cc   : > { %v354_v35 = vpop.xlane.xlu1 %353 }
 0x2cd   : > { %v359_v36 = vsub.f32 %v349_v20, %v354_v35 }
 0x2ce   : > { %v358_v37 = vpop.xlane.xlu0 %357 }
 0x2cf   : > { %v361_v38 = vmul.f32 1.442695, %v359_v36  ;;  %v360_v39 = vsub.f32 %v350_v23, %v358_v37 }
 0x2d1   : > { %834 = vpow2.f32 %v361_v38  ;;  %v363_v40 = vmul.f32 1.442695, %v360_v39 }
 0x2d3   : > { %836 = vpow2.f32 %v363_v40 }
 0x2d4   : > { %v487_v41 = vpop.xlane.xlu0 %486 }
 0x2d5   : > { %v491_v42 = vsub.f32 %v483_v28, %v487_v41 }
 0x2d6   : > { %v490_v43 = vpop.xlane.xlu1 %489 }
 0x2d7   : > { %v493_v44 = vmul.f32 1.442695, %v491_v42  ;;  %v492_v45 = vsub.f32 %v484_v31, %v490_v43 }
 0x2d9   : > { %838 = vpow2.f32 %v493_v44  ;;  %v495_v46 = vmul.f32 1.442695, %v492_v45 }
 0x2db   : > { %v835_v47 = vpop.eup %834  ;;  %840 = vpow2.f32 %v495_v46 }
 0x2dc   : > { %v365_v48 = vsel %vm351_vm3, %v835_v47, 0.0 }
 0x2dd   : > { %v837_v49 = vpop.eup %836  ;;  %366 = vadd.xlane.f32.xlu0 %v365_v48 }
 0x2de   : > { %v368_v50 = vsel %vm355_vm4, %v837_v49, 0.0 }
 0x2df   : > { %369 = vadd.xlane.f32.xlu1 %v368_v50 }
 0x2e3   : > { %v839_v51 = vpop.eup %838 }
 0x2e4   : > { %v497_v52 = vsel %vm351_vm3, %v839_v51, 0.0 }
 0x2e5   : > { %v841_v53 = vpop.eup %840  ;;  %498 = vadd.xlane.f32.xlu0 %v497_v52 }
 0x2e6   : > { %v500_v54 = vsel %vm355_vm4, %v841_v53, 0.0 }
 0x2e7   : > { %501 = vadd.xlane.f32.xlu1 %v500_v54 }
 0x2f8   : > { %508 = vrot.lane.b32.xlu1 %v938_v13, %s863_s8 }
 0x2fb   : > { %376 = vrot.lane.b32.xlu0 %v938_v13, %s864_s9 }
 0x36a   : > { %v367_v55 = vpop.xlane.xlu0 %366 }
 0x36b   : > { %842 = vrcp.f32 %v367_v55 }
 0x36c   : > { %v370_v56 = vpop.xlane.xlu1 %369 }
 0x36d   : > { %844 = vrcp.f32 %v370_v56 }
 0x372   : > { %v499_v59 = vpop.xlane.xlu0 %498 }
 0x373   : > { %846 = vrcp.f32 %v499_v59 }
 0x374   : > { %v502_v60 = vpop.xlane.xlu1 %501 }
 0x375   : > { %v843_v62 = vpop.eup %842  ;;  %848 = vrcp.f32 %v502_v60 }
 0x376   : > { %v377_v63 = vpop.permute.xlu0 %376  ;;  %v373_v5 = vmul.f32 %v843_v62, %v835_v47 }
 0x377   : > { %v845_v0 = vpop.eup %844  ;;  %v386_v2 = vand.u32 %v384_v61, %v377_v63 }
 0x378   : > { %v374_v6 = vmul.f32 %v845_v0, %v837_v49  ;;  %v509_v7 = vpop.permute.xlu1 %508 }
 0x379   : > { %785 = vmatpush3.bf16.msra.mxu0 %v386_v2  ;;  %v514_v9 = vand.u32 %v509_v7, %v384_v61 }
 0x37a   : > { %v375_v8 = vpack.c.bf16 %v374_v6, %v373_v5  ;;  %796 = vmatprep.subr.bf16.mxu0 %v858_v1 }
 0x37c   : > { %787 = vmatmul.mubr.msk.bf16.vlgmr.msra.gmra.mrb[4].mxu0 %vm351_vm3, %v375_v8 }
 0x37d   : > { %v847_v10 = vpop.eup %846  ;;  %797 = vmatpush3.bf16.msra.mxu0 %v514_v9  ;;  %798 = vmatprep.mubr.msk.bf16.mxu0 %vm859_vm0, %v858_v1 }
 0x37e   : > { %808 = vmatprep.subr.bf16.mxu0 %v858_v1  ;;  %v505_v12 = vmul.f32 %v847_v10, %v839_v51 }
 0x37f   : > { %v849_v11 = vpop.eup %848 }
 0x380   : > { %v506_v13 = vmul.f32 %v849_v11, %v841_v53 }
 0x382   : > { %v507_v14 = vpack.c.bf16 %v506_v13, %v505_v12 }
 0x384   : > { %799 = vmatmul.mubr.msk.bf16.vlgmr.msra.gmra.mrb[8].mxu0 %vm351_vm3, %v507_v14 }
 0x385   : > { %810 = vmatprep.mubr.msk.bf16.mxu0 %vm859_vm0, %v858_v1  ;;  %809 = vmatpush3.bf16.msra.mxu0 %v832_v15 }
 0x44f   : > { %v422_v17 = vpop.f32.mrb[4].mxu0 }
 0x450   : > { %v788_v18 = vpop.f32.mrb[5].mxu0 }
 0x451   : > { %v425_v19 = vpop.f32.mrb[6].mxu0 }
 0x452   : > { %v429_v20 = vpack.c.bf16 %v425_v19, %v422_v17  ;;  %v789_v21 = vpop.f32.mrb[7].mxu0 }
 0x454   : > { %811 = vmatmul.mubr.msk.bf16.vlgmr.msra.gmra.mrb[12].mxu0 %vm301_vm2, %v429_v20 }
 0x457   : > { %v550_v22 = vpop.f32.mrb[8].mxu0 }
 0x458   : > { %v800_v23 = vpop.f32.mrb[9].mxu0 }
 0x459   : > { %v553_v1 = vpop.f32.mrb[10].mxu0 }
 0x45a   : > { %v557_v24 = vpack.c.bf16 %v553_v1, %v550_v22  ;;  %v801_v25 = vpop.f32.mrb[11].mxu0 }
 0x45c   : > { %805 = vmatmul.mubr.msk.bf16.vlgmr.msra.gmra.mrb[8].mxu1 %vm301_vm2, %v557_v24 }
 0x527   : > { %v653_v26 = vpop.f32.mrb[12].mxu0 }
 0x528   : > { %v812_v27 = vpop.f32.mrb[13].mxu0 }
 0x529   : > { %v656_v28 = vpop.f32.mrb[14].mxu0 }
 0x52a   : > { %v813_v29 = vpop.f32.mrb[15].mxu0 }
 0x52f   : > { %v603_v30 = vpop.f32.mrb[8].mxu1 }
 0x530   : > { %v654_v31 = vadd.f32 %v653_v26, %v603_v30  ;;  %v806_v32 = vpop.f32.mrb[9].mxu1 }
 0x531   : > { %v606_v34 = vpop.f32.mrb[10].mxu1 }
 0x532   : > { %v660_v35 = vadd.f32 %v654_v31, %v926_v3  ;;  %v657_v36 = vadd.f32 %v656_v28, %v606_v34  ;;  %v807_v37 = vpop.f32.mrb[11].mxu1 }
 0x534   : > { %v669_v38 = vadd.f32 %v750_v33, %v660_v35  ;;  %v661_v39 = vadd.f32 %v657_v36, %v928_v4 }
 0x536   : > { %671 = vst.msk [vmem:[%s224_s20] sm:$0xff] %vm252_vm1, %v669_v38  ;;  %v670_v40 = vadd.f32 %v750_v33, %v661_v39 }
 0x538   : > { %673 = vst.msk [vmem:[%s224_s20 + $0x8] sm:$0x1] %vm672_vm7, %v670_v40 }
 0x539 PF: > { %s15_s18 = sadd.s32 1, %s856_s18  }
 0x53a   : > { %p12_p4 = scmp.ge.s32.totalorder %s15_s18, 4  }
 0x53c   :  { %14 = sbr.rel (!%p12_p4) target bundleno = 1 (0x1), region = 70 }

// kernel: _lambda_.43
= control target key start
LH: loop header
LB: loop body
LE: loop exit
PB: predicated region body
PF: predicated region fallthrough
CT: control target
= control target key end

     0   :  { %s735_s15 = smov 0   ;;  %s737_s16 = smov 0   ;;  %s804_s0 = inlined_call_operand.vmem [shape: f32[2,11,32], index: 0, kind: input, shape index: {}]   ;;  %s805_s1 = inlined_call_operand.vmem [shape: bf16[3,32,32], index: 1, kind: input, shape index: {}]   ;;  %s806_s2 = inlined_call_operand.vmem [shape: f32[1,32], index: 2, kind: input, shape index: {}]   ;;  %s807_s3 = inlined_call_operand.vmem [shape: f32[2,9,32], index: 3, kind: input, shape index: {}]   ;;  %s808_s4 = inlined_call_operand.vmem [shape: f32[2,9,32], index: 4, kind: output, shape index: {}]  }
   0x1   :  { %s739_s17 = smov 0  }
   0x2 LB: > { %s26_s18 = sadd.s32 1, %s702_s16  ;;  %p585_p0 = scmp.ge.s32.totalorder %s706_s17, 1  ;;  %s706_s17 = sphi %s739_s17, %s14_s17   ;;  %s702_s16 = sphi %s737_s16, %s810_s16   ;;  %s698_s15 = sphi %s735_s15, %s809_s15  }
   0x3   : > { %p28_p1 = scmp.ge.s32.totalorder %s26_s18, 2  ;;  %p193_p2 = scmp.lt.s32.totalorder %s706_s17, 3 }
   0x5   : > { %s812_s18 = smov (%p28_p1, %s26_s18), 0  ;;  %p194_p3 = pnand %p585_p0, %p193_p2 }
   0x6   : > { %v678_v0 = vld [vmem:[%s805_s1 + $0x10] sm:$0xff] (!%p194_p3)   ;;  %v708_v1 = vmov (!%p194_p3), 0.0   ;;  %v679_v2 = vld [vmem:[%s805_s1] sm:$0xff] (!%p194_p3)   ;;  %v680_v3 = vld [vmem:[%s805_s1 + $0x18] sm:$0xff] (!%p194_p3)   ;;  %vm709_vm0 = vmmov (!%p194_p3), 0   ;;  %p232_p4 = scmp.lt.s32.totalorder (!%p194_p3), %s698_s15, 1 }
   0x7   : > { %197 = sbr.rel (%p194_p3) target bundleno = 249 (0xf9), region = 36  ;;  %628 = vmatprep.subr.bf16.mxu0 (!%p194_p3), %v708_v1  ;;  %636 = vmatprep.subr.bf16.mxu1 (!%p194_p3), %v708_v1  ;;  %v681_v4 = vld [vmem:[%s805_s1 + $0x8] sm:$0xff] (!%p194_p3)   ;;  %v682_v5 = vld [vmem:[%s805_s1 + $0x20] sm:$0xff] (!%p194_p3)   ;;  %vm289_vm1 = vcmask (!%p194_p3), 261120   ;;  %vm472_vm2 = vcmask (!%p194_p3), 253952  }
   0x8   : > { %629 = vmatpush3.bf16.msra.mxu0 (!%p194_p3), %v678_v0  ;;  %632 = vmatprep.mubr.msk.bf16.mxu0 (!%p194_p3), %vm709_vm0, %v708_v1  ;;  %v683_v12 = vld [vmem:[%s805_s1 + $0x28] sm:$0xff] (!%p194_p3)   ;;  %v613_v27 = vld [vmem:[%s806_s2] ss:$0 sm:$0xff] (!%p194_p3) }
   0x9   : > { %637 = vmatpush3.bf16.msra.mxu1 (!%p194_p3), %v679_v2  ;;  %630 = vmatprep.subr.bf16.mxu0 (!%p194_p3), %v708_v1 }
   0xa   : > { %638 = vmatprep.subr.bf16.mxu1 (!%p194_p3), %v708_v1  ;;  %640 = vmatprep.mubr.msk.bf16.mxu1 (!%p194_p3), %vm709_vm0, %v708_v1 }
   0xc   : > { %631 = vmatpush3.bf16.msra.mxu0 (!%p194_p3), %v680_v3 }
   0xd   : > { %639 = vmatpush3.bf16.msra.mxu1 (!%p194_p3), %v681_v4  ;;  %644 = vmatprep.subr.bf16.mxu0 (!%p194_p3), %v708_v1 }
   0xe   : > { %s814_s15 = smov (!%p232_p4, %s698_s15), 1 }
   0xf   : > { %s767_s27 = sshll.u32 %s814_s15, 4 }
  0x10   : > { %s236_s30 = scalar_lea.vmem %s804_s0, %s767_s27  ;;  %s245_s11 = scalar_lea.vmem %s807_s3, %s767_s27 }
  0x11   : > { %v592_v6 = vld [vmem:[%s236_s30 + $0x1] sm:$0xff]  ;;  %v593_v7 = vld [vmem:[%s236_s30 + $0x9] sm:$0x1]  ;;  %v605_v14 = vld [vmem:[%s236_s30 + $0xa] sm:$0x1]  ;;  %s255_s19 = scalar_lea.vmem %s808_s4, %s767_s27 }
  0x12   : > { %v260_v8 = vld [vmem:[%s236_s30] sm:$0xff]  ;;  %v271_v9 = vpack.c.bf16 %v593_v7, %v592_v6  ;;  %v261_v10 = vld [vmem:[%s236_s30 + $0x8] sm:$0x1] }
  0x13   : > { %v262_v11 = vpack.c.bf16 %v261_v10, %v260_v8  ;;  %v604_v13 = vld [vmem:[%s236_s30 + $0x2] sm:$0xff] }
  0x14   : > { %633 = vmatmul.mubr.msk.bf16.vlgmr.msra.gmra.mrb[0].mxu0 %vm289_vm1, %v271_v9  ;;  %v394_v15 = vpack.c.bf16 %v605_v14, %v604_v13  ;;  %v467_v30 = vld [vmem:[%s245_s11] sm:$0xff]  ;;  %v468_v35 = vld [vmem:[%s245_s11 + $0x8] sm:$0x1] }
  0x15   : > { %641 = vmatmul.mubr.msk.bf16.vlgmr.msra.gmra.mrb[0].mxu1 %vm289_vm1, %v262_v11  ;;  %645 = vmatpush3.bf16.msra.mxu0 %v682_v5 }
  0x16   : > { %646 = vmatprep.subr.bf16.mxu0 %v708_v1  ;;  %648 = vmatprep.mubr.msk.bf16.mxu0 %vm709_vm0, %v708_v1 }
  0x19   : > { %647 = vmatpush3.bf16.msra.mxu0 %v683_v12 }
  0x1c   : > { %649 = vmatmul.mubr.msk.bf16.vlgmr.msra.gmra.mrb[4].mxu0 %vm289_vm1, %v394_v15 }
  0xe7   : > { %v327_v16 = vpop.f32.mrb[0].mxu0 }
  0xe8   : > { %v383_v17 = vpop.f32.mrb[0].mxu1  ;;  %v634_v18 = vpop.f32.mrb[1].mxu0 }
  0xe9   : > { %v384_v19 = vadd.f32 %v383_v17, %v327_v16  ;;  %v642_v20 = vpop.f32.mrb[1].mxu1  ;;  %v330_v21 = vpop.f32.mrb[2].mxu0 }
  0xea   : > { %v386_v22 = vpop.f32.mrb[2].mxu1  ;;  %v635_v23 = vpop.f32.mrb[3].mxu0 }
  0xeb   : > { %v387_v24 = vadd.f32 %v386_v22, %v330_v21  ;;  %v643_v25 = vpop.f32.mrb[3].mxu1 }
  0xef   : > { %v449_v26 = vpop.f32.mrb[4].mxu0 }
  0xf0   : > { %v456_v28 = vadd.f32 %v449_v26, %v384_v19  ;;  %v650_v29 = vpop.f32.mrb[5].mxu0 }
  0xf1   : > { %v452_v31 = vpop.f32.mrb[6].mxu0 }
  0xf2   : > { %v465_v32 = vadd.f32 %v613_v27, %v456_v28  ;;  %v457_v33 = vadd.f32 %v452_v31, %v387_v24  ;;  %v651_v34 = vpop.f32.mrb[7].mxu0 }
  0xf4   : > { %v469_v36 = vadd.f32 %v467_v30, %v465_v32  ;;  %v466_v37 = vadd.f32 %v613_v27, %v457_v33 }
  0xf6   : > { %471 = vst.msk [vmem:[%s255_s19] sm:$0xff] %vm289_vm1, %v469_v36  ;;  %v470_v38 = vadd.f32 %v468_v35, %v466_v37 }
  0xf8   : > { %473 = vst.msk [vmem:[%s255_s19 + $0x8] sm:$0x1] %vm472_vm2, %v470_v38 }
  0xf9 PF: > { %s14_s17 = sadd.s32 1, %s706_s17   ;;  %s809_s15 = smov %s702_s16 }
  0xfa   : > { %p11_p5 = scmp.ge.s32.totalorder %s14_s17, 4   ;;  %s810_s16 = smov %s812_s18 }
  0xfc   :  { %13 = sbr.rel (!%p11_p5) target bundleno = 2 (0x2), region = 74 }

// kernel: _lambda_.50
= control target key start
LH: loop header
LB: loop body
LE: loop exit
PB: predicated region body
PF: predicated region fallthrough
CT: control target
= control target key end

     0   :  { %s733_s15 = smov 0   ;;  %s735_s16 = smov 0   ;;  %s802_s0 = inlined_call_operand.vmem [shape: f32[2,18,32], index: 0, kind: input, shape index: {}]   ;;  %s803_s1 = inlined_call_operand.vmem [shape: bf16[3,32,32], index: 1, kind: input, shape index: {}]   ;;  %s804_s2 = inlined_call_operand.vmem [shape: f32[1,32], index: 2, kind: input, shape index: {}]   ;;  %s805_s3 = inlined_call_operand.vmem [shape: f32[2,16,32], index: 3, kind: input, shape index: {}]   ;;  %s806_s4 = inlined_call_operand.vmem [shape: f32[2,16,32], index: 4, kind: output, shape index: {}]  }
   0x1   :  { %s737_s17 = smov 0  }
   0x2 LB: > { %s26_s18 = sadd.s32 1, %s700_s16  ;;  %p584_p0 = scmp.ge.s32.totalorder %s704_s17, 1  ;;  %s704_s17 = sphi %s737_s17, %s14_s17   ;;  %s700_s16 = sphi %s735_s16, %s808_s16   ;;  %s696_s15 = sphi %s733_s15, %s807_s15  }
   0x3   : > { %p28_p1 = scmp.ge.s32.totalorder %s26_s18, 2  ;;  %p193_p2 = scmp.lt.s32.totalorder %s704_s17, 3 }
   0x5   : > { %s810_s18 = smov (%p28_p1, %s26_s18), 0  ;;  %p194_p3 = pnand %p584_p0, %p193_p2 }
   0x6   : > { %v676_v0 = vld [vmem:[%s803_s1 + $0x10] sm:$0xff] (!%p194_p3)   ;;  %v706_v1 = vmov (!%p194_p3), 0.0   ;;  %v677_v2 = vld [vmem:[%s803_s1] sm:$0xff] (!%p194_p3)   ;;  %v678_v3 = vld [vmem:[%s803_s1 + $0x18] sm:$0xff] (!%p194_p3)   ;;  %vm707_vm0 = vmmov (!%p194_p3), 0   ;;  %p232_p4 = scmp.lt.s32.totalorder (!%p194_p3), %s696_s15, 1 }
   0x7   : > { %197 = sbr.rel (%p194_p3) target bundleno = 250 (0xfa), region = 36  ;;  %625 = vmatprep.subr.bf16.mxu0 (!%p194_p3), %v706_v1  ;;  %633 = vmatprep.subr.bf16.mxu1 (!%p194_p3), %v706_v1  ;;  %v679_v4 = vld [vmem:[%s803_s1 + $0x8] sm:$0xff] (!%p194_p3)   ;;  %v680_v5 = vld [vmem:[%s803_s1 + $0x20] sm:$0xff] (!%p194_p3)   ;;  %vm289_vm1 = vcmask (!%p194_p3), 261120  }
   0x8   : > { %626 = vmatpush3.bf16.msra.mxu0 (!%p194_p3), %v676_v0  ;;  %629 = vmatprep.mubr.msk.bf16.mxu0 (!%p194_p3), %vm707_vm0, %v706_v1  ;;  %v681_v12 = vld [vmem:[%s803_s1 + $0x28] sm:$0xff] (!%p194_p3)   ;;  %v611_v27 = vld [vmem:[%s804_s2] ss:$0 sm:$0xff] (!%p194_p3) }
   0x9   : > { %634 = vmatpush3.bf16.msra.mxu1 (!%p194_p3), %v677_v2  ;;  %627 = vmatprep.subr.bf16.mxu0 (!%p194_p3), %v706_v1 }
   0xa   : > { %635 = vmatprep.subr.bf16.mxu1 (!%p194_p3), %v706_v1  ;;  %637 = vmatprep.mubr.msk.bf16.mxu1 (!%p194_p3), %vm707_vm0, %v706_v1 }
   0xc   : > { %628 = vmatpush3.bf16.msra.mxu0 (!%p194_p3), %v678_v3 }
   0xd   : > { %636 = vmatpush3.bf16.msra.mxu1 (!%p194_p3), %v679_v4  ;;  %641 = vmatprep.subr.bf16.mxu0 (!%p194_p3), %v706_v1 }
   0xe   : > { %s812_s15 = smov (!%p232_p4, %s696_s15), 1 }
   0xf   : > { %s649_s27 = smul.u32 24, %s812_s15  ;;  %s614_s9 = sshll.u32 %s812_s15, 4 }
  0x10   : > { %s245_s12 = scalar_lea.vmem %s805_s3, %s614_s9  ;;  %s255_s15 = scalar_lea.vmem %s806_s4, %s614_s9 }
  0x11   : > { %s236_s30 = scalar_lea.vmem %s802_s0, %s649_s27  ;;  %v467_v30 = vld [vmem:[%s245_s12] sm:$0xff]  ;;  %v468_v35 = vld [vmem:[%s245_s12 + $0x8] sm:$0xff] }
  0x12   : > { %v590_v6 = vld [vmem:[%s236_s30 + $0x1] sm:$0xff]  ;;  %v591_v7 = vld [vmem:[%s236_s30 + $0x9] sm:$0xff] }
  0x13   : > { %v260_v8 = vld [vmem:[%s236_s30] sm:$0xff]  ;;  %v271_v9 = vpack.c.bf16 %v591_v7, %v590_v6  ;;  %v261_v10 = vld [vmem:[%s236_s30 + $0x8] sm:$0xff] }
  0x14   : > { %v262_v11 = vpack.c.bf16 %v261_v10, %v260_v8  ;;  %v602_v13 = vld [vmem:[%s236_s30 + $0x2] sm:$0xff]  ;;  %v603_v14 = vld [vmem:[%s236_s30 + $0xa] sm:$0xff] }
  0x15   : > { %630 = vmatmul.mubr.msk.bf16.vlgmr.msra.gmra.mrb[0].mxu0 %vm289_vm1, %v271_v9  ;;  %v394_v15 = vpack.c.bf16 %v603_v14, %v602_v13 }
  0x16   : > { %638 = vmatmul.mubr.msk.bf16.vlgmr.msra.gmra.mrb[0].mxu1 %vm289_vm1, %v262_v11  ;;  %642 = vmatpush3.bf16.msra.mxu0 %v680_v5 }
  0x17   : > { %643 = vmatprep.subr.bf16.mxu0 %v706_v1  ;;  %645 = vmatprep.mubr.msk.bf16.mxu0 %vm707_vm0, %v706_v1 }
  0x1a   : > { %644 = vmatpush3.bf16.msra.mxu0 %v681_v12 }
  0x1d   : > { %646 = vmatmul.mubr.msk.bf16.vlgmr.msra.gmra.mrb[4].mxu0 %vm289_vm1, %v394_v15 }
  0xe8   : > { %v327_v16 = vpop.f32.mrb[0].mxu0 }
  0xe9   : > { %v383_v17 = vpop.f32.mrb[0].mxu1  ;;  %v631_v18 = vpop.f32.mrb[1].mxu0 }
  0xea   : > { %v384_v19 = vadd.f32 %v383_v17, %v327_v16  ;;  %v639_v20 = vpop.f32.mrb[1].mxu1  ;;  %v330_v21 = vpop.f32.mrb[2].mxu0 }
  0xeb   : > { %v386_v22 = vpop.f32.mrb[2].mxu1  ;;  %v632_v23 = vpop.f32.mrb[3].mxu0 }
  0xec   : > { %v387_v24 = vadd.f32 %v386_v22, %v330_v21  ;;  %v640_v25 = vpop.f32.mrb[3].mxu1 }
  0xf0   : > { %v449_v26 = vpop.f32.mrb[4].mxu0 }
  0xf1   : > { %v456_v28 = vadd.f32 %v449_v26, %v384_v19  ;;  %v647_v29 = vpop.f32.mrb[5].mxu0 }
  0xf2   : > { %v452_v31 = vpop.f32.mrb[6].mxu0 }
  0xf3   : > { %v465_v32 = vadd.f32 %v611_v27, %v456_v28  ;;  %v457_v33 = vadd.f32 %v452_v31, %v387_v24  ;;  %v648_v34 = vpop.f32.mrb[7].mxu0 }
  0xf5   : > { %v469_v36 = vadd.f32 %v467_v30, %v465_v32  ;;  %v466_v37 = vadd.f32 %v611_v27, %v457_v33 }
  0xf7   : > { %471 = vst.msk [vmem:[%s255_s15] sm:$0xff] %vm289_vm1, %v469_v36  ;;  %v470_v38 = vadd.f32 %v468_v35, %v466_v37 }
  0xf9   : > { %472 = vst.msk [vmem:[%s255_s15 + $0x8] sm:$0xff] %vm289_vm1, %v470_v38 }
  0xfa PF: > { %s14_s17 = sadd.s32 1, %s704_s17   ;;  %s807_s15 = smov %s700_s16 }
  0xfb   : > { %p11_p5 = scmp.ge.s32.totalorder %s14_s17, 4   ;;  %s808_s16 = smov %s810_s18 }
  0xfd   :  { %13 = sbr.rel (!%p11_p5) target bundleno = 2 (0x2), region = 74 }

// kernel: _lambda_.48
= control target key start
LH: loop header
LB: loop body
LE: loop exit
PB: predicated region body
PF: predicated region fallthrough
CT: control target
= control target key end

     0   :  { %s883_s18 = smov 0   ;;  %s982_s0 = inlined_call_operand.vmem [shape: f32[2,16,32], index: 0, kind: input, shape index: {}]   ;;  %s983_s1 = inlined_call_operand.vmem [shape: bf16[32,96], index: 1, kind: input, shape index: {}]   ;;  %s984_s2 = inlined_call_operand.vmem [shape: f32[1,96], index: 2, kind: input, shape index: {}]   ;;  %s985_s3 = inlined_call_operand.vmem [shape: bf16[32,32], index: 3, kind: input, shape index: {}]   ;;  %s986_s4 = inlined_call_operand.vmem [shape: f32[1,32], index: 4, kind: input, shape index: {}]   ;;  %s987_s5 = inlined_call_operand.vmem [shape: f32[2,16,32], index: 5, kind: output, shape index: {}]  }
   0x1 LB: > { %s718_s19 = sadd.s32 4294967295, %s844_s18   ;;  %p722_p0 = scmp.ge.s32.totalorder %s844_s18, 1  ;;  %s844_s18 = sphi %s883_s18, %s15_s18  }
   0x2   : > { %p187_p1 = scmp.lt.s32.totalorder %s844_s18, 3 }
   0x4   : > { %p188_p2 = pnand %p722_p0, %p187_p1 }
   0x5   : > { %v818_v0 = vld [vmem:[%s983_s1] sm:$0xff] (!%p188_p2)   ;;  %v846_v1 = vmov (!%p188_p2), 0.0   ;;  %v819_v2 = vld [vmem:[%s983_s1 + $0x8] sm:$0xff] (!%p188_p2)   ;;  %vm847_vm0 = vmmov (!%p188_p2), 0   ;;  %p215_p3 = scmp.lt.s32.totalorder (!%p188_p2), %s718_s19, 1  ;;  %vm252_vm1 = vcmask (!%p188_p2), 261120  }
   0x6   : > { %191 = sbr.rel (%p188_p2) target bundleno = 1337 (0x539), region = 40  ;;  %759 = vmatprep.subr.bf16.mxu0 (!%p188_p2), %v846_v1  ;;  %767 = vmatprep.subr.bf16.mxu1 (!%p188_p2), %v846_v1  ;;  %v727_v6 = vld [vmem:[%s984_s2] ss:$0 sm:$0xff] (!%p188_p2)  ;;  %s848_s30 = smov (!%p188_p2), 112   ;;  %vm301_vm2 = vcmask (!%p188_p2), 130048  }
   0x7   : > { %760 = vmatpush3.bf16.msra.mxu0 (!%p188_p2), %v818_v0  ;;  %763 = vmatprep.mubr.msk.bf16.mxu0 (!%p188_p2), %vm847_vm0, %v846_v1  ;;  %s849_s6 = smov (!%p188_p2), 96   ;;  %s850_s7 = smov (!%p188_p2), 80  }
   0x8   : > { %761 = vmatprep.subr.bf16.mxu0 (!%p188_p2), %v846_v1  ;;  %769 = vmatprep.mubr.msk.bf16.mxu1 (!%p188_p2), %vm847_vm0, %v846_v1  ;;  %s851_s8 = smov (!%p188_p2), 48   ;;  %s852_s9 = smov (!%p188_p2), 64  }
   0xb   : > { %762 = vmatpush3.bf16.msra.mxu0 (!%p188_p2), %v819_v2 }
   0xc   : > { %773 = vmatprep.subr.bf16.mxu0 (!%p188_p2), %v846_v1 }
   0xd   : > { %s989_s19 = smov (!%p215_p3, %s718_s19), 1 }
   0xe   : > { %s742_s24 = sshll.u32 %s989_s19, 4 }
   0xf   : > { %s219_s27 = scalar_lea.vmem %s982_s0, %s742_s24  ;;  %s224_s20 = scalar_lea.vmem %s987_s5, %s742_s24 }
  0x10   : > { %v913_v3 = vld [vmem:[%s219_s27] sm:$0xff]  ;;  %v915_v4 = vld [vmem:[%s219_s27 + $0x8] sm:$0xff] }
  0x11   : > { %v228_v5 = vpack.c.bf16 %v915_v4, %v913_v3 }
  0x13   : > { %764 = vmatmul.mubr.msk.bf16.vlgmr.msra.gmra.mrb[0].mxu0 %vm252_vm1, %v228_v5 }
  0x14   : > { %775 = vmatprep.mubr.msk.bf16.mxu0 %vm847_vm0, %v846_v1 }
  0xe6   : > { %v290_v7 = vpop.f32.mrb[0].mxu0 }
  0xe7   : > { %v765_v8 = vpop.f32.mrb[1].mxu0  ;;  %v291_v10 = vadd.f32 %v727_v6, %v290_v7 }
  0xe8   : > { %v293_v9 = vpop.f32.mrb[2].mxu0 }
  0xe9   : > { %v294_v11 = vadd.f32 %v727_v6, %v293_v9  ;;  %v766_v12 = vpop.f32.mrb[3].mxu0 }
  0xeb   : > { %v925_v13 = vpack.c.bf16 %v294_v11, %v291_v10  ;;  %v820_v10 = vld [vmem:[%s985_s3] sm:$0xff]   ;;  %v821_v11 = vld [vmem:[%s985_s3 + $0x8] sm:$0xff]  }
  0xed   : > { %424 = vrot.lane.b32.xlu1 %v925_v13, %s848_s30  ;;  %299 = vrot.lane.b32.xlu0 %v925_v13, %s849_s6 }
  0xf1   : > { %426 = vrot.lane.b32.xlu0 %v925_v13, %s850_s7 }
 0x15f   : > { %v300_v14 = vpop.permute.xlu0 %299  ;;  %v425_v18 = vpop.permute.xlu1 %424 }
 0x160   : > { %v306_v15 = vsel %vm301_vm2, %v300_v14, 0 }
 0x161   : > { %768 = vmatpush3.bf16.xpose.msra.mxu1 %v306_v15 }
 0x162   : > { %779 = vmatprep.subr.bf16.mxu1 %v846_v1 }
 0x163   : > { %v427_v16 = vpop.permute.xlu0 %426 }
 0x164   : > { %v432_v17 = vsel %vm301_vm2, %v427_v16, 0 }
 0x168   : > { %770 = vmatmul.mubr.msk.bf16.vlgmr.msra.gmra.mrb[0].mxu1 %vm301_vm2, %v925_v13 }
 0x169   : > { %780 = vmatpush3.bf16.xpose.msra.mxu1 %v432_v17  ;;  %781 = vmatprep.mubr.msk.bf16.mxu1 %vm847_vm0, %v846_v1 }
 0x16a   : > { %791 = vmatprep.subr.bf16.mxu1 %v846_v1 }
 0x170   : > { %782 = vmatmul.mubr.msk.bf16.vlgmr.msra.gmra.mrb[4].mxu1 %vm301_vm2, %v425_v18 }
 0x171   : > { %793 = vmatprep.mubr.msk.bf16.mxu1 %vm847_vm0, %v846_v1  ;;  %792 = vmatpush3.bf16.msra.mxu1 %v821_v11 }
 0x23b   : > { %v342_v19 = vpop.f32.mrb[0].mxu1 }
 0x23c   : > { %v349_v20 = vmul.f32 0.25, %v342_v19  ;;  %v771_v21 = vpop.f32.mrb[1].mxu1 }
 0x23d   : > { %v345_v22 = vpop.f32.mrb[2].mxu1 }
 0x23e   : > { %v350_v23 = vmul.f32 0.25, %v345_v22  ;;  %v772_v24 = vpop.f32.mrb[3].mxu1  ;;  %v351_v25 = vsel %vm301_vm2, %v349_v20, -inf }
 0x23f   : > { %352 = vmax.xlane.f32.xlu1 %v351_v25 }
 0x240   : > { %v354_v26 = vsel %vm301_vm2, %v350_v23, -inf }
 0x241   : > { %355 = vmax.xlane.f32.xlu0 %v354_v26 }
 0x243   : > { %v468_v27 = vpop.f32.mrb[4].mxu1 }
 0x244   : > { %v475_v28 = vmul.f32 0.25, %v468_v27  ;;  %v783_v29 = vpop.f32.mrb[5].mxu1 }
 0x245   : > { %v471_v30 = vpop.f32.mrb[6].mxu1 }
 0x246   : > { %v476_v31 = vmul.f32 0.25, %v471_v30  ;;  %v784_v32 = vpop.f32.mrb[7].mxu1  ;;  %v477_v33 = vsel %vm301_vm2, %v475_v28, -inf }
 0x247   : > { %478 = vmax.xlane.f32.xlu0 %v477_v33 }
 0x248   : > { %v480_v34 = vsel %vm301_vm2, %v476_v31, -inf }
 0x249   : > { %481 = vmax.xlane.f32.xlu1 %v480_v34 }
 0x2cc   : > { %v353_v35 = vpop.xlane.xlu1 %352 }
 0x2cd   : > { %v357_v36 = vsub.f32 %v349_v20, %v353_v35 }
 0x2ce   : > { %v356_v37 = vpop.xlane.xlu0 %355 }
 0x2cf   : > { %v359_v38 = vmul.f32 1.442695, %v357_v36  ;;  %v358_v39 = vsub.f32 %v350_v23, %v356_v37 }
 0x2d1   : > { %822 = vpow2.f32 %v359_v38  ;;  %v361_v40 = vmul.f32 1.442695, %v358_v39 }
 0x2d3   : > { %824 = vpow2.f32 %v361_v40 }
 0x2d4   : > { %v479_v41 = vpop.xlane.xlu0 %478 }
 0x2d5   : > { %v483_v42 = vsub.f32 %v475_v28, %v479_v41  ;;  %v739_v28 = vld [vmem:[%s986_s4] ss:$0 sm:$0xff] }
 0x2d6   : > { %v482_v43 = vpop.xlane.xlu1 %481 }
 0x2d7   : > { %v485_v44 = vmul.f32 1.442695, %v483_v42  ;;  %v484_v45 = vsub.f32 %v476_v31, %v482_v43 }
 0x2d9   : > { %826 = vpow2.f32 %v485_v44  ;;  %v487_v46 = vmul.f32 1.442695, %v484_v45 }
 0x2db   : > { %v823_v47 = vpop.eup %822  ;;  %828 = vpow2.f32 %v487_v46 }
 0x2dc   : > { %v363_v48 = vsel %vm301_vm2, %v823_v47, 0.0 }
 0x2dd   : > { %v825_v49 = vpop.eup %824  ;;  %364 = vadd.xlane.f32.xlu0 %v363_v48 }
 0x2de   : > { %v366_v50 = vsel %vm301_vm2, %v825_v49, 0.0 }
 0x2df   : > { %367 = vadd.xlane.f32.xlu1 %v366_v50 }
 0x2e3   : > { %v827_v51 = vpop.eup %826 }
 0x2e4   : > { %v489_v52 = vsel %vm301_vm2, %v827_v51, 0.0 }
 0x2e5   : > { %v829_v53 = vpop.eup %828  ;;  %490 = vadd.xlane.f32.xlu0 %v489_v52 }
 0x2e6   : > { %v492_v54 = vsel %vm301_vm2, %v829_v53, 0.0 }
 0x2e7   : > { %493 = vadd.xlane.f32.xlu1 %v492_v54 }
 0x2f8   : > { %500 = vrot.lane.b32.xlu1 %v925_v13, %s851_s8 }
 0x2fb   : > { %374 = vrot.lane.b32.xlu0 %v925_v13, %s852_s9 }
 0x36a   : > { %v365_v55 = vpop.xlane.xlu0 %364 }
 0x36b   : > { %830 = vrcp.f32 %v365_v55 }
 0x36c   : > { %v368_v56 = vpop.xlane.xlu1 %367 }
 0x36d   : > { %832 = vrcp.f32 %v368_v56 }
 0x372   : > { %v491_v57 = vpop.xlane.xlu0 %490 }
 0x373   : > { %834 = vrcp.f32 %v491_v57 }
 0x374   : > { %v494_v58 = vpop.xlane.xlu1 %493 }
 0x375   : > { %v831_v59 = vpop.eup %830  ;;  %836 = vrcp.f32 %v494_v58 }
 0x376   : > { %v375_v60 = vpop.permute.xlu0 %374  ;;  %v371_v62 = vmul.f32 %v831_v59, %v823_v47 }
 0x377   : > { %v833_v61 = vpop.eup %832  ;;  %774 = vmatpush3.bf16.msra.mxu0 %v375_v60 }
 0x378   : > { %v372_v63 = vmul.f32 %v833_v61, %v825_v49  ;;  %785 = vmatprep.subr.bf16.mxu0 %v846_v1  ;;  %v501_v2 = vpop.permute.xlu1 %500 }
 0x37a   : > { %v373_v0 = vpack.c.bf16 %v372_v63, %v371_v62 }
 0x37c   : > { %776 = vmatmul.mubr.msk.bf16.vlgmr.msra.gmra.mrb[4].mxu0 %vm301_vm2, %v373_v0 }
 0x37d   : > { %v835_v5 = vpop.eup %834  ;;  %786 = vmatpush3.bf16.msra.mxu0 %v501_v2  ;;  %787 = vmatprep.mubr.msk.bf16.mxu0 %vm847_vm0, %v846_v1 }
 0x37e   : > { %797 = vmatprep.subr.bf16.mxu0 %v846_v1  ;;  %v497_v7 = vmul.f32 %v835_v5, %v827_v51 }
 0x37f   : > { %v837_v6 = vpop.eup %836 }
 0x380   : > { %v498_v8 = vmul.f32 %v837_v6, %v829_v53 }
 0x382   : > { %v499_v9 = vpack.c.bf16 %v498_v8, %v497_v7 }
 0x384   : > { %788 = vmatmul.mubr.msk.bf16.vlgmr.msra.gmra.mrb[8].mxu0 %vm301_vm2, %v499_v9 }
 0x385   : > { %799 = vmatprep.mubr.msk.bf16.mxu0 %vm847_vm0, %v846_v1  ;;  %798 = vmatpush3.bf16.msra.mxu0 %v820_v10 }
 0x44f   : > { %v414_v12 = vpop.f32.mrb[4].mxu0 }
 0x450   : > { %v777_v13 = vpop.f32.mrb[5].mxu0 }
 0x451   : > { %v417_v14 = vpop.f32.mrb[6].mxu0 }
 0x452   : > { %v421_v15 = vpack.c.bf16 %v417_v14, %v414_v12  ;;  %v778_v16 = vpop.f32.mrb[7].mxu0 }
 0x454   : > { %800 = vmatmul.mubr.msk.bf16.vlgmr.msra.gmra.mrb[12].mxu0 %vm301_vm2, %v421_v15 }
 0x457   : > { %v540_v17 = vpop.f32.mrb[8].mxu0 }
 0x458   : > { %v789_v18 = vpop.f32.mrb[9].mxu0 }
 0x459   : > { %v543_v1 = vpop.f32.mrb[10].mxu0 }
 0x45a   : > { %v547_v19 = vpack.c.bf16 %v543_v1, %v540_v17  ;;  %v790_v20 = vpop.f32.mrb[11].mxu0 }
 0x45c   : > { %794 = vmatmul.mubr.msk.bf16.vlgmr.msra.gmra.mrb[8].mxu1 %vm301_vm2, %v547_v19 }
 0x527   : > { %v643_v21 = vpop.f32.mrb[12].mxu0 }
 0x528   : > { %v801_v22 = vpop.f32.mrb[13].mxu0 }
 0x529   : > { %v646_v23 = vpop.f32.mrb[14].mxu0 }
 0x52a   : > { %v802_v24 = vpop.f32.mrb[15].mxu0 }
 0x52f   : > { %v593_v25 = vpop.f32.mrb[8].mxu1 }
 0x530   : > { %v644_v26 = vadd.f32 %v643_v21, %v593_v25  ;;  %v795_v27 = vpop.f32.mrb[9].mxu1 }
 0x531   : > { %v596_v29 = vpop.f32.mrb[10].mxu1 }
 0x532   : > { %v650_v30 = vadd.f32 %v644_v26, %v913_v3  ;;  %v647_v31 = vadd.f32 %v646_v23, %v596_v29  ;;  %v796_v32 = vpop.f32.mrb[11].mxu1 }
 0x534   : > { %v659_v33 = vadd.f32 %v739_v28, %v650_v30  ;;  %v651_v34 = vadd.f32 %v647_v31, %v915_v4 }
 0x536   : > { %661 = vst.msk [vmem:[%s224_s20] sm:$0xff] %vm252_vm1, %v659_v33  ;;  %v660_v35 = vadd.f32 %v739_v28, %v651_v34 }
 0x538   : > { %662 = vst.msk [vmem:[%s224_s20 + $0x8] sm:$0xff] %vm252_vm1, %v660_v35 }
 0x539 PF: > { %s15_s18 = sadd.s32 1, %s844_s18  }
 0x53a   : > { %p12_p4 = scmp.ge.s32.totalorder %s15_s18, 4  }
 0x53c   :  { %14 = sbr.rel (!%p12_p4) target bundleno = 1 (0x1), region = 70 }

// kernel: _lambda_.51
= control target key start
LH: loop header
LB: loop body
LE: loop exit
PB: predicated region body
PF: predicated region fallthrough
CT: control target
= control target key end

     0   :  { %s456_s12 = smov 0   ;;  %s458_s13 = smov 0   ;;  %s498_s0 = inlined_call_operand.vmem [shape: f32[2,16,32], index: 0, kind: input, shape index: {}]   ;;  %s499_s1 = inlined_call_operand.vmem [shape: bf16[1,32,16], index: 1, kind: input, shape index: {}]   ;;  %s500_s2 = inlined_call_operand.vmem [shape: f32[1,16], index: 2, kind: input, shape index: {}]   ;;  %s501_s3 = inlined_call_operand.vmem [shape: f32[2,16,16], index: 3, kind: output, shape index: {}]  }
   0x1   :  { %s460_s14 = smov 0  }
   0x2 LB: > { %s25_s15 = sadd.s32 1, %s428_s13  ;;  %p358_p0 = scmp.ge.s32.totalorder %s432_s14, 1  ;;  %s432_s14 = sphi %s460_s14, %s13_s14   ;;  %s428_s13 = sphi %s458_s13, %s503_s13   ;;  %s424_s12 = sphi %s456_s12, %s502_s12  }
   0x3   : > { %p27_p1 = scmp.ge.s32.totalorder %s25_s15, 2  ;;  %p151_p2 = scmp.lt.s32.totalorder %s432_s14, 3 }
   0x5   : > { %s505_s15 = smov (%p27_p1, %s25_s15), 0  ;;  %p152_p3 = pnand %p358_p0, %p151_p2 }
   0x6   : > { %v408_v0 = vld [vmem:[%s499_s1] sm:$0xff] (!%p152_p3)   ;;  %v434_v1 = vmov (!%p152_p3), 0.0   ;;  %v409_v2 = vld [vmem:[%s499_s1 + $0x8] sm:$0xff] (!%p152_p3)   ;;  %vm435_vm0 = vmmov (!%p152_p3), 0   ;;  %p179_p4 = scmp.lt.s32.totalorder (!%p152_p3), %s424_s12, 1  ;;  %vm223_vm1 = vcmask (!%p152_p3), 261120  }
   0x7   : > { %155 = sbr.rel (%p152_p3) target bundleno = 237 (0xed), region = 32  ;;  %374 = vmatprep.subr.bf16.mxu0 (!%p152_p3), %v434_v1  ;;  %378 = vmatprep.mubr.msk.bf16.mxu0 (!%p152_p3), %vm435_vm0, %v434_v1  ;;  %v363_v6 = vld [vmem:[%s500_s2] ss:$0 sm:$0xff] (!%p152_p3)  ;;  %vm268_vm2 = vcmask (!%p152_p3), 130048  }
   0x8   : > { %375 = vmatpush3.bf16.msra.mxu0 (!%p152_p3), %v408_v0 }
   0x9   : > { %376 = vmatprep.subr.bf16.mxu0 (!%p152_p3), %v434_v1 }
   0xc   : > { %377 = vmatpush3.bf16.msra.mxu0 (!%p152_p3), %v409_v2 }
   0xe   : > { %s507_s12 = smov (!%p179_p4, %s424_s12), 1 }
   0xf   : > { %s369_s20 = sshll.u32 %s507_s12, 4 }
  0x10   : > { %s183_s23 = scalar_lea.vmem %s498_s0, %s369_s20  ;;  %s192_s28 = scalar_lea.vmem %s501_s3, %s369_s20 }
  0x11   : > { %v197_v3 = vld [vmem:[%s183_s23] sm:$0xff]  ;;  %v198_v4 = vld [vmem:[%s183_s23 + $0x8] sm:$0xff] }
  0x12   : > { %v199_v5 = vpack.c.bf16 %v198_v4, %v197_v3 }
  0x14   : > { %379 = vmatmul.mubr.msk.bf16.vlgmr.msra.gmra.mrb[0].mxu0 %vm223_vm1, %v199_v5 }
  0xe7   : > { %v261_v7 = vpop.f32.mrb[0].mxu0 }
  0xe8   : > { %v262_v8 = vadd.f32 %v363_v6, %v261_v7  ;;  %v380_v9 = vpop.f32.mrb[1].mxu0 }
  0xe9   : > { %v264_v10 = vpop.f32.mrb[2].mxu0 }
  0xea   : > { %269 = vst.msk [vmem:[%s192_s28] sm:$0xff] %vm268_vm2, %v262_v8  ;;  %v265_v11 = vadd.f32 %v363_v6, %v264_v10  ;;  %v381_v12 = vpop.f32.mrb[3].mxu0 }
  0xec   : > { %270 = vst.msk [vmem:[%s192_s28 + $0x8] sm:$0xff] %vm268_vm2, %v265_v11 }
  0xed PF: > { %s13_s14 = sadd.s32 1, %s432_s14   ;;  %s502_s12 = smov %s428_s13 }
  0xee   : > { %p10_p5 = scmp.ge.s32.totalorder %s13_s14, 4   ;;  %s503_s13 = smov %s505_s15 }
  0xf0   :  { %12 = sbr.rel (!%p10_p5) target bundleno = 2 (0x2), region = 63 }

// kernel: _lambda_.44
= control target key start
LH: loop header
LB: loop body
LE: loop exit
PB: predicated region body
PF: predicated region fallthrough
CT: control target
= control target key end

     0   :  { %s436_s14 = smov 0   ;;  %s438_s15 = smov 0   ;;  %s475_s0 = inlined_call_operand.vmem [shape: f32[2,8,32], index: 0, kind: input, shape index: {}]   ;;  %s476_s1 = inlined_call_operand.vmem [shape: bf16[1,32,1], index: 1, kind: input, shape index: {}]   ;;  %s477_s2 = inlined_call_operand.<no memory space> [shape: f32[1,1], index: 2, kind: input, shape index: {}]   ;;  %s478_s3 = inlined_call_operand.vmem [shape: f32[2,8,1], index: 3, kind: output, shape index: {}]  }
   0x1   :  { %v8_v0 = vstv %s477_s2  ;;  %s440_s16 = smov 0  }
   0x2   :  { %9 = vst [vmem:[#allocation2] sm:$0x1] %v8_v0 }
   0x3 LB: > { %s27_s2 = sadd.s32 1, %s405_s15  ;;  %p339_p0 = scmp.ge.s32.totalorder %s409_s16, 1  ;;  %s409_s16 = sphi %s440_s16, %s15_s16   ;;  %s405_s15 = sphi %s438_s15, %s480_s15   ;;  %s401_s14 = sphi %s436_s14, %s479_s14  }
   0x4   : > { %p29_p1 = scmp.ge.s32.totalorder %s27_s2, 2  ;;  %p152_p2 = scmp.lt.s32.totalorder %s409_s16, 3 }
   0x6   : > { %s482_s2 = smov (%p29_p1, %s27_s2), 0  ;;  %p153_p3 = pnand %p339_p0, %p152_p2 }
   0x7   : > { %v385_v1 = vld [vmem:[%s476_s1] sm:$0xff] (!%p153_p3)   ;;  %v411_v2 = vmov (!%p153_p3), 0.0   ;;  %v386_v3 = vld [vmem:[%s476_s1 + $0x8] sm:$0xff] (!%p153_p3)   ;;  %vm412_vm0 = vmmov (!%p153_p3), 0   ;;  %p177_p4 = scmp.lt.s32.totalorder (!%p153_p3), %s401_s14, 1  ;;  %vm216_vm1 = vcmask (!%p153_p3), 261120  }
   0x8   : > { %156 = sbr.rel (%p153_p3) target bundleno = 236 (0xec), region = 32  ;;  %351 = vmatprep.subr.bf16.mxu0 (!%p153_p3), %v411_v2  ;;  %355 = vmatprep.mubr.msk.bf16.mxu0 (!%p153_p3), %vm412_vm0, %v411_v2  ;;  %vm260_vm2 = vcmask (!%p153_p3), 7168  }
   0x9   : > { %352 = vmatpush3.bf16.msra.mxu0 (!%p153_p3), %v385_v1  ;;  %v342_v6 = vld [vmem:[#allocation2] ss:$0 sm:$0xff] (!%p153_p3) }
   0xa   : > { %353 = vmatprep.subr.bf16.mxu0 (!%p153_p3), %v411_v2 }
   0xd   : > { %354 = vmatpush3.bf16.msra.mxu0 (!%p153_p3), %v386_v3 }
   0xf   : > { %s484_s14 = smov (!%p177_p4, %s401_s14), 1 }
  0x10   : > { %s340_s21 = sshll.u32 %s484_s14, 3 }
  0x11   : > { %s180_s24 = scalar_lea.vmem %s475_s0, %s340_s21  ;;  %s187_s27 = scalar_lea.vmem %s478_s3, %s340_s21 }
  0x12   : > { %v191_v4 = vld [vmem:[%s180_s24] sm:$0xff] }
  0x13   : > { %v192_v5 = vpack.c.bf16 %v191_v4, %v191_v4 }
  0x15   : > { %356 = vmatmul.mubr.msk.bf16.vlgmr.msra.gmra.mrb[0].mxu0 %vm216_vm1, %v192_v5 }
  0xe8   : > { %v254_v7 = vpop.f32.mrb[0].mxu0 }
  0xe9   : > { %v255_v8 = vadd.f32 %v342_v6, %v254_v7  ;;  %v357_v9 = vpop.f32.mrb[1].mxu0 }
  0xea   : > { %v257_v10 = vpop.f32.mrb[2].mxu0 }
  0xeb   : > { %261 = vst.msk [vmem:[%s187_s27] sm:$0xff] %vm260_vm2, %v255_v8  ;;  %v358_v11 = vpop.f32.mrb[3].mxu0 }
  0xec PF: > { %s15_s16 = sadd.s32 1, %s409_s16   ;;  %s479_s14 = smov %s405_s15 }
  0xed   : > { %p12_p5 = scmp.ge.s32.totalorder %s15_s16, 4   ;;  %s480_s15 = smov %s482_s2 }
  0xef   :  { %14 = sbr.rel (!%p12_p5) target bundleno = 3 (0x3), region = 63 }

</bundles_post_ra>
